<compile_context>
chip_gen: v7x
topology: tpu7x:2x2x1
jax: 0.10.0
libtpu: 0.0.40
codegen_flags: <defaults>
</compile_context>

<pallas_src>
import jax
import jax.numpy as jnp
from jax import lax
from jax.experimental import pallas as pl
from jax.experimental.pallas import tpu as pltpu

F32 = jnp.float32
BF16 = jnp.bfloat16


# ----------------------- one-time host-side weight preparation -----------------------
def _conv_toeplitz(w, w_out, w_pad):
    """w: (K, K, Cin, Cout) -> (K, w_pad*Cin, w_out*Cout) per-kh Toeplitz matrices.
    T[kh, jp*Cin+ci, j*Cout+co] = w[kh, jp-j, ci, co] if 0 <= jp-j < K else 0."""
    K, _, Cin, Cout = w.shape
    j = jnp.arange(w_out)[:, None, None]
    kw = jnp.arange(K)[None, :, None]
    jp = jnp.arange(w_pad)[None, None, :]
    one_hot = (jp == j + kw).astype(w.dtype)                    # (w_out, K, w_pad)
    t = jnp.einsum("jkp,hkic->hpijc", one_hot, w)               # (K, w_pad, Cin, w_out, Cout)
    return t.reshape(K, w_pad * Cin, w_out * Cout)


def _pool_select(w_in, c):
    """0/1 matrices so max(y @ s_even, y @ s_odd) is a stride-2 max-pool over the
    width packed in lanes as w*c + channel."""
    o = jnp.arange((w_in // 2) * c)
    base = 2 * (o // c) * c + (o % c)
    i = jnp.arange(w_in * c)[:, None]
    s_even = (i == base[None, :]).astype(jnp.float32)
    s_odd = (i == (base + c)[None, :]).astype(jnp.float32)
    return s_even, s_odd


def prepare_params(p):
    """Turn PyTorch-layout weights into MXU-friendly bf16 kernel operands (done once)."""
    t1 = _conv_toeplitz(p["conv1_w"].astype(F32), w_out=28, w_pad=32)       # (5, 32, 448)
    t1f = t1.reshape(5 * 32, 448).astype(BF16)                              # fused-K (160, 448)
    t2 = _conv_toeplitz(p["conv2_w"].astype(F32), w_out=14, w_pad=18).astype(BF16)  # (5,288,448)
    b1 = jnp.tile(p["conv1_b"].astype(F32), 28).reshape(1, 448)
    b2 = jnp.tile(p["conv2_b"].astype(F32), 14).reshape(1, 448)
    s1e, s1o = _pool_select(28, 16)                                         # (448, 224)
    s2e, s2o = _pool_select(14, 32)                                         # (448, 224)
    # fc1: PyTorch flatten order is (c, h, w); the kernel produces (h, w, c).
    hh, ww, cc = jnp.meshgrid(jnp.arange(7), jnp.arange(7), jnp.arange(32), indexing="ij")
    perm = (cc * 49 + hh * 7 + ww).reshape(-1)                              # (1568,)
    w1 = p["fc1_w"].astype(F32)[perm]                                       # rows now (h, w, c)
    w1 = jnp.pad(w1, ((0, 0), (0, 12))).reshape(7, 224, 512).astype(BF16)   # 500 -> 512
    bf1 = jnp.pad(p["fc1_b"].astype(F32), (0, 12)).reshape(1, 512)
    w2 = jnp.pad(p["fc2_w"].astype(F32), ((0, 12), (0, 28))).astype(BF16)   # (512, 128)
    bf2 = jnp.pad(p["fc2_b"].astype(F32), (0, 28)).reshape(1, 128)
    w3 = jnp.pad(p["fc3_w"].astype(F32), ((0, 28), (0, 118))).astype(BF16)  # (128, 128) lane-dense
    bf3 = jnp.pad(p["fc3_b"].astype(F32), (0, 118)).reshape(1, 128)
    return dict(t1f=t1f, b1=b1, s1e=s1e.astype(BF16), s1o=s1o.astype(BF16),
                t2=t2, b2=b2, s2e=s2e.astype(BF16), s2o=s2o.astype(BF16),
                w1=w1, bf1=bf1, w2=w2, bf2=bf2, w3=w3, bf3=bf3)


_KP_ORDER = ("t1f", "b1", "s1e", "s1o", "t2", "b2", "s2e", "s2o",
             "w1", "bf1", "w2", "bf2", "w3", "bf3")


# ------------------------------------ fused kernel -----------------------------------
def fused_cnn_kernel(x_ref, t1f_ref, b1_ref, s1e_ref, s1o_ref,
                     t2_ref, b2_ref, s2e_ref, s2o_ref,
                     w1_ref, bf1_ref, w2_ref, bf2_ref, w3_ref, bf3_ref,
                     o_ref, xpad1, xpad2):
    bt = x_ref.shape[1]          # images per grid step (batch lives in sublanes)

    # ---- conv1 (1->16, 5x5, pad 2) + ReLU + 2x2 max-pool, 28x28 ----
    # Layout: H leading, batch in sublanes, W*C packed dense in lanes.
    # Zero only the halo strips every step (interior is fully overwritten right after;
    # do NOT move this under pl.when(step==0): the grid axis is "parallel").
    xpad1[0:2, :, :] = jnp.zeros((2, bt, 32), F32)
    xpad1[30:32, :, :] = jnp.zeros((2, bt, 32), F32)
    xpad1[2:30, :, 0:2] = jnp.zeros((28, bt, 2), F32)
    xpad1[2:30, :, 30:32] = jnp.zeros((28, bt, 2), F32)
    xpad1[2:30, :, 2:30] = x_ref[...]

    # Fused-K conv1: concatenate the 5 kh-shifted windows along lanes -> one K=160 dot.
    lhs = jnp.concatenate([xpad1[kh:kh + 28, :, :] for kh in range(5)], axis=-1)  # (28,bt,160)
    lhs = lhs.reshape(28 * bt, 160).astype(BF16)
    acc = jnp.dot(lhs, t1f_ref[...], preferred_element_type=F32)        # (28*bt, 448) lanes=w*16+c
    y = jnp.maximum(acc + b1_ref[...], 0.0)
    y = y.reshape(14, 2, bt, 448)                                       # H-pool on values
    y = jnp.maximum(y[:, 0], y[:, 1]).reshape(14 * bt, 448).astype(BF16)
    p1 = jnp.maximum(jnp.dot(y, s1e_ref[...], preferred_element_type=F32),
                     jnp.dot(y, s1o_ref[...], preferred_element_type=F32))    # (14*bt, 224)

    # ---- conv2 (16->32, 5x5, pad 2) + ReLU + 2x2 max-pool, 14x14 ----
    xpad2[0:2, :, :] = jnp.zeros((2, bt, 288), F32)
    xpad2[16:18, :, :] = jnp.zeros((2, bt, 288), F32)
    xpad2[2:16, :, 0:32] = jnp.zeros((14, bt, 32), F32)
    xpad2[2:16, :, 256:288] = jnp.zeros((14, bt, 32), F32)
    xpad2[2:16, :, 32:256] = p1.reshape(14, bt, 224)

    acc = jnp.dot(xpad2[0:14, :, :].reshape(14 * bt, 288).astype(BF16), t2_ref[0],
                  preferred_element_type=F32)                           # first-dot init
    for kh in range(1, 5):                                              # K=288 per dot
        acc = acc + jnp.dot(xpad2[kh:kh + 14, :, :].reshape(14 * bt, 288).astype(BF16),
                            t2_ref[kh], preferred_element_type=F32)
    y = jnp.maximum(acc + b2_ref[...], 0.0)                             # (14*bt, 448) lanes=w*32+c
    y = y.reshape(7, 2, bt, 448)
    y = jnp.maximum(y[:, 0], y[:, 1]).reshape(7 * bt, 448).astype(BF16)
    p2 = jnp.maximum(jnp.dot(y, s2e_ref[...], preferred_element_type=F32),
                     jnp.dot(y, s2o_ref[...], preferred_element_type=F32))    # (7*bt, 224)
    p2 = p2.astype(BF16).reshape(7, bt, 224)

    # ---- MLP head: 1568 -> 500(pad 512) -> 100(pad 128) -> 10(pad 128 lanes) ----
    # The (c,h,w) flatten is folded into the fc1 row permutation; the h dimension is
    # handled as 7 accumulated matmul chunks (no in-kernel relayout).
    h = jnp.dot(p2[0], w1_ref[0], preferred_element_type=F32)           # first-dot init
    for hh in range(1, 7):
        h = h + jnp.dot(p2[hh], w1_ref[hh], preferred_element_type=F32)
    h = jnp.maximum(h + bf1_ref[...], 0.0).astype(BF16)                 # (bt, 512)
    h = jnp.maximum(jnp.dot(h, w2_ref[...], preferred_element_type=F32) + bf2_ref[...], 0.0)
    h = h.astype(BF16)                                                  # (bt, 128)
    o_ref[...] = (jnp.dot(h, w3_ref[...], preferred_element_type=F32)
                  + bf3_ref[...]).astype(o_ref.dtype)                   # (bt, 128) lane-dense


# ------------------------------------- wrapper ---------------------------------------
def _round_up(n, m):
    return ((n + m - 1) // m) * m


def cnn_forward(x_nchw, kp, *, batch_tile=64):
    """batch_tile = images per grid step (rounded to a multiple of 8).
    64 keeps the VMEM footprint ~25-30 MB (fits v7x's 64 MiB); on v5e/v6e (128 MiB)
    it can be raised to 128.  The batch is zero-padded up to a multiple of the tile
    and the output sliced back (no bt-shrink loop / MXU-utilization cliff)."""
    B = x_nchw.shape[0]
    bt = min(_round_up(max(batch_tile, 1), 8), _round_up(B, 8))
    B_pad = _round_up(B, bt)

    x = x_nchw.astype(F32).reshape(B, 28, 28)
    if B_pad != B:
        x = jnp.concatenate([x, jnp.zeros((B_pad - B, 28, 28), F32)], axis=0)
    # NCHW (B,1,28,28) -> (28, B_pad, 28): H leading, batch in sublanes, W in lanes.
    x = jnp.transpose(x, (1, 0, 2))

    def fixed(a):   # grid-invariant (weight) operand: full-array block, constant index
        return pl.BlockSpec(a.shape, lambda b, n=a.ndim: (0,) * n)

    out = pl.pallas_call(
        fused_cnn_kernel,
        out_shape=jax.ShapeDtypeStruct((B_pad, 128), F32),          # lane-dense logits tile
        grid_spec=pltpu.PrefetchScalarGridSpec(
            num_scalar_prefetch=0,
            grid=(B_pad // bt,),
            in_specs=[pl.BlockSpec((28, bt, 28), lambda b: (0, b, 0))]
                     + [fixed(kp[k]) for k in _KP_ORDER],
            out_specs=pl.BlockSpec((bt, 128), lambda b: (b, 0)),
            scratch_shapes=[pltpu.VMEM((32, bt, 32), F32),          # padded conv1 input
                            pltpu.VMEM((18, bt, 288), F32)]),       # padded conv2 input
        compiler_params=pltpu.CompilerParams(
            dimension_semantics=("parallel",),       # v7x: shard batch steps over both TCs
            vmem_limit_bytes=48 * 1024 * 1024),      # > v5e default; < v7x 64 MiB physical
    )(x, *[kp[k] for k in _KP_ORDER])
    return out[:B, :10]


# ----------------------------- deterministic parameters ------------------------------
def init_params(key):
    ks = jax.random.split(key, 5)

    def xavier_normal(k, shape):  # (K, K, Cin, Cout), matches torch xavier_normal_
        K1, K2, Cin, Cout = shape
        std = (2.0 / (Cin * K1 * K2 + Cout * K1 * K2)) ** 0.5
        return std * jax.random.normal(k, shape, jnp.float32)

    return dict(
        conv1_w=xavier_normal(ks[0], (5, 5, 1, 16)),
        conv1_b=jnp.zeros((16,), jnp.float32),
        conv2_w=xavier_normal(ks[1], (5, 5, 16, 32)),
        conv2_b=jnp.zeros((32,), jnp.float32),
        fc1_w=0.01 * jax.random.normal(ks[2], (32 * 7 * 7, 500), jnp.float32),
        fc1_b=jnp.zeros((500,), jnp.float32),
        fc2_w=0.01 * jax.random.normal(ks[3], (500, 100), jnp.float32),
        fc2_b=jnp.zeros((100,), jnp.float32),
        fc3_w=0.01 * jax.random.normal(ks[4], (100, 10), jnp.float32),
        fc3_b=jnp.zeros((10,), jnp.float32),
    )


# ----------------------------------- reference ---------------------------------------
def ref_forward(x_nchw, p):
    x = jnp.transpose(x_nchw, (0, 2, 3, 1)).astype(jnp.float32)

    def conv_block(x, w, b):
        y = lax.conv_general_dilated(
            x, w, window_strides=(1, 1), padding="SAME",
            dimension_numbers=("NHWC", "HWIO", "NHWC")) + b
        y = jnp.maximum(y, 0.0)
        return lax.reduce_window(y, -jnp.inf, lax.max,
                                 (1, 2, 2, 1), (1, 2, 2, 1), "VALID")

    x = conv_block(x, p["conv1_w"], p["conv1_b"])
    x = conv_block(x, p["conv2_w"], p["conv2_b"])
    x = jnp.transpose(x, (0, 3, 1, 2)).reshape(x.shape[0], -1)   # PyTorch (c,h,w) flatten
    h = jnp.maximum(x @ p["fc1_w"] + p["fc1_b"], 0.0)
    h = jnp.maximum(h @ p["fc2_w"] + p["fc2_b"], 0.0)
    return h @ p["fc3_w"] + p["fc3_b"]


if __name__ == "__main__":
    key = jax.random.PRNGKey(0)
    pkey, xkey = jax.random.split(key)
    params = init_params(pkey)
    kparams = prepare_params(params)          # one-time weight transform (outside kernel)

    # Small test (batch=2, padded to one bt=8 tile) — exercises the batch-padding path.
    x = jax.random.normal(xkey, (2, 1, 28, 28), jnp.float32)   # NCHW, like torch MNIST
    out = jax.block_until_ready(cnn_forward(x, kparams))
    assert out.shape == (2, 10) and out.dtype == jnp.float32
    ref = jax.block_until_ready(ref_forward(x, params))
    max_err = float(jnp.max(jnp.abs(out - ref)))
    assert max_err < 2e-3, f"mismatch vs reference: {max_err}"

    # Multi-grid-step check (batch 18 padded to 24 = 3 steps of bt=8): verifies the
    # per-step halo re-zeroing / scratch reuse across grid iterations.
    x2 = jax.random.normal(jax.random.fold_in(xkey, 1), (18, 1, 28, 28), jnp.float32)
    out2 = jax.block_until_ready(cnn_forward(x2, kparams, batch_tile=8))
    ref2 = jax.block_until_ready(ref_forward(x2, params))
    max_err2 = float(jnp.max(jnp.abs(out2 - ref2)))
    assert out2.shape == (18, 10) and max_err2 < 2e-3, f"mismatch vs reference: {max_err2}"

    print("KERNEL_OK")
</pallas_src>

<mosaic_0001>
module attributes {stable_mosaic.version = 11 : i64} {
  func.func @fused_cnn_kernel(%arg0: i32, %arg1: memref<28x8x28xf32, #tpu.memory_space<vmem>>, %arg2: memref<160x448xbf16, #tpu.memory_space<vmem>>, %arg3: memref<1x448xf32, #tpu.memory_space<vmem>>, %arg4: memref<448x224xbf16, #tpu.memory_space<vmem>>, %arg5: memref<448x224xbf16, #tpu.memory_space<vmem>>, %arg6: memref<5x288x448xbf16, #tpu.memory_space<vmem>>, %arg7: memref<1x448xf32, #tpu.memory_space<vmem>>, %arg8: memref<448x224xbf16, #tpu.memory_space<vmem>>, %arg9: memref<448x224xbf16, #tpu.memory_space<vmem>>, %arg10: memref<7x224x512xbf16, #tpu.memory_space<vmem>>, %arg11: memref<1x512xf32, #tpu.memory_space<vmem>>, %arg12: memref<512x128xbf16, #tpu.memory_space<vmem>>, %arg13: memref<1x128xf32, #tpu.memory_space<vmem>>, %arg14: memref<128x128xbf16, #tpu.memory_space<vmem>>, %arg15: memref<1x128xf32, #tpu.memory_space<vmem>>, %arg16: memref<8x128xf32, #tpu.memory_space<vmem>>, %arg17: memref<32x8x32xf32, #tpu.memory_space<vmem>>, %arg18: memref<18x8x288xf32, #tpu.memory_space<vmem>>) attributes {dimension_semantics = [#tpu.dimension_semantics<parallel>], iteration_bounds = array<i64: 1>, scalar_prefetch = 0 : i64, scratch_operands = 2 : i64, tpu.core_type = #tpu.core_type<tc>, window_params = [{transform_indices = @transform_0, window_bounds = array<i64: 28, 8, 28>}, {pipeline_mode = #tpu.pipeline_mode<synchronous>, transform_indices = @transform_1, window_bounds = array<i64: 160, 448>}, {pipeline_mode = #tpu.pipeline_mode<synchronous>, transform_indices = @transform_2, window_bounds = array<i64: 1, 448>}, {pipeline_mode = #tpu.pipeline_mode<synchronous>, transform_indices = @transform_3, window_bounds = array<i64: 448, 224>}, {pipeline_mode = #tpu.pipeline_mode<synchronous>, transform_indices = @transform_4, window_bounds = array<i64: 448, 224>}, {pipeline_mode = #tpu.pipeline_mode<synchronous>, transform_indices = @transform_5, window_bounds = array<i64: 5, 288, 448>}, {pipeline_mode = #tpu.pipeline_mode<synchronous>, transform_indices = @transform_6, window_bounds = array<i64: 1, 448>}, {pipeline_mode = #tpu.pipeline_mode<synchronous>, transform_indices = @transform_7, window_bounds = array<i64: 448, 224>}, {pipeline_mode = #tpu.pipeline_mode<synchronous>, transform_indices = @transform_8, window_bounds = array<i64: 448, 224>}, {pipeline_mode = #tpu.pipeline_mode<synchronous>, transform_indices = @transform_9, window_bounds = array<i64: 7, 224, 512>}, {pipeline_mode = #tpu.pipeline_mode<synchronous>, transform_indices = @transform_10, window_bounds = array<i64: 1, 512>}, {pipeline_mode = #tpu.pipeline_mode<synchronous>, transform_indices = @transform_11, window_bounds = array<i64: 512, 128>}, {pipeline_mode = #tpu.pipeline_mode<synchronous>, transform_indices = @transform_12, window_bounds = array<i64: 1, 128>}, {pipeline_mode = #tpu.pipeline_mode<synchronous>, transform_indices = @transform_13, window_bounds = array<i64: 128, 128>}, {pipeline_mode = #tpu.pipeline_mode<synchronous>, transform_indices = @transform_14, window_bounds = array<i64: 1, 128>}, {transform_indices = @transform_15, window_bounds = array<i64: 8, 128>}]} {
    %cst = arith.constant 0.000000e+00 : f32
    %0 = vector.broadcast %cst : f32 to vector<2x8x32xf32>
    %c0 = arith.constant 0 : index
    %c0_0 = arith.constant 0 : index
    %c0_1 = arith.constant 0 : index
    %1 = vector.load %arg17[%c0, %c0_0, %c0_1] : memref<32x8x32xf32, #tpu.memory_space<vmem>>, vector<2x8x32xf32>
    tpu.vector_store %arg17[%c0, %c0_0, %c0_1], %0 {strides = array<i32>} : memref<32x8x32xf32, #tpu.memory_space<vmem>>, vector<2x8x32xf32>,
    %cst_2 = arith.constant 0.000000e+00 : f32
    %2 = vector.broadcast %cst_2 : f32 to vector<2x8x32xf32>
    %c30 = arith.constant 30 : index
    %c0_3 = arith.constant 0 : index
    %c0_4 = arith.constant 0 : index
    %3 = vector.load %arg17[%c30, %c0_3, %c0_4] : memref<32x8x32xf32, #tpu.memory_space<vmem>>, vector<2x8x32xf32>
    tpu.vector_store %arg17[%c30, %c0_3, %c0_4], %2 {strides = array<i32>} : memref<32x8x32xf32, #tpu.memory_space<vmem>>, vector<2x8x32xf32>,
    %cst_5 = arith.constant 0.000000e+00 : f32
    %4 = vector.broadcast %cst_5 : f32 to vector<28x8x2xf32>
    %c2 = arith.constant 2 : index
    %c0_6 = arith.constant 0 : index
    %c0_7 = arith.constant 0 : index
    %5 = vector.load %arg17[%c2, %c0_6, %c0_7] : memref<32x8x32xf32, #tpu.memory_space<vmem>>, vector<28x8x2xf32>
    tpu.vector_store %arg17[%c2, %c0_6, %c0_7], %4 {strides = array<i32>} : memref<32x8x32xf32, #tpu.memory_space<vmem>>, vector<28x8x2xf32>,
    %cst_8 = arith.constant 0.000000e+00 : f32
    %6 = vector.broadcast %cst_8 : f32 to vector<28x8x2xf32>
    %c2_9 = arith.constant 2 : index
    %c0_10 = arith.constant 0 : index
    %c30_11 = arith.constant 30 : index
    %7 = vector.load %arg17[%c2_9, %c0_10, %c30_11] : memref<32x8x32xf32, #tpu.memory_space<vmem>>, vector<28x8x2xf32>
    tpu.vector_store %arg17[%c2_9, %c0_10, %c30_11], %6 {strides = array<i32>} : memref<32x8x32xf32, #tpu.memory_space<vmem>>, vector<28x8x2xf32>,
    %c0_12 = arith.constant 0 : index
    %c0_13 = arith.constant 0 : index
    %c0_14 = arith.constant 0 : index
    %8 = vector.load %arg1[%c0_12, %c0_13, %c0_14] : memref<28x8x28xf32, #tpu.memory_space<vmem>>, vector<28x8x28xf32>
    %c2_15 = arith.constant 2 : index
    %c0_16 = arith.constant 0 : index
    %c2_17 = arith.constant 2 : index
    %9 = vector.load %arg17[%c2_15, %c0_16, %c2_17] : memref<32x8x32xf32, #tpu.memory_space<vmem>>, vector<28x8x28xf32>
    tpu.vector_store %arg17[%c2_15, %c0_16, %c2_17], %8 {strides = array<i32>} : memref<32x8x32xf32, #tpu.memory_space<vmem>>, vector<28x8x28xf32>,
    %c0_18 = arith.constant 0 : index
    %c0_19 = arith.constant 0 : index
    %c0_20 = arith.constant 0 : index
    %10 = vector.load %arg17[%c0_18, %c0_19, %c0_20] : memref<32x8x32xf32, #tpu.memory_space<vmem>>, vector<28x8x32xf32>
    %c1 = arith.constant 1 : index
    %c0_21 = arith.constant 0 : index
    %c0_22 = arith.constant 0 : index
    %11 = vector.load %arg17[%c1, %c0_21, %c0_22] : memref<32x8x32xf32, #tpu.memory_space<vmem>>, vector<28x8x32xf32>
    %c2_23 = arith.constant 2 : index
    %c0_24 = arith.constant 0 : index
    %c0_25 = arith.constant 0 : index
    %12 = vector.load %arg17[%c2_23, %c0_24, %c0_25] : memref<32x8x32xf32, #tpu.memory_space<vmem>>, vector<28x8x32xf32>
    %c3 = arith.constant 3 : index
    %c0_26 = arith.constant 0 : index
    %c0_27 = arith.constant 0 : index
    %13 = vector.load %arg17[%c3, %c0_26, %c0_27] : memref<32x8x32xf32, #tpu.memory_space<vmem>>, vector<28x8x32xf32>
    %c4 = arith.constant 4 : index
    %c0_28 = arith.constant 0 : index
    %c0_29 = arith.constant 0 : index
    %14 = vector.load %arg17[%c4, %c0_28, %c0_29] : memref<32x8x32xf32, #tpu.memory_space<vmem>>, vector<28x8x32xf32>
    %15 = tpu.concatenate %10, %11, %12, %13, %14 in 2 : vector<28x8x32xf32>, vector<28x8x32xf32>, vector<28x8x32xf32>, vector<28x8x32xf32>, vector<28x8x32xf32> -> vector<28x8x160xf32>
    %16 = vector.shape_cast %15 : vector<28x8x160xf32> to vector<224x160xf32>
    %17 = arith.truncf %16 : vector<224x160xf32> to vector<224x160xbf16>
    %c0_30 = arith.constant 0 : index
    %c0_31 = arith.constant 0 : index
    %18 = vector.load %arg2[%c0_30, %c0_31] : memref<160x448xbf16, #tpu.memory_space<vmem>>, vector<160x448xbf16>
    %cst_32 = arith.constant dense<0.000000e+00> : vector<224x448xf32>
    %19 = tpu.matmul %17, %18, %cst_32 {dimension_numbers = #tpu.dot_dimension_numbers<[1], [0], [0], [1], [0, 0, 1, 1], [], []>} : vector<224x160xbf16>, vector<160x448xbf16>, vector<224x448xf32> -> vector<224x448xf32>
    %c0_33 = arith.constant 0 : index
    %c0_34 = arith.constant 0 : index
    %20 = vector.load %arg3[%c0_33, %c0_34] : memref<1x448xf32, #tpu.memory_space<vmem>>, vector<1x448xf32>
    %21 = vector.broadcast %20 : vector<1x448xf32> to vector<224x448xf32>
    %22 = arith.addf %19, %21 : vector<224x448xf32>
    %cst_35 = arith.constant 0.000000e+00 : f32
    %23 = vector.broadcast %cst_35 : f32 to vector<224x448xf32>
    %24 = arith.maximumf %22, %23 : vector<224x448xf32>
    %25 = vector.shape_cast %24 : vector<224x448xf32> to vector<14x2x8x448xf32>
    %26 = vector.extract_strided_slice %25 {offsets = [0, 0, 0, 0], sizes = [14, 1, 8, 448], strides = [1, 1, 1, 1]} : vector<14x2x8x448xf32> to vector<14x1x8x448xf32>
    %27 = vector.shape_cast %26 : vector<14x1x8x448xf32> to vector<14x8x448xf32>
    %28 = vector.extract_strided_slice %25 {offsets = [0, 1, 0, 0], sizes = [14, 1, 8, 448], strides = [1, 1, 1, 1]} : vector<14x2x8x448xf32> to vector<14x1x8x448xf32>
    %29 = vector.shape_cast %28 : vector<14x1x8x448xf32> to vector<14x8x448xf32>
    %30 = arith.maximumf %27, %29 : vector<14x8x448xf32>
    %31 = vector.shape_cast %30 : vector<14x8x448xf32> to vector<112x448xf32>
    %32 = arith.truncf %31 : vector<112x448xf32> to vector<112x448xbf16>
    %c0_36 = arith.constant 0 : index
    %c0_37 = arith.constant 0 : index
    %33 = vector.load %arg4[%c0_36, %c0_37] : memref<448x224xbf16, #tpu.memory_space<vmem>>, vector<448x224xbf16>
    %cst_38 = arith.constant dense<0.000000e+00> : vector<112x224xf32>
    %34 = tpu.matmul %32, %33, %cst_38 {dimension_numbers = #tpu.dot_dimension_numbers<[1], [0], [0], [1], [0, 0, 1, 1], [], []>} : vector<112x448xbf16>, vector<448x224xbf16>, vector<112x224xf32> -> vector<112x224xf32>
    %c0_39 = arith.constant 0 : index
    %c0_40 = arith.constant 0 : index
    %35 = vector.load %arg5[%c0_39, %c0_40] : memref<448x224xbf16, #tpu.memory_space<vmem>>, vector<448x224xbf16>
    %cst_41 = arith.constant dense<0.000000e+00> : vector<112x224xf32>
    %36 = tpu.matmul %32, %35, %cst_41 {dimension_numbers = #tpu.dot_dimension_numbers<[1], [0], [0], [1], [0, 0, 1, 1], [], []>} : vector<112x448xbf16>, vector<448x224xbf16>, vector<112x224xf32> -> vector<112x224xf32>
    %37 = arith.maximumf %34, %36 : vector<112x224xf32>
    %cst_42 = arith.constant 0.000000e+00 : f32
    %38 = vector.broadcast %cst_42 : f32 to vector<2x8x288xf32>
    %c0_43 = arith.constant 0 : index
    %c0_44 = arith.constant 0 : index
    %c0_45 = arith.constant 0 : index
    %39 = vector.load %arg18[%c0_43, %c0_44, %c0_45] : memref<18x8x288xf32, #tpu.memory_space<vmem>>, vector<2x8x288xf32>
    tpu.vector_store %arg18[%c0_43, %c0_44, %c0_45], %38 {strides = array<i32>} : memref<18x8x288xf32, #tpu.memory_space<vmem>>, vector<2x8x288xf32>,
    %cst_46 = arith.constant 0.000000e+00 : f32
    %40 = vector.broadcast %cst_46 : f32 to vector<2x8x288xf32>
    %c16 = arith.constant 16 : index
    %c0_47 = arith.constant 0 : index
    %c0_48 = arith.constant 0 : index
    %41 = vector.load %arg18[%c16, %c0_47, %c0_48] : memref<18x8x288xf32, #tpu.memory_space<vmem>>, vector<2x8x288xf32>
    tpu.vector_store %arg18[%c16, %c0_47, %c0_48], %40 {strides = array<i32>} : memref<18x8x288xf32, #tpu.memory_space<vmem>>, vector<2x8x288xf32>,
    %cst_49 = arith.constant 0.000000e+00 : f32
    %42 = vector.broadcast %cst_49 : f32 to vector<14x8x32xf32>
    %c2_50 = arith.constant 2 : index
    %c0_51 = arith.constant 0 : index
    %c0_52 = arith.constant 0 : index
    %43 = vector.load %arg18[%c2_50, %c0_51, %c0_52] : memref<18x8x288xf32, #tpu.memory_space<vmem>>, vector<14x8x32xf32>
    tpu.vector_store %arg18[%c2_50, %c0_51, %c0_52], %42 {strides = array<i32>} : memref<18x8x288xf32, #tpu.memory_space<vmem>>, vector<14x8x32xf32>,
    %cst_53 = arith.constant 0.000000e+00 : f32
    %44 = vector.broadcast %cst_53 : f32 to vector<14x8x32xf32>
    %c2_54 = arith.constant 2 : index
    %c0_55 = arith.constant 0 : index
    %c256 = arith.constant 256 : index
    %45 = vector.load %arg18[%c2_54, %c0_55, %c256] : memref<18x8x288xf32, #tpu.memory_space<vmem>>, vector<14x8x32xf32>
    tpu.vector_store %arg18[%c2_54, %c0_55, %c256], %44 {strides = array<i32>} : memref<18x8x288xf32, #tpu.memory_space<vmem>>, vector<14x8x32xf32>,
    %46 = vector.shape_cast %37 : vector<112x224xf32> to vector<14x8x224xf32>
    %c2_56 = arith.constant 2 : index
    %c0_57 = arith.constant 0 : index
    %c32 = arith.constant 32 : index
    %47 = vector.load %arg18[%c2_56, %c0_57, %c32] : memref<18x8x288xf32, #tpu.memory_space<vmem>>, vector<14x8x224xf32>
    tpu.vector_store %arg18[%c2_56, %c0_57, %c32], %46 {strides = array<i32>} : memref<18x8x288xf32, #tpu.memory_space<vmem>>, vector<14x8x224xf32>,
    %c0_58 = arith.constant 0 : index
    %c0_59 = arith.constant 0 : index
    %c0_60 = arith.constant 0 : index
    %48 = vector.load %arg18[%c0_58, %c0_59, %c0_60] : memref<18x8x288xf32, #tpu.memory_space<vmem>>, vector<14x8x288xf32>
    %49 = vector.shape_cast %48 : vector<14x8x288xf32> to vector<112x288xf32>
    %50 = arith.truncf %49 : vector<112x288xf32> to vector<112x288xbf16>
    %c0_61 = arith.constant 0 : index
    %c0_62 = arith.constant 0 : index
    %c0_63 = arith.constant 0 : index
    %51 = vector.load %arg6[%c0_61, %c0_62, %c0_63] : memref<5x288x448xbf16, #tpu.memory_space<vmem>>, vector<1x288x448xbf16>
    %52 = vector.shape_cast %51 : vector<1x288x448xbf16> to vector<288x448xbf16>
    %cst_64 = arith.constant dense<0.000000e+00> : vector<112x448xf32>
    %53 = tpu.matmul %50, %52, %cst_64 {dimension_numbers = #tpu.dot_dimension_numbers<[1], [0], [0], [1], [0, 0, 1, 1], [], []>} : vector<112x288xbf16>, vector<288x448xbf16>, vector<112x448xf32> -> vector<112x448xf32>
    %c1_65 = arith.constant 1 : index
    %c0_66 = arith.constant 0 : index
    %c0_67 = arith.constant 0 : index
    %54 = vector.load %arg18[%c1_65, %c0_66, %c0_67] : memref<18x8x288xf32, #tpu.memory_space<vmem>>, vector<14x8x288xf32>
    %55 = vector.shape_cast %54 : vector<14x8x288xf32> to vector<112x288xf32>
    %56 = arith.truncf %55 : vector<112x288xf32> to vector<112x288xbf16>
    %c1_68 = arith.constant 1 : index
    %c0_69 = arith.constant 0 : index
    %c0_70 = arith.constant 0 : index
    %57 = vector.load %arg6[%c1_68, %c0_69, %c0_70] : memref<5x288x448xbf16, #tpu.memory_space<vmem>>, vector<1x288x448xbf16>
    %58 = vector.shape_cast %57 : vector<1x288x448xbf16> to vector<288x448xbf16>
    %cst_71 = arith.constant dense<0.000000e+00> : vector<112x448xf32>
    %59 = tpu.matmul %56, %58, %cst_71 {dimension_numbers = #tpu.dot_dimension_numbers<[1], [0], [0], [1], [0, 0, 1, 1], [], []>} : vector<112x288xbf16>, vector<288x448xbf16>, vector<112x448xf32> -> vector<112x448xf32>
    %60 = arith.addf %53, %59 : vector<112x448xf32>
    %c2_72 = arith.constant 2 : index
    %c0_73 = arith.constant 0 : index
    %c0_74 = arith.constant 0 : index
    %61 = vector.load %arg18[%c2_72, %c0_73, %c0_74] : memref<18x8x288xf32, #tpu.memory_space<vmem>>, vector<14x8x288xf32>
    %62 = vector.shape_cast %61 : vector<14x8x288xf32> to vector<112x288xf32>
    %63 = arith.truncf %62 : vector<112x288xf32> to vector<112x288xbf16>
    %c2_75 = arith.constant 2 : index
    %c0_76 = arith.constant 0 : index
    %c0_77 = arith.constant 0 : index
    %64 = vector.load %arg6[%c2_75, %c0_76, %c0_77] : memref<5x288x448xbf16, #tpu.memory_space<vmem>>, vector<1x288x448xbf16>
    %65 = vector.shape_cast %64 : vector<1x288x448xbf16> to vector<288x448xbf16>
    %cst_78 = arith.constant dense<0.000000e+00> : vector<112x448xf32>
    %66 = tpu.matmul %63, %65, %cst_78 {dimension_numbers = #tpu.dot_dimension_numbers<[1], [0], [0], [1], [0, 0, 1, 1], [], []>} : vector<112x288xbf16>, vector<288x448xbf16>, vector<112x448xf32> -> vector<112x448xf32>
    %67 = arith.addf %60, %66 : vector<112x448xf32>
    %c3_79 = arith.constant 3 : index
    %c0_80 = arith.constant 0 : index
    %c0_81 = arith.constant 0 : index
    %68 = vector.load %arg18[%c3_79, %c0_80, %c0_81] : memref<18x8x288xf32, #tpu.memory_space<vmem>>, vector<14x8x288xf32>
    %69 = vector.shape_cast %68 : vector<14x8x288xf32> to vector<112x288xf32>
    %70 = arith.truncf %69 : vector<112x288xf32> to vector<112x288xbf16>
    %c3_82 = arith.constant 3 : index
    %c0_83 = arith.constant 0 : index
    %c0_84 = arith.constant 0 : index
    %71 = vector.load %arg6[%c3_82, %c0_83, %c0_84] : memref<5x288x448xbf16, #tpu.memory_space<vmem>>, vector<1x288x448xbf16>
    %72 = vector.shape_cast %71 : vector<1x288x448xbf16> to vector<288x448xbf16>
    %cst_85 = arith.constant dense<0.000000e+00> : vector<112x448xf32>
    %73 = tpu.matmul %70, %72, %cst_85 {dimension_numbers = #tpu.dot_dimension_numbers<[1], [0], [0], [1], [0, 0, 1, 1], [], []>} : vector<112x288xbf16>, vector<288x448xbf16>, vector<112x448xf32> -> vector<112x448xf32>
    %74 = arith.addf %67, %73 : vector<112x448xf32>
    %c4_86 = arith.constant 4 : index
    %c0_87 = arith.constant 0 : index
    %c0_88 = arith.constant 0 : index
    %75 = vector.load %arg18[%c4_86, %c0_87, %c0_88] : memref<18x8x288xf32, #tpu.memory_space<vmem>>, vector<14x8x288xf32>
    %76 = vector.shape_cast %75 : vector<14x8x288xf32> to vector<112x288xf32>
    %77 = arith.truncf %76 : vector<112x288xf32> to vector<112x288xbf16>
    %c4_89 = arith.constant 4 : index
    %c0_90 = arith.constant 0 : index
    %c0_91 = arith.constant 0 : index
    %78 = vector.load %arg6[%c4_89, %c0_90, %c0_91] : memref<5x288x448xbf16, #tpu.memory_space<vmem>>, vector<1x288x448xbf16>
    %79 = vector.shape_cast %78 : vector<1x288x448xbf16> to vector<288x448xbf16>
    %cst_92 = arith.constant dense<0.000000e+00> : vector<112x448xf32>
    %80 = tpu.matmul %77, %79, %cst_92 {dimension_numbers = #tpu.dot_dimension_numbers<[1], [0], [0], [1], [0, 0, 1, 1], [], []>} : vector<112x288xbf16>, vector<288x448xbf16>, vector<112x448xf32> -> vector<112x448xf32>
    %81 = arith.addf %74, %80 : vector<112x448xf32>
    %c0_93 = arith.constant 0 : index
    %c0_94 = arith.constant 0 : index
    %82 = vector.load %arg7[%c0_93, %c0_94] : memref<1x448xf32, #tpu.memory_space<vmem>>, vector<1x448xf32>
    %83 = vector.broadcast %82 : vector<1x448xf32> to vector<112x448xf32>
    %84 = arith.addf %81, %83 : vector<112x448xf32>
    %cst_95 = arith.constant 0.000000e+00 : f32
    %85 = vector.broadcast %cst_95 : f32 to vector<112x448xf32>
    %86 = arith.maximumf %84, %85 : vector<112x448xf32>
    %87 = vector.shape_cast %86 : vector<112x448xf32> to vector<7x2x8x448xf32>
    %88 = vector.extract_strided_slice %87 {offsets = [0, 0, 0, 0], sizes = [7, 1, 8, 448], strides = [1, 1, 1, 1]} : vector<7x2x8x448xf32> to vector<7x1x8x448xf32>
    %89 = vector.shape_cast %88 : vector<7x1x8x448xf32> to vector<7x8x448xf32>
    %90 = vector.extract_strided_slice %87 {offsets = [0, 1, 0, 0], sizes = [7, 1, 8, 448], strides = [1, 1, 1, 1]} : vector<7x2x8x448xf32> to vector<7x1x8x448xf32>
    %91 = vector.shape_cast %90 : vector<7x1x8x448xf32> to vector<7x8x448xf32>
    %92 = arith.maximumf %89, %91 : vector<7x8x448xf32>
    %93 = vector.shape_cast %92 : vector<7x8x448xf32> to vector<56x448xf32>
    %94 = arith.truncf %93 : vector<56x448xf32> to vector<56x448xbf16>
    %c0_96 = arith.constant 0 : index
    %c0_97 = arith.constant 0 : index
    %95 = vector.load %arg8[%c0_96, %c0_97] : memref<448x224xbf16, #tpu.memory_space<vmem>>, vector<448x224xbf16>
    %cst_98 = arith.constant dense<0.000000e+00> : vector<56x224xf32>
    %96 = tpu.matmul %94, %95, %cst_98 {dimension_numbers = #tpu.dot_dimension_numbers<[1], [0], [0], [1], [0, 0, 1, 1], [], []>} : vector<56x448xbf16>, vector<448x224xbf16>, vector<56x224xf32> -> vector<56x224xf32>
    %c0_99 = arith.constant 0 : index
    %c0_100 = arith.constant 0 : index
    %97 = vector.load %arg9[%c0_99, %c0_100] : memref<448x224xbf16, #tpu.memory_space<vmem>>, vector<448x224xbf16>
    %cst_101 = arith.constant dense<0.000000e+00> : vector<56x224xf32>
    %98 = tpu.matmul %94, %97, %cst_101 {dimension_numbers = #tpu.dot_dimension_numbers<[1], [0], [0], [1], [0, 0, 1, 1], [], []>} : vector<56x448xbf16>, vector<448x224xbf16>, vector<56x224xf32> -> vector<56x224xf32>
    %99 = arith.maximumf %96, %98 : vector<56x224xf32>
    %100 = arith.truncf %99 : vector<56x224xf32> to vector<56x224xbf16>
    %101 = vector.shape_cast %100 : vector<56x224xbf16> to vector<7x8x224xbf16>
    %102 = vector.extract_strided_slice %101 {offsets = [0, 0, 0], sizes = [1, 8, 224], strides = [1, 1, 1]} : vector<7x8x224xbf16> to vector<1x8x224xbf16>
    %103 = vector.shape_cast %102 : vector<1x8x224xbf16> to vector<8x224xbf16>
    %c0_102 = arith.constant 0 : index
    %c0_103 = arith.constant 0 : index
    %c0_104 = arith.constant 0 : index
    %104 = vector.load %arg10[%c0_102, %c0_103, %c0_104] : memref<7x224x512xbf16, #tpu.memory_space<vmem>>, vector<1x224x512xbf16>
    %105 = vector.shape_cast %104 : vector<1x224x512xbf16> to vector<224x512xbf16>
    %cst_105 = arith.constant dense<0.000000e+00> : vector<8x512xf32>
    %106 = tpu.matmul %103, %105, %cst_105 {dimension_numbers = #tpu.dot_dimension_numbers<[1], [0], [0], [1], [0, 0, 1, 1], [], []>} : vector<8x224xbf16>, vector<224x512xbf16>, vector<8x512xf32> -> vector<8x512xf32>
    %107 = vector.extract_strided_slice %101 {offsets = [1, 0, 0], sizes = [1, 8, 224], strides = [1, 1, 1]} : vector<7x8x224xbf16> to vector<1x8x224xbf16>
    %108 = vector.shape_cast %107 : vector<1x8x224xbf16> to vector<8x224xbf16>
    %c1_106 = arith.constant 1 : index
    %c0_107 = arith.constant 0 : index
    %c0_108 = arith.constant 0 : index
    %109 = vector.load %arg10[%c1_106, %c0_107, %c0_108] : memref<7x224x512xbf16, #tpu.memory_space<vmem>>, vector<1x224x512xbf16>
    %110 = vector.shape_cast %109 : vector<1x224x512xbf16> to vector<224x512xbf16>
    %cst_109 = arith.constant dense<0.000000e+00> : vector<8x512xf32>
    %111 = tpu.matmul %108, %110, %cst_109 {dimension_numbers = #tpu.dot_dimension_numbers<[1], [0], [0], [1], [0, 0, 1, 1], [], []>} : vector<8x224xbf16>, vector<224x512xbf16>, vector<8x512xf32> -> vector<8x512xf32>
    %112 = arith.addf %106, %111 : vector<8x512xf32>
    %113 = vector.extract_strided_slice %101 {offsets = [2, 0, 0], sizes = [1, 8, 224], strides = [1, 1, 1]} : vector<7x8x224xbf16> to vector<1x8x224xbf16>
    %114 = vector.shape_cast %113 : vector<1x8x224xbf16> to vector<8x224xbf16>
    %c2_110 = arith.constant 2 : index
    %c0_111 = arith.constant 0 : index
    %c0_112 = arith.constant 0 : index
    %115 = vector.load %arg10[%c2_110, %c0_111, %c0_112] : memref<7x224x512xbf16, #tpu.memory_space<vmem>>, vector<1x224x512xbf16>
    %116 = vector.shape_cast %115 : vector<1x224x512xbf16> to vector<224x512xbf16>
    %cst_113 = arith.constant dense<0.000000e+00> : vector<8x512xf32>
    %117 = tpu.matmul %114, %116, %cst_113 {dimension_numbers = #tpu.dot_dimension_numbers<[1], [0], [0], [1], [0, 0, 1, 1], [], []>} : vector<8x224xbf16>, vector<224x512xbf16>, vector<8x512xf32> -> vector<8x512xf32>
    %118 = arith.addf %112, %117 : vector<8x512xf32>
    %119 = vector.extract_strided_slice %101 {offsets = [3, 0, 0], sizes = [1, 8, 224], strides = [1, 1, 1]} : vector<7x8x224xbf16> to vector<1x8x224xbf16>
    %120 = vector.shape_cast %119 : vector<1x8x224xbf16> to vector<8x224xbf16>
    %c3_114 = arith.constant 3 : index
    %c0_115 = arith.constant 0 : index
    %c0_116 = arith.constant 0 : index
    %121 = vector.load %arg10[%c3_114, %c0_115, %c0_116] : memref<7x224x512xbf16, #tpu.memory_space<vmem>>, vector<1x224x512xbf16>
    %122 = vector.shape_cast %121 : vector<1x224x512xbf16> to vector<224x512xbf16>
    %cst_117 = arith.constant dense<0.000000e+00> : vector<8x512xf32>
    %123 = tpu.matmul %120, %122, %cst_117 {dimension_numbers = #tpu.dot_dimension_numbers<[1], [0], [0], [1], [0, 0, 1, 1], [], []>} : vector<8x224xbf16>, vector<224x512xbf16>, vector<8x512xf32> -> vector<8x512xf32>
    %124 = arith.addf %118, %123 : vector<8x512xf32>
    %125 = vector.extract_strided_slice %101 {offsets = [4, 0, 0], sizes = [1, 8, 224], strides = [1, 1, 1]} : vector<7x8x224xbf16> to vector<1x8x224xbf16>
    %126 = vector.shape_cast %125 : vector<1x8x224xbf16> to vector<8x224xbf16>
    %c4_118 = arith.constant 4 : index
    %c0_119 = arith.constant 0 : index
    %c0_120 = arith.constant 0 : index
    %127 = vector.load %arg10[%c4_118, %c0_119, %c0_120] : memref<7x224x512xbf16, #tpu.memory_space<vmem>>, vector<1x224x512xbf16>
    %128 = vector.shape_cast %127 : vector<1x224x512xbf16> to vector<224x512xbf16>
    %cst_121 = arith.constant dense<0.000000e+00> : vector<8x512xf32>
    %129 = tpu.matmul %126, %128, %cst_121 {dimension_numbers = #tpu.dot_dimension_numbers<[1], [0], [0], [1], [0, 0, 1, 1], [], []>} : vector<8x224xbf16>, vector<224x512xbf16>, vector<8x512xf32> -> vector<8x512xf32>
    %130 = arith.addf %124, %129 : vector<8x512xf32>
    %131 = vector.extract_strided_slice %101 {offsets = [5, 0, 0], sizes = [1, 8, 224], strides = [1, 1, 1]} : vector<7x8x224xbf16> to vector<1x8x224xbf16>
    %132 = vector.shape_cast %131 : vector<1x8x224xbf16> to vector<8x224xbf16>
    %c5 = arith.constant 5 : index
    %c0_122 = arith.constant 0 : index
    %c0_123 = arith.constant 0 : index
    %133 = vector.load %arg10[%c5, %c0_122, %c0_123] : memref<7x224x512xbf16, #tpu.memory_space<vmem>>, vector<1x224x512xbf16>
    %134 = vector.shape_cast %133 : vector<1x224x512xbf16> to vector<224x512xbf16>
    %cst_124 = arith.constant dense<0.000000e+00> : vector<8x512xf32>
    %135 = tpu.matmul %132, %134, %cst_124 {dimension_numbers = #tpu.dot_dimension_numbers<[1], [0], [0], [1], [0, 0, 1, 1], [], []>} : vector<8x224xbf16>, vector<224x512xbf16>, vector<8x512xf32> -> vector<8x512xf32>
    %136 = arith.addf %130, %135 : vector<8x512xf32>
    %137 = vector.extract_strided_slice %101 {offsets = [6, 0, 0], sizes = [1, 8, 224], strides = [1, 1, 1]} : vector<7x8x224xbf16> to vector<1x8x224xbf16>
    %138 = vector.shape_cast %137 : vector<1x8x224xbf16> to vector<8x224xbf16>
    %c6 = arith.constant 6 : index
    %c0_125 = arith.constant 0 : index
    %c0_126 = arith.constant 0 : index
    %139 = vector.load %arg10[%c6, %c0_125, %c0_126] : memref<7x224x512xbf16, #tpu.memory_space<vmem>>, vector<1x224x512xbf16>
    %140 = vector.shape_cast %139 : vector<1x224x512xbf16> to vector<224x512xbf16>
    %cst_127 = arith.constant dense<0.000000e+00> : vector<8x512xf32>
    %141 = tpu.matmul %138, %140, %cst_127 {dimension_numbers = #tpu.dot_dimension_numbers<[1], [0], [0], [1], [0, 0, 1, 1], [], []>} : vector<8x224xbf16>, vector<224x512xbf16>, vector<8x512xf32> -> vector<8x512xf32>
    %142 = arith.addf %136, %141 : vector<8x512xf32>
    %c0_128 = arith.constant 0 : index
    %c0_129 = arith.constant 0 : index
    %143 = vector.load %arg11[%c0_128, %c0_129] : memref<1x512xf32, #tpu.memory_space<vmem>>, vector<1x512xf32>
    %144 = vector.broadcast %143 : vector<1x512xf32> to vector<8x512xf32>
    %145 = arith.addf %142, %144 : vector<8x512xf32>
    %cst_130 = arith.constant 0.000000e+00 : f32
    %146 = vector.broadcast %cst_130 : f32 to vector<8x512xf32>
    %147 = arith.maximumf %145, %146 : vector<8x512xf32>
    %148 = arith.truncf %147 : vector<8x512xf32> to vector<8x512xbf16>
    %c0_131 = arith.constant 0 : index
    %c0_132 = arith.constant 0 : index
    %149 = vector.load %arg12[%c0_131, %c0_132] : memref<512x128xbf16, #tpu.memory_space<vmem>>, vector<512x128xbf16>
    %cst_133 = arith.constant dense<0.000000e+00> : vector<8x128xf32>
    %150 = tpu.matmul %148, %149, %cst_133 {dimension_numbers = #tpu.dot_dimension_numbers<[1], [0], [0], [1], [0, 0, 1, 1], [], []>} : vector<8x512xbf16>, vector<512x128xbf16>, vector<8x128xf32> -> vector<8x128xf32>
    %c0_134 = arith.constant 0 : index
    %c0_135 = arith.constant 0 : index
    %151 = vector.load %arg13[%c0_134, %c0_135] : memref<1x128xf32, #tpu.memory_space<vmem>>, vector<1x128xf32>
    %152 = vector.broadcast %151 : vector<1x128xf32> to vector<8x128xf32>
    %153 = arith.addf %150, %152 : vector<8x128xf32>
    %cst_136 = arith.constant 0.000000e+00 : f32
    %154 = vector.broadcast %cst_136 : f32 to vector<8x128xf32>
    %155 = arith.maximumf %153, %154 : vector<8x128xf32>
    %156 = arith.truncf %155 : vector<8x128xf32> to vector<8x128xbf16>
    %c0_137 = arith.constant 0 : index
    %c0_138 = arith.constant 0 : index
    %157 = vector.load %arg14[%c0_137, %c0_138] : memref<128x128xbf16, #tpu.memory_space<vmem>>, vector<128x128xbf16>
    %cst_139 = arith.constant dense<0.000000e+00> : vector<8x128xf32>
    %158 = tpu.matmul %156, %157, %cst_139 {dimension_numbers = #tpu.dot_dimension_numbers<[1], [0], [0], [1], [0, 0, 1, 1], [], []>} : vector<8x128xbf16>, vector<128x128xbf16>, vector<8x128xf32> -> vector<8x128xf32>
    %c0_140 = arith.constant 0 : index
    %c0_141 = arith.constant 0 : index
    %159 = vector.load %arg15[%c0_140, %c0_141] : memref<1x128xf32, #tpu.memory_space<vmem>>, vector<1x128xf32>
    %160 = vector.broadcast %159 : vector<1x128xf32> to vector<8x128xf32>
    %161 = arith.addf %158, %160 : vector<8x128xf32>
    %c0_142 = arith.constant 0 : index
    %c0_143 = arith.constant 0 : index
    %162 = vector.load %arg16[%c0_142, %c0_143] : memref<8x128xf32, #tpu.memory_space<vmem>>, vector<8x128xf32>
    tpu.vector_store %arg16[%c0_142, %c0_143], %161 {strides = array<i32>} : memref<8x128xf32, #tpu.memory_space<vmem>>, vector<8x128xf32>,
    return
  }
  func.func @transform_0(%arg0: i32) -> (i32, i32, i32) {
    %c0_i32 = arith.constant 0 : i32
    %c0_i32_0 = arith.constant 0 : i32
    %c0_i32_1 = arith.constant 0 : i32
    return %c0_i32, %arg0, %c0_i32_0 : i32, i32, i32
  }
  func.func @transform_1(%arg0: i32) -> (i32, i32) {
    %c0_i32 = arith.constant 0 : i32
    %c0_i32_0 = arith.constant 0 : i32
    %c0_i32_1 = arith.constant 0 : i32
    return %c0_i32, %c0_i32_0 : i32, i32
  }
  func.func @transform_2(%arg0: i32) -> (i32, i32) {
    %c0_i32 = arith.constant 0 : i32
    %c0_i32_0 = arith.constant 0 : i32
    %c0_i32_1 = arith.constant 0 : i32
    return %c0_i32, %c0_i32_0 : i32, i32
  }
  func.func @transform_3(%arg0: i32) -> (i32, i32) {
    %c0_i32 = arith.constant 0 : i32
    %c0_i32_0 = arith.constant 0 : i32
    %c0_i32_1 = arith.constant 0 : i32
    return %c0_i32, %c0_i32_0 : i32, i32
  }
  func.func @transform_4(%arg0: i32) -> (i32, i32) {
    %c0_i32 = arith.constant 0 : i32
    %c0_i32_0 = arith.constant 0 : i32
    %c0_i32_1 = arith.constant 0 : i32
    return %c0_i32, %c0_i32_0 : i32, i32
  }
  func.func @transform_5(%arg0: i32) -> (i32, i32, i32) {
    %c0_i32 = arith.constant 0 : i32
    %c0_i32_0 = arith.constant 0 : i32
    %c0_i32_1 = arith.constant 0 : i32
    %c0_i32_2 = arith.constant 0 : i32
    return %c0_i32, %c0_i32_0, %c0_i32_1 : i32, i32, i32
  }
  func.func @transform_6(%arg0: i32) -> (i32, i32) {
    %c0_i32 = arith.constant 0 : i32
    %c0_i32_0 = arith.constant 0 : i32
    %c0_i32_1 = arith.constant 0 : i32
    return %c0_i32, %c0_i32_0 : i32, i32
  }
  func.func @transform_7(%arg0: i32) -> (i32, i32) {
    %c0_i32 = arith.constant 0 : i32
    %c0_i32_0 = arith.constant 0 : i32
    %c0_i32_1 = arith.constant 0 : i32
    return %c0_i32, %c0_i32_0 : i32, i32
  }
  func.func @transform_8(%arg0: i32) -> (i32, i32) {
    %c0_i32 = arith.constant 0 : i32
    %c0_i32_0 = arith.constant 0 : i32
    %c0_i32_1 = arith.constant 0 : i32
    return %c0_i32, %c0_i32_0 : i32, i32
  }
  func.func @transform_9(%arg0: i32) -> (i32, i32, i32) {
    %c0_i32 = arith.constant 0 : i32
    %c0_i32_0 = arith.constant 0 : i32
    %c0_i32_1 = arith.constant 0 : i32
    %c0_i32_2 = arith.constant 0 : i32
    return %c0_i32, %c0_i32_0, %c0_i32_1 : i32, i32, i32
  }
  func.func @transform_10(%arg0: i32) -> (i32, i32) {
    %c0_i32 = arith.constant 0 : i32
    %c0_i32_0 = arith.constant 0 : i32
    %c0_i32_1 = arith.constant 0 : i32
    return %c0_i32, %c0_i32_0 : i32, i32
  }
  func.func @transform_11(%arg0: i32) -> (i32, i32) {
    %c0_i32 = arith.constant 0 : i32
    %c0_i32_0 = arith.constant 0 : i32
    %c0_i32_1 = arith.constant 0 : i32
    return %c0_i32, %c0_i32_0 : i32, i32
  }
  func.func @transform_12(%arg0: i32) -> (i32, i32) {
    %c0_i32 = arith.constant 0 : i32
    %c0_i32_0 = arith.constant 0 : i32
    %c0_i32_1 = arith.constant 0 : i32
    return %c0_i32, %c0_i32_0 : i32, i32
  }
  func.func @transform_13(%arg0: i32) -> (i32, i32) {
    %c0_i32 = arith.constant 0 : i32
    %c0_i32_0 = arith.constant 0 : i32
    %c0_i32_1 = arith.constant 0 : i32
    return %c0_i32, %c0_i32_0 : i32, i32
  }
  func.func @transform_14(%arg0: i32) -> (i32, i32) {
    %c0_i32 = arith.constant 0 : i32
    %c0_i32_0 = arith.constant 0 : i32
    %c0_i32_1 = arith.constant 0 : i32
    return %c0_i32, %c0_i32_0 : i32, i32
  }
  func.func @transform_15(%arg0: i32) -> (i32, i32) {
    %c0_i32 = arith.constant 0 : i32
    %c0_i32_0 = arith.constant 0 : i32
    return %arg0, %c0_i32 : i32, i32
  }
}

</mosaic_0001>

<bundles_post_ra>
// kernel: tpu_custom_call.1
= control target key start
LH: loop header
LB: loop body
LE: loop exit
PB: predicated region body
PF: predicated region fallthrough
CT: control target
= control target key end

     0   :  { %s18626_s0 = inlined_call_operand.hbm [shape: f32[28,8,28], index: 0, kind: input, shape index: {}]   ;;  %s18627_s1 = inlined_call_operand.hbm [shape: bf16[160,448], index: 1, kind: input, shape index: {}]   ;;  %s18628_s2 = inlined_call_operand.hbm [shape: f32[1,448], index: 2, kind: input, shape index: {}]   ;;  %s18629_s3 = inlined_call_operand.hbm [shape: bf16[448,224], index: 3, kind: input, shape index: {}]   ;;  %s18630_s4 = inlined_call_operand.hbm [shape: bf16[448,224], index: 4, kind: input, shape index: {}]   ;;  %s18631_s5 = inlined_call_operand.hbm [shape: bf16[5,288,448], index: 5, kind: input, shape index: {}]   ;;  %s18632_s6 = inlined_call_operand.hbm [shape: f32[1,448], index: 6, kind: input, shape index: {}]   ;;  %s18633_s7 = inlined_call_operand.hbm [shape: bf16[448,224], index: 7, kind: input, shape index: {}]   ;;  %s18634_s8 = inlined_call_operand.hbm [shape: bf16[448,224], index: 8, kind: input, shape index: {}]   ;;  %s18635_s9 = inlined_call_operand.hbm [shape: bf16[7,224,512], index: 9, kind: input, shape index: {}]   ;;  %s18636_s10 = inlined_call_operand.hbm [shape: f32[1,512], index: 10, kind: input, shape index: {}]   ;;  %s18637_s11 = inlined_call_operand.hbm [shape: bf16[512,128], index: 11, kind: input, shape index: {}]   ;;  %s18638_s12 = inlined_call_operand.hbm [shape: f32[1,128], index: 12, kind: input, shape index: {}]   ;;  %s18639_s13 = inlined_call_operand.hbm [shape: bf16[128,128], index: 13, kind: input, shape index: {}]   ;;  %s18640_s14 = inlined_call_operand.hbm [shape: f32[1,128], index: 14, kind: input, shape index: {}]   ;;  %s18641_s15 = inlined_call_operand.hbm [shape: f32[8,128], index: 15, kind: output, shape index: {}]  }
   0x1   :  { %18659 = sst [smem:[#allocation48_spill]] %s18641_s15 }
   0x2   :  { %20 = vsyncpa [#allocation5], 0 }
   0x3   :  { %21 = vsyncpa [#allocation8], 0 }
   0x4   :  { %22 = vsyncpa [#allocation11], 0 }
   0x5   :  { %23 = vsyncpa [#allocation14], 0 }
   0x6   :  { %24 = vsyncpa [#allocation17], 0 }
   0x7   :  { %25 = vsyncpa [#allocation20], 0 }
   0x8   :  { %26 = vsyncpa [#allocation23], 0 }
   0x9   :  { %27 = vsyncpa [#allocation26], 0 }
   0xa   :  { %28 = vsyncpa [#allocation6], 0  ;;  %s16852_s18 = smov [#allocation7]   ;;  %s16482_s22 = scalar_lea.hbm %s18627_s1, 5120 }
   0xb   :  { %s46_s19 = sshll.u32 %s16852_s18, 4  ;;  %p16483_p0 = scmp.ne.s32.totalorder %s18627_s1, %s16482_s22  ;;  %s47_s19 = int_to_ptr.vmem [resolvable:$true] %s46_s19 }
   0xc   :  { %p16486_p1 = scmp.lt.u32.totalorder %s16482_s22, %s18627_s1 }
   0xe   :  { %p16488_p2 = pnand %p16486_p1, %p16483_p0 }
  0x10   :  { %16491 = shalt.err (!%p16488_p2)
}
  0x11   :  { %s16492_s27 = scalar_lea.vmem %s47_s19, 5120  ;;  %p16497_p4 = scmp.lt.s32.totalorder %s47_s19, %s47_s19 }
  0x12   :  { %p16493_p3 = scmp.ne.s32.totalorder %s47_s19, %s16492_s27  ;;  %p16498_p5 = scmp.lt.s32.totalorder %s16492_s27, %s16492_s27 }
  0x14   :  { %p16499_p6 = por %p16498_p5, %p16497_p4 }
  0x16   :  { %p16500_p7 = pnand %p16499_p6, %p16493_p3 }
  0x18   :  { %16503 = shalt.err (!%p16500_p7)
}
  0x19   :  { %s16853_s28 = smov 256   ;;  %s16854_s29 = smov 16  }
  0x1a   :  { %52 = dma.hbm_to_vmem [thread:$0]  %s18627_s1, 5120, %s47_s19, [#allocation8], %s16853_s28, %s16853_s28, %s16854_s29  }
  0x1b   :  { %s16855_s17 = smov [#allocation10]   ;;  %s16856_s20 = smov [#allocation13]  }
  0x1c   :  { %s68_s18 = sshll.u32 %s16855_s17, 4  ;;  %s92_s21 = sshll.u32 %s16856_s20, 4  ;;  %s69_s18 = int_to_ptr.vmem [resolvable:$true] %s68_s18  ;;  %s93_s21 = int_to_ptr.vmem [resolvable:$true] %s92_s21 }
  0x1d   :  { %s16504_s24 = scalar_lea.hbm %s18629_s3, 7168 }
  0x1e   :  { %p16505_p8 = scmp.ne.s32.totalorder %s18629_s3, %s16504_s24  ;;  %p16508_p9 = scmp.lt.u32.totalorder %s16504_s24, %s18629_s3 }
  0x20   :  { %p16510_p10 = pnand %p16508_p9, %p16505_p8 }
  0x22   :  { %16513 = shalt.err (!%p16510_p10)
}
  0x23   :  { %s16514_s1 = scalar_lea.vmem %s69_s18, 7168  ;;  %p16519_p12 = scmp.lt.s32.totalorder %s69_s18, %s69_s18 }
  0x24   :  { %p16515_p11 = scmp.ne.s32.totalorder %s69_s18, %s16514_s1  ;;  %p16520_p13 = scmp.lt.s32.totalorder %s16514_s1, %s16514_s1 }
  0x26   :  { %p16521_p0 = por %p16520_p13, %p16519_p12 }
  0x28   :  { %p16522_p1 = pnand %p16521_p0, %p16515_p11 }
  0x2a   :  { %16525 = shalt.err (!%p16522_p1)
}
  0x2b   :  { %s16857_s19 = smov 128   ;;  %s16858_s30 = smov 8  }
  0x2c   :  { %74 = dma.hbm_to_vmem [thread:$0]  %s18629_s3, 7168, %s69_s18, [#allocation11], %s16857_s19, %s16857_s19, %s16858_s30  }
  0x2d   :  { %s16526_s22 = scalar_lea.hbm %s18631_s5, 46080 }
  0x2e   :  { %p16527_p2 = scmp.ne.s32.totalorder %s18631_s5, %s16526_s22  ;;  %p16530_p3 = scmp.lt.u32.totalorder %s16526_s22, %s18631_s5 }
  0x30   :  { %p16532_p4 = pnand %p16530_p3, %p16527_p2 }
  0x32   :  { %16535 = shalt.err (!%p16532_p4)
}
  0x33   :  { %s16536_s27 = scalar_lea.vmem %s93_s21, 46080  ;;  %p16541_p6 = scmp.lt.s32.totalorder %s93_s21, %s93_s21 }
  0x34   :  { %p16537_p5 = scmp.ne.s32.totalorder %s93_s21, %s16536_s27  ;;  %p16542_p7 = scmp.lt.s32.totalorder %s16536_s27, %s16536_s27 }
  0x36   :  { %p16543_p8 = por %p16542_p7, %p16541_p6 }
  0x38   :  { %p16544_p9 = pnand %p16543_p8, %p16537_p5 }
  0x3a   :  { %16547 = shalt.err (!%p16544_p9)
}
  0x3b   :  { %98 = dma.hbm_to_vmem [thread:$0]  %s18631_s5, 46080, %s93_s21, [#allocation14], %s16853_s28, %s16853_s28, %s16854_s29  }
  0x3c   :  { %s16859_s1 = smov [#allocation16]   ;;  %s16860_s17 = smov [#allocation19]  }
  0x3d   :  { %s114_s16 = sshll.u32 %s16859_s1, 4  ;;  %s138_s15 = sshll.u32 %s16860_s17, 4  ;;  %s115_s16 = int_to_ptr.vmem [resolvable:$true] %s114_s16  ;;  %s139_s15 = int_to_ptr.vmem [resolvable:$true] %s138_s15 }
  0x3e   :  { %s16548_s23 = scalar_lea.hbm %s18633_s7, 7168 }
  0x3f   :  { %p16549_p10 = scmp.ne.s32.totalorder %s18633_s7, %s16548_s23  ;;  %p16552_p11 = scmp.lt.u32.totalorder %s16548_s23, %s18633_s7 }
  0x41   :  { %p16554_p12 = pnand %p16552_p11, %p16549_p10 }
  0x43   :  { %16557 = shalt.err (!%p16554_p12)
}
  0x44   :  { %s16558_s5 = scalar_lea.vmem %s115_s16, 7168  ;;  %p16563_p0 = scmp.lt.s32.totalorder %s115_s16, %s115_s16 }
  0x45   :  { %p16559_p13 = scmp.ne.s32.totalorder %s115_s16, %s16558_s5  ;;  %p16564_p1 = scmp.lt.s32.totalorder %s16558_s5, %s16558_s5 }
  0x47   :  { %p16565_p2 = por %p16564_p1, %p16563_p0 }
  0x49   :  { %p16566_p3 = pnand %p16565_p2, %p16559_p13 }
  0x4b   :  { %16569 = shalt.err (!%p16566_p3)
}
  0x4c   :  { %120 = dma.hbm_to_vmem [thread:$0]  %s18633_s7, 7168, %s115_s16, [#allocation17], %s16857_s19, %s16857_s19, %s16858_s30  }
  0x4d   :  { %s16570_s17 = scalar_lea.hbm %s18635_s9, 50176 }
  0x4e   :  { %p16571_p4 = scmp.ne.s32.totalorder %s18635_s9, %s16570_s17  ;;  %p16574_p5 = scmp.lt.u32.totalorder %s16570_s17, %s18635_s9 }
  0x50   :  { %p16576_p6 = pnand %p16574_p5, %p16571_p4 }
  0x52   :  { %16579 = shalt.err (!%p16576_p6)
}
  0x53   :  { %s16580_s25 = scalar_lea.vmem %s139_s15, 50176  ;;  %p16585_p8 = scmp.lt.s32.totalorder %s139_s15, %s139_s15 }
  0x54   :  { %p16581_p7 = scmp.ne.s32.totalorder %s139_s15, %s16580_s25  ;;  %p16586_p9 = scmp.lt.s32.totalorder %s16580_s25, %s16580_s25 }
  0x56   :  { %p16587_p10 = por %p16586_p9, %p16585_p8 }
  0x58   :  { %p16588_p11 = pnand %p16587_p10, %p16581_p7 }
  0x5a   :  { %16591 = shalt.err (!%p16588_p11)
}
  0x5b   :  { %144 = dma.hbm_to_vmem [thread:$0]  %s18635_s9, 50176, %s139_s15, [#allocation20], %s16853_s28, %s16853_s28, %s16854_s29  }
  0x5c   :  { %s16861_s26 = smov [#allocation22]   ;;  %s16592_s3 = scalar_lea.hbm %s18637_s11, 4096 }
  0x5d   :  { %s160_s27 = sshll.u32 %s16861_s26, 4  ;;  %p16593_p12 = scmp.ne.s32.totalorder %s18637_s11, %s16592_s3  ;;  %s161_s27 = int_to_ptr.vmem [resolvable:$true] %s160_s27 }
  0x5e   :  { %p16596_p13 = scmp.lt.u32.totalorder %s16592_s3, %s18637_s11 }
  0x60   :  { %p16598_p0 = pnand %p16596_p13, %p16593_p12 }
  0x62   :  { %16601 = shalt.err (!%p16598_p0)
}
  0x63   :  { %s16602_s22 = scalar_lea.vmem %s161_s27, 4096  ;;  %p16607_p2 = scmp.lt.s32.totalorder %s161_s27, %s161_s27 }
  0x64   :  { %p16603_p1 = scmp.ne.s32.totalorder %s161_s27, %s16602_s22  ;;  %p16608_p3 = scmp.lt.s32.totalorder %s16602_s22, %s16602_s22 }
  0x66   :  { %p16609_p4 = por %p16608_p3, %p16607_p2 }
  0x68   :  { %p16610_p5 = pnand %p16609_p4, %p16603_p1 }
  0x6a   :  { %16613 = shalt.err (!%p16610_p5)
}
  0x6b   :  { %s16862_s9 = smov 64   ;;  %s16863_s28 = smov 4  }
  0x6c   :  { %166 = dma.hbm_to_vmem [thread:$0]  %s18637_s11, 4096, %s161_s27, [#allocation23], %s16862_s9, %s16862_s9, %s16863_s28  }
  0x6d   :  { %s16864_s23 = smov [#allocation25]   ;;  %s16865_s25 = smov [#allocation4]  }
  0x6e   :  { %s182_s24 = sshll.u32 %s16864_s23, 4  ;;  %s34_s7 = sshll.u32 %s16865_s25, 4  ;;  %s183_s24 = int_to_ptr.vmem [resolvable:$true] %s182_s24  ;;  %s17049_s7 = int_to_ptr.vmem [resolvable:$true] %s34_s7 }
  0x6f   :  { %s16614_s5 = scalar_lea.hbm %s18639_s13, 1024 }
  0x70   :  { %p16615_p6 = scmp.ne.s32.totalorder %s18639_s13, %s16614_s5  ;;  %p16618_p7 = scmp.lt.u32.totalorder %s16614_s5, %s18639_s13 }
  0x72   :  { %p16620_p8 = pnand %p16618_p7, %p16615_p6 }
  0x74   :  { %16623 = shalt.err (!%p16620_p8)
}
  0x75   :  { %s16624_s11 = scalar_lea.vmem %s183_s24, 1024  ;;  %p16629_p10 = scmp.lt.s32.totalorder %s183_s24, %s183_s24 }
  0x76   :  { %p16625_p9 = scmp.ne.s32.totalorder %s183_s24, %s16624_s11  ;;  %p16630_p11 = scmp.lt.s32.totalorder %s16624_s11, %s16624_s11 }
  0x78   :  { %p16631_p12 = por %p16630_p11, %p16629_p10 }
  0x7a   :  { %p16632_p13 = pnand %p16631_p12, %p16625_p9 }
  0x7c   :  { %16635 = shalt.err (!%p16632_p13)
}
  0x7d   :  { %188 = dma.hbm_to_vmem [thread:$0]  %s18639_s13, 1024, %s183_s24, [#allocation26], %s16862_s9, %s16862_s9, %s16863_s28  }
  0x7e   :  { %s16636_s29 = scalar_lea.hbm %s18626_s0, 3584 }
  0x7f   :  { %p16637_p0 = scmp.ne.s32.totalorder %s18626_s0, %s16636_s29  ;;  %p16640_p1 = scmp.lt.u32.totalorder %s16636_s29, %s18626_s0 }
  0x81   :  { %p16642_p2 = pnand %p16640_p1, %p16637_p0 }
  0x83   :  { %16645 = shalt.err (!%p16642_p2)
}
  0x84   :  { %s16646_s26 = scalar_lea.vmem %s17049_s7, 3584  ;;  %p16651_p4 = scmp.lt.s32.totalorder %s17049_s7, %s17049_s7 }
  0x85   :  { %p16647_p3 = scmp.ne.s32.totalorder %s17049_s7, %s16646_s26  ;;  %p16652_p5 = scmp.lt.s32.totalorder %s16646_s26, %s16646_s26 }
  0x87   :  { %p16653_p6 = por %p16652_p5, %p16651_p4 }
  0x89   :  { %p16654_p7 = pnand %p16653_p6, %p16647_p3 }
  0x8b   :  { %16657 = shalt.err (!%p16654_p7)
}
  0x8c   :  { %40 = dma.hbm_to_vmem [thread:$0]  %s18626_s0, 3584, %s17049_s7, [#allocation5], %s16857_s19, %s16857_s19, %s16858_s30  }
  0x8d   :  { %s16866_s24 = smov [#allocation9]   ;;  %s16867_s21 = smov [#allocation12]  }
  0x8e   :  { %s59_s5 = sshll.u32 %s16866_s24, 4  ;;  %s80_s3 = sshll.u32 %s16867_s21, 4  ;;  %s60_s5 = int_to_ptr.vmem [resolvable:$true] %s59_s5  ;;  %s17085_s3 = int_to_ptr.vmem [resolvable:$true] %s80_s3 }
  0x8f   :  { %s16658_s11 = scalar_lea.hbm %s18628_s2, 64 }
  0x90   :  { %p16659_p8 = scmp.ne.s32.totalorder %s18628_s2, %s16658_s11  ;;  %p16662_p9 = scmp.lt.u32.totalorder %s16658_s11, %s18628_s2 }
  0x92   :  { %p16664_p10 = pnand %p16662_p9, %p16659_p8 }
  0x94   :  { %16667 = shalt.err (!%p16664_p10)
}
  0x95   :  { %s16668_s0 = scalar_lea.vmem %s60_s5, 64  ;;  %p16673_p12 = scmp.lt.s32.totalorder %s60_s5, %s60_s5 }
  0x96   :  { %p16669_p11 = scmp.ne.s32.totalorder %s60_s5, %s16668_s0  ;;  %p16674_p13 = scmp.lt.s32.totalorder %s16668_s0, %s16668_s0 }
  0x98   :  { %p16675_p0 = por %p16674_p13, %p16673_p12 }
  0x9a   :  { %p16676_p1 = pnand %p16675_p0, %p16669_p11 }
  0x9c   :  { %16679 = shalt.err (!%p16676_p1)
}
  0x9d   :  { %62 = dma.hbm_to_vmem [thread:$0]  %s18628_s2, 64, %s60_s5, [#allocation8]  }
  0x9e   :  { %s16680_s25 = scalar_lea.hbm %s18630_s4, 7168 }
  0x9f   :  { %p16681_p2 = scmp.ne.s32.totalorder %s18630_s4, %s16680_s25  ;;  %p16684_p3 = scmp.lt.u32.totalorder %s16680_s25, %s18630_s4 }
  0xa1   :  { %p16686_p4 = pnand %p16684_p3, %p16681_p2 }
  0xa3   :  { %16689 = shalt.err (!%p16686_p4)
}
  0xa4   :  { %s16690_s24 = scalar_lea.vmem %s17085_s3, 7168  ;;  %p16695_p6 = scmp.lt.s32.totalorder %s17085_s3, %s17085_s3 }
  0xa5   :  { %p16691_p5 = scmp.ne.s32.totalorder %s17085_s3, %s16690_s24  ;;  %p16696_p7 = scmp.lt.s32.totalorder %s16690_s24, %s16690_s24 }
  0xa7   :  { %p16697_p8 = por %p16696_p7, %p16695_p6 }
  0xa9   :  { %p16698_p9 = pnand %p16697_p8, %p16691_p5 }
  0xab   :  { %16701 = shalt.err (!%p16698_p9)
}
  0xac   :  { %86 = dma.hbm_to_vmem [thread:$0]  %s18630_s4, 7168, %s17085_s3, [#allocation11], %s16857_s19, %s16857_s19, %s16858_s30  }
  0xad   :  { %s16868_s21 = smov [#allocation15]   ;;  %s16869_s1 = smov [#allocation18]  }
  0xae   :  { %s105_s18 = sshll.u32 %s16868_s21, 4  ;;  %s126_s11 = sshll.u32 %s16869_s1, 4  ;;  %s106_s18 = int_to_ptr.vmem [resolvable:$true] %s105_s18  ;;  %s17119_s11 = int_to_ptr.vmem [resolvable:$true] %s126_s11 }
  0xaf   :  { %s16702_s20 = scalar_lea.hbm %s18632_s6, 64 }
  0xb0   :  { %p16703_p10 = scmp.ne.s32.totalorder %s18632_s6, %s16702_s20  ;;  %p16706_p11 = scmp.lt.u32.totalorder %s16702_s20, %s18632_s6 }
  0xb2   :  { %p16708_p12 = pnand %p16706_p11, %p16703_p10 }
  0xb4   :  { %16711 = shalt.err (!%p16708_p12)
}
  0xb5   :  { %s16712_s4 = scalar_lea.vmem %s106_s18, 64  ;;  %p16717_p0 = scmp.lt.s32.totalorder %s106_s18, %s106_s18 }
  0xb6   :  { %p16713_p13 = scmp.ne.s32.totalorder %s106_s18, %s16712_s4  ;;  %p16718_p1 = scmp.lt.s32.totalorder %s16712_s4, %s16712_s4 }
  0xb8   :  { %p16719_p2 = por %p16718_p1, %p16717_p0 }
  0xba   :  { %p16720_p3 = pnand %p16719_p2, %p16713_p13 }
  0xbc   :  { %16723 = shalt.err (!%p16720_p3)
}
  0xbd   :  { %108 = dma.hbm_to_vmem [thread:$0]  %s18632_s6, 64, %s106_s18, [#allocation14]  }
  0xbe   :  { %s16724_s16 = scalar_lea.hbm %s18634_s8, 7168 }
  0xbf   :  { %p16725_p4 = scmp.ne.s32.totalorder %s18634_s8, %s16724_s16  ;;  %p16728_p5 = scmp.lt.u32.totalorder %s16724_s16, %s18634_s8 }
  0xc1   :  { %p16730_p6 = pnand %p16728_p5, %p16725_p4 }
  0xc3   :  { %16733 = shalt.err (!%p16730_p6)
}
  0xc4   :  { %s16734_s2 = scalar_lea.vmem %s17119_s11, 7168  ;;  %p16739_p8 = scmp.lt.s32.totalorder %s17119_s11, %s17119_s11 }
  0xc5   :  { %p16735_p7 = scmp.ne.s32.totalorder %s17119_s11, %s16734_s2  ;;  %p16740_p9 = scmp.lt.s32.totalorder %s16734_s2, %s16734_s2 }
  0xc7   :  { %p16741_p10 = por %p16740_p9, %p16739_p8 }
  0xc9   :  { %p16742_p11 = pnand %p16741_p10, %p16735_p7 }
  0xcb   :  { %16745 = shalt.err (!%p16742_p11)
}
  0xcc   :  { %132 = dma.hbm_to_vmem [thread:$0]  %s18634_s8, 7168, %s17119_s11, [#allocation17], %s16857_s19, %s16857_s19, %s16858_s30  }
  0xcd   :  { %s16870_s21 = smov [#allocation21]   ;;  %s16871_s1 = smov [#allocation24]  }
  0xce   :  { %s151_s18 = sshll.u32 %s16870_s21, 4  ;;  %s173_s27 = sshll.u32 %s16871_s1, 4  ;;  %s152_s18 = int_to_ptr.vmem [resolvable:$true] %s151_s18  ;;  %s174_s27 = int_to_ptr.vmem [resolvable:$true] %s173_s27 }
  0xcf   :  { %s16746_s22 = scalar_lea.hbm %s18636_s10, 64 }
  0xd0   :  { %p16747_p12 = scmp.ne.s32.totalorder %s18636_s10, %s16746_s22  ;;  %p16750_p13 = scmp.lt.u32.totalorder %s16746_s22, %s18636_s10 }
  0xd2   :  { %p16752_p0 = pnand %p16750_p13, %p16747_p12 }
  0xd4   :  { %16755 = shalt.err (!%p16752_p0)
}
  0xd5   :  { %s16756_s8 = scalar_lea.vmem %s152_s18, 64  ;;  %p16761_p2 = scmp.lt.s32.totalorder %s152_s18, %s152_s18 }
  0xd6   :  { %p16757_p1 = scmp.ne.s32.totalorder %s152_s18, %s16756_s8  ;;  %p16762_p3 = scmp.lt.s32.totalorder %s16756_s8, %s16756_s8 }
  0xd8   :  { %p16763_p4 = por %p16762_p3, %p16761_p2 }
  0xda   :  { %p16764_p5 = pnand %p16763_p4, %p16757_p1 }
  0xdc   :  { %16767 = shalt.err (!%p16764_p5)
}
  0xdd   :  { %154 = dma.hbm_to_vmem [thread:$0]  %s18636_s10, 64, %s152_s18, [#allocation20]  }
  0xde   :  { %s16768_s15 = scalar_lea.hbm %s18638_s12, 16 }
  0xdf   :  { %p16769_p6 = scmp.ne.s32.totalorder %s18638_s12, %s16768_s15  ;;  %p16772_p7 = scmp.lt.u32.totalorder %s16768_s15, %s18638_s12 }
  0xe1   :  { %p16774_p8 = pnand %p16772_p7, %p16769_p6 }
  0xe3   :  { %16777 = shalt.err (!%p16774_p8)
}
  0xe4   :  { %s16778_s13 = scalar_lea.vmem %s174_s27, 16  ;;  %s16782_s28 = scalar_lea.vmem %s174_s27, 32 }
  0xe5   :  { %p16779_p9 = scmp.ne.s32.totalorder %s174_s27, %s16778_s13  ;;  %p16783_p10 = scmp.lt.s32.totalorder %s174_s27, %s174_s27 }
  0xe6   :  { %p16784_p11 = scmp.lt.s32.totalorder %s16782_s28, %s16778_s13 }
  0xe8   :  { %p16785_p12 = por %p16784_p11, %p16783_p10 }
  0xea   :  { %p16786_p13 = pnand %p16785_p12, %p16779_p9 }
  0xec   :  { %16789 = shalt.err (!%p16786_p13)
}
  0xed   :  { %176 = dma.hbm_to_vmem [thread:$0]  %s18638_s12, 16, %s174_s27, [#allocation23]  }
  0xee   :  { %s16872_s2 = smov [#allocation27]   ;;  %s16790_s18 = scalar_lea.hbm %s18640_s14, 16 }
  0xef   :  { %s195_s6 = sshll.u32 %s16872_s2, 4  ;;  %p16791_p0 = scmp.ne.s32.totalorder %s18640_s14, %s16790_s18  ;;  %s196_s6 = int_to_ptr.vmem [resolvable:$true] %s195_s6 }
  0xf0   :  { %p16794_p1 = scmp.lt.u32.totalorder %s16790_s18, %s18640_s14 }
  0xf2   :  { %p16796_p2 = pnand %p16794_p1, %p16791_p0 }
  0xf4   :  { %16799 = shalt.err (!%p16796_p2)
}
  0xf5   :  { %s16800_s0 = scalar_lea.vmem %s196_s6, 16  ;;  %s16804_s12 = scalar_lea.vmem %s196_s6, 32 }
  0xf6   :  { %p16801_p3 = scmp.ne.s32.totalorder %s196_s6, %s16800_s0  ;;  %p16805_p4 = scmp.lt.s32.totalorder %s196_s6, %s196_s6 }
  0xf7   :  { %p16806_p5 = scmp.lt.s32.totalorder %s16804_s12, %s16800_s0 }
  0xf9   :  { %p16807_p6 = por %p16806_p5, %p16805_p4 }
  0xfb   :  { %p16808_p7 = pnand %p16807_p6, %p16801_p3 }
  0xfd   :  { %16811 = shalt.err (!%p16808_p7)
}
  0xfe   :  { %198 = dma.hbm_to_vmem [thread:$0]  %s18640_s14, 16, %s196_s6, [#allocation26]  }
  0xff   :  { %16834 = dma.done.wait [#allocation5], 3584  }
 0x100   :  { %16835 = vsyncadd [#allocation5], 4294963712 }
 0x101   :  { %16836 = dma.done.wait [#allocation8], 5184  }
 0x102   :  { %16837 = vsyncadd [#allocation8], 4294962112 }
 0x103   :  { %16838 = dma.done.wait [#allocation11], 14336  }
 0x104   :  { %16839 = vsyncadd [#allocation11], 4294952960 }
 0x105   :  { %16840 = dma.done.wait [#allocation14], 46144  }
 0x106   :  { %16841 = vsyncadd [#allocation14], 4294921152 }
 0x107   :  { %16842 = dma.done.wait [#allocation17], 14336  }
 0x108   :  { %16843 = vsyncadd [#allocation17], 4294952960 }
 0x109   :  { %16844 = dma.done.wait [#allocation20], 50240  }
 0x10a   :  { %16845 = vsyncadd [#allocation20], 4294917056 }
 0x10b   :  { %16846 = dma.done.wait [#allocation23], 4112  }
 0x10c   :  { %16847 = vsyncadd [#allocation23], 4294963184 }
 0x10d   :  { %16848 = dma.done.wait [#allocation26], 1040  }
 0x10e   :  { %16849 = vsyncadd [#allocation26], 4294966256  ;;  %vm252_vm0 = vcmask 15360   ;;  %vm281_vm1 = vcmask 261360   ;;  %v16873_v0 = vmov 0.0   ;;  %vm245_vm2 = vcmask 261120  }
 0x10f   :  { %253 = vst.msk [vmem:[#allocation2 + $0x10] sm:$0xff] %vm252_vm0, %v16873_v0  ;;  %254 = vst.msk [vmem:[#allocation2 + $0x18] sm:$0xff] %vm252_vm0, %v16873_v0  ;;  %v310_v1 = vld [vmem:[#allocation4] sm:$0xff]  ;;  %v312_v2 = vld [vmem:[#allocation4 + $0x10] sm:$0xff]  ;;  %s16874_s14 = smov 2   ;;  %vm450_vm3 = vcmask 244752  }
 0x110   :  { %255 = vst.msk [vmem:[#allocation2 + $0x20] sm:$0xff] %vm252_vm0, %v16873_v0  ;;  %256 = vst.msk [vmem:[#allocation2 + $0x28] sm:$0xff] %vm252_vm0, %v16873_v0  ;;  %366 = vrot.lane.b32.xlu0 %v310_v1, %s16874_s14  ;;  %370 = vrot.lane.b32.xlu1 %v312_v2, %s16874_s14  ;;  %v311_v3 = vld [vmem:[#allocation4 + $0x8] sm:$0xff]  ;;  %v313_v4 = vld [vmem:[#allocation4 + $0x18] sm:$0xff]  ;;  %s16875_s29 = smov 32   ;;  %s16876_s4 = smov 96  }
 0x111   :  { %257 = vst.msk [vmem:[#allocation2 + $0x30] sm:$0xff] %vm252_vm0, %v16873_v0  ;;  %258 = vst.msk [vmem:[#allocation2 + $0x38] sm:$0xff] %vm252_vm0, %v16873_v0  ;;  %v315_v5 = vld [vmem:[#allocation4 + $0x28] sm:$0xff]  ;;  %v314_v6 = vld [vmem:[#allocation4 + $0x20] sm:$0xff]  ;;  %vm986_vm4 = vcmask 523264   ;;  %vm1015_vm5 = vcmask 785408  }
 0x112   :  { %259 = vst.msk [vmem:[#allocation2 + $0x40] sm:$0xff] %vm252_vm0, %v16873_v0  ;;  %260 = vst.msk [vmem:[#allocation2 + $0x48] sm:$0xff] %vm252_vm0, %v16873_v0  ;;  %v316_v7 = vld [vmem:[#allocation4 + $0x30] sm:$0xff]  ;;  %v317_v8 = vld [vmem:[#allocation4 + $0x38] sm:$0xff]  ;;  %vm3219_vm6 = vcmask 1047808   ;;  %vm16878_vm7 = vmmov 0  }
 0x113   :  { %261 = vst.msk [vmem:[#allocation2 + $0x50] sm:$0xff] %vm252_vm0, %v16873_v0  ;;  %262 = vst.msk [vmem:[#allocation2 + $0x58] sm:$0xff] %vm252_vm0, %v16873_v0  ;;  %v319_v9 = vld [vmem:[#allocation4 + $0x48] sm:$0xff]  ;;  %v318_v10 = vld [vmem:[#allocation4 + $0x40] sm:$0xff] }
 0x114   :  { %263 = vst.msk [vmem:[#allocation2 + $0x60] sm:$0xff] %vm252_vm0, %v16873_v0  ;;  %264 = vst.msk [vmem:[#allocation2 + $0x68] sm:$0xff] %vm252_vm0, %v16873_v0  ;;  %368 = vrot.lane.b32.xlu0 %v311_v3, %s16874_s14  ;;  %372 = vrot.lane.b32.xlu1 %v313_v4, %s16874_s14  ;;  %v320_v11 = vld [vmem:[#allocation4 + $0x50] sm:$0xff]  ;;  %v321_v12 = vld [vmem:[#allocation4 + $0x58] sm:$0xff] }
 0x115   :  { %265 = vst.msk [vmem:[#allocation2 + $0x70] sm:$0xff] %vm252_vm0, %v16873_v0  ;;  %266 = vst.msk [vmem:[#allocation2 + $0x78] sm:$0xff] %vm252_vm0, %v16873_v0  ;;  %v322_v13 = vld [vmem:[#allocation4 + $0x60] sm:$0xff]  ;;  %v323_v14 = vld [vmem:[#allocation4 + $0x68] sm:$0xff] }
 0x116   :  { %267 = vst.msk [vmem:[#allocation2 + $0x80] sm:$0xff] %vm252_vm0, %v16873_v0  ;;  %268 = vst.msk [vmem:[#allocation2 + $0x88] sm:$0xff] %vm252_vm0, %v16873_v0  ;;  %v324_v15 = vld [vmem:[#allocation4 + $0x70] sm:$0xff]  ;;  %v325_v16 = vld [vmem:[#allocation4 + $0x78] sm:$0xff] }
 0x117   :  { %269 = vst.msk [vmem:[#allocation2 + $0x90] sm:$0xff] %vm252_vm0, %v16873_v0  ;;  %270 = vst.msk [vmem:[#allocation2 + $0x98] sm:$0xff] %vm252_vm0, %v16873_v0  ;;  %v326_v17 = vld [vmem:[#allocation4 + $0x80] sm:$0xff]  ;;  %v327_v18 = vld [vmem:[#allocation4 + $0x88] sm:$0xff] }
 0x118   :  { %271 = vst.msk [vmem:[#allocation2 + $0xa0] sm:$0xff] %vm252_vm0, %v16873_v0  ;;  %272 = vst.msk [vmem:[#allocation2 + $0xa8] sm:$0xff] %vm252_vm0, %v16873_v0  ;;  %376 = vrot.lane.b32.xlu1 %v315_v5, %s16874_s14  ;;  %374 = vrot.lane.b32.xlu0 %v314_v6, %s16874_s14  ;;  %v328_v19 = vld [vmem:[#allocation4 + $0x90] sm:$0xff]  ;;  %v330_v20 = vld [vmem:[#allocation4 + $0xa0] sm:$0xff] }
 0x119   :  { %273 = vst.msk [vmem:[#allocation2 + $0xb0] sm:$0xff] %vm252_vm0, %v16873_v0  ;;  %274 = vst.msk [vmem:[#allocation2 + $0xb8] sm:$0xff] %vm252_vm0, %v16873_v0  ;;  %v329_v21 = vld [vmem:[#allocation4 + $0x98] sm:$0xff]  ;;  %v331_v22 = vld [vmem:[#allocation4 + $0xa8] sm:$0xff] }
 0x11a   :  { %275 = vst.msk [vmem:[#allocation2 + $0xc0] sm:$0xff] %vm252_vm0, %v16873_v0  ;;  %276 = vst.msk [vmem:[#allocation2 + $0xc8] sm:$0xff] %vm252_vm0, %v16873_v0  ;;  %v332_v23 = vld [vmem:[#allocation4 + $0xb0] sm:$0xff]  ;;  %v14885_v25 = vld [vmem:[#allocation7 + $0xc] ss:$16 sps:$4 sm:$0xff]  }
 0x11b   :  { %277 = vst.msk [vmem:[#allocation2 + $0xd0] sm:$0xff] %vm252_vm0, %v16873_v0  ;;  %278 = vst.msk [vmem:[#allocation2 + $0xd8] sm:$0xff] %vm252_vm0, %v16873_v0  ;;  %v14883_v24 = vld [vmem:[#allocation7 + $0x4] ss:$16 sps:$4 sm:$0xff]   ;;  %v14887_v26 = vld [vmem:[#allocation7] ss:$16 sps:$4 sm:$0xff]   ;;  %1549 = vmatprep.subr.bf16.mxu1 %v14885_v25 }
 0x11c   :  { %279 = vst.msk [vmem:[#allocation2 + $0xe0] sm:$0xff] %vm252_vm0, %v16873_v0  ;;  %280 = vst.msk [vmem:[#allocation2 + $0xe8] sm:$0xff] %vm252_vm0, %v16873_v0  ;;  %378 = vrot.lane.b32.xlu0 %v316_v7, %s16874_s14  ;;  %380 = vrot.lane.b32.xlu1 %v317_v8, %s16874_s14  ;;  %v14888_v27 = vld [vmem:[#allocation7 + $0x8] ss:$16 sps:$4 sm:$0xff]   ;;  %v14889_v28 = vld [vmem:[#allocation7 + $0x24] ss:$16 sps:$4 sm:$0xff]  }
 0x11d   :  { %3051 = vst [vmem:[#allocation3] sm:$0xff] %v16873_v0  ;;  %282 = vst.msk [vmem:[#allocation2 + $0x10] sm:$0xff] %vm281_vm1, %v16873_v0  ;;  %v14891_v29 = vld [vmem:[#allocation7 + $0x2c] ss:$16 sps:$4 sm:$0xff]   ;;  %1376 = vmatprep.subr.bf16.mxu0 %v14883_v24  ;;  %1550 = vmatpush1.bf16.msra.mxu1 %v14888_v27  ;;  %v14893_v30 = vld [vmem:[#allocation7 + $0x20] ss:$16 sps:$4 sm:$0xff]  }
 0x11e   :  { %284 = vst.msk [vmem:[#allocation2 + $0x20] sm:$0xff] %vm281_vm1, %v16873_v0  ;;  %283 = vst.msk [vmem:[#allocation2 + $0x18] sm:$0xff] %vm281_vm1, %v16873_v0  ;;  %1377 = vmatpush1.bf16.msra.mxu0 %v14887_v26  ;;  %v14894_v31 = vld [vmem:[#allocation7 + $0x28] ss:$16 sps:$4 sm:$0xff]   ;;  %1551 = vmatprep.subr.bf16.mxu1 %v14891_v29  ;;  %v14895_v32 = vld [vmem:[#allocation7 + $0x44] ss:$16 sps:$4 sm:$0xff]  }
 0x11f   :  { %285 = vst.msk [vmem:[#allocation2 + $0x28] sm:$0xff] %vm281_vm1, %v16873_v0  ;;  %286 = vst.msk [vmem:[#allocation2 + $0x30] sm:$0xff] %vm281_vm1, %v16873_v0  ;;  %1378 = vmatprep.subr.bf16.mxu0 %v14889_v28  ;;  %v14897_v33 = vld [vmem:[#allocation7 + $0x4c] ss:$16 sps:$4 sm:$0xff]   ;;  %v14899_v34 = vld [vmem:[#allocation7 + $0x40] ss:$16 sps:$4 sm:$0xff]  }
 0x120   :  { %287 = vst.msk [vmem:[#allocation2 + $0x38] sm:$0xff] %vm281_vm1, %v16873_v0  ;;  %288 = vst.msk [vmem:[#allocation2 + $0x40] sm:$0xff] %vm281_vm1, %v16873_v0  ;;  %384 = vrot.lane.b32.xlu1 %v319_v9, %s16874_s14  ;;  %382 = vrot.lane.b32.xlu0 %v318_v10, %s16874_s14  ;;  %v14900_v35 = vld [vmem:[#allocation7 + $0x48] ss:$16 sps:$4 sm:$0xff]   ;;  %v14901_v36 = vld [vmem:[#allocation7 + $0x64] ss:$16 sps:$4 sm:$0xff]  }
 0x121   :  { %289 = vst.msk [vmem:[#allocation2 + $0x48] sm:$0xff] %vm281_vm1, %v16873_v0  ;;  %290 = vst.msk [vmem:[#allocation2 + $0x50] sm:$0xff] %vm281_vm1, %v16873_v0  ;;  %1552 = vmatpush1.bf16.msra.mxu1 %v14894_v31  ;;  %v14903_v37 = vld [vmem:[#allocation7 + $0x6c] ss:$16 sps:$4 sm:$0xff]   ;;  %v14905_v38 = vld [vmem:[#allocation7 + $0x60] ss:$16 sps:$4 sm:$0xff]  }
 0x122   :  { %291 = vst.msk [vmem:[#allocation2 + $0x58] sm:$0xff] %vm281_vm1, %v16873_v0  ;;  %292 = vst.msk [vmem:[#allocation2 + $0x60] sm:$0xff] %vm281_vm1, %v16873_v0  ;;  %1379 = vmatpush1.bf16.msra.mxu0 %v14893_v30  ;;  %1553 = vmatprep.subr.bf16.mxu1 %v14897_v33  ;;  %v14906_v39 = vld [vmem:[#allocation7 + $0x68] ss:$16 sps:$4 sm:$0xff]   ;;  %v14907_v40 = vld [vmem:[#allocation7 + $0x84] ss:$16 sps:$4 sm:$0xff]  }
 0x123   :  { %293 = vst.msk [vmem:[#allocation2 + $0x68] sm:$0xff] %vm281_vm1, %v16873_v0  ;;  %294 = vst.msk [vmem:[#allocation2 + $0x70] sm:$0xff] %vm281_vm1, %v16873_v0  ;;  %1380 = vmatprep.subr.bf16.mxu0 %v14895_v32  ;;  %v14909_v41 = vld [vmem:[#allocation7 + $0x8c] ss:$16 sps:$4 sm:$0xff]   ;;  %v14911_v42 = vld [vmem:[#allocation7 + $0x80] ss:$16 sps:$4 sm:$0xff]  }
 0x124   :  { %295 = vst.msk [vmem:[#allocation2 + $0x78] sm:$0xff] %vm281_vm1, %v16873_v0  ;;  %296 = vst.msk [vmem:[#allocation2 + $0x80] sm:$0xff] %vm281_vm1, %v16873_v0  ;;  %386 = vrot.lane.b32.xlu0 %v320_v11, %s16874_s14  ;;  %388 = vrot.lane.b32.xlu1 %v321_v12, %s16874_s14  ;;  %v14912_v43 = vld [vmem:[#allocation7 + $0x88] ss:$16 sps:$4 sm:$0xff]   ;;  %v14913_v44 = vld [vmem:[#allocation7 + $0xa4] ss:$16 sps:$4 sm:$0xff]  }
 0x125   :  { %297 = vst.msk [vmem:[#allocation2 + $0x88] sm:$0xff] %vm281_vm1, %v16873_v0  ;;  %298 = vst.msk [vmem:[#allocation2 + $0x90] sm:$0xff] %vm281_vm1, %v16873_v0  ;;  %1554 = vmatpush1.bf16.msra.mxu1 %v14900_v35  ;;  %v14915_v45 = vld [vmem:[#allocation7 + $0xac] ss:$16 sps:$4 sm:$0xff]   ;;  %v14917_v46 = vld [vmem:[#allocation7 + $0xa0] ss:$16 sps:$4 sm:$0xff]  }
 0x126   :  { %299 = vst.msk [vmem:[#allocation2 + $0x98] sm:$0xff] %vm281_vm1, %v16873_v0  ;;  %300 = vst.msk [vmem:[#allocation2 + $0xa0] sm:$0xff] %vm281_vm1, %v16873_v0  ;;  %1381 = vmatpush1.bf16.msra.mxu0 %v14899_v34  ;;  %1555 = vmatprep.subr.bf16.mxu1 %v14903_v37  ;;  %v14918_v47 = vld [vmem:[#allocation7 + $0xa8] ss:$16 sps:$4 sm:$0xff]   ;;  %v14919_v48 = vld [vmem:[#allocation7 + $0xc4] ss:$16 sps:$4 sm:$0xff]  }
 0x127   :  { %301 = vst.msk [vmem:[#allocation2 + $0xa8] sm:$0xff] %vm281_vm1, %v16873_v0  ;;  %302 = vst.msk [vmem:[#allocation2 + $0xb0] sm:$0xff] %vm281_vm1, %v16873_v0  ;;  %1382 = vmatprep.subr.bf16.mxu0 %v14901_v36  ;;  %v14921_v49 = vld [vmem:[#allocation7 + $0xcc] ss:$16 sps:$4 sm:$0xff]   ;;  %v14923_v50 = vld [vmem:[#allocation7 + $0xc0] ss:$16 sps:$4 sm:$0xff]  }
 0x128   :  { %303 = vst.msk [vmem:[#allocation2 + $0xb8] sm:$0xff] %vm281_vm1, %v16873_v0  ;;  %304 = vst.msk [vmem:[#allocation2 + $0xc0] sm:$0xff] %vm281_vm1, %v16873_v0  ;;  %390 = vrot.lane.b32.xlu0 %v322_v13, %s16874_s14  ;;  %392 = vrot.lane.b32.xlu1 %v323_v14, %s16874_s14  ;;  %v14924_v51 = vld [vmem:[#allocation7 + $0xc8] ss:$16 sps:$4 sm:$0xff]   ;;  %v14925_v52 = vld [vmem:[#allocation7 + $0xe4] ss:$16 sps:$4 sm:$0xff]  }
 0x129   :  { %305 = vst.msk [vmem:[#allocation2 + $0xc8] sm:$0xff] %vm281_vm1, %v16873_v0  ;;  %306 = vst.msk [vmem:[#allocation2 + $0xd0] sm:$0xff] %vm281_vm1, %v16873_v0  ;;  %1556 = vmatpush1.bf16.msra.mxu1 %v14906_v39  ;;  %v14927_v53 = vld [vmem:[#allocation7 + $0xec] ss:$16 sps:$4 sm:$0xff]   ;;  %v14929_v54 = vld [vmem:[#allocation7 + $0xe0] ss:$16 sps:$4 sm:$0xff]  }
 0x12a   :  { %307 = vst.msk [vmem:[#allocation2 + $0xd8] sm:$0xff] %vm281_vm1, %v16873_v0  ;;  %308 = vst.msk [vmem:[#allocation2 + $0xe0] sm:$0xff] %vm281_vm1, %v16873_v0  ;;  %1383 = vmatpush1.bf16.msra.mxu0 %v14905_v38  ;;  %1557 = vmatprep.subr.bf16.mxu1 %v14909_v41  ;;  %v14930_v55 = vld [vmem:[#allocation7 + $0xe8] ss:$16 sps:$4 sm:$0xff]   ;;  %v14931_v56 = vld [vmem:[#allocation7 + $0x104] ss:$16 sps:$4 sm:$0xff]  }
 0x12b   :  { %309 = vst.msk [vmem:[#allocation2 + $0xe8] sm:$0xff] %vm281_vm1, %v16873_v0  ;;  %1384 = vmatprep.subr.bf16.mxu0 %v14907_v40  ;;  %v14933_v57 = vld [vmem:[#allocation7 + $0x10c] ss:$16 sps:$4 sm:$0xff]   ;;  %v14935_v58 = vld [vmem:[#allocation7 + $0x100] ss:$16 sps:$4 sm:$0xff]  }
 0x12c   :  { %247 = vst.msk [vmem:[#allocation2 + $0x8] sm:$0xff] %vm245_vm2, %v16873_v0  ;;  %246 = vst.msk [vmem:[#allocation2] sm:$0xff] %vm245_vm2, %v16873_v0  ;;  %394 = vrot.lane.b32.xlu0 %v324_v15, %s16874_s14  ;;  %396 = vrot.lane.b32.xlu1 %v325_v16, %s16874_s14  ;;  %v14936_v59 = vld [vmem:[#allocation7 + $0x108] ss:$16 sps:$4 sm:$0xff]   ;;  %v14937_v62 = vld [vmem:[#allocation7 + $0x124] ss:$16 sps:$4 sm:$0xff]  }
 0x12d   :  { %249 = vst.msk [vmem:[#allocation2 + $0xf0] sm:$0xff] %vm245_vm2, %v16873_v0  ;;  %250 = vst.msk [vmem:[#allocation2 + $0xf8] sm:$0xff] %vm245_vm2, %v16873_v0  ;;  %1558 = vmatpush1.bf16.msra.mxu1 %v14912_v43  ;;  %v14939_v63 = vld [vmem:[#allocation7 + $0x12c] ss:$16 sps:$4 sm:$0xff]   ;;  %v14942_v1 = vld [vmem:[#allocation7 + $0x128] ss:$16 sps:$4 sm:$0xff]  }
 0x12e   :  { %3053 = vst.msk [vmem:[#allocation3 + $0x10] sm:$0xff] %vm245_vm2, %v16873_v0  ;;  %3056 = vst.msk [vmem:[#allocation3 + $0x28] sm:$0xff] %vm245_vm2, %v16873_v0  ;;  %1385 = vmatpush1.bf16.msra.mxu0 %v14911_v42  ;;  %1559 = vmatprep.subr.bf16.mxu1 %v14915_v45  ;;  %v333_v25 = vld [vmem:[#allocation4 + $0xb8] sm:$0xff]  ;;  %v335_v40 = vld [vmem:[#allocation4 + $0xc8] sm:$0xff] }
 0x12f   :  { %3060 = vst.msk [vmem:[#allocation3 + $0x190] sm:$0xff] %vm245_vm2, %v16873_v0  ;;  %3063 = vst.msk [vmem:[#allocation3 + $0x1a8] sm:$0xff] %vm245_vm2, %v16873_v0  ;;  %1386 = vmatprep.subr.bf16.mxu0 %v14913_v44  ;;  %v336_v43 = vld [vmem:[#allocation4 + $0xd0] sm:$0xff] }
 0x130   :  { %3065 = vst.msk [vmem:[#allocation3 + $0x30] sm:$0xff] %vm245_vm2, %v16873_v0  ;;  %3066 = vst.msk [vmem:[#allocation3 + $0x48] sm:$0xff] %vm245_vm2, %v16873_v0  ;;  %398 = vrot.lane.b32.xlu0 %v326_v17, %s16874_s14  ;;  %400 = vrot.lane.b32.xlu1 %v327_v18, %s16874_s14 }
 0x131   :  { %3067 = vst.msk [vmem:[#allocation3 + $0x60] sm:$0xff] %vm245_vm2, %v16873_v0  ;;  %3068 = vst.msk [vmem:[#allocation3 + $0x78] sm:$0xff] %vm245_vm2, %v16873_v0  ;;  %1560 = vmatpush1.bf16.msra.mxu1 %v14918_v47 }
 0x132   :  { %3069 = vst.msk [vmem:[#allocation3 + $0x90] sm:$0xff] %vm245_vm2, %v16873_v0  ;;  %3070 = vst.msk [vmem:[#allocation3 + $0xa8] sm:$0xff] %vm245_vm2, %v16873_v0  ;;  %1387 = vmatpush1.bf16.msra.mxu0 %v14917_v46  ;;  %1561 = vmatprep.subr.bf16.mxu1 %v14921_v49 }
 0x133   :  { %3071 = vst.msk [vmem:[#allocation3 + $0xc0] sm:$0xff] %vm245_vm2, %v16873_v0  ;;  %3072 = vst.msk [vmem:[#allocation3 + $0xd8] sm:$0xff] %vm245_vm2, %v16873_v0  ;;  %1388 = vmatprep.subr.bf16.mxu0 %v14919_v48  ;;  %v17399_v4 = vld [vmem:[#allocation2 + $0x8] sm:$0xff] }
 0x134   :  { %3073 = vst.msk [vmem:[#allocation3 + $0xf0] sm:$0xff] %vm245_vm2, %v16873_v0  ;;  %3074 = vst.msk [vmem:[#allocation3 + $0x108] sm:$0xff] %vm245_vm2, %v16873_v0  ;;  %402 = vrot.lane.b32.xlu0 %v328_v19, %s16874_s14  ;;  %406 = vrot.lane.b32.xlu1 %v330_v20, %s16874_s14 }
 0x135   :  { %3075 = vst.msk [vmem:[#allocation3 + $0x120] sm:$0xff] %vm245_vm2, %v16873_v0  ;;  %3076 = vst.msk [vmem:[#allocation3 + $0x138] sm:$0xff] %vm245_vm2, %v16873_v0  ;;  %1562 = vmatpush1.bf16.msra.mxu1 %v14924_v51  ;;  %v337_v51 = vld [vmem:[#allocation4 + $0xd8] sm:$0xff] }
 0x136   :  { %3077 = vst.msk [vmem:[#allocation3 + $0x150] sm:$0xff] %vm245_vm2, %v16873_v0  ;;  %3078 = vst.msk [vmem:[#allocation3 + $0x168] sm:$0xff] %vm245_vm2, %v16873_v0  ;;  %1389 = vmatpush1.bf16.msra.mxu0 %v14923_v50  ;;  %1563 = vmatprep.subr.bf16.mxu1 %v14927_v53 }
 0x137   :  { %3079 = vst.msk [vmem:[#allocation3 + $0x40] sm:$0xff] %vm245_vm2, %v16873_v0  ;;  %3080 = vst.msk [vmem:[#allocation3 + $0x58] sm:$0xff] %vm245_vm2, %v16873_v0  ;;  %1390 = vmatprep.subr.bf16.mxu0 %v14925_v52 }
 0x138   :  { %3081 = vst.msk [vmem:[#allocation3 + $0x70] sm:$0xff] %vm245_vm2, %v16873_v0  ;;  %3082 = vst.msk [vmem:[#allocation3 + $0x88] sm:$0xff] %vm245_vm2, %v16873_v0  ;;  %404 = vrot.lane.b32.xlu0 %v329_v21, %s16874_s14  ;;  %408 = vrot.lane.b32.xlu1 %v331_v22, %s16874_s14  ;;  %v334_v22 = vld [vmem:[#allocation4 + $0xc0] sm:$0xff] }
 0x139   :  { %3083 = vst.msk [vmem:[#allocation3 + $0xa0] sm:$0xff] %vm245_vm2, %v16873_v0  ;;  %3084 = vst.msk [vmem:[#allocation3 + $0xb8] sm:$0xff] %vm245_vm2, %v16873_v0  ;;  %1564 = vmatpush1.bf16.msra.mxu1 %v14930_v55 }
 0x13a   :  { %3085 = vst.msk [vmem:[#allocation3 + $0xd0] sm:$0xff] %vm245_vm2, %v16873_v0  ;;  %3086 = vst.msk [vmem:[#allocation3 + $0xe8] sm:$0xff] %vm245_vm2, %v16873_v0  ;;  %1391 = vmatpush1.bf16.msra.mxu0 %v14929_v54  ;;  %1565 = vmatprep.subr.bf16.mxu1 %v14933_v57 }
 0x13b   :  { %3087 = vst.msk [vmem:[#allocation3 + $0x100] sm:$0xff] %vm245_vm2, %v16873_v0  ;;  %3088 = vst.msk [vmem:[#allocation3 + $0x118] sm:$0xff] %vm245_vm2, %v16873_v0  ;;  %1392 = vmatprep.subr.bf16.mxu0 %v14931_v56 }
 0x13c   :  { %3089 = vst.msk [vmem:[#allocation3 + $0x130] sm:$0xff] %vm245_vm2, %v16873_v0  ;;  %3090 = vst.msk [vmem:[#allocation3 + $0x148] sm:$0xff] %vm245_vm2, %v16873_v0  ;;  %410 = vrot.lane.b32.xlu0 %v332_v23, %s16874_s14 }
 0x13d   :  { %3091 = vst.msk [vmem:[#allocation3 + $0x160] sm:$0xff] %vm245_vm2, %v16873_v0  ;;  %3092 = vst.msk [vmem:[#allocation3 + $0x178] sm:$0xff] %vm245_vm2, %v16873_v0  ;;  %1566 = vmatpush1.bf16.msra.mxu1 %v14936_v59  ;;  %v14941_v0 = vld [vmem:[#allocation7 + $0x120] ss:$16 sps:$4 sm:$0xff]  }
 0x13e   :  { %1393 = vmatpush1.bf16.msra.mxu0 %v14935_v58  ;;  %1567 = vmatprep.subr.bf16.mxu1 %v14939_v63 }
 0x13f   :  { %1394 = vmatprep.subr.bf16.mxu0 %v14937_v62 }
 0x141   :  { %1568 = vmatpush1.bf16.msra.mxu1 %v14942_v1 }
 0x142   :  { %1395 = vmatpush1.bf16.msra.mxu0 %v14941_v0 }
 0x182   :  { %v367_v60 = vpop.permute.xlu0 %366  ;;  %v371_v61 = vpop.permute.xlu1 %370 }
 0x183   :  { %451 = vst.msk [vmem:[#allocation2 + $0x10] sm:$0xff] %vm450_vm3, %v367_v60  ;;  %453 = vst.msk [vmem:[#allocation2 + $0x20] sm:$0xff] %vm450_vm3, %v371_v61 }
 0x186   :  { %v369_v2 = vpop.permute.xlu0 %368  ;;  %v373_v3 = vpop.permute.xlu1 %372 }
 0x187   :  { %452 = vst.msk [vmem:[#allocation2 + $0x18] sm:$0xff] %vm450_vm3, %v369_v2  ;;  %454 = vst.msk [vmem:[#allocation2 + $0x28] sm:$0xff] %vm450_vm3, %v373_v3 }
 0x18a   :  { %v509_v5 = vld [vmem:[#allocation2 + $0x10] sm:$0xff]  ;;  %v377_v6 = vpop.permute.xlu1 %376  ;;  %v375_v7 = vpop.permute.xlu0 %374  ;;  %v566_v8 = vld [vmem:[#allocation2 + $0x20] sm:$0xff] }
 0x18b   :  { %v14673_v9 = vpack.i.bf16 %v509_v5, %v17399_v4  ;;  %456 = vst.msk [vmem:[#allocation2 + $0x38] sm:$0xff] %vm450_vm3, %v377_v6  ;;  %455 = vst.msk [vmem:[#allocation2 + $0x30] sm:$0xff] %vm450_vm3, %v375_v7 }
 0x18d   :  { %14674 = vrot.lane.b32.xlu1 %v14673_v9, %s16875_s29 }
 0x18e   :  { %v17407_v10 = vld [vmem:[#allocation2 + $0x18] sm:$0xff]  ;;  %v595_v11 = vld [vmem:[#allocation2 + $0x28] sm:$0xff]  ;;  %v379_v12 = vpop.permute.xlu0 %378  ;;  %v381_v13 = vpop.permute.xlu1 %380 }
 0x18f   :  { %v14678_v14 = vpack.i.bf16 %v17407_v10, %v509_v5  ;;  %v14683_v15 = vpack.i.bf16 %v566_v8, %v17407_v10  ;;  %v1045_v16 = vpack.c.bf16 %v595_v11, %v566_v8  ;;  %457 = vst.msk [vmem:[#allocation2 + $0x40] sm:$0xff] %vm450_vm3, %v379_v12  ;;  %458 = vst.msk [vmem:[#allocation2 + $0x48] sm:$0xff] %vm450_vm3, %v381_v13 }
 0x190   :  { %v14693_v17 = vpack.i.bf16 %v595_v11, %v566_v8 }
 0x191   :  { %14679 = vrot.lane.b32.xlu0 %v14678_v14, %s16862_s9  ;;  %14684 = vrot.lane.b32.xlu1 %v14683_v15, %s16876_s4 }
 0x192   :  { %12800 = vmatprep.mubr.msk.bf16.mxu0 %vm245_vm2, %v1045_v16  ;;  %12814 = vmatprep.mubr.msk.bf16.mxu1 %vm245_vm2, %v1045_v16  ;;  %v17417_v18 = vld [vmem:[#allocation2 + $0x30] sm:$0xff]  ;;  %v385_v19 = vpop.permute.xlu1 %384  ;;  %v383_v20 = vpop.permute.xlu0 %382  ;;  %v17428_v26 = vld [vmem:[#allocation2 + $0x38] sm:$0xff] }
 0x193   :  { %460 = vst.msk [vmem:[#allocation2 + $0x58] sm:$0xff] %vm450_vm3, %v385_v19  ;;  %459 = vst.msk [vmem:[#allocation2 + $0x50] sm:$0xff] %vm450_vm3, %v383_v20  ;;  %v14698_v21 = vpack.i.bf16 %v17417_v18, %v595_v11  ;;  %v14708_v34 = vpack.i.bf16 %v17428_v26, %v17417_v18 }
 0x195   :  { %14689 = vrot.lane.b32.xlu0 %v14683_v15, %s16875_s29  ;;  %14694 = vrot.lane.b32.xlu1 %v14693_v17, %s16862_s9  ;;  %v479_v15 = vld [vmem:[#allocation2] sm:$0xff] }
 0x196   :  { %v387_v23 = vpop.permute.xlu0 %386  ;;  %v389_v24 = vpop.permute.xlu1 %388  ;;  %v17430_v27 = vld [vmem:[#allocation2 + $0x40] sm:$0xff]  ;;  %v17438_v31 = vld [vmem:[#allocation2 + $0x48] sm:$0xff] }
 0x197   :  { %461 = vst.msk [vmem:[#allocation2 + $0x60] sm:$0xff] %vm450_vm3, %v387_v23  ;;  %462 = vst.msk [vmem:[#allocation2 + $0x68] sm:$0xff] %vm450_vm3, %v389_v24  ;;  %v14713_v30 = vpack.i.bf16 %v17430_v27, %v17428_v26  ;;  %v14723_v35 = vpack.i.bf16 %v17438_v31, %v17430_v27 }
 0x199   :  { %14699 = vrot.lane.b32.xlu0 %v14698_v21, %s16876_s4  ;;  %414 = vrot.lane.b32.xlu1 %v334_v22, %s16874_s14 }
 0x19a   :  { %v391_v28 = vpop.permute.xlu0 %390  ;;  %v393_v29 = vpop.permute.xlu1 %392  ;;  %v17448_v36 = vld [vmem:[#allocation2 + $0x50] sm:$0xff]  ;;  %v17460_v44 = vld [vmem:[#allocation2 + $0x58] sm:$0xff] }
 0x19b   :  { %463 = vst.msk [vmem:[#allocation2 + $0x70] sm:$0xff] %vm450_vm3, %v391_v28  ;;  %464 = vst.msk [vmem:[#allocation2 + $0x78] sm:$0xff] %vm450_vm3, %v393_v29  ;;  %v14728_v39 = vpack.i.bf16 %v17448_v36, %v17438_v31  ;;  %v14738_v50 = vpack.i.bf16 %v17460_v44, %v17448_v36 }
 0x19d   :  { %412 = vrot.lane.b32.xlu0 %v333_v25, %s16874_s14  ;;  %14704 = vrot.lane.b32.xlu1 %v14698_v21, %s16875_s29 }
 0x19e   :  { %v395_v32 = vpop.permute.xlu0 %394  ;;  %v397_v33 = vpop.permute.xlu1 %396  ;;  %v574_v45 = vld [vmem:[#allocation2 + $0x60] sm:$0xff]  ;;  %v17472_v52 = vld [vmem:[#allocation2 + $0x68] sm:$0xff] }
 0x19f   :  { %465 = vst.msk [vmem:[#allocation2 + $0x80] sm:$0xff] %vm450_vm3, %v395_v32  ;;  %466 = vst.msk [vmem:[#allocation2 + $0x88] sm:$0xff] %vm450_vm3, %v397_v33  ;;  %v14743_v48 = vpack.i.bf16 %v574_v45, %v17460_v44  ;;  %v14753_v54 = vpack.i.bf16 %v17472_v52, %v574_v45  ;;  %v1047_v45 = vpack.c.bf16 %v17428_v26, %v17417_v18 }
 0x1a1   :  { %14709 = vrot.lane.b32.xlu0 %v14708_v34, %s16862_s9  ;;  %14714 = vrot.lane.b32.xlu1 %v14713_v30, %s16876_s4 }
 0x1a2   :  { %v399_v37 = vpop.permute.xlu0 %398  ;;  %v401_v38 = vpop.permute.xlu1 %400  ;;  %v576_v53 = vld [vmem:[#allocation2 + $0x70] sm:$0xff]  ;;  %v549_v56 = vld [vmem:[#allocation2 + $0x78] sm:$0xff] }
 0x1a3   :  { %467 = vst.msk [vmem:[#allocation2 + $0x90] sm:$0xff] %vm450_vm3, %v399_v37  ;;  %468 = vst.msk [vmem:[#allocation2 + $0x98] sm:$0xff] %vm450_vm3, %v401_v38  ;;  %v14758_v55 = vpack.i.bf16 %v576_v53, %v17472_v52  ;;  %v14768_v58 = vpack.i.bf16 %v549_v56, %v576_v53 }
 0x1a5   :  { %14719 = vrot.lane.b32.xlu0 %v14713_v30, %s16875_s29  ;;  %14724 = vrot.lane.b32.xlu1 %v14723_v35, %s16862_s9 }
 0x1a6   :  { %v403_v41 = vpop.permute.xlu0 %402  ;;  %v407_v42 = vpop.permute.xlu1 %406  ;;  %v578_v57 = vld [vmem:[#allocation2 + $0x80] sm:$0xff]  ;;  %v551_v59 = vld [vmem:[#allocation2 + $0x88] sm:$0xff] }
 0x1a7   :  { %469 = vst.msk [vmem:[#allocation2 + $0xa0] sm:$0xff] %vm450_vm3, %v403_v41  ;;  %471 = vst.msk [vmem:[#allocation2 + $0xb0] sm:$0xff] %vm450_vm3, %v407_v42  ;;  %v14773_v61 = vpack.i.bf16 %v578_v57, %v549_v56  ;;  %v14783_v63 = vpack.i.bf16 %v551_v59, %v578_v57  ;;  %v1049_v57 = vpack.c.bf16 %v17438_v31, %v17430_v27 }
 0x1a9   :  { %14729 = vrot.lane.b32.xlu0 %v14728_v39, %s16876_s4  ;;  %416 = vrot.lane.b32.xlu1 %v335_v40, %s16874_s14 }
 0x1aa   :  { %v405_v46 = vpop.permute.xlu0 %404  ;;  %v409_v47 = vpop.permute.xlu1 %408  ;;  %v580_v60 = vld [vmem:[#allocation2 + $0x90] sm:$0xff]  ;;  %v553_v62 = vld [vmem:[#allocation2 + $0x98] sm:$0xff] }
 0x1ab   :  { %470 = vst.msk [vmem:[#allocation2 + $0xa8] sm:$0xff] %vm450_vm3, %v405_v46  ;;  %472 = vst.msk [vmem:[#allocation2 + $0xb8] sm:$0xff] %vm450_vm3, %v409_v47  ;;  %v14788_v0 = vpack.i.bf16 %v580_v60, %v551_v59  ;;  %v14798_v2 = vpack.i.bf16 %v553_v62, %v580_v60 }
 0x1ad   :  { %418 = vrot.lane.b32.xlu0 %v336_v43, %s16874_s14  ;;  %14734 = vrot.lane.b32.xlu1 %v14728_v39, %s16875_s29  ;;  %v16447_v43 = vld [vmem:[#allocation2 + $0x10] sm:$0xff] }
 0x1ae   :  { %v411_v49 = vpop.permute.xlu0 %410  ;;  %v582_v1 = vld [vmem:[#allocation2 + $0xa0] sm:$0xff]  ;;  %v584_v5 = vld [vmem:[#allocation2 + $0xb0] sm:$0xff] }
 0x1af   :  { %473 = vst.msk [vmem:[#allocation2 + $0xc0] sm:$0xff] %vm450_vm3, %v411_v49  ;;  %v14803_v6 = vpack.i.bf16 %v582_v1, %v553_v62 }
 0x1b1   :  { %14739 = vrot.lane.b32.xlu0 %v14738_v50, %s16862_s9  ;;  %14744 = vrot.lane.b32.xlu1 %v14743_v48, %s16876_s4 }
 0x1b2   :  { %v555_v3 = vld [vmem:[#allocation2 + $0xa8] sm:$0xff]  ;;  %v557_v7 = vld [vmem:[#allocation2 + $0xb8] sm:$0xff] }
 0x1b3   :  { %v14813_v8 = vpack.i.bf16 %v555_v3, %v582_v1  ;;  %v14818_v9 = vpack.i.bf16 %v584_v5, %v555_v3  ;;  %v14828_v12 = vpack.i.bf16 %v557_v7, %v584_v5  ;;  %v16448_v1 = vld [vmem:[#allocation2 + $0x28] sm:$0xff]  ;;  %v16449_v3 = vld [vmem:[#allocation2 + $0x20] sm:$0xff] }
 0x1b5   :  { %420 = vrot.lane.b32.xlu0 %v337_v51, %s16874_s14  ;;  %14749 = vrot.lane.b32.xlu1 %v14743_v48, %s16875_s29 }
 0x1b6   :  { %v17490_v11 = vld [vmem:[#allocation2 + $0xc0] sm:$0xff] }
 0x1b7   :  { %v14833_v13 = vpack.i.bf16 %v17490_v11, %v557_v7 }
 0x1b9   :  { %14754 = vrot.lane.b32.xlu0 %v14753_v54, %s16862_s9  ;;  %14759 = vrot.lane.b32.xlu1 %v14758_v55, %s16876_s4 }
 0x1bd   :  { %14764 = vrot.lane.b32.xlu0 %v14758_v55, %s16875_s29  ;;  %14769 = vrot.lane.b32.xlu1 %v14768_v58, %s16862_s9 }
 0x1c1   :  { %14774 = vrot.lane.b32.xlu0 %v14773_v61, %s16876_s4  ;;  %14779 = vrot.lane.b32.xlu1 %v14773_v61, %s16875_s29 }
 0x1c5   :  { %14784 = vrot.lane.b32.xlu0 %v14783_v63, %s16862_s9  ;;  %14789 = vrot.lane.b32.xlu1 %v14788_v0, %s16876_s4 }
 0x1c9   :  { %14794 = vrot.lane.b32.xlu0 %v14788_v0, %s16875_s29  ;;  %14799 = vrot.lane.b32.xlu1 %v14798_v2, %s16862_s9 }
 0x1cd   :  { %14804 = vrot.lane.b32.xlu0 %v14803_v6, %s16876_s4  ;;  %14809 = vrot.lane.b32.xlu1 %v14803_v6, %s16875_s29 }
 0x1d1   :  { %14814 = vrot.lane.b32.xlu0 %v14813_v8, %s16862_s9  ;;  %14819 = vrot.lane.b32.xlu1 %v14818_v9, %s16876_s4 }
 0x1d5   :  { %14824 = vrot.lane.b32.xlu0 %v14818_v9, %s16875_s29  ;;  %14829 = vrot.lane.b32.xlu1 %v14828_v12, %s16862_s9 }
 0x1d9   :  { %14834 = vrot.lane.b32.xlu0 %v14833_v13, %s16876_s4  ;;  %14839 = vrot.lane.b32.xlu1 %v14833_v13, %s16875_s29 }
 0x1ff   :  { %v14675_v14 = vpop.permute.xlu1 %14674 }
 0x200   :  { %v14677_v16 = vunpack.i.h.bf16 %v14675_v14  ;;  %v14676_v17 = vunpack.i.l.bf16 %v14675_v14 }
 0x202   :  { %v958_v25 = vsel %vm245_vm2, %v479_v15, %v14676_v17  ;;  %v959_v28 = vsel %vm245_vm2, %v17399_v4, %v14677_v16 }
 0x203   :  { %v14680_v19 = vpop.permute.xlu0 %14679  ;;  %v14685_v20 = vpop.permute.xlu1 %14684 }
 0x204   :  { %v14682_v21 = vunpack.i.h.bf16 %v14680_v19  ;;  %v14681_v22 = vunpack.i.l.bf16 %v14680_v19  ;;  %v14687_v23 = vunpack.i.h.bf16 %v14685_v20  ;;  %v14686_v24 = vunpack.i.l.bf16 %v14685_v20 }
 0x206   :  { %v987_v29 = vsel %vm986_vm4, %v958_v25, %v14681_v22  ;;  %v988_v30 = vsel %vm986_vm4, %v959_v28, %v14682_v21  ;;  %v16450_v21 = vld [vmem:[#allocation2 + $0x38] sm:$0xff] }
 0x207   :  { %v14690_v32 = vpop.permute.xlu0 %14689  ;;  %v14695_v33 = vpop.permute.xlu1 %14694  ;;  %v1016_v34 = vsel %vm1015_vm5, %v987_v29, %v14686_v24  ;;  %v1017_v35 = vsel %vm1015_vm5, %v988_v30, %v14687_v23  ;;  %v16451_v23 = vld [vmem:[#allocation2 + $0x30] sm:$0xff]  ;;  %v1051_v29 = vpack.c.bf16 %v17460_v44, %v17448_v36 }
 0x208   :  { %v14692_v37 = vunpack.i.h.bf16 %v14690_v32  ;;  %v14691_v38 = vunpack.i.l.bf16 %v14690_v32  ;;  %v14697_v39 = vunpack.i.h.bf16 %v14695_v33  ;;  %v14696_v40 = vunpack.i.l.bf16 %v14695_v33 }
 0x209   :  { %v1044_v41 = vpack.c.bf16 %v1017_v35, %v1016_v34 }
 0x20a   :  { %v961_v42 = vsel %vm245_vm2, %v17407_v10, %v14692_v37  ;;  %v960_v4 = vsel %vm245_vm2, %v16447_v43, %v14691_v38 }
 0x20b   :  { %1409 = vmatmul.mubr.bf16.vlgmr.msra.gmra.mrb[0].mxu0 %v1044_v41  ;;  %1582 = vmatmul.mubr.bf16.vlgmr.msra.gmra.mrb[0].mxu1 %v1044_v41  ;;  %v14700_v46 = vpop.permute.xlu0 %14699  ;;  %v415_v47 = vpop.permute.xlu1 %414  ;;  %v990_v10 = vsel %vm986_vm4, %v961_v42, %v14697_v39  ;;  %v989_v50 = vsel %vm986_vm4, %v960_v4, %v14696_v40  ;;  %v17552_v42 = vld [vmem:[#allocation2 + $0x60] sm:$0xff] }
 0x20c   :  { %v14702_v48 = vunpack.i.h.bf16 %v14700_v46  ;;  %v14701_v49 = vunpack.i.l.bf16 %v14700_v46  ;;  %475 = vst.msk [vmem:[#allocation2 + $0xd0] sm:$0xff] %vm450_vm3, %v415_v47  ;;  %12801 = vmatprep.mubr.msk.bf16.mxu0 %vm245_vm2, %v1047_v45  ;;  %12815 = vmatprep.mubr.msk.bf16.mxu1 %vm245_vm2, %v1047_v45  ;;  %v1053_v43 = vpack.c.bf16 %v17472_v52, %v17552_v42 }
 0x20e   :  { %v1018_v51 = vsel %vm1015_vm5, %v989_v50, %v14701_v49  ;;  %v1019_v18 = vsel %vm1015_vm5, %v990_v10, %v14702_v48  ;;  %v16453_v49 = vld [vmem:[#allocation2 + $0x48] sm:$0xff]  ;;  %v16454_v50 = vld [vmem:[#allocation2 + $0x40] sm:$0xff] }
 0x20f   :  { %v413_v26 = vpop.permute.xlu0 %412  ;;  %v14705_v53 = vpop.permute.xlu1 %14704  ;;  %v1046_v54 = vpack.c.bf16 %v1019_v18, %v1018_v51 }
 0x210   :  { %474 = vst.msk [vmem:[#allocation2 + $0xc8] sm:$0xff] %vm450_vm3, %v413_v26  ;;  %v14707_v55 = vunpack.i.h.bf16 %v14705_v53  ;;  %v14706_v56 = vunpack.i.l.bf16 %v14705_v53 }
 0x212   :  { %v963_v2 = vsel %vm245_vm2, %v16448_v1, %v14707_v55  ;;  %v962_v27 = vsel %vm245_vm2, %v16449_v3, %v14706_v56  ;;  %v17573_v1 = vld [vmem:[#allocation2 + $0x70] sm:$0xff] }
 0x213   :  { %1419 = vmatmul.mubr.bf16.gmra.mrb[4].mxu0 %v1046_v54  ;;  %1592 = vmatmul.mubr.bf16.gmra.mrb[4].mxu1 %v1046_v54  ;;  %v14710_v58 = vpop.permute.xlu0 %14709  ;;  %v14715_v59 = vpop.permute.xlu1 %14714  ;;  %v17523_v0 = vld [vmem:[#allocation2 + $0xd0] sm:$0xff] }
 0x214   :  { %v14712_v60 = vunpack.i.h.bf16 %v14710_v58  ;;  %v14711_v61 = vunpack.i.l.bf16 %v14710_v58  ;;  %v14717_v62 = vunpack.i.h.bf16 %v14715_v59  ;;  %v14716_v63 = vunpack.i.l.bf16 %v14715_v59  ;;  %12802 = vmatprep.mubr.msk.bf16.mxu0 %vm245_vm2, %v1049_v57  ;;  %12816 = vmatprep.mubr.msk.bf16.mxu1 %vm245_vm2, %v1049_v57 }
 0x216   :  { %v991_v31 = vsel %vm986_vm4, %v962_v27, %v14711_v61  ;;  %v992_v5 = vsel %vm986_vm4, %v963_v2, %v14712_v60  ;;  %v17575_v2 = vld [vmem:[#allocation2 + $0x78] sm:$0xff] }
 0x217   :  { %v14720_v6 = vpop.permute.xlu0 %14719  ;;  %v14725_v7 = vpop.permute.xlu1 %14724  ;;  %v17529_v8 = vld [vmem:[#allocation2 + $0xc8] sm:$0xff]  ;;  %v1020_v9 = vsel %vm1015_vm5, %v991_v31, %v14716_v63  ;;  %v1021_v12 = vsel %vm1015_vm5, %v992_v5, %v14717_v62  ;;  %v1055_v3 = vpack.c.bf16 %v17575_v2, %v17573_v1 }
 0x218   :  { %v14722_v13 = vunpack.i.h.bf16 %v14720_v6  ;;  %v14721_v14 = vunpack.i.l.bf16 %v14720_v6  ;;  %v14727_v15 = vunpack.i.h.bf16 %v14725_v7  ;;  %v14726_v16 = vunpack.i.l.bf16 %v14725_v7  ;;  %v14943_v7 = vld [vmem:[#allocation10] ss:$8 sps:$4 sm:$0xff]  }
 0x219   :  { %v14843_v17 = vpack.i.bf16 %v17529_v8, %v17490_v11  ;;  %v14848_v19 = vpack.i.bf16 %v17523_v0, %v17529_v8  ;;  %v1048_v20 = vpack.c.bf16 %v1021_v12, %v1020_v9  ;;  %v14945_v9 = vld [vmem:[#allocation10 + $0x4] ss:$8 sps:$4 sm:$0xff]   ;;  %v14946_v12 = vld [vmem:[#allocation12] ss:$8 sps:$4 sm:$0xff]  }
 0x21a   :  { %v965_v22 = vsel %vm245_vm2, %v16450_v21, %v14722_v13  ;;  %v964_v24 = vsel %vm245_vm2, %v16451_v23, %v14721_v14  ;;  %v16457_v13 = vld [vmem:[#allocation2 + $0x58] sm:$0xff]  ;;  %2275 = vmatprep.subr.bf16.mxu0 %v14945_v9  ;;  %v14954_v23 = vld [vmem:[#allocation12 + $0x14] ss:$8 sps:$4 sm:$0xff]  }
 0x21b   :  { %14844 = vrot.lane.b32.xlu0 %v14843_v17, %s16862_s9  ;;  %14849 = vrot.lane.b32.xlu1 %v14848_v19, %s16876_s4  ;;  %v14730_v25 = vpop.permute.xlu0 %14729  ;;  %v417_v28 = vpop.permute.xlu1 %416  ;;  %v994_v32 = vsel %vm986_vm4, %v965_v22, %v14727_v15  ;;  %v993_v33 = vsel %vm986_vm4, %v964_v24, %v14726_v16  ;;  %v16458_v15 = vld [vmem:[#allocation2 + $0x50] sm:$0xff]  ;;  %v14948_v17 = vld [vmem:[#allocation12 + $0x4] ss:$8 sps:$4 sm:$0xff]  }
 0x21c   :  { %1429 = vmatmul.mubr.bf16.gmra.mrb[8].mxu0 %v1048_v20  ;;  %1602 = vmatmul.mubr.bf16.gmra.mrb[8].mxu1 %v1048_v20  ;;  %v14732_v11 = vunpack.i.h.bf16 %v14730_v25  ;;  %v14731_v30 = vunpack.i.l.bf16 %v14730_v25  ;;  %476 = vst.msk [vmem:[#allocation2 + $0xd8] sm:$0xff] %vm450_vm3, %v417_v28  ;;  %v592_v22 = vld [vmem:[#allocation2 + $0xf0] sm:$0xff]  ;;  %v14969_v9 = vld [vmem:[#allocation10 + $0x44] ss:$8 sps:$4 sm:$0xff]  }
 0x21d   :  { %12803 = vmatprep.mubr.msk.bf16.mxu0 %vm245_vm2, %v1051_v29  ;;  %12817 = vmatprep.mubr.msk.bf16.mxu1 %vm245_vm2, %v1051_v29 }
 0x21e   :  { %v1022_v34 = vsel %vm1015_vm5, %v993_v33, %v14731_v30  ;;  %v1023_v35 = vsel %vm1015_vm5, %v994_v32, %v14732_v11  ;;  %2817 = vmatprep.subr.bf16.mxu1 %v14948_v17  ;;  %2276 = vmatpush1.bf16.msra.mxu0 %v14943_v7  ;;  %v14966_v7 = vld [vmem:[#allocation12 + $0x34] ss:$8 sps:$4 sm:$0xff]   ;;  %v14972_v17 = vld [vmem:[#allocation12 + $0x44] ss:$8 sps:$4 sm:$0xff]  }
 0x21f   :  { %14854 = vrot.lane.b32.xlu0 %v14848_v19, %s16875_s29  ;;  %v419_v36 = vpop.permute.xlu0 %418  ;;  %v14735_v44 = vpop.permute.xlu1 %14734  ;;  %v1050_v37 = vpack.c.bf16 %v1023_v35, %v1022_v34  ;;  %v14951_v19 = vld [vmem:[#allocation10 + $0x14] ss:$8 sps:$4 sm:$0xff]   ;;  %2818 = vmatpush1.bf16.msra.mxu1 %v14946_v12 }
 0x220   :  { %477 = vst.msk [vmem:[#allocation2 + $0xe0] sm:$0xff] %vm450_vm3, %v419_v36  ;;  %v14737_v38 = vunpack.i.h.bf16 %v14735_v44  ;;  %v14736_v39 = vunpack.i.l.bf16 %v14735_v44  ;;  %2277 = vmatprep.subr.bf16.mxu0 %v14951_v19  ;;  %2819 = vmatprep.subr.bf16.mxu1 %v14954_v23 }
 0x222   :  { %v967_v10 = vsel %vm245_vm2, %v16453_v49, %v14737_v38  ;;  %v966_v51 = vsel %vm245_vm2, %v16454_v50, %v14736_v39  ;;  %v16459_v38 = vld [vmem:[#allocation2 + $0x68] sm:$0xff] }
 0x223   :  { %v14740_v40 = vpop.permute.xlu0 %14739  ;;  %v14745_v41 = vpop.permute.xlu1 %14744  ;;  %v17556_v4 = vld [vmem:[#allocation2 + $0xd8] sm:$0xff]  ;;  %v14952_v49 = vld [vmem:[#allocation12 + $0x10] ss:$8 sps:$4 sm:$0xff]  }
 0x224   :  { %1439 = vmatmul.mubr.bf16.gmra.mrb[12].mxu0 %v1050_v37  ;;  %1612 = vmatmul.mubr.bf16.gmra.mrb[12].mxu1 %v1050_v37  ;;  %v14742_v45 = vunpack.i.h.bf16 %v14740_v40  ;;  %v14741_v46 = vunpack.i.l.bf16 %v14740_v40  ;;  %v14747_v47 = vunpack.i.h.bf16 %v14745_v41  ;;  %v14746_v48 = vunpack.i.l.bf16 %v14745_v41  ;;  %v14949_v41 = vld [vmem:[#allocation10 + $0x10] ss:$8 sps:$4 sm:$0xff]  }
 0x225   :  { %12804 = vmatprep.mubr.msk.bf16.mxu0 %vm245_vm2, %v1053_v43  ;;  %12818 = vmatprep.mubr.msk.bf16.mxu1 %vm245_vm2, %v1053_v43  ;;  %v14858_v52 = vpack.i.bf16 %v17556_v4, %v17523_v0 }
 0x226   :  { %v995_v18 = vsel %vm986_vm4, %v966_v51, %v14741_v46  ;;  %v996_v26 = vsel %vm986_vm4, %v967_v10, %v14742_v45  ;;  %v17594_v46 = vld [vmem:[#allocation2 + $0x80] sm:$0xff]  ;;  %2278 = vmatpush1.bf16.msra.mxu0 %v14949_v41  ;;  %2820 = vmatpush1.bf16.msra.mxu1 %v14952_v49 }
 0x227   :  { %14859 = vrot.lane.b32.xlu1 %v14858_v52, %s16862_s9  ;;  %v421_v53 = vpop.permute.xlu0 %420  ;;  %v14750_v54 = vpop.permute.xlu1 %14749  ;;  %v590_v55 = vld [vmem:[#allocation2 + $0xe0] sm:$0xff]  ;;  %v1024_v56 = vsel %vm1015_vm5, %v995_v18, %v14746_v48  ;;  %v1025_v57 = vsel %vm1015_vm5, %v996_v26, %v14747_v47  ;;  %v17596_v47 = vld [vmem:[#allocation2 + $0x88] sm:$0xff] }
 0x228   :  { %478 = vst.msk [vmem:[#allocation2 + $0xe8] sm:$0xff] %vm450_vm3, %v421_v53  ;;  %v14863_v58 = vpack.i.bf16 %v590_v55, %v17556_v4  ;;  %v1052_v59 = vpack.c.bf16 %v1025_v57, %v1024_v56  ;;  %v14752_v60 = vunpack.i.h.bf16 %v14750_v54  ;;  %v14751_v61 = vunpack.i.l.bf16 %v14750_v54  ;;  %v14957_v10 = vld [vmem:[#allocation10 + $0x24] ss:$8 sps:$4 sm:$0xff]   ;;  %v14955_v54 = vld [vmem:[#allocation10 + $0x20] ss:$8 sps:$4 sm:$0xff]  }
 0x229   :  { %v1057_v48 = vpack.c.bf16 %v17596_v47, %v17594_v46  ;;  %v14960_v51 = vld [vmem:[#allocation12 + $0x24] ss:$8 sps:$4 sm:$0xff]   ;;  %2279 = vmatprep.subr.bf16.mxu0 %v14957_v10 }
 0x22a   :  { %14864 = vrot.lane.b32.xlu0 %v14863_v58, %s16876_s4  ;;  %v969_v14 = vsel %vm245_vm2, %v16457_v13, %v14752_v60  ;;  %v968_v16 = vsel %vm245_vm2, %v16458_v15, %v14751_v61  ;;  %v14963_v60 = vld [vmem:[#allocation10 + $0x34] ss:$8 sps:$4 sm:$0xff]   ;;  %2821 = vmatprep.subr.bf16.mxu1 %v14960_v51  ;;  %v14984_v41 = vld [vmem:[#allocation12 + $0x64] ss:$8 sps:$4 sm:$0xff]  }
 0x22b   :  { %14869 = vrot.lane.b32.xlu1 %v14863_v58, %s16875_s29  ;;  %v14755_v62 = vpop.permute.xlu0 %14754  ;;  %v14760_v63 = vpop.permute.xlu1 %14759  ;;  %2280 = vmatpush1.bf16.msra.mxu0 %v14955_v54  ;;  %v14987_v51 = vld [vmem:[#allocation10 + $0x74] ss:$8 sps:$4 sm:$0xff]  }
 0x22c   :  { %1449 = vmatmul.mubr.bf16.gmra.mrb[16].mxu0 %v1052_v59  ;;  %1622 = vmatmul.mubr.bf16.gmra.mrb[16].mxu1 %v1052_v59  ;;  %v14757_v27 = vunpack.i.h.bf16 %v14755_v62  ;;  %v14756_v31 = vunpack.i.l.bf16 %v14755_v62  ;;  %v14762_v5 = vunpack.i.h.bf16 %v14760_v63  ;;  %v14761_v6 = vunpack.i.l.bf16 %v14760_v63  ;;  %v14958_v59 = vld [vmem:[#allocation12 + $0x20] ss:$8 sps:$4 sm:$0xff]  }
 0x22d   :  { %12805 = vmatprep.mubr.msk.bf16.mxu0 %vm245_vm2, %v1055_v3  ;;  %12819 = vmatprep.mubr.msk.bf16.mxu1 %vm245_vm2, %v1055_v3  ;;  %v14961_v3 = vld [vmem:[#allocation10 + $0x30] ss:$8 sps:$4 sm:$0xff]  }
 0x22e   :  { %v997_v20 = vsel %vm986_vm4, %v968_v16, %v14756_v31  ;;  %v998_v21 = vsel %vm986_vm4, %v969_v14, %v14757_v27  ;;  %v17606_v27 = vld [vmem:[#allocation2 + $0x90] sm:$0xff]  ;;  %v17608_v31 = vld [vmem:[#allocation2 + $0x98] sm:$0xff]  ;;  %2822 = vmatpush1.bf16.msra.mxu1 %v14958_v59  ;;  %2281 = vmatprep.subr.bf16.mxu0 %v14963_v60  ;;  %v14988_v59 = vld [vmem:[#allocation12 + $0x70] ss:$8 sps:$4 sm:$0xff]  }
 0x22f   :  { %v14765_v24 = vpop.permute.xlu0 %14764  ;;  %v14770_v25 = vpop.permute.xlu1 %14769  ;;  %v563_v28 = vld [vmem:[#allocation2 + $0xe8] sm:$0xff]  ;;  %v1026_v29 = vsel %vm1015_vm5, %v997_v20, %v14761_v6  ;;  %v1027_v11 = vsel %vm1015_vm5, %v998_v21, %v14762_v5  ;;  %v1059_v5 = vpack.c.bf16 %v17608_v31, %v17606_v27  ;;  %2823 = vmatprep.subr.bf16.mxu1 %v14966_v7  ;;  %2282 = vmatpush1.bf16.msra.mxu0 %v14961_v3 }
 0x230   :  { %v14767_v30 = vunpack.i.h.bf16 %v14765_v24  ;;  %v14766_v32 = vunpack.i.l.bf16 %v14765_v24  ;;  %v14772_v33 = vunpack.i.h.bf16 %v14770_v25  ;;  %v14771_v34 = vunpack.i.l.bf16 %v14770_v25  ;;  %v14964_v6 = vld [vmem:[#allocation12 + $0x30] ss:$8 sps:$4 sm:$0xff]   ;;  %2283 = vmatprep.subr.bf16.mxu0 %v14969_v9 }
 0x231   :  { %v14873_v35 = vpack.i.bf16 %v563_v28, %v590_v55  ;;  %v14878_v36 = vpack.i.bf16 %v592_v22, %v563_v28  ;;  %v1054_v44 = vpack.c.bf16 %v1027_v11, %v1026_v29  ;;  %v17587_v37 = vpack.c.bf16 %v563_v28, %v590_v55  ;;  %v14967_v22 = vld [vmem:[#allocation10 + $0x40] ss:$8 sps:$4 sm:$0xff]   ;;  %v14973_v11 = vld [vmem:[#allocation10 + $0x50] ss:$8 sps:$4 sm:$0xff]  }
 0x232   :  { %v971_v39 = vsel %vm245_vm2, %v16459_v38, %v14767_v30  ;;  %v970_v40 = vsel %vm245_vm2, %v17552_v42, %v14766_v32  ;;  %2824 = vmatpush1.bf16.msra.mxu1 %v14964_v6  ;;  %v14978_v30 = vld [vmem:[#allocation12 + $0x54] ss:$8 sps:$4 sm:$0xff]   ;;  %v14976_v32 = vld [vmem:[#allocation12 + $0x50] ss:$8 sps:$4 sm:$0xff]   ;;  %v14996_v6 = vld [vmem:[#allocation12 + $0x84] ss:$8 sps:$4 sm:$0xff]  }
 0x233   :  { %14874 = vrot.lane.b32.xlu0 %v14873_v35, %s16862_s9  ;;  %14879 = vrot.lane.b32.xlu1 %v14878_v36, %s16876_s4  ;;  %v14775_v43 = vpop.permute.xlu0 %14774  ;;  %v14780_v45 = vpop.permute.xlu1 %14779  ;;  %v1000_v52 = vsel %vm986_vm4, %v971_v39, %v14772_v33  ;;  %v999_v18 = vsel %vm986_vm4, %v970_v40, %v14771_v34  ;;  %v14981_v33 = vld [vmem:[#allocation10 + $0x64] ss:$8 sps:$4 sm:$0xff]   ;;  %v17624_v39 = vld [vmem:[#allocation2 + $0xa8] sm:$0xff]  ;;  %s16879_s9 = smov [#allocation28]  }
 0x234   :  { %1459 = vmatmul.mubr.bf16.gmra.mrb[20].mxu0 %v1054_v44  ;;  %1632 = vmatmul.mubr.bf16.gmra.mrb[20].mxu1 %v1054_v44  ;;  %v14777_v50 = vunpack.i.h.bf16 %v14775_v43  ;;  %v14776_v42 = vunpack.i.l.bf16 %v14775_v43  ;;  %v14782_v55 = vunpack.i.h.bf16 %v14780_v45  ;;  %v14781_v56 = vunpack.i.l.bf16 %v14780_v45  ;;  %v17622_v38 = vld [vmem:[#allocation2 + $0xa0] sm:$0xff]  ;;  %s12744_s8 = sshll.u32 %s16879_s9, 4  ;;  %s12745_s8 = int_to_ptr.vmem [resolvable:$true] %s12744_s8 }
 0x235   :  { %12806 = vmatprep.mubr.msk.bf16.mxu0 %vm245_vm2, %v1057_v48  ;;  %12820 = vmatprep.mubr.msk.bf16.mxu1 %vm245_vm2, %v1057_v48  ;;  %v1061_v40 = vpack.c.bf16 %v17624_v39, %v17622_v38  ;;  %s16812_s19 = scalar_lea.vmem %s12745_s8, 128  ;;  %p16817_p9 = scmp.lt.s32.totalorder %s12745_s8, %s12745_s8 }
 0x236   :  { %v1028_v26 = vsel %vm1015_vm5, %v999_v18, %v14776_v42  ;;  %v1029_v53 = vsel %vm1015_vm5, %v1000_v52, %v14777_v50  ;;  %v973_v12 = vsel %vm245_vm2, %v17575_v2, %v14782_v55  ;;  %v972_v13 = vsel %vm245_vm2, %v17573_v1, %v14781_v56  ;;  %v14970_v2 = vld [vmem:[#allocation12 + $0x40] ss:$8 sps:$4 sm:$0xff]   ;;  %v14975_v1 = vld [vmem:[#allocation10 + $0x54] ss:$8 sps:$4 sm:$0xff]   ;;  %2825 = vmatprep.subr.bf16.mxu1 %v14972_v17  ;;  %p16813_p8 = scmp.ne.s32.totalorder %s12745_s8, %s16812_s19  ;;  %p16818_p10 = scmp.lt.s32.totalorder %s16812_s19, %s16812_s19 }
 0x237   :  { %v14785_v57 = vpop.permute.xlu0 %14784  ;;  %v14790_v58 = vpop.permute.xlu1 %14789  ;;  %v1056_v63 = vpack.c.bf16 %v1029_v53, %v1028_v26  ;;  %2284 = vmatpush1.bf16.msra.mxu0 %v14967_v22  ;;  %2826 = vmatpush1.bf16.msra.mxu1 %v14970_v2  ;;  %v14979_v50 = vld [vmem:[#allocation10 + $0x60] ss:$8 sps:$4 sm:$0xff]   ;;  %v14999_v2 = vld [vmem:[#allocation10 + $0x94] ss:$8 sps:$4 sm:$0xff]  }
 0x238   :  { %v14787_v61 = vunpack.i.h.bf16 %v14785_v57  ;;  %v14786_v62 = vunpack.i.l.bf16 %v14785_v57  ;;  %v14792_v14 = vunpack.i.h.bf16 %v14790_v58  ;;  %v14791_v15 = vunpack.i.l.bf16 %v14790_v58  ;;  %2285 = vmatprep.subr.bf16.mxu0 %v14975_v1  ;;  %v14982_v42 = vld [vmem:[#allocation12 + $0x60] ss:$8 sps:$4 sm:$0xff]   ;;  %2827 = vmatprep.subr.bf16.mxu1 %v14978_v30  ;;  %v14990_v57 = vld [vmem:[#allocation12 + $0x74] ss:$8 sps:$4 sm:$0xff]   ;;  %v14985_v58 = vld [vmem:[#allocation10 + $0x70] ss:$8 sps:$4 sm:$0xff]   ;;  %p16819_p11 = por %p16818_p10, %p16817_p9 }
 0x239   :  { %v14994_v17 = vld [vmem:[#allocation12 + $0x80] ss:$8 sps:$4 sm:$0xff]   ;;  %v15002_v1 = vld [vmem:[#allocation12 + $0x94] ss:$8 sps:$4 sm:$0xff]  }
 0x23a   :  { %v1001_v19 = vsel %vm986_vm4, %v972_v13, %v14786_v62  ;;  %v1002_v20 = vsel %vm986_vm4, %v973_v12, %v14787_v61  ;;  %v17638_v62 = vld [vmem:[#allocation2 + $0xb0] sm:$0xff]  ;;  %p16820_p12 = pnand %p16819_p11, %p16813_p8 }
 0x23b   :  { %v14795_v16 = vpop.permute.xlu0 %14794  ;;  %v14800_v21 = vpop.permute.xlu1 %14799  ;;  %v1030_v28 = vsel %vm1015_vm5, %v1001_v19, %v14791_v15  ;;  %v1031_v29 = vsel %vm1015_vm5, %v1002_v20, %v14792_v14  ;;  %2286 = vmatpush1.bf16.msra.mxu0 %v14973_v11  ;;  %2828 = vmatpush1.bf16.msra.mxu1 %v14976_v32  ;;  %v17654_v11 = vld [vmem:[#allocation2 + $0xc0] sm:$0xff] }
 0x23c   :  { %1469 = vmatmul.mubr.bf16.gmra.mrb[24].mxu0 %v1056_v63  ;;  %1642 = vmatmul.mubr.bf16.gmra.mrb[24].mxu1 %v1056_v63  ;;  %v14797_v23 = vunpack.i.h.bf16 %v14795_v16  ;;  %v14796_v24 = vunpack.i.l.bf16 %v14795_v16  ;;  %v14802_v34 = vunpack.i.h.bf16 %v14800_v21  ;;  %v14801_v35 = vunpack.i.l.bf16 %v14800_v21  ;;  %v17640_v63 = vld [vmem:[#allocation2 + $0xb8] sm:$0xff] }
 0x23d   :  { %12807 = vmatprep.mubr.msk.bf16.mxu0 %vm245_vm2, %v1059_v5  ;;  %12821 = vmatprep.mubr.msk.bf16.mxu1 %vm245_vm2, %v1059_v5  ;;  %v1058_v44 = vpack.c.bf16 %v1031_v29, %v1030_v28  ;;  %v1063_v3 = vpack.c.bf16 %v17640_v63, %v17638_v62  ;;  %v14993_v5 = vld [vmem:[#allocation10 + $0x84] ss:$8 sps:$4 sm:$0xff]   ;;  %v14991_v16 = vld [vmem:[#allocation10 + $0x80] ss:$8 sps:$4 sm:$0xff]   ;;  %v1065_v30 = vpack.c.bf16 %v17529_v8, %v17654_v11 }
 0x23e   :  { %v975_v43 = vsel %vm245_vm2, %v17596_v47, %v14797_v23  ;;  %v974_v45 = vsel %vm245_vm2, %v17594_v46, %v14796_v24  ;;  %2287 = vmatprep.subr.bf16.mxu0 %v14981_v33  ;;  %2829 = vmatprep.subr.bf16.mxu1 %v14984_v41  ;;  %v14997_v23 = vld [vmem:[#allocation10 + $0x90] ss:$8 sps:$4 sm:$0xff]   ;;  %v15005_v32 = vld [vmem:[#allocation10 + $0xa4] ss:$8 sps:$4 sm:$0xff]   ;;  %v15006_v8 = vld [vmem:[#allocation12 + $0xa0] ss:$8 sps:$4 sm:$0xff]  }
 0x23f   :  { %v14805_v25 = vpop.permute.xlu0 %14804  ;;  %v14810_v36 = vpop.permute.xlu1 %14809  ;;  %v1004_v52 = vsel %vm986_vm4, %v975_v43, %v14802_v34  ;;  %v1003_v47 = vsel %vm986_vm4, %v974_v45, %v14801_v35  ;;  %2288 = vmatpush1.bf16.msra.mxu0 %v14979_v50  ;;  %2830 = vmatpush1.bf16.msra.mxu1 %v14982_v42  ;;  %v15000_v24 = vld [vmem:[#allocation12 + $0x90] ss:$8 sps:$4 sm:$0xff]   ;;  %v15008_v33 = vld [vmem:[#allocation12 + $0xa4] ss:$8 sps:$4 sm:$0xff]  }
 0x240   :  { %v14807_v48 = vunpack.i.h.bf16 %v14805_v25  ;;  %v14806_v49 = vunpack.i.l.bf16 %v14805_v25  ;;  %v14812_v46 = vunpack.i.h.bf16 %v14810_v36  ;;  %v14811_v18 = vunpack.i.l.bf16 %v14810_v36  ;;  %2289 = vmatprep.subr.bf16.mxu0 %v14987_v51  ;;  %2831 = vmatprep.subr.bf16.mxu1 %v14990_v57  ;;  %v15009_v50 = vld [vmem:[#allocation10 + $0xb0] ss:$8 sps:$4 sm:$0xff]   ;;  %v15017_v51 = vld [vmem:[#allocation10 + $0xc4] ss:$8 sps:$4 sm:$0xff]   ;;  %v15035_v57 = vld [vmem:[#allocation10 + $0xf4] ss:$8 sps:$4 sm:$0xff]  }
 0x241   :  { %v15012_v42 = vld [vmem:[#allocation12 + $0xb0] ss:$8 sps:$4 sm:$0xff]  }
 0x242   :  { %v1032_v26 = vsel %vm1015_vm5, %v1003_v47, %v14806_v49  ;;  %v1033_v53 = vsel %vm1015_vm5, %v1004_v52, %v14807_v48  ;;  %v977_v7 = vsel %vm245_vm2, %v17608_v31, %v14812_v46  ;;  %v976_v9 = vsel %vm245_vm2, %v17606_v27, %v14811_v18  ;;  %v15011_v49 = vld [vmem:[#allocation10 + $0xb4] ss:$8 sps:$4 sm:$0xff]   ;;  %v15020_v52 = vld [vmem:[#allocation12 + $0xc4] ss:$8 sps:$4 sm:$0xff]   ;;  %v15015_v47 = vld [vmem:[#allocation10 + $0xc0] ss:$8 sps:$4 sm:$0xff]  }
 0x243   :  { %v14815_v10 = vpop.permute.xlu0 %14814  ;;  %v14820_v56 = vpop.permute.xlu1 %14819  ;;  %v1060_v61 = vpack.c.bf16 %v1033_v53, %v1032_v26  ;;  %2290 = vmatpush1.bf16.msra.mxu0 %v14985_v58  ;;  %2832 = vmatpush1.bf16.msra.mxu1 %v14988_v59  ;;  %v1067_v48 = vpack.c.bf16 %v17556_v4, %v17523_v0  ;;  %v15018_v0 = vld [vmem:[#allocation12 + $0xc0] ss:$8 sps:$4 sm:$0xff]   ;;  %v15023_v4 = vld [vmem:[#allocation10 + $0xd4] ss:$8 sps:$4 sm:$0xff]   ;;  %v15021_v18 = vld [vmem:[#allocation10 + $0xd0] ss:$8 sps:$4 sm:$0xff]  }
 0x244   :  { %1479 = vmatmul.mubr.bf16.gmra.mrb[28].mxu0 %v1058_v44  ;;  %1652 = vmatmul.mubr.bf16.gmra.mrb[28].mxu1 %v1058_v44  ;;  %v14817_v54 = vunpack.i.h.bf16 %v14815_v10  ;;  %v14816_v55 = vunpack.i.l.bf16 %v14815_v10  ;;  %v14822_v12 = vunpack.i.h.bf16 %v14820_v56  ;;  %v14821_v13 = vunpack.i.l.bf16 %v14820_v56  ;;  %v15014_v10 = vld [vmem:[#allocation12 + $0xb4] ss:$8 sps:$4 sm:$0xff]   ;;  %v15024_v26 = vld [vmem:[#allocation12 + $0xd0] ss:$8 sps:$4 sm:$0xff]   ;;  %v15029_v53 = vld [vmem:[#allocation10 + $0xe4] ss:$8 sps:$4 sm:$0xff]  }
 0x245   :  { %12808 = vmatprep.mubr.msk.bf16.mxu0 %vm245_vm2, %v1061_v40  ;;  %12822 = vmatprep.mubr.msk.bf16.mxu1 %vm245_vm2, %v1061_v40  ;;  %v15003_v40 = vld [vmem:[#allocation10 + $0xa0] ss:$8 sps:$4 sm:$0xff]   ;;  %v15026_v46 = vld [vmem:[#allocation12 + $0xd4] ss:$8 sps:$4 sm:$0xff]   ;;  %v15033_v59 = vld [vmem:[#allocation10 + $0xf0] ss:$8 sps:$4 sm:$0xff]  }
 0x246   :  { %v1005_v14 = vsel %vm986_vm4, %v976_v9, %v14816_v55  ;;  %v1006_v15 = vsel %vm986_vm4, %v977_v7, %v14817_v54  ;;  %2291 = vmatprep.subr.bf16.mxu0 %v14993_v5  ;;  %2833 = vmatprep.subr.bf16.mxu1 %v14996_v6  ;;  %v15032_v54 = vld [vmem:[#allocation12 + $0xe4] ss:$8 sps:$4 sm:$0xff]   ;;  %v15027_v55 = vld [vmem:[#allocation10 + $0xe0] ss:$8 sps:$4 sm:$0xff]   ;;  %v15038_v58 = vld [vmem:[#allocation12 + $0xf4] ss:$8 sps:$4 sm:$0xff]  }
 0x247   :  { %v14825_v60 = vpop.permute.xlu0 %14824  ;;  %v14830_v27 = vpop.permute.xlu1 %14829  ;;  %v1034_v20 = vsel %vm1015_vm5, %v1005_v14, %v14821_v13  ;;  %v1035_v21 = vsel %vm1015_vm5, %v1006_v15, %v14822_v12  ;;  %2292 = vmatpush1.bf16.msra.mxu0 %v14991_v16  ;;  %2834 = vmatpush1.bf16.msra.mxu1 %v14994_v17  ;;  %v15030_v56 = vld [vmem:[#allocation12 + $0xe0] ss:$8 sps:$4 sm:$0xff]  }
 0x248   :  { %v14827_v31 = vunpack.i.h.bf16 %v14825_v60  ;;  %v14826_v19 = vunpack.i.l.bf16 %v14825_v60  ;;  %v14832_v25 = vunpack.i.h.bf16 %v14830_v27  ;;  %v14831_v28 = vunpack.i.l.bf16 %v14830_v27  ;;  %2293 = vmatprep.subr.bf16.mxu0 %v14999_v2  ;;  %2835 = vmatprep.subr.bf16.mxu1 %v15002_v1  ;;  %v15036_v60 = vld [vmem:[#allocation12 + $0xf0] ss:$8 sps:$4 sm:$0xff]  }
 0x249   :  { %v1062_v29 = vpack.c.bf16 %v1035_v21, %v1034_v20 }
 0x24a   :  { %v979_v34 = vsel %vm245_vm2, %v17624_v39, %v14827_v31  ;;  %v978_v35 = vsel %vm245_vm2, %v17622_v38, %v14826_v19 }
 0x24b   :  { %v14835_v22 = vpop.permute.xlu0 %14834  ;;  %v1008_v41 = vsel %vm986_vm4, %v979_v34, %v14832_v25  ;;  %v1007_v43 = vsel %vm986_vm4, %v978_v35, %v14831_v28  ;;  %2294 = vmatpush1.bf16.msra.mxu0 %v14997_v23  ;;  %2836 = vmatpush1.bf16.msra.mxu1 %v15000_v24  ;;  %v621_v23 = vld [vmem:[#allocation2 + $0xf8] sm:$0xff]  ;;  %v16469_v25 = vld [vmem:[#allocation2 + $0xc8] sm:$0xff] }
 0x24c   :  { %1489 = vmatmul.mubr.bf16.gmra.mrb[32].mxu0 %v1060_v61  ;;  %1662 = vmatmul.mubr.bf16.gmra.mrb[32].mxu1 %v1060_v61  ;;  %v14837_v36 = vunpack.i.h.bf16 %v14835_v22  ;;  %v14836_v44 = vunpack.i.l.bf16 %v14835_v22  ;;  %v14840_v61 = vpop.permute.xlu1 %14839 }
 0x24d   :  { %12809 = vmatprep.mubr.msk.bf16.mxu0 %vm245_vm2, %v1063_v3  ;;  %12823 = vmatprep.mubr.msk.bf16.mxu1 %vm245_vm2, %v1063_v3  ;;  %v14842_v3 = vunpack.i.h.bf16 %v14840_v61  ;;  %v14841_v5 = vunpack.i.l.bf16 %v14840_v61 }
 0x24e   :  { %v1036_v38 = vsel %vm1015_vm5, %v1007_v43, %v14836_v44  ;;  %v1037_v39 = vsel %vm1015_vm5, %v1008_v41, %v14837_v36  ;;  %2295 = vmatprep.subr.bf16.mxu0 %v15005_v32  ;;  %2837 = vmatprep.subr.bf16.mxu1 %v15008_v33  ;;  %v16470_v36 = vld [vmem:[#allocation2 + $0xf0] sm:$0xff] }
 0x24f   :  { %v1064_v45 = vpack.c.bf16 %v1037_v39, %v1036_v38  ;;  %2296 = vmatpush1.bf16.msra.mxu0 %v15003_v40  ;;  %2838 = vmatpush1.bf16.msra.mxu1 %v15006_v8  ;;  %v981_v15 = vsel %vm245_vm2, %v17640_v63, %v14842_v3  ;;  %v980_v16 = vsel %vm245_vm2, %v17638_v62, %v14841_v5 }
 0x250   :  { %2297 = vmatprep.subr.bf16.mxu0 %v15011_v49  ;;  %2839 = vmatprep.subr.bf16.mxu1 %v15014_v10  ;;  %v1071_v44 = vpack.c.bf16 %v621_v23, %v16470_v36  ;;  %v16471_v10 = vld [vmem:[#allocation2 + $0xd8] sm:$0xff] }
 0x253   :  { %2298 = vmatpush1.bf16.msra.mxu0 %v15009_v50  ;;  %2840 = vmatpush1.bf16.msra.mxu1 %v15012_v42  ;;  %v16472_v42 = vld [vmem:[#allocation2 + $0xd0] sm:$0xff] }
 0x254   :  { %1499 = vmatmul.mubr.bf16.gmra.mrb[36].mxu0 %v1062_v29  ;;  %1672 = vmatmul.mubr.bf16.gmra.mrb[36].mxu1 %v1062_v29 }
 0x255   :  { %12810 = vmatprep.mubr.msk.bf16.mxu0 %vm245_vm2, %v1065_v30  ;;  %12824 = vmatprep.mubr.msk.bf16.mxu1 %vm245_vm2, %v1065_v30 }
 0x256   :  { %2299 = vmatprep.subr.bf16.mxu0 %v15017_v51  ;;  %2841 = vmatprep.subr.bf16.mxu1 %v15020_v52 }
 0x257   :  { %2300 = vmatpush1.bf16.msra.mxu0 %v15015_v47  ;;  %2842 = vmatpush1.bf16.msra.mxu1 %v15018_v0 }
 0x258   :  { %2301 = vmatprep.subr.bf16.mxu0 %v15023_v4  ;;  %2843 = vmatprep.subr.bf16.mxu1 %v15026_v46 }
 0x25b   :  { %2302 = vmatpush1.bf16.msra.mxu0 %v15021_v18  ;;  %2844 = vmatpush1.bf16.msra.mxu1 %v15024_v26  ;;  %v15041_v18 = vld [vmem:[#allocation10 + $0x104] ss:$8 sps:$4 sm:$0xff]  }
 0x25c   :  { %1509 = vmatmul.mubr.bf16.gmra.mrb[40].mxu0 %v1064_v45  ;;  %1682 = vmatmul.mubr.bf16.gmra.mrb[40].mxu1 %v1064_v45  ;;  %v15044_v26 = vld [vmem:[#allocation12 + $0x104] ss:$8 sps:$4 sm:$0xff]  }
 0x25d   :  { %12811 = vmatprep.mubr.msk.bf16.mxu0 %vm245_vm2, %v1067_v48  ;;  %12825 = vmatprep.mubr.msk.bf16.mxu1 %vm245_vm2, %v1067_v48 }
 0x25e   :  { %2303 = vmatprep.subr.bf16.mxu0 %v15029_v53  ;;  %2845 = vmatprep.subr.bf16.mxu1 %v15032_v54  ;;  %v1114_v53 = vlaneseq }
 0x25f   :  { %2304 = vmatpush1.bf16.msra.mxu0 %v15027_v55  ;;  %2846 = vmatpush1.bf16.msra.mxu1 %v15030_v56 }
 0x260   :  { %2305 = vmatprep.subr.bf16.mxu0 %v15035_v57  ;;  %2847 = vmatprep.subr.bf16.mxu1 %v15038_v58  ;;  %v1115_v54 = vshrl.u32 %v1114_v53, 7  ;;  %v1112_v57 = vld [vmem:[#allocation9] sm:$0xf] }
 0x262   :  { %v17699_v55 = vsub.s32 0, %v1115_v54  ;;  %v17701_v56 = vsub.s32 2, %v1115_v54  ;;  %v17703_v58 = vsub.s32 1, %v1115_v54 }
 0x263   :  { %2306 = vmatpush1.bf16.msra.mxu0 %v15033_v59  ;;  %2848 = vmatpush1.bf16.msra.mxu1 %v15036_v60  ;;  %v17705_v59 = vsub.s32 3, %v1115_v54 }
 0x264   :  { %2378 = vmatprep.subr.bf16.mxu0 %v15041_v18  ;;  %2920 = vmatprep.subr.bf16.mxu1 %v15044_v26  ;;  %18660 = vst [vmem:[#allocation38_spill] sm:$0xff] %v17699_v55  ;;  %18661 = vst [vmem:[#allocation39_spill] sm:$0xff] %v17701_v56  ;;  %v17708_v60 = vrot.slane %v1112_v57, %v17699_v55  ;;  %v17711_v61 = vrot.slane %v1112_v57, %v17701_v56  ;;  %v18090_v56 = vld [vmem:[#allocation3 + $0xd0] sm:$0xff] }
 0x265   :  { %18662 = vst [vmem:[#allocation40_spill] sm:$0xff] %v17703_v58  ;;  %18663 = vst [vmem:[#allocation41_spill] sm:$0xff] %v17705_v59  ;;  %v17714_v3 = vrot.slane %v1112_v57, %v17703_v58  ;;  %v17717_v5 = vrot.slane %v1112_v57, %v17705_v59  ;;  %v15254_v59 = vld [vmem:[#allocation13 + $0xac] ss:$16 sps:$4 sm:$0xff]   ;;  %v15249_v58 = vld [vmem:[#allocation13 + $0xa0] ss:$16 sps:$4 sm:$0xff]  }
 0x266   :  { %v15261_v55 = vld [vmem:[#allocation13 + $0xe0] ss:$16 sps:$4 sm:$0xff]  }
 0x28d   :  { %v14845_v6 = vpop.permute.xlu0 %14844  ;;  %v14850_v7 = vpop.permute.xlu1 %14849 }
 0x28e   :  { %v14847_v9 = vunpack.i.h.bf16 %v14845_v6  ;;  %v14846_v12 = vunpack.i.l.bf16 %v14845_v6  ;;  %v14852_v13 = vunpack.i.h.bf16 %v14850_v7  ;;  %v14851_v14 = vunpack.i.l.bf16 %v14850_v7 }
 0x290   :  { %v1009_v17 = vsel %vm986_vm4, %v980_v16, %v14846_v12  ;;  %v1010_v31 = vsel %vm986_vm4, %v981_v15, %v14847_v9 }
 0x291   :  { %v1038_v19 = vsel %vm1015_vm5, %v1009_v17, %v14851_v14  ;;  %v1039_v27 = vsel %vm1015_vm5, %v1010_v31, %v14852_v13  ;;  %v14855_v63 = vpop.permute.xlu0 %14854 }
 0x292   :  { %v1066_v20 = vpack.c.bf16 %v1039_v27, %v1038_v19  ;;  %v14857_v21 = vunpack.i.h.bf16 %v14855_v63  ;;  %v14856_v62 = vunpack.i.l.bf16 %v14855_v63 }
 0x294   :  { %1519 = vmatmul.mubr.bf16.gmra.mrb[44].mxu0 %v1066_v20  ;;  %1692 = vmatmul.mubr.bf16.gmra.mrb[44].mxu1 %v1066_v20  ;;  %v983_v28 = vsel %vm245_vm2, %v16469_v25, %v14857_v21  ;;  %v982_v29 = vsel %vm245_vm2, %v17654_v11, %v14856_v62 }
 0x295   :  { %12812 = vmatprep.mubr.msk.bf16.mxu0 %vm245_vm2, %v17587_v37  ;;  %12826 = vmatprep.mubr.msk.bf16.mxu1 %vm245_vm2, %v17587_v37 }
 0x299   :  { %v14860_v22 = vpop.permute.xlu1 %14859 }
 0x29a   :  { %v14862_v2 = vunpack.i.h.bf16 %v14860_v22  ;;  %v14861_v1 = vunpack.i.l.bf16 %v14860_v22 }
 0x29c   :  { %v14865_v24 = vpop.permute.xlu0 %14864  ;;  %v1012_v33 = vsel %vm986_vm4, %v983_v28, %v14862_v2  ;;  %v1011_v37 = vsel %vm986_vm4, %v982_v29, %v14861_v1 }
 0x29d   :  { %v14867_v30 = vunpack.i.h.bf16 %v14865_v24  ;;  %v14866_v32 = vunpack.i.l.bf16 %v14865_v24  ;;  %v14870_v40 = vpop.permute.xlu1 %14869 }
 0x29e   :  { %v14872_v41 = vunpack.i.h.bf16 %v14870_v40  ;;  %v14871_v43 = vunpack.i.l.bf16 %v14870_v40 }
 0x29f   :  { %v1040_v34 = vsel %vm1015_vm5, %v1011_v37, %v14866_v32  ;;  %v1041_v35 = vsel %vm1015_vm5, %v1012_v33, %v14867_v30 }
 0x2a0   :  { %v1068_v8 = vpack.c.bf16 %v1041_v35, %v1040_v34  ;;  %v985_v50 = vsel %vm245_vm2, %v16471_v10, %v14872_v41  ;;  %v984_v51 = vsel %vm245_vm2, %v16472_v42, %v14871_v43 }
 0x2a2   :  { %1529 = vmatmul.mubr.bf16.gmra.mrb[48].mxu0 %v1068_v8  ;;  %1702 = vmatmul.mubr.bf16.gmra.mrb[48].mxu1 %v1068_v8 }
 0x2a3   :  { %12813 = vmatprep.mubr.msk.bf16.mxu0 %vm245_vm2, %v1071_v44  ;;  %12827 = vmatprep.mubr.msk.bf16.mxu1 %vm245_vm2, %v1071_v44 }
 0x2a5   :  { %v14875_v11 = vpop.permute.xlu0 %14874  ;;  %v14880_v38 = vpop.permute.xlu1 %14879 }
 0x2a6   :  { %v14877_v39 = vunpack.i.h.bf16 %v14875_v11  ;;  %v14876_v45 = vunpack.i.l.bf16 %v14875_v11  ;;  %v14882_v48 = vunpack.i.h.bf16 %v14880_v38  ;;  %v14881_v49 = vunpack.i.l.bf16 %v14880_v38 }
 0x2a8   :  { %v1013_v52 = vsel %vm986_vm4, %v984_v51, %v14876_v45  ;;  %v1014_v47 = vsel %vm986_vm4, %v985_v50, %v14877_v39 }
 0x2a9   :  { %v1042_v0 = vsel %vm1015_vm5, %v1013_v52, %v14881_v49  ;;  %v1043_v4 = vsel %vm1015_vm5, %v1014_v47, %v14882_v48 }
 0x2aa   :  { %v1070_v46 = vpack.c.bf16 %v1043_v4, %v1042_v0 }
 0x2ac   :  { %1539 = vmatmul.mubr.bf16.gmra.mrb[52].mxu0 %v1070_v46  ;;  %1712 = vmatmul.mubr.bf16.gmra.mrb[52].mxu1 %v1070_v46 }
 0x2de   :  { %v1410_v6 = vpop.f32.mrb[0].mxu0  ;;  %v1583_v7 = vpop.f32.mrb[0].mxu1 }
 0x2df   :  { %v1411_v9 = vadd.f32 %v1410_v6, %v17708_v60  ;;  %v1584_v12 = vadd.f32 %v1583_v7, %v17711_v61  ;;  %v1412_v13 = vpop.f32.mrb[1].mxu0  ;;  %v1585_v14 = vpop.f32.mrb[1].mxu1 }
 0x2e0   :  { %v1413_v15 = vadd.f32 %v1412_v13, %v17714_v3  ;;  %v1586_v16 = vadd.f32 %v1585_v14, %v17717_v5  ;;  %v1414_v17 = vpop.f32.mrb[2].mxu0  ;;  %v1587_v31 = vpop.f32.mrb[2].mxu1 }
 0x2e1   :  { %v1415_v19 = vadd.f32 %v1414_v17, %v17708_v60  ;;  %v1588_v27 = vadd.f32 %v1587_v31, %v17711_v61  ;;  %v1416_v20 = vpop.f32.mrb[3].mxu0  ;;  %v1589_v63 = vpop.f32.mrb[3].mxu1  ;;  %v1722_v22 = vmax.f32 %v1411_v9, 0.0  ;;  %v1724_v2 = vmax.f32 %v1584_v12, 0.0 }
 0x2e2   :  { %v1417_v21 = vadd.f32 %v1416_v20, %v17714_v3  ;;  %v1590_v62 = vadd.f32 %v1589_v63, %v17717_v5  ;;  %v1723_v24 = vmax.f32 %v1413_v15, 0.0  ;;  %v1725_v25 = vmax.f32 %v1586_v16, 0.0 }
 0x2e3   :  { %v1726_v1 = vmax.f32 %v1415_v19, 0.0  ;;  %v1728_v23 = vmax.f32 %v1588_v27, 0.0  ;;  %v15039_v19 = vld [vmem:[#allocation10 + $0x100] ss:$8 sps:$4 sm:$0xff]  }
 0x2e4   :  { %v1727_v28 = vmax.f32 %v1417_v21, 0.0  ;;  %v1729_v29 = vmax.f32 %v1590_v62, 0.0  ;;  %v15042_v27 = vld [vmem:[#allocation12 + $0x100] ss:$8 sps:$4 sm:$0xff]  }
 0x2e5   :  { %v1834_v30 = vmax.f32 %v1722_v22, %v1726_v1  ;;  %v1836_v32 = vmax.f32 %v1724_v2, %v1728_v23  ;;  %v15047_v22 = vld [vmem:[#allocation10 + $0x114] ss:$8 sps:$4 sm:$0xff]  }
 0x2e6   :  { %v1835_v33 = vmax.f32 %v1723_v24, %v1727_v28  ;;  %v1837_v37 = vmax.f32 %v1725_v25, %v1729_v29  ;;  %v1420_v34 = vpop.f32.mrb[4].mxu0  ;;  %v1593_v35 = vpop.f32.mrb[4].mxu1  ;;  %v15050_v2 = vld [vmem:[#allocation12 + $0x114] ss:$8 sps:$4 sm:$0xff]  }
 0x2e7   :  { %v1421_v36 = vadd.f32 %v1420_v34, %v17708_v60  ;;  %v1594_v44 = vadd.f32 %v1593_v35, %v17711_v61  ;;  %v1422_v40 = vpop.f32.mrb[5].mxu0  ;;  %v1595_v8 = vpop.f32.mrb[5].mxu1 }
 0x2e8   :  { %v1423_v41 = vadd.f32 %v1422_v40, %v17714_v3  ;;  %v1596_v43 = vadd.f32 %v1595_v8, %v17717_v5  ;;  %v1424_v11 = vpop.f32.mrb[6].mxu0  ;;  %v1597_v38 = vpop.f32.mrb[6].mxu1 }
 0x2e9   :  { %v1425_v39 = vadd.f32 %v1424_v11, %v17708_v60  ;;  %v1598_v45 = vadd.f32 %v1597_v38, %v17711_v61  ;;  %v1426_v48 = vpop.f32.mrb[7].mxu0  ;;  %v1599_v49 = vpop.f32.mrb[7].mxu1  ;;  %v1730_v42 = vmax.f32 %v1421_v36, 0.0  ;;  %v1732_v51 = vmax.f32 %v1594_v44, 0.0  ;;  %v15053_v36 = vld [vmem:[#allocation10 + $0x124] ss:$8 sps:$4 sm:$0xff]  }
 0x2ea   :  { %v1427_v10 = vadd.f32 %v1426_v48, %v17714_v3  ;;  %v1600_v50 = vadd.f32 %v1599_v49, %v17717_v5  ;;  %v1731_v0 = vmax.f32 %v1423_v41, 0.0  ;;  %v1733_v4 = vmax.f32 %v1596_v43, 0.0  ;;  %v15056_v43 = vld [vmem:[#allocation12 + $0x124] ss:$8 sps:$4 sm:$0xff]  }
 0x2eb   :  { %v1734_v52 = vmax.f32 %v1425_v39, 0.0  ;;  %v1736_v47 = vmax.f32 %v1598_v45, 0.0 }
 0x2ec   :  { %v1735_v46 = vmax.f32 %v1427_v10, 0.0  ;;  %v1737_v18 = vmax.f32 %v1600_v50, 0.0 }
 0x2ed   :  { %v1838_v26 = vmax.f32 %v1730_v42, %v1734_v52  ;;  %v1840_v53 = vmax.f32 %v1732_v51, %v1736_v47  ;;  %v15051_v52 = vld [vmem:[#allocation10 + $0x120] ss:$8 sps:$4 sm:$0xff]  }
 0x2ee   :  { %v1839_v54 = vmax.f32 %v1731_v0, %v1735_v46  ;;  %v1841_v57 = vmax.f32 %v1733_v4, %v1737_v18  ;;  %v15054_v47 = vld [vmem:[#allocation12 + $0x120] ss:$8 sps:$4 sm:$0xff]  }
 0x2ef   :  { %v1890_v6 = vpack.c.bf16 %v1838_v26, %v1834_v30  ;;  %v17735_v7 = vpack.c.bf16 %v1840_v53, %v1836_v32  ;;  %v1430_v9 = vpop.f32.mrb[8].mxu0  ;;  %v1603_v12 = vpop.f32.mrb[8].mxu1  ;;  %v15045_v30 = vld [vmem:[#allocation10 + $0x110] ss:$8 sps:$4 sm:$0xff]   ;;  %v15059_v26 = vld [vmem:[#allocation10 + $0x134] ss:$8 sps:$4 sm:$0xff]  }
 0x2f0   :  { %v17737_v13 = vpack.c.bf16 %v1841_v57, %v1837_v37  ;;  %v1431_v14 = vadd.f32 %v1430_v9, %v17708_v60  ;;  %v1604_v15 = vadd.f32 %v1603_v12, %v17711_v61  ;;  %v1432_v16 = vpop.f32.mrb[9].mxu0  ;;  %v1605_v17 = vpop.f32.mrb[9].mxu1  ;;  %v1891_v31 = vpack.c.bf16 %v1839_v54, %v1835_v33  ;;  %v15048_v32 = vld [vmem:[#allocation12 + $0x110] ss:$8 sps:$4 sm:$0xff]   ;;  %v15062_v53 = vld [vmem:[#allocation12 + $0x134] ss:$8 sps:$4 sm:$0xff]  }
 0x2f1   :  { %v1433_v20 = vadd.f32 %v1432_v16, %v17714_v3  ;;  %v1606_v63 = vadd.f32 %v1605_v17, %v17717_v5  ;;  %v1434_v21 = vpop.f32.mrb[10].mxu0  ;;  %v1607_v62 = vpop.f32.mrb[10].mxu1 }
 0x2f2   :  { %v1435_v1 = vadd.f32 %v1434_v21, %v17708_v60  ;;  %v1608_v23 = vadd.f32 %v1607_v62, %v17711_v61  ;;  %v1436_v24 = vpop.f32.mrb[11].mxu0  ;;  %v1609_v25 = vpop.f32.mrb[11].mxu1  ;;  %2307 = vmatprep.mubr.bf16.mxu0 %v1891_v31  ;;  %2849 = vmatprep.mubr.bf16.mxu1 %v1891_v31  ;;  %v1738_v33 = vmax.f32 %v1431_v14, 0.0  ;;  %v1740_v37 = vmax.f32 %v1604_v15, 0.0  ;;  %v15057_v15 = vld [vmem:[#allocation10 + $0x130] ss:$8 sps:$4 sm:$0xff]  }
 0x2f3   :  { %v1437_v28 = vadd.f32 %v1436_v24, %v17714_v3  ;;  %v1610_v29 = vadd.f32 %v1609_v25, %v17717_v5  ;;  %2308 = vmatmul.mubr.bf16.vlgmr.msra.gmra.mrb[56].mxu0 %v1890_v6  ;;  %2850 = vmatmul.mubr.bf16.vlgmr.msra.gmra.mrb[56].mxu1 %v1890_v6  ;;  %v1739_v44 = vmax.f32 %v1433_v20, 0.0  ;;  %v1741_v40 = vmax.f32 %v1606_v63, 0.0 }
 0x2f4   :  { %v1742_v34 = vmax.f32 %v1435_v1, 0.0  ;;  %v1744_v35 = vmax.f32 %v1608_v23, 0.0  ;;  %2379 = vmatpush1.bf16.msra.mxu0 %v15039_v19  ;;  %2921 = vmatpush1.bf16.msra.mxu1 %v15042_v27  ;;  %v15060_v27 = vld [vmem:[#allocation12 + $0x130] ss:$8 sps:$4 sm:$0xff]   ;;  %v15068_v23 = vld [vmem:[#allocation12 + $0x144] ss:$8 sps:$4 sm:$0xff]  }
 0x2f5   :  { %v1743_v8 = vmax.f32 %v1437_v28, 0.0  ;;  %v1745_v41 = vmax.f32 %v1610_v29, 0.0  ;;  %2380 = vmatprep.subr.bf16.mxu0 %v15047_v22  ;;  %2922 = vmatprep.subr.bf16.mxu1 %v15050_v2  ;;  %v15065_v22 = vld [vmem:[#allocation10 + $0x144] ss:$8 sps:$4 sm:$0xff]  }
 0x2f6   :  { %v1842_v11 = vmax.f32 %v1738_v33, %v1742_v34  ;;  %v17747_v38 = vmax.f32 %v1740_v37, %v1744_v35 }
 0x2f7   :  { %v1843_v39 = vmax.f32 %v1739_v44, %v1743_v8  ;;  %v1845_v45 = vmax.f32 %v1741_v40, %v1745_v41  ;;  %v1440_v48 = vpop.f32.mrb[12].mxu0  ;;  %v1613_v49 = vpop.f32.mrb[12].mxu1 }
 0x2f8   :  { %v1441_v10 = vadd.f32 %v1440_v48, %v17708_v60  ;;  %v1614_v50 = vadd.f32 %v1613_v49, %v17711_v61  ;;  %v1442_v42 = vpop.f32.mrb[13].mxu0  ;;  %v1615_v51 = vpop.f32.mrb[13].mxu1  ;;  %2381 = vmatpush1.bf16.msra.mxu0 %v15045_v30  ;;  %2923 = vmatpush1.bf16.msra.mxu1 %v15048_v32  ;;  %v15066_v48 = vld [vmem:[#allocation12 + $0x140] ss:$8 sps:$4 sm:$0xff]  }
 0x2f9   :  { %v1443_v0 = vadd.f32 %v1442_v42, %v17714_v3  ;;  %v1616_v4 = vadd.f32 %v1615_v51, %v17717_v5  ;;  %v1444_v46 = vpop.f32.mrb[14].mxu0  ;;  %v1617_v18 = vpop.f32.mrb[14].mxu1  ;;  %2382 = vmatprep.subr.bf16.mxu0 %v15053_v36  ;;  %2924 = vmatprep.subr.bf16.mxu1 %v15056_v43  ;;  %v15063_v43 = vld [vmem:[#allocation10 + $0x140] ss:$8 sps:$4 sm:$0xff]   ;;  %v15071_v42 = vld [vmem:[#allocation10 + $0x154] ss:$8 sps:$4 sm:$0xff]  }
 0x2fa   :  { %v1445_v54 = vadd.f32 %v1444_v46, %v17708_v60  ;;  %v1618_v57 = vadd.f32 %v1617_v18, %v17711_v61  ;;  %v1446_v6 = vpop.f32.mrb[15].mxu0  ;;  %v1619_v9 = vpop.f32.mrb[15].mxu1  ;;  %v1746_v16 = vmax.f32 %v1441_v10, 0.0  ;;  %v1748_v17 = vmax.f32 %v1614_v50, 0.0  ;;  %v15069_v46 = vld [vmem:[#allocation10 + $0x150] ss:$8 sps:$4 sm:$0xff]  }
 0x2fb   :  { %v1447_v12 = vadd.f32 %v1446_v6, %v17714_v3  ;;  %v1620_v14 = vadd.f32 %v1619_v9, %v17717_v5  ;;  %v1747_v20 = vmax.f32 %v1443_v0, 0.0  ;;  %v1749_v63 = vmax.f32 %v1616_v4, 0.0  ;;  %v15072_v6 = vld [vmem:[#allocation12 + $0x150] ss:$8 sps:$4 sm:$0xff]  }
 0x2fc   :  { %v1750_v31 = vmax.f32 %v1445_v54, 0.0  ;;  %v1752_v19 = vmax.f32 %v1618_v57, 0.0  ;;  %2383 = vmatpush1.bf16.msra.mxu0 %v15051_v52  ;;  %2925 = vmatpush1.bf16.msra.mxu1 %v15054_v47 }
 0x2fd   :  { %v1751_v21 = vmax.f32 %v1447_v12, 0.0  ;;  %v1753_v62 = vmax.f32 %v1620_v14, 0.0  ;;  %2384 = vmatprep.subr.bf16.mxu0 %v15059_v26  ;;  %2926 = vmatprep.subr.bf16.mxu1 %v15062_v53  ;;  %v15077_v14 = vld [vmem:[#allocation10 + $0x164] ss:$8 sps:$4 sm:$0xff]  }
 0x2fe   :  { %v1846_v2 = vmax.f32 %v1746_v16, %v1750_v31  ;;  %v1848_v1 = vmax.f32 %v1748_v17, %v1752_v19 }
 0x2ff   :  { %v1847_v24 = vmax.f32 %v1747_v20, %v1751_v21  ;;  %v1849_v25 = vmax.f32 %v1749_v63, %v1753_v62  ;;  %v1450_v28 = vpop.f32.mrb[16].mxu0  ;;  %v1623_v29 = vpop.f32.mrb[16].mxu1 }
 0x300   :  { %v1451_v30 = vadd.f32 %v1450_v28, %v17708_v60  ;;  %v1624_v32 = vadd.f32 %v1623_v29, %v17711_v61  ;;  %v1452_v33 = vpop.f32.mrb[17].mxu0  ;;  %v1625_v37 = vpop.f32.mrb[17].mxu1  ;;  %v1894_v34 = vpack.c.bf16 %v1846_v2, %v1842_v11  ;;  %2385 = vmatpush1.bf16.msra.mxu0 %v15057_v15  ;;  %2927 = vmatpush1.bf16.msra.mxu1 %v15060_v27  ;;  %v15080_v15 = vld [vmem:[#allocation12 + $0x164] ss:$8 sps:$4 sm:$0xff]  }
 0x301   :  { %v17759_v35 = vpack.c.bf16 %v1849_v25, %v1845_v45  ;;  %v1453_v36 = vadd.f32 %v1452_v33, %v17714_v3  ;;  %v1626_v44 = vadd.f32 %v1625_v37, %v17717_v5  ;;  %v1454_v40 = vpop.f32.mrb[18].mxu0  ;;  %v1627_v8 = vpop.f32.mrb[18].mxu1  ;;  %v1895_v41 = vpack.c.bf16 %v1847_v24, %v1843_v39  ;;  %2386 = vmatprep.subr.bf16.mxu0 %v15065_v22  ;;  %v15074_v45 = vld [vmem:[#allocation12 + $0x154] ss:$8 sps:$4 sm:$0xff]  }
 0x302   :  { %v1455_v49 = vadd.f32 %v1454_v40, %v17708_v60  ;;  %v1628_v10 = vadd.f32 %v1627_v8, %v17711_v61  ;;  %v1456_v50 = vpop.f32.mrb[19].mxu0  ;;  %v1629_v11 = vpop.f32.mrb[19].mxu1  ;;  %2928 = vmatprep.subr.bf16.mxu1 %v15068_v23  ;;  %v1754_v51 = vmax.f32 %v1451_v30, 0.0  ;;  %v1756_v39 = vmax.f32 %v1624_v32, 0.0  ;;  %v15078_v23 = vld [vmem:[#allocation12 + $0x160] ss:$8 sps:$4 sm:$0xff]  }
 0x303   :  { %v1457_v52 = vadd.f32 %v1456_v50, %v17714_v3  ;;  %v1630_v47 = vadd.f32 %v1629_v11, %v17717_v5  ;;  %2317 = vmatprep.mubr.bf16.mxu0 %v1895_v41  ;;  %2859 = vmatprep.mubr.bf16.mxu1 %v1895_v41  ;;  %v17768_v18 = vpack.c.bf16 %v1848_v1, %v17747_v38  ;;  %v1755_v26 = vmax.f32 %v1453_v36, 0.0  ;;  %v15075_v1 = vld [vmem:[#allocation10 + $0x160] ss:$8 sps:$4 sm:$0xff]   ;;  %v15083_v30 = vld [vmem:[#allocation10 + $0x174] ss:$8 sps:$4 sm:$0xff]  }
 0x304   :  { %v1758_v0 = vmax.f32 %v1455_v49, 0.0  ;;  %v1760_v4 = vmax.f32 %v1628_v10, 0.0  ;;  %2318 = vmatmul.mubr.bf16.gmra.mrb[60].mxu0 %v1894_v34  ;;  %2860 = vmatmul.mubr.bf16.gmra.mrb[60].mxu1 %v1894_v34  ;;  %v1757_v53 = vmax.f32 %v1626_v44, 0.0  ;;  %v15086_v32 = vld [vmem:[#allocation12 + $0x174] ss:$8 sps:$4 sm:$0xff]  }
 0x305   :  { %v1759_v54 = vmax.f32 %v1457_v52, 0.0  ;;  %v1761_v57 = vmax.f32 %v1630_v47, 0.0  ;;  %2387 = vmatpush1.bf16.msra.mxu0 %v15063_v43  ;;  %2929 = vmatpush1.bf16.msra.mxu1 %v15066_v48  ;;  %v15081_v49 = vld [vmem:[#allocation10 + $0x170] ss:$8 sps:$4 sm:$0xff]  }
 0x306   :  { %v1850_v9 = vmax.f32 %v1754_v51, %v1758_v0  ;;  %v1852_v12 = vmax.f32 %v1756_v39, %v1760_v4  ;;  %2388 = vmatprep.subr.bf16.mxu0 %v15071_v42  ;;  %2930 = vmatprep.subr.bf16.mxu1 %v15074_v45  ;;  %v15084_v11 = vld [vmem:[#allocation12 + $0x170] ss:$8 sps:$4 sm:$0xff]   ;;  %v15089_v42 = vld [vmem:[#allocation10 + $0x184] ss:$8 sps:$4 sm:$0xff]  }
 0x307   :  { %v1851_v16 = vmax.f32 %v1755_v26, %v1759_v54  ;;  %v1853_v17 = vmax.f32 %v1757_v53, %v1761_v57  ;;  %v1460_v31 = vpop.f32.mrb[20].mxu0  ;;  %v1633_v19 = vpop.f32.mrb[20].mxu1 }
 0x308   :  { %v1461_v38 = vadd.f32 %v1460_v31, %v17708_v60  ;;  %v1634_v27 = vadd.f32 %v1633_v19, %v17711_v61  ;;  %v1462_v20 = vpop.f32.mrb[21].mxu0  ;;  %v1635_v63 = vpop.f32.mrb[21].mxu1  ;;  %v15087_v19 = vld [vmem:[#allocation10 + $0x180] ss:$8 sps:$4 sm:$0xff]  }
 0x309   :  { %v1463_v21 = vadd.f32 %v1462_v20, %v17714_v3  ;;  %v1636_v62 = vadd.f32 %v1635_v63, %v17717_v5  ;;  %v1464_v22 = vpop.f32.mrb[22].mxu0  ;;  %v1637_v2 = vpop.f32.mrb[22].mxu1  ;;  %2389 = vmatpush1.bf16.msra.mxu0 %v15069_v46  ;;  %2931 = vmatpush1.bf16.msra.mxu1 %v15072_v6 }
 0x30a   :  { %v1465_v24 = vadd.f32 %v1464_v22, %v17708_v60  ;;  %v1638_v25 = vadd.f32 %v1637_v2, %v17711_v61  ;;  %v1466_v28 = vpop.f32.mrb[23].mxu0  ;;  %v1639_v29 = vpop.f32.mrb[23].mxu1  ;;  %2390 = vmatprep.subr.bf16.mxu0 %v15077_v14  ;;  %2932 = vmatprep.subr.bf16.mxu1 %v15080_v15  ;;  %v1762_v34 = vmax.f32 %v1461_v38, 0.0  ;;  %v1764_v36 = vmax.f32 %v1634_v27, 0.0  ;;  %v15092_v38 = vld [vmem:[#allocation12 + $0x184] ss:$8 sps:$4 sm:$0xff]  }
 0x30b   :  { %v1467_v33 = vadd.f32 %v1466_v28, %v17714_v3  ;;  %v1640_v37 = vadd.f32 %v1639_v29, %v17717_v5  ;;  %v1763_v8 = vmax.f32 %v1463_v21, 0.0  ;;  %v1765_v41 = vmax.f32 %v1636_v62, 0.0 }
 0x30c   :  { %v1766_v44 = vmax.f32 %v1465_v24, 0.0  ;;  %v1768_v40 = vmax.f32 %v1638_v25, 0.0 }
 0x30d   :  { %v1767_v43 = vmax.f32 %v1467_v33, 0.0  ;;  %v1769_v48 = vmax.f32 %v1640_v37, 0.0  ;;  %2391 = vmatpush1.bf16.msra.mxu0 %v15075_v1  ;;  %2933 = vmatpush1.bf16.msra.mxu1 %v15078_v23  ;;  %v15096_v37 = vld [vmem:[#allocation12 + $0x190] ss:$8 sps:$4 sm:$0xff]  }
 0x30e   :  { %v1854_v10 = vmax.f32 %v1762_v34, %v1766_v44  ;;  %v1856_v50 = vmax.f32 %v1764_v36, %v1768_v40  ;;  %2392 = vmatprep.subr.bf16.mxu0 %v15083_v30  ;;  %2934 = vmatprep.subr.bf16.mxu1 %v15086_v32  ;;  %v15093_v30 = vld [vmem:[#allocation10 + $0x190] ss:$8 sps:$4 sm:$0xff]   ;;  %v15101_v34 = vld [vmem:[#allocation10 + $0x1a4] ss:$8 sps:$4 sm:$0xff]  }
 0x30f   :  { %v1855_v45 = vmax.f32 %v1763_v8, %v1767_v43  ;;  %v1857_v51 = vmax.f32 %v1765_v41, %v1769_v48  ;;  %v1470_v52 = vpop.f32.mrb[24].mxu0  ;;  %v1643_v47 = vpop.f32.mrb[24].mxu1  ;;  %v15104_v41 = vld [vmem:[#allocation12 + $0x1a4] ss:$8 sps:$4 sm:$0xff]  }
 0x310   :  { %v1471_v39 = vadd.f32 %v1470_v52, %v17708_v60  ;;  %v1644_v0 = vadd.f32 %v1643_v47, %v17711_v61  ;;  %v1472_v4 = vpop.f32.mrb[25].mxu0  ;;  %v1645_v46 = vpop.f32.mrb[25].mxu1  ;;  %v1898_v26 = vpack.c.bf16 %v1854_v10, %v1850_v9  ;;  %v17780_v53 = vpack.c.bf16 %v1856_v50, %v1852_v12  ;;  %v15090_v12 = vld [vmem:[#allocation12 + $0x180] ss:$8 sps:$4 sm:$0xff]  }
 0x311   :  { %v17782_v54 = vpack.c.bf16 %v1857_v51, %v1853_v17  ;;  %v1473_v57 = vadd.f32 %v1472_v4, %v17714_v3  ;;  %v1646_v6 = vadd.f32 %v1645_v46, %v17717_v5  ;;  %v1474_v14 = vpop.f32.mrb[26].mxu0  ;;  %v1647_v15 = vpop.f32.mrb[26].mxu1  ;;  %v1899_v31 = vpack.c.bf16 %v1855_v45, %v1851_v16  ;;  %2393 = vmatpush1.bf16.msra.mxu0 %v15081_v49  ;;  %v15095_v17 = vld [vmem:[#allocation10 + $0x194] ss:$8 sps:$4 sm:$0xff]   ;;  %v15099_v51 = vld [vmem:[#allocation10 + $0x1a0] ss:$8 sps:$4 sm:$0xff]  }
 0x312   :  { %v1475_v27 = vadd.f32 %v1474_v14, %v17708_v60  ;;  %v1648_v20 = vadd.f32 %v1647_v15, %v17711_v61  ;;  %v1476_v63 = vpop.f32.mrb[27].mxu0  ;;  %v1649_v9 = vpop.f32.mrb[27].mxu1  ;;  %2935 = vmatpush1.bf16.msra.mxu1 %v15084_v11  ;;  %2394 = vmatprep.subr.bf16.mxu0 %v15089_v42  ;;  %v15098_v16 = vld [vmem:[#allocation12 + $0x194] ss:$8 sps:$4 sm:$0xff]   ;;  %v1770_v22 = vmax.f32 %v1471_v39, 0.0  ;;  %v1772_v2 = vmax.f32 %v1644_v0, 0.0 }
 0x313   :  { %v1477_v21 = vadd.f32 %v1476_v63, %v17714_v3  ;;  %v1650_v62 = vadd.f32 %v1649_v9, %v17717_v5  ;;  %2327 = vmatprep.mubr.bf16.mxu0 %v1899_v31  ;;  %2869 = vmatprep.mubr.bf16.mxu1 %v1899_v31  ;;  %v1771_v24 = vmax.f32 %v1473_v57, 0.0  ;;  %v1773_v25 = vmax.f32 %v1646_v6, 0.0  ;;  %v15102_v4 = vld [vmem:[#allocation12 + $0x1a0] ss:$8 sps:$4 sm:$0xff]   ;;  %v15107_v46 = vld [vmem:[#allocation10 + $0x1b4] ss:$8 sps:$4 sm:$0xff]  }
 0x314   :  { %v1774_v1 = vmax.f32 %v1475_v27, 0.0  ;;  %v1776_v23 = vmax.f32 %v1648_v20, 0.0  ;;  %2328 = vmatmul.mubr.bf16.gmra.mrb[64].mxu0 %v1898_v26  ;;  %2870 = vmatmul.mubr.bf16.gmra.mrb[64].mxu1 %v1898_v26  ;;  %v15110_v6 = vld [vmem:[#allocation12 + $0x1b4] ss:$8 sps:$4 sm:$0xff]   ;;  %v15105_v9 = vld [vmem:[#allocation10 + $0x1b0] ss:$8 sps:$4 sm:$0xff]  }
 0x315   :  { %v1775_v28 = vmax.f32 %v1477_v21, 0.0  ;;  %v1777_v29 = vmax.f32 %v1650_v62, 0.0  ;;  %2936 = vmatprep.subr.bf16.mxu1 %v15092_v38  ;;  %2395 = vmatpush1.bf16.msra.mxu0 %v15087_v19  ;;  %v15108_v21 = vld [vmem:[#allocation12 + $0x1b0] ss:$8 sps:$4 sm:$0xff]  }
 0x316   :  { %v1858_v32 = vmax.f32 %v1770_v22, %v1774_v1  ;;  %v1860_v33 = vmax.f32 %v1772_v2, %v1776_v23  ;;  %2937 = vmatpush1.bf16.msra.mxu1 %v15090_v12  ;;  %2396 = vmatprep.subr.bf16.mxu0 %v15095_v17 }
 0x317   :  { %v1859_v36 = vmax.f32 %v1771_v24, %v1775_v28  ;;  %v1861_v44 = vmax.f32 %v1773_v25, %v1777_v29  ;;  %v1480_v40 = vpop.f32.mrb[28].mxu0  ;;  %v1653_v8 = vpop.f32.mrb[28].mxu1  ;;  %2938 = vmatprep.subr.bf16.mxu1 %v15098_v16 }
 0x318   :  { %v1481_v43 = vadd.f32 %v1480_v40, %v17708_v60  ;;  %v1654_v48 = vadd.f32 %v1653_v8, %v17711_v61  ;;  %v1482_v49 = vpop.f32.mrb[29].mxu0  ;;  %v1655_v10 = vpop.f32.mrb[29].mxu1 }
 0x319   :  { %v1483_v50 = vadd.f32 %v1482_v49, %v17714_v3  ;;  %v1656_v11 = vadd.f32 %v1655_v10, %v17717_v5  ;;  %v1484_v42 = vpop.f32.mrb[30].mxu0  ;;  %v1657_v45 = vpop.f32.mrb[30].mxu1  ;;  %2397 = vmatpush1.bf16.msra.mxu0 %v15093_v30 }
 0x31a   :  { %v1485_v52 = vadd.f32 %v1484_v42, %v17708_v60  ;;  %v1658_v47 = vadd.f32 %v1657_v45, %v17711_v61  ;;  %v1486_v39 = vpop.f32.mrb[31].mxu0  ;;  %v1659_v0 = vpop.f32.mrb[31].mxu1  ;;  %2939 = vmatpush1.bf16.msra.mxu1 %v15096_v37  ;;  %2398 = vmatprep.subr.bf16.mxu0 %v15101_v34  ;;  %v1778_v14 = vmax.f32 %v1481_v43, 0.0  ;;  %v1780_v15 = vmax.f32 %v1654_v48, 0.0 }
 0x31b   :  { %v1487_v26 = vadd.f32 %v1486_v39, %v17714_v3  ;;  %v1660_v57 = vadd.f32 %v1659_v0, %v17717_v5  ;;  %2940 = vmatprep.subr.bf16.mxu1 %v15104_v41  ;;  %v1779_v38 = vmax.f32 %v1483_v50, 0.0  ;;  %v1781_v27 = vmax.f32 %v1656_v11, 0.0 }
 0x31c   :  { %v1782_v31 = vmax.f32 %v1485_v52, 0.0  ;;  %v1784_v19 = vmax.f32 %v1658_v47, 0.0 }
 0x31d   :  { %v1783_v20 = vmax.f32 %v1487_v26, 0.0  ;;  %v1785_v63 = vmax.f32 %v1660_v57, 0.0  ;;  %2399 = vmatpush1.bf16.msra.mxu0 %v15099_v51 }
 0x31e   :  { %v1862_v12 = vmax.f32 %v1778_v14, %v1782_v31  ;;  %v1864_v17 = vmax.f32 %v1780_v15, %v1784_v19  ;;  %2941 = vmatpush1.bf16.msra.mxu1 %v15102_v4  ;;  %2400 = vmatprep.subr.bf16.mxu0 %v15107_v46 }
 0x31f   :  { %v1863_v62 = vmax.f32 %v1779_v38, %v1783_v20  ;;  %v1865_v16 = vmax.f32 %v1781_v27, %v1785_v63  ;;  %v1490_v22 = vpop.f32.mrb[32].mxu0  ;;  %v1663_v2 = vpop.f32.mrb[32].mxu1  ;;  %2942 = vmatprep.subr.bf16.mxu1 %v15110_v6 }
 0x320   :  { %v1491_v1 = vadd.f32 %v1490_v22, %v17708_v60  ;;  %v1664_v23 = vadd.f32 %v1663_v2, %v17711_v61  ;;  %v1492_v24 = vpop.f32.mrb[33].mxu0  ;;  %v1665_v25 = vpop.f32.mrb[33].mxu1  ;;  %v1902_v28 = vpack.c.bf16 %v1862_v12, %v1858_v32  ;;  %v17800_v29 = vpack.c.bf16 %v1864_v17, %v1860_v33 }
 0x321   :  { %v17802_v30 = vpack.c.bf16 %v1865_v16, %v1861_v44  ;;  %v1493_v37 = vadd.f32 %v1492_v24, %v17714_v3  ;;  %v1666_v34 = vadd.f32 %v1665_v25, %v17717_v5  ;;  %v1494_v40 = vpop.f32.mrb[34].mxu0  ;;  %v1667_v8 = vpop.f32.mrb[34].mxu1  ;;  %v1903_v41 = vpack.c.bf16 %v1863_v62, %v1859_v36  ;;  %2401 = vmatpush1.bf16.msra.mxu0 %v15105_v9 }
 0x322   :  { %v1495_v43 = vadd.f32 %v1494_v40, %v17708_v60  ;;  %v1668_v48 = vadd.f32 %v1667_v8, %v17711_v61  ;;  %v1496_v49 = vpop.f32.mrb[35].mxu0  ;;  %v1669_v10 = vpop.f32.mrb[35].mxu1  ;;  %2943 = vmatpush1.bf16.msra.mxu1 %v15108_v21  ;;  %v1786_v44 = vmax.f32 %v1491_v1, 0.0  ;;  %v1788_v50 = vmax.f32 %v1664_v23, 0.0 }
 0x323   :  { %v1497_v32 = vadd.f32 %v1496_v49, %v17714_v3  ;;  %v1670_v33 = vadd.f32 %v1669_v10, %v17717_v5  ;;  %2337 = vmatprep.mubr.bf16.mxu0 %v1903_v41  ;;  %2879 = vmatprep.mubr.bf16.mxu1 %v1903_v41  ;;  %v1787_v36 = vmax.f32 %v1493_v37, 0.0  ;;  %v1789_v45 = vmax.f32 %v1666_v34, 0.0 }
 0x324   :  { %v1790_v11 = vmax.f32 %v1495_v43, 0.0  ;;  %v1792_v42 = vmax.f32 %v1668_v48, 0.0  ;;  %2338 = vmatmul.mubr.bf16.gmra.mrb[68].mxu0 %v1902_v28  ;;  %2880 = vmatmul.mubr.bf16.gmra.mrb[68].mxu1 %v1902_v28 }
 0x325   :  { %v1791_v51 = vmax.f32 %v1497_v32, 0.0  ;;  %v1793_v52 = vmax.f32 %v1670_v33, 0.0 }
 0x326   :  { %v1866_v47 = vmax.f32 %v1786_v44, %v1790_v11  ;;  %v1868_v39 = vmax.f32 %v1788_v50, %v1792_v42 }
 0x327   :  { %v1867_v0 = vmax.f32 %v1787_v36, %v1791_v51  ;;  %v1869_v4 = vmax.f32 %v1789_v45, %v1793_v52  ;;  %v1500_v46 = vpop.f32.mrb[36].mxu0  ;;  %v1673_v26 = vpop.f32.mrb[36].mxu1 }
 0x328   :  { %v1501_v57 = vadd.f32 %v1500_v46, %v17708_v60  ;;  %v1674_v6 = vadd.f32 %v1673_v26, %v17711_v61  ;;  %v1502_v14 = vpop.f32.mrb[37].mxu0  ;;  %v1675_v15 = vpop.f32.mrb[37].mxu1 }
 0x329   :  { %v1503_v31 = vadd.f32 %v1502_v14, %v17714_v3  ;;  %v1676_v19 = vadd.f32 %v1675_v15, %v17717_v5  ;;  %v1504_v38 = vpop.f32.mrb[38].mxu0  ;;  %v1677_v27 = vpop.f32.mrb[38].mxu1 }
 0x32a   :  { %v1505_v20 = vadd.f32 %v1504_v38, %v17708_v60  ;;  %v1678_v63 = vadd.f32 %v1677_v27, %v17711_v61  ;;  %v1506_v9 = vpop.f32.mrb[39].mxu0  ;;  %v1679_v12 = vpop.f32.mrb[39].mxu1  ;;  %v1794_v62 = vmax.f32 %v1501_v57, 0.0  ;;  %v1796_v16 = vmax.f32 %v1674_v6, 0.0 }
 0x32b   :  { %v1507_v17 = vadd.f32 %v1506_v9, %v17714_v3  ;;  %v1680_v21 = vadd.f32 %v1679_v12, %v17717_v5  ;;  %v1795_v1 = vmax.f32 %v1503_v31, 0.0  ;;  %v1797_v23 = vmax.f32 %v1676_v19, 0.0 }
 0x32c   :  { %v1798_v22 = vmax.f32 %v1505_v20, 0.0  ;;  %v1800_v2 = vmax.f32 %v1678_v63, 0.0 }
 0x32d   :  { %v1799_v24 = vmax.f32 %v1507_v17, 0.0  ;;  %v1801_v25 = vmax.f32 %v1680_v21, 0.0 }
 0x32e   :  { %v1870_v28 = vmax.f32 %v1794_v62, %v1798_v22  ;;  %v1872_v37 = vmax.f32 %v1796_v16, %v1800_v2 }
 0x32f   :  { %v1871_v34 = vmax.f32 %v1795_v1, %v1799_v24  ;;  %v1873_v40 = vmax.f32 %v1797_v23, %v1801_v25  ;;  %v1510_v8 = vpop.f32.mrb[40].mxu0  ;;  %v1683_v41 = vpop.f32.mrb[40].mxu1 }
 0x330   :  { %v1511_v43 = vadd.f32 %v1510_v8, %v17708_v60  ;;  %v1684_v48 = vadd.f32 %v1683_v41, %v17711_v61  ;;  %v1512_v49 = vpop.f32.mrb[41].mxu0  ;;  %v1685_v10 = vpop.f32.mrb[41].mxu1  ;;  %v1906_v32 = vpack.c.bf16 %v1870_v28, %v1866_v47  ;;  %v17820_v33 = vpack.c.bf16 %v1872_v37, %v1868_v39 }
 0x331   :  { %v17822_v44 = vpack.c.bf16 %v1873_v40, %v1869_v4  ;;  %v1513_v50 = vadd.f32 %v1512_v49, %v17714_v3  ;;  %v1686_v11 = vadd.f32 %v1685_v10, %v17717_v5  ;;  %v1514_v42 = vpop.f32.mrb[42].mxu0  ;;  %v1687_v36 = vpop.f32.mrb[42].mxu1  ;;  %v1907_v45 = vpack.c.bf16 %v1871_v34, %v1867_v0 }
 0x332   :  { %v1515_v51 = vadd.f32 %v1514_v42, %v17708_v60  ;;  %v1688_v52 = vadd.f32 %v1687_v36, %v17711_v61  ;;  %v1516_v46 = vpop.f32.mrb[43].mxu0  ;;  %v1689_v26 = vpop.f32.mrb[43].mxu1  ;;  %v1802_v39 = vmax.f32 %v1511_v43, 0.0  ;;  %v1804_v4 = vmax.f32 %v1684_v48, 0.0 }
 0x333   :  { %v1517_v57 = vadd.f32 %v1516_v46, %v17714_v3  ;;  %v1690_v47 = vadd.f32 %v1689_v26, %v17717_v5  ;;  %2347 = vmatprep.mubr.bf16.mxu0 %v1907_v45  ;;  %2889 = vmatprep.mubr.bf16.mxu1 %v1907_v45  ;;  %v1803_v15 = vmax.f32 %v1513_v50, 0.0  ;;  %v1805_v0 = vmax.f32 %v1686_v11, 0.0 }
 0x334   :  { %v1806_v6 = vmax.f32 %v1515_v51, 0.0  ;;  %v1808_v14 = vmax.f32 %v1688_v52, 0.0  ;;  %2348 = vmatmul.mubr.bf16.gmra.mrb[72].mxu0 %v1906_v32  ;;  %2890 = vmatmul.mubr.bf16.gmra.mrb[72].mxu1 %v1906_v32 }
 0x335   :  { %v1807_v31 = vmax.f32 %v1517_v57, 0.0  ;;  %v1809_v19 = vmax.f32 %v1690_v47, 0.0 }
 0x336   :  { %v1874_v38 = vmax.f32 %v1802_v39, %v1806_v6  ;;  %v1876_v27 = vmax.f32 %v1804_v4, %v1808_v14 }
 0x337   :  { %v1875_v20 = vmax.f32 %v1803_v15, %v1807_v31  ;;  %v1877_v63 = vmax.f32 %v1805_v0, %v1809_v19 }
 0x367   :  { %v1520_v9 = vpop.f32.mrb[44].mxu0  ;;  %v1693_v12 = vpop.f32.mrb[44].mxu1 }
 0x368   :  { %v1521_v17 = vadd.f32 %v1520_v9, %v17708_v60  ;;  %v1694_v21 = vadd.f32 %v1693_v12, %v17711_v61  ;;  %v1522_v62 = vpop.f32.mrb[45].mxu0  ;;  %v1695_v16 = vpop.f32.mrb[45].mxu1 }
 0x369   :  { %v1523_v22 = vadd.f32 %v1522_v62, %v17714_v3  ;;  %v1696_v2 = vadd.f32 %v1695_v16, %v17717_v5  ;;  %v1524_v1 = vpop.f32.mrb[46].mxu0  ;;  %v1697_v23 = vpop.f32.mrb[46].mxu1 }
 0x36a   :  { %v1525_v24 = vadd.f32 %v1524_v1, %v17708_v60  ;;  %v1698_v25 = vadd.f32 %v1697_v23, %v17711_v61  ;;  %v1526_v28 = vpop.f32.mrb[47].mxu0  ;;  %v1699_v37 = vpop.f32.mrb[47].mxu1  ;;  %v1810_v8 = vmax.f32 %v1521_v17, 0.0  ;;  %v1812_v41 = vmax.f32 %v1694_v21, 0.0 }
 0x36b   :  { %v1527_v34 = vadd.f32 %v1526_v28, %v17714_v3  ;;  %v1700_v40 = vadd.f32 %v1699_v37, %v17717_v5  ;;  %v1811_v49 = vmax.f32 %v1523_v22, 0.0  ;;  %v1813_v10 = vmax.f32 %v1696_v2, 0.0 }
 0x36c   :  { %v1814_v43 = vmax.f32 %v1525_v24, 0.0  ;;  %v1816_v48 = vmax.f32 %v1698_v25, 0.0 }
 0x36d   :  { %v1815_v32 = vmax.f32 %v1527_v34, 0.0  ;;  %v1817_v50 = vmax.f32 %v1700_v40, 0.0 }
 0x36e   :  { %v1878_v11 = vmax.f32 %v1810_v8, %v1814_v43  ;;  %v1880_v42 = vmax.f32 %v1812_v41, %v1816_v48 }
 0x36f   :  { %v1879_v36 = vmax.f32 %v1811_v49, %v1815_v32  ;;  %v1881_v45 = vmax.f32 %v1813_v10, %v1817_v50 }
 0x370   :  { %v1910_v51 = vpack.c.bf16 %v1878_v11, %v1874_v38  ;;  %v17838_v52 = vpack.c.bf16 %v1880_v42, %v1876_v27 }
 0x371   :  { %v17840_v46 = vpack.c.bf16 %v1881_v45, %v1877_v63  ;;  %v1911_v26 = vpack.c.bf16 %v1879_v36, %v1875_v20 }
 0x373   :  { %2357 = vmatprep.mubr.bf16.mxu0 %v1911_v26  ;;  %2899 = vmatprep.mubr.bf16.mxu1 %v1911_v26 }
 0x374   :  { %2358 = vmatmul.mubr.bf16.gmra.mrb[76].mxu0 %v1910_v51  ;;  %2900 = vmatmul.mubr.bf16.gmra.mrb[76].mxu1 %v1910_v51 }
 0x375   :  { %v1530_v57 = vpop.f32.mrb[48].mxu0  ;;  %v1703_v47 = vpop.f32.mrb[48].mxu1 }
 0x376   :  { %v1531_v39 = vadd.f32 %v1530_v57, %v17708_v60  ;;  %v1704_v4 = vadd.f32 %v1703_v47, %v17711_v61  ;;  %v1532_v6 = vpop.f32.mrb[49].mxu0  ;;  %v1705_v14 = vpop.f32.mrb[49].mxu1 }
 0x377   :  { %v1533_v15 = vadd.f32 %v1532_v6, %v17714_v3  ;;  %v1706_v0 = vadd.f32 %v1705_v14, %v17717_v5  ;;  %v1534_v31 = vpop.f32.mrb[50].mxu0  ;;  %v1707_v19 = vpop.f32.mrb[50].mxu1 }
 0x378   :  { %v1535_v38 = vadd.f32 %v1534_v31, %v17708_v60  ;;  %v1708_v27 = vadd.f32 %v1707_v19, %v17711_v61  ;;  %v1536_v20 = vpop.f32.mrb[51].mxu0  ;;  %v1709_v63 = vpop.f32.mrb[51].mxu1  ;;  %v1818_v17 = vmax.f32 %v1531_v39, 0.0  ;;  %v1820_v21 = vmax.f32 %v1704_v4, 0.0 }
 0x379   :  { %v1537_v9 = vadd.f32 %v1536_v20, %v17714_v3  ;;  %v1710_v12 = vadd.f32 %v1709_v63, %v17717_v5  ;;  %v1819_v22 = vmax.f32 %v1533_v15, 0.0  ;;  %v1821_v2 = vmax.f32 %v1706_v0, 0.0 }
 0x37a   :  { %v1822_v62 = vmax.f32 %v1535_v38, 0.0  ;;  %v1824_v16 = vmax.f32 %v1708_v27, 0.0 }
 0x37b   :  { %v1823_v1 = vmax.f32 %v1537_v9, 0.0  ;;  %v1825_v23 = vmax.f32 %v1710_v12, 0.0  ;;  %v15129_v9 = vld [vmem:[#allocation13 + $0x2a0] ss:$16 sps:$4 sm:$0xff]   ;;  %v15132_v12 = vld [vmem:[#allocation13 + $0x2a8] ss:$16 sps:$4 sm:$0xff]  }
 0x37c   :  { %v1882_v24 = vmax.f32 %v1818_v17, %v1822_v62  ;;  %v1884_v25 = vmax.f32 %v1820_v21, %v1824_v16  ;;  %v15137_v17 = vld [vmem:[#allocation13 + $0x2c4] ss:$16 sps:$4 sm:$0xff]   ;;  %v15140_v21 = vld [vmem:[#allocation13 + $0x2cc] ss:$16 sps:$4 sm:$0xff]   ;;  %v15135_v62 = vld [vmem:[#allocation13 + $0x2c0] ss:$16 sps:$4 sm:$0xff]  }
 0x37d   :  { %v1883_v28 = vmax.f32 %v1819_v22, %v1823_v1  ;;  %v1885_v37 = vmax.f32 %v1821_v2, %v1825_v23  ;;  %v15138_v16 = vld [vmem:[#allocation13 + $0x2c8] ss:$16 sps:$4 sm:$0xff]   ;;  %v15143_v22 = vld [vmem:[#allocation13 + $0x2e4] ss:$16 sps:$4 sm:$0xff]   ;;  %v15146_v2 = vld [vmem:[#allocation13 + $0x2ec] ss:$16 sps:$4 sm:$0xff]  }
 0x37e   :  { %v15141_v1 = vld [vmem:[#allocation13 + $0x2e0] ss:$16 sps:$4 sm:$0xff]   ;;  %v15144_v23 = vld [vmem:[#allocation13 + $0x2e8] ss:$16 sps:$4 sm:$0xff]  }
 0x37f   :  { %v1540_v34 = vpop.f32.mrb[52].mxu0  ;;  %v1713_v40 = vpop.f32.mrb[52].mxu1 }
 0x380   :  { %v1541_v8 = vadd.f32 %v1540_v34, %v17708_v60  ;;  %v1714_v41 = vadd.f32 %v1713_v40, %v17711_v61  ;;  %v1542_v43 = vpop.f32.mrb[53].mxu0  ;;  %v1715_v48 = vpop.f32.mrb[53].mxu1  ;;  %v15155_v34 = vld [vmem:[#allocation13 + $0x324] ss:$16 sps:$4 sm:$0xff]   ;;  %v15158_v40 = vld [vmem:[#allocation13 + $0x32c] ss:$16 sps:$4 sm:$0xff]  }
 0x381   :  { %v1543_v49 = vadd.f32 %v1542_v43, %v17714_v3  ;;  %v1716_v10 = vadd.f32 %v1715_v48, %v17717_v5  ;;  %v1544_v32 = vpop.f32.mrb[54].mxu0  ;;  %v1717_v50 = vpop.f32.mrb[54].mxu1  ;;  %v15161_v43 = vld [vmem:[#allocation13 + $0x344] ss:$16 sps:$4 sm:$0xff]   ;;  %v15164_v48 = vld [vmem:[#allocation13 + $0x34c] ss:$16 sps:$4 sm:$0xff]  }
 0x382   :  { %v1545_v11 = vadd.f32 %v1544_v32, %v17708_v60  ;;  %v1718_v42 = vadd.f32 %v1717_v50, %v17711_v61  ;;  %v1546_v36 = vpop.f32.mrb[55].mxu0  ;;  %v1719_v45 = vpop.f32.mrb[55].mxu1  ;;  %v1826_v57 = vmax.f32 %v1541_v8, 0.0  ;;  %v1828_v47 = vmax.f32 %v1714_v41, 0.0  ;;  %v15153_v8 = vld [vmem:[#allocation13 + $0x320] ss:$16 sps:$4 sm:$0xff]  }
 0x383   :  { %v1547_v51 = vadd.f32 %v1546_v36, %v17714_v3  ;;  %v1720_v26 = vadd.f32 %v1719_v45, %v17717_v5  ;;  %v1827_v6 = vmax.f32 %v1543_v49, 0.0  ;;  %v1829_v14 = vmax.f32 %v1716_v10, 0.0  ;;  %v15111_v3 = vld [vmem:[#allocation13 + $0x240] ss:$16 sps:$4 sm:$0xff]   ;;  %v15113_v5 = vld [vmem:[#allocation13 + $0x244] ss:$16 sps:$4 sm:$0xff]  }
 0x384   :  { %v1830_v39 = vmax.f32 %v1545_v11, 0.0  ;;  %v1832_v4 = vmax.f32 %v1718_v42, 0.0  ;;  %3901 = vmatprep.subr.bf16.mxu0 %v15113_v5  ;;  %v15156_v41 = vld [vmem:[#allocation13 + $0x328] ss:$16 sps:$4 sm:$0xff]   ;;  %v15159_v49 = vld [vmem:[#allocation13 + $0x340] ss:$16 sps:$4 sm:$0xff]  }
 0x385   :  { %v1831_v15 = vmax.f32 %v1547_v51, 0.0  ;;  %v1833_v0 = vmax.f32 %v1720_v26, 0.0  ;;  %v15162_v10 = vld [vmem:[#allocation13 + $0x348] ss:$16 sps:$4 sm:$0xff]   ;;  %v15167_v32 = vld [vmem:[#allocation13 + $0x364] ss:$16 sps:$4 sm:$0xff]  }
 0x386   :  { %v1886_v31 = vmax.f32 %v1826_v57, %v1830_v39  ;;  %v1888_v19 = vmax.f32 %v1828_v47, %v1832_v4  ;;  %v15170_v50 = vld [vmem:[#allocation13 + $0x36c] ss:$16 sps:$4 sm:$0xff]   ;;  %v15165_v11 = vld [vmem:[#allocation13 + $0x360] ss:$16 sps:$4 sm:$0xff]   ;;  %v15168_v42 = vld [vmem:[#allocation13 + $0x368] ss:$16 sps:$4 sm:$0xff]  }
 0x387   :  { %v1887_v38 = vmax.f32 %v1827_v6, %v1831_v15  ;;  %v1889_v60 = vmax.f32 %v1829_v14, %v1833_v0  ;;  %v15173_v36 = vld [vmem:[#allocation13 + $0x384] ss:$16 sps:$4 sm:$0xff]   ;;  %v15176_v45 = vld [vmem:[#allocation13 + $0x38c] ss:$16 sps:$4 sm:$0xff]   ;;  %v15171_v51 = vld [vmem:[#allocation13 + $0x380] ss:$16 sps:$4 sm:$0xff]  }
 0x388   :  { %v1914_v27 = vpack.c.bf16 %v1886_v31, %v1882_v24  ;;  %v1916_v61 = vpack.c.bf16 %v1888_v19, %v1884_v25  ;;  %v15149_v24 = vld [vmem:[#allocation13 + $0x304] ss:$16 sps:$4 sm:$0xff]   ;;  %v15152_v25 = vld [vmem:[#allocation13 + $0x30c] ss:$16 sps:$4 sm:$0xff]   ;;  %v15174_v26 = vld [vmem:[#allocation13 + $0x388] ss:$16 sps:$4 sm:$0xff]  }
 0x389   :  { %v1917_v20 = vpack.c.bf16 %v1889_v60, %v1885_v37  ;;  %v1915_v63 = vpack.c.bf16 %v1887_v38, %v1883_v28  ;;  %v15147_v28 = vld [vmem:[#allocation13 + $0x300] ss:$16 sps:$4 sm:$0xff]   ;;  %v15150_v37 = vld [vmem:[#allocation13 + $0x308] ss:$16 sps:$4 sm:$0xff]   ;;  %v15179_v57 = vld [vmem:[#allocation13 + $0x3a4] ss:$16 sps:$4 sm:$0xff]  }
 0x38a   :  { %v15182_v47 = vld [vmem:[#allocation13 + $0x3ac] ss:$16 sps:$4 sm:$0xff]   ;;  %v15177_v39 = vld [vmem:[#allocation13 + $0x3a0] ss:$16 sps:$4 sm:$0xff]   ;;  %v15180_v4 = vld [vmem:[#allocation13 + $0x3a8] ss:$16 sps:$4 sm:$0xff]  }
 0x38b   :  { %2367 = vmatprep.mubr.bf16.mxu0 %v1915_v63  ;;  %2909 = vmatprep.mubr.bf16.mxu1 %v1915_v63  ;;  %v15185_v6 = vld [vmem:[#allocation13 + $0x3c4] ss:$16 sps:$4 sm:$0xff]   ;;  %v15188_v14 = vld [vmem:[#allocation13 + $0x3cc] ss:$16 sps:$4 sm:$0xff]   ;;  %v15183_v15 = vld [vmem:[#allocation13 + $0x3c0] ss:$16 sps:$4 sm:$0xff]  }
 0x38c   :  { %2368 = vmatmul.mubr.bf16.gmra.mrb[80].mxu0 %v1914_v27  ;;  %2910 = vmatmul.mubr.bf16.gmra.mrb[80].mxu1 %v1914_v27  ;;  %v15186_v0 = vld [vmem:[#allocation13 + $0x3c8] ss:$16 sps:$4 sm:$0xff]   ;;  %v15191_v31 = vld [vmem:[#allocation13 + $0x3e4] ss:$16 sps:$4 sm:$0xff]   ;;  %v15194_v19 = vld [vmem:[#allocation13 + $0x3ec] ss:$16 sps:$4 sm:$0xff]  }
 0x38d   :  { %12884 = vmatprep.mubr.msk.bf16.mxu0 %vm986_vm4, %v17737_v13  ;;  %12947 = vmatprep.mubr.msk.bf16.mxu1 %vm986_vm4, %v17737_v13  ;;  %v15116_v13 = vld [vmem:[#allocation13 + $0x24c] ss:$16 sps:$4 sm:$0xff]   ;;  %v15189_v38 = vld [vmem:[#allocation13 + $0x3e0] ss:$16 sps:$4 sm:$0xff]   ;;  %v15192_v60 = vld [vmem:[#allocation13 + $0x3e8] ss:$16 sps:$4 sm:$0xff]  }
 0x38e   :  { %4107 = vmatprep.subr.bf16.mxu1 %v15116_v13  ;;  %v15197_v27 = vld [vmem:[#allocation13 + $0x404] ss:$16 sps:$4 sm:$0xff]   ;;  %v15198_v63 = vld [vmem:[#allocation13 + $0x408] ss:$16 sps:$4 sm:$0xff]   ;;  %v15206_v5 = vld [vmem:[#allocation13 + $0x42c] ss:$16 sps:$4 sm:$0xff]  }
 0x394   :  { %2411 = vmatmul.mubr.bf16.vlgmr.msra.gmra.mrb[56].mxu0 %v17735_v7  ;;  %2953 = vmatmul.mubr.bf16.vlgmr.msra.gmra.mrb[56].mxu1 %v17735_v7  ;;  %v15114_v7 = vld [vmem:[#allocation13 + $0x248] ss:$16 sps:$4 sm:$0xff]  }
 0x395   :  { %12885 = vmatprep.mubr.msk.bf16.mxu0 %vm986_vm4, %v17759_v35  ;;  %12948 = vmatprep.mubr.msk.bf16.mxu1 %vm986_vm4, %v17759_v35  ;;  %v15119_v35 = vld [vmem:[#allocation13 + $0x264] ss:$16 sps:$4 sm:$0xff]  }
 0x396   :  { %3902 = vmatpush1.bf16.msra.mxu0 %v15111_v3  ;;  %4108 = vmatpush1.bf16.msra.mxu1 %v15114_v7  ;;  %v15203_v3 = vld [vmem:[#allocation13 + $0x424] ss:$16 sps:$4 sm:$0xff]  }
 0x397   :  { %3903 = vmatprep.subr.bf16.mxu0 %v15119_v35  ;;  %v15201_v35 = vld [vmem:[#allocation13 + $0x420] ss:$16 sps:$4 sm:$0xff]  }
 0x39c   :  { %2421 = vmatmul.mubr.bf16.gmra.mrb[60].mxu0 %v17768_v18  ;;  %2963 = vmatmul.mubr.bf16.gmra.mrb[60].mxu1 %v17768_v18  ;;  %v15122_v18 = vld [vmem:[#allocation13 + $0x26c] ss:$16 sps:$4 sm:$0xff]  }
 0x39d   :  { %12886 = vmatprep.mubr.msk.bf16.mxu0 %vm986_vm4, %v17782_v54  ;;  %12949 = vmatprep.mubr.msk.bf16.mxu1 %vm986_vm4, %v17782_v54  ;;  %v15120_v54 = vld [vmem:[#allocation13 + $0x268] ss:$16 sps:$4 sm:$0xff]  }
 0x39e   :  { %4109 = vmatprep.subr.bf16.mxu1 %v15122_v18  ;;  %v15204_v18 = vld [vmem:[#allocation13 + $0x428] ss:$16 sps:$4 sm:$0xff]  }
 0x39f   :  { %4110 = vmatpush1.bf16.msra.mxu1 %v15120_v54 }
 0x3a4   :  { %2431 = vmatmul.mubr.bf16.gmra.mrb[64].mxu0 %v17780_v53  ;;  %2973 = vmatmul.mubr.bf16.gmra.mrb[64].mxu1 %v17780_v53  ;;  %v15117_v53 = vld [vmem:[#allocation13 + $0x260] ss:$16 sps:$4 sm:$0xff]  }
 0x3a5   :  { %12887 = vmatprep.mubr.msk.bf16.mxu0 %vm986_vm4, %v17802_v30  ;;  %12950 = vmatprep.mubr.msk.bf16.mxu1 %vm986_vm4, %v17802_v30  ;;  %v15128_v30 = vld [vmem:[#allocation13 + $0x28c] ss:$16 sps:$4 sm:$0xff]  }
 0x3a6   :  { %3904 = vmatpush1.bf16.msra.mxu0 %v15117_v53  ;;  %4111 = vmatprep.subr.bf16.mxu1 %v15128_v30 }
 0x3ac   :  { %2441 = vmatmul.mubr.bf16.gmra.mrb[68].mxu0 %v17800_v29  ;;  %2983 = vmatmul.mubr.bf16.gmra.mrb[68].mxu1 %v17800_v29  ;;  %v15125_v29 = vld [vmem:[#allocation13 + $0x284] ss:$16 sps:$4 sm:$0xff]  }
 0x3ad   :  { %12888 = vmatprep.mubr.msk.bf16.mxu0 %vm986_vm4, %v17822_v44  ;;  %12951 = vmatprep.mubr.msk.bf16.mxu1 %vm986_vm4, %v17822_v44  ;;  %v15126_v44 = vld [vmem:[#allocation13 + $0x288] ss:$16 sps:$4 sm:$0xff]  }
 0x3ae   :  { %3905 = vmatprep.subr.bf16.mxu0 %v15125_v29  ;;  %4112 = vmatpush1.bf16.msra.mxu1 %v15126_v44 }
 0x3b4   :  { %2451 = vmatmul.mubr.bf16.gmra.mrb[72].mxu0 %v17820_v33  ;;  %2993 = vmatmul.mubr.bf16.gmra.mrb[72].mxu1 %v17820_v33  ;;  %v15123_v33 = vld [vmem:[#allocation13 + $0x280] ss:$16 sps:$4 sm:$0xff]  }
 0x3b5   :  { %12889 = vmatprep.mubr.msk.bf16.mxu0 %vm986_vm4, %v17840_v46  ;;  %12952 = vmatprep.mubr.msk.bf16.mxu1 %vm986_vm4, %v17840_v46  ;;  %v15134_v46 = vld [vmem:[#allocation13 + $0x2ac] ss:$16 sps:$4 sm:$0xff]  }
 0x3b6   :  { %3906 = vmatpush1.bf16.msra.mxu0 %v15123_v33  ;;  %4113 = vmatprep.subr.bf16.mxu1 %v15134_v46 }
 0x3b7   :  { %4114 = vmatpush1.bf16.msra.mxu1 %v15132_v12 }
 0x3b8   :  { %4115 = vmatprep.subr.bf16.mxu1 %v15140_v21 }
 0x3bb   :  { %4116 = vmatpush1.bf16.msra.mxu1 %v15138_v16 }
 0x3bc   :  { %2461 = vmatmul.mubr.bf16.gmra.mrb[76].mxu0 %v17838_v52  ;;  %3003 = vmatmul.mubr.bf16.gmra.mrb[76].mxu1 %v17838_v52  ;;  %v15131_v52 = vld [vmem:[#allocation13 + $0x2a4] ss:$16 sps:$4 sm:$0xff]  }
 0x3bd   :  { %12890 = vmatprep.mubr.msk.bf16.mxu0 %vm986_vm4, %v1917_v20  ;;  %12953 = vmatprep.mubr.msk.bf16.mxu1 %vm986_vm4, %v1917_v20  ;;  %v15195_v20 = vld [vmem:[#allocation13 + $0x400] ss:$16 sps:$4 sm:$0xff]  }
 0x3be   :  { %3907 = vmatprep.subr.bf16.mxu0 %v15131_v52  ;;  %4117 = vmatprep.subr.bf16.mxu1 %v15146_v2 }
 0x3bf   :  { %3908 = vmatpush1.bf16.msra.mxu0 %v15129_v9  ;;  %4118 = vmatpush1.bf16.msra.mxu1 %v15144_v23 }
 0x3c0   :  { %3909 = vmatprep.subr.bf16.mxu0 %v15137_v17  ;;  %4119 = vmatprep.subr.bf16.mxu1 %v15152_v25  ;;  %v15209_v17 = vld [vmem:[#allocation13 + $0x444] ss:$16 sps:$4 sm:$0xff]  }
 0x3c3   :  { %3910 = vmatpush1.bf16.msra.mxu0 %v15135_v62  ;;  %4120 = vmatpush1.bf16.msra.mxu1 %v15150_v37 }
 0x3c4   :  { %2471 = vmatmul.mubr.bf16.gmra.mrb[80].mxu0 %v1916_v61  ;;  %3013 = vmatmul.mubr.bf16.gmra.mrb[80].mxu1 %v1916_v61  ;;  %v15200_v61 = vld [vmem:[#allocation13 + $0x40c] ss:$16 sps:$4 sm:$0xff]  }
 0x3c5   :  { %3911 = vmatprep.subr.bf16.mxu0 %v15143_v22  ;;  %4121 = vmatprep.subr.bf16.mxu1 %v15158_v40 }
 0x3c7   :  { %3912 = vmatpush1.bf16.msra.mxu0 %v15141_v1  ;;  %4122 = vmatpush1.bf16.msra.mxu1 %v15156_v41 }
 0x3c8   :  { %3913 = vmatprep.subr.bf16.mxu0 %v15149_v24  ;;  %4123 = vmatprep.subr.bf16.mxu1 %v15164_v48 }
 0x3cb   :  { %3914 = vmatpush1.bf16.msra.mxu0 %v15147_v28  ;;  %4124 = vmatpush1.bf16.msra.mxu1 %v15162_v10 }
 0x3cc   :  { %3915 = vmatprep.subr.bf16.mxu0 %v15155_v34  ;;  %4125 = vmatprep.subr.bf16.mxu1 %v15170_v50 }
 0x3cf   :  { %3916 = vmatpush1.bf16.msra.mxu0 %v15153_v8  ;;  %4126 = vmatpush1.bf16.msra.mxu1 %v15168_v42 }
 0x3d0   :  { %3917 = vmatprep.subr.bf16.mxu0 %v15161_v43  ;;  %4127 = vmatprep.subr.bf16.mxu1 %v15176_v45 }
 0x3d3   :  { %3918 = vmatpush1.bf16.msra.mxu0 %v15159_v49  ;;  %4128 = vmatpush1.bf16.msra.mxu1 %v15174_v26 }
 0x3d4   :  { %3919 = vmatprep.subr.bf16.mxu0 %v15167_v32  ;;  %4129 = vmatprep.subr.bf16.mxu1 %v15182_v47 }
 0x3d7   :  { %3920 = vmatpush1.bf16.msra.mxu0 %v15165_v11  ;;  %4130 = vmatpush1.bf16.msra.mxu1 %v15180_v4 }
 0x3d8   :  { %3921 = vmatprep.subr.bf16.mxu0 %v15173_v36  ;;  %4131 = vmatprep.subr.bf16.mxu1 %v15188_v14 }
 0x3db   :  { %3922 = vmatpush1.bf16.msra.mxu0 %v15171_v51  ;;  %4132 = vmatpush1.bf16.msra.mxu1 %v15186_v0 }
 0x3dc   :  { %3923 = vmatprep.subr.bf16.mxu0 %v15179_v57  ;;  %4133 = vmatprep.subr.bf16.mxu1 %v15194_v19 }
 0x3df   :  { %3924 = vmatpush1.bf16.msra.mxu0 %v15177_v39  ;;  %4134 = vmatpush1.bf16.msra.mxu1 %v15192_v60 }
 0x3e0   :  { %3925 = vmatprep.subr.bf16.mxu0 %v15185_v6  ;;  %4135 = vmatprep.subr.bf16.mxu1 %v15200_v61 }
 0x3e3   :  { %3926 = vmatpush1.bf16.msra.mxu0 %v15183_v15  ;;  %4136 = vmatpush1.bf16.msra.mxu1 %v15198_v63 }
 0x3e4   :  { %3927 = vmatprep.subr.bf16.mxu0 %v15191_v31  ;;  %4137 = vmatprep.subr.bf16.mxu1 %v15206_v5 }
 0x3e7   :  { %3928 = vmatpush1.bf16.msra.mxu0 %v15189_v38  ;;  %4138 = vmatpush1.bf16.msra.mxu1 %v15204_v18 }
 0x3e8   :  { %3929 = vmatprep.subr.bf16.mxu0 %v15197_v27 }
 0x3eb   :  { %3930 = vmatpush1.bf16.msra.mxu0 %v15195_v20 }
 0x3ec   :  { %3931 = vmatprep.subr.bf16.mxu0 %v15203_v3 }
 0x3ef   :  { %3932 = vmatpush1.bf16.msra.mxu0 %v15201_v35 }
 0x3f0   :  { %4004 = vmatprep.subr.bf16.mxu0 %v15209_v17 }
 0x467   :  { %v2412_v7 = vpop.f32.mrb[56].mxu0  ;;  %v2954_v13 = vpop.f32.mrb[56].mxu1 }
 0x468   :  { %v3023_v53 = vmax.f32 %v2412_v7, %v2954_v13  ;;  %v2414_v54 = vpop.f32.mrb[57].mxu0  ;;  %v2956_v29 = vpop.f32.mrb[57].mxu1 }
 0x469   :  { %v3024_v30 = vmax.f32 %v2414_v54, %v2956_v29  ;;  %v2416_v33 = vpop.f32.mrb[58].mxu0  ;;  %v2958_v44 = vpop.f32.mrb[58].mxu1 }
 0x46a   :  { %v3025_v52 = vmax.f32 %v2416_v33, %v2958_v44  ;;  %v2960_v46 = vpop.f32.mrb[59].mxu1  ;;  %3121 = vrot.lane.b32.xlu0 %v3023_v53, %s16875_s29  ;;  %v2418_v9 = vpop.f32.mrb[59].mxu0 }
 0x46b   :  { %v3026_v12 = vmax.f32 %v2418_v9, %v2960_v46  ;;  %3123 = vrot.lane.b32.xlu1 %v3024_v30, %s16875_s29 }
 0x46e   :  { %3125 = vrot.lane.b32.xlu0 %v3025_v52, %s16875_s29 }
 0x46f   :  { %v2964_v21 = vpop.f32.mrb[60].mxu1  ;;  %3127 = vrot.lane.b32.xlu1 %v3026_v12, %s16875_s29  ;;  %v2422_v62 = vpop.f32.mrb[60].mxu0 }
 0x470   :  { %v3027_v16 = vmax.f32 %v2422_v62, %v2964_v21  ;;  %v2424_v22 = vpop.f32.mrb[61].mxu0  ;;  %v2966_v2 = vpop.f32.mrb[61].mxu1  ;;  %v15215_v21 = vld [vmem:[#allocation13 + $0x44c] ss:$16 sps:$4 sm:$0xff]  }
 0x471   :  { %v3028_v1 = vmax.f32 %v2424_v22, %v2966_v2  ;;  %v2426_v23 = vpop.f32.mrb[62].mxu0  ;;  %v2968_v24 = vpop.f32.mrb[62].mxu1  ;;  %4210 = vmatprep.subr.bf16.mxu1 %v15215_v21 }
 0x472   :  { %v3029_v25 = vmax.f32 %v2426_v23, %v2968_v24  ;;  %v2970_v28 = vpop.f32.mrb[63].mxu1  ;;  %3129 = vrot.lane.b32.xlu0 %v3027_v16, %s16875_s29  ;;  %v2428_v37 = vpop.f32.mrb[63].mxu0 }
 0x473   :  { %v3030_v34 = vmax.f32 %v2428_v37, %v2970_v28  ;;  %3131 = vrot.lane.b32.xlu1 %v3028_v1, %s16875_s29 }
 0x476   :  { %3133 = vrot.lane.b32.xlu0 %v3029_v25, %s16875_s29 }
 0x477   :  { %v2974_v40 = vpop.f32.mrb[64].mxu1  ;;  %3135 = vrot.lane.b32.xlu1 %v3030_v34, %s16875_s29  ;;  %v2432_v8 = vpop.f32.mrb[64].mxu0 }
 0x478   :  { %v3031_v41 = vmax.f32 %v2432_v8, %v2974_v40  ;;  %v2434_v43 = vpop.f32.mrb[65].mxu0  ;;  %v2976_v48 = vpop.f32.mrb[65].mxu1 }
 0x479   :  { %v3032_v49 = vmax.f32 %v2434_v43, %v2976_v48  ;;  %v2436_v10 = vpop.f32.mrb[66].mxu0  ;;  %v2978_v32 = vpop.f32.mrb[66].mxu1  ;;  %v17926_v48 = vld [vmem:[#allocation3] sm:$0xff] }
 0x47a   :  { %v3033_v50 = vmax.f32 %v2436_v10, %v2978_v32  ;;  %v2980_v11 = vpop.f32.mrb[67].mxu1  ;;  %3137 = vrot.lane.b32.xlu0 %v3031_v41, %s16875_s29  ;;  %v2438_v42 = vpop.f32.mrb[67].mxu0 }
 0x47b   :  { %v3034_v36 = vmax.f32 %v2438_v42, %v2980_v11  ;;  %3139 = vrot.lane.b32.xlu1 %v3032_v49, %s16875_s29 }
 0x47e   :  { %3141 = vrot.lane.b32.xlu0 %v3033_v50, %s16875_s29 }
 0x47f   :  { %v2984_v45 = vpop.f32.mrb[68].mxu1  ;;  %3143 = vrot.lane.b32.xlu1 %v3034_v36, %s16875_s29  ;;  %v2442_v51 = vpop.f32.mrb[68].mxu0 }
 0x480   :  { %v3035_v26 = vmax.f32 %v2442_v51, %v2984_v45  ;;  %v2444_v57 = vpop.f32.mrb[69].mxu0  ;;  %v2986_v47 = vpop.f32.mrb[69].mxu1  ;;  %v15207_v45 = vld [vmem:[#allocation13 + $0x440] ss:$16 sps:$4 sm:$0xff]   ;;  %v15213_v51 = vld [vmem:[#allocation13 + $0x448] ss:$16 sps:$4 sm:$0xff]  }
 0x481   :  { %v3036_v39 = vmax.f32 %v2444_v57, %v2986_v47  ;;  %v2446_v4 = vpop.f32.mrb[70].mxu0  ;;  %v2988_v6 = vpop.f32.mrb[70].mxu1 }
 0x482   :  { %v3037_v14 = vmax.f32 %v2446_v4, %v2988_v6  ;;  %v2990_v15 = vpop.f32.mrb[71].mxu1  ;;  %3145 = vrot.lane.b32.xlu0 %v3035_v26, %s16875_s29  ;;  %v2448_v0 = vpop.f32.mrb[71].mxu0  ;;  %v15218_v4 = vld [vmem:[#allocation13 + $0x46c] ss:$16 sps:$4 sm:$0xff]  }
 0x483   :  { %v3038_v31 = vmax.f32 %v2448_v0, %v2990_v15  ;;  %3147 = vrot.lane.b32.xlu1 %v3036_v39, %s16875_s29  ;;  %v15212_v39 = vld [vmem:[#allocation13 + $0x464] ss:$16 sps:$4 sm:$0xff]   ;;  %v15210_v0 = vld [vmem:[#allocation13 + $0x460] ss:$16 sps:$4 sm:$0xff]  }
 0x486   :  { %3149 = vrot.lane.b32.xlu0 %v3037_v14, %s16875_s29 }
 0x487   :  { %v2994_v19 = vpop.f32.mrb[72].mxu1  ;;  %3151 = vrot.lane.b32.xlu1 %v3038_v31, %s16875_s29  ;;  %v2452_v38 = vpop.f32.mrb[72].mxu0  ;;  %v15216_v31 = vld [vmem:[#allocation13 + $0x468] ss:$16 sps:$4 sm:$0xff]  }
 0x488   :  { %v3039_v60 = vmax.f32 %v2452_v38, %v2994_v19  ;;  %v2454_v27 = vpop.f32.mrb[73].mxu0  ;;  %v2996_v61 = vpop.f32.mrb[73].mxu1  ;;  %v15221_v38 = vld [vmem:[#allocation13 + $0x4] ss:$16 sps:$4 sm:$0xff]  }
 0x489   :  { %v3040_v20 = vmax.f32 %v2454_v27, %v2996_v61  ;;  %v2456_v63 = vpop.f32.mrb[74].mxu0  ;;  %v2998_v3 = vpop.f32.mrb[74].mxu1 }
 0x48a   :  { %v3041_v5 = vmax.f32 %v2456_v63, %v2998_v3  ;;  %v3000_v7 = vpop.f32.mrb[75].mxu1  ;;  %3153 = vrot.lane.b32.xlu0 %v3039_v60, %s16875_s29  ;;  %v2458_v13 = vpop.f32.mrb[75].mxu0  ;;  %v15224_v60 = vld [vmem:[#allocation13 + $0xc] ss:$16 sps:$4 sm:$0xff]  }
 0x48b   :  { %v3042_v35 = vmax.f32 %v2458_v13, %v3000_v7  ;;  %3155 = vrot.lane.b32.xlu1 %v3040_v20, %s16875_s29 }
 0x48e   :  { %3157 = vrot.lane.b32.xlu0 %v3041_v5, %s16875_s29 }
 0x48f   :  { %v3004_v18 = vpop.f32.mrb[76].mxu1  ;;  %3159 = vrot.lane.b32.xlu1 %v3042_v35, %s16875_s29  ;;  %v2462_v53 = vpop.f32.mrb[76].mxu0 }
 0x490   :  { %v3043_v54 = vmax.f32 %v2462_v53, %v3004_v18  ;;  %v2464_v29 = vpop.f32.mrb[77].mxu0  ;;  %v3006_v30 = vpop.f32.mrb[77].mxu1 }
 0x491   :  { %v3044_v33 = vmax.f32 %v2464_v29, %v3006_v30  ;;  %v2466_v44 = vpop.f32.mrb[78].mxu0  ;;  %v3008_v52 = vpop.f32.mrb[78].mxu1 }
 0x492   :  { %v3045_v46 = vmax.f32 %v2466_v44, %v3008_v52  ;;  %v3010_v9 = vpop.f32.mrb[79].mxu1  ;;  %3161 = vrot.lane.b32.xlu0 %v3043_v54, %s16875_s29  ;;  %v2468_v12 = vpop.f32.mrb[79].mxu0 }
 0x493   :  { %v3046_v17 = vmax.f32 %v2468_v12, %v3010_v9  ;;  %3163 = vrot.lane.b32.xlu1 %v3044_v33, %s16875_s29 }
 0x496   :  { %3165 = vrot.lane.b32.xlu0 %v3045_v46, %s16875_s29 }
 0x497   :  { %v3014_v62 = vpop.f32.mrb[80].mxu1  ;;  %3167 = vrot.lane.b32.xlu1 %v3046_v17, %s16875_s29  ;;  %v2472_v16 = vpop.f32.mrb[80].mxu0 }
 0x498   :  { %v3047_v22 = vmax.f32 %v2472_v16, %v3014_v62  ;;  %v2474_v2 = vpop.f32.mrb[81].mxu0  ;;  %v3016_v1 = vpop.f32.mrb[81].mxu1 }
 0x499   :  { %v3048_v23 = vmax.f32 %v2474_v2, %v3016_v1  ;;  %v2476_v24 = vpop.f32.mrb[82].mxu0  ;;  %v3018_v25 = vpop.f32.mrb[82].mxu1 }
 0x49a   :  { %v3049_v28 = vmax.f32 %v2476_v24, %v3018_v25  ;;  %v3020_v37 = vpop.f32.mrb[83].mxu1  ;;  %3169 = vrot.lane.b32.xlu0 %v3047_v22, %s16875_s29  ;;  %v2478_v34 = vpop.f32.mrb[83].mxu0 }
 0x49b   :  { %v3050_v40 = vmax.f32 %v2478_v34, %v3020_v37  ;;  %3171 = vrot.lane.b32.xlu1 %v3048_v23, %s16875_s29 }
 0x49e   :  { %3173 = vrot.lane.b32.xlu0 %v3049_v28, %s16875_s29 }
 0x49f   :  { %3175 = vrot.lane.b32.xlu1 %v3050_v40, %s16875_s29 }
 0x4dc   :  { %v3122_v8 = vpop.permute.xlu0 %3121 }
 0x4dd   :  { %3220 = vst.msk [vmem:[#allocation3 + $0x30] sm:$0xff] %vm3219_vm6, %v3122_v8  ;;  %v3124_v41 = vpop.permute.xlu1 %3123 }
 0x4de   :  { %v3177_v43 = vsel %vm245_vm2, %v3122_v8, %v3124_v41 }
 0x4df   :  { %3221 = vst [vmem:[#allocation3 + $0x38] sm:$0xff] %v3177_v43  ;;  %v3427_v49 = vpack.c.bf16 %v3177_v43, %v17926_v48 }
 0x4e0   :  { %v3126_v10 = vpop.permute.xlu0 %3125 }
 0x4e1   :  { %3222 = vst.msk [vmem:[#allocation3 + $0x48] sm:$0xff] %vm3219_vm6, %v3126_v10  ;;  %v3128_v32 = vpop.permute.xlu1 %3127  ;;  %3933 = vmatprep.mubr.bf16.mxu0 %v3427_v49  ;;  %4139 = vmatprep.mubr.bf16.mxu1 %v3427_v49 }
 0x4e2   :  { %v3178_v50 = vsel %vm245_vm2, %v3126_v10, %v3128_v32 }
 0x4e3   :  { %3223 = vst [vmem:[#allocation3 + $0x50] sm:$0xff] %v3178_v50  ;;  %v17931_v11 = vpack.c.bf16 %v3178_v50, %v3177_v43 }
 0x4e4   :  { %v3130_v42 = vpop.permute.xlu0 %3129  ;;  %v3387_v36 = vld [vmem:[#allocation3 + $0x30] sm:$0xff] }
 0x4e5   :  { %3224 = vst.msk [vmem:[#allocation3 + $0x60] sm:$0xff] %vm3219_vm6, %v3130_v42  ;;  %v3132_v26 = vpop.permute.xlu1 %3131  ;;  %v3426_v57 = vpack.c.bf16 %v3387_v36, %v17926_v48 }
 0x4e6   :  { %v3179_v47 = vsel %vm245_vm2, %v3130_v42, %v3132_v26 }
 0x4e7   :  { %3225 = vst [vmem:[#allocation3 + $0x68] sm:$0xff] %v3179_v47  ;;  %3934 = vmatmul.mubr.bf16.vlgmr.msra.gmra.mrb[84].mxu0 %v3426_v57  ;;  %4140 = vmatmul.mubr.bf16.vlgmr.msra.gmra.mrb[84].mxu1 %v3426_v57  ;;  %v3430_v6 = vpack.c.bf16 %v3179_v47, %v3178_v50 }
 0x4e8   :  { %v3134_v14 = vpop.permute.xlu0 %3133  ;;  %4005 = vmatpush1.bf16.msra.mxu0 %v15207_v45  ;;  %v3390_v15 = vld [vmem:[#allocation3 + $0x48] sm:$0xff]  ;;  %4211 = vmatpush1.bf16.msra.mxu1 %v15213_v51 }
 0x4e9   :  { %3226 = vst.msk [vmem:[#allocation3 + $0x78] sm:$0xff] %vm3219_vm6, %v3134_v14  ;;  %v3136_v19 = vpop.permute.xlu1 %3135  ;;  %3943 = vmatprep.mubr.bf16.mxu0 %v3430_v6  ;;  %4149 = vmatprep.mubr.bf16.mxu1 %v3430_v6  ;;  %v17937_v27 = vpack.c.bf16 %v3390_v15, %v3387_v36  ;;  %v5109_v5 = vld [vmem:[#allocation3 + $0x48] sm:$0xff] }
 0x4ea   :  { %v3180_v61 = vsel %vm245_vm2, %v3134_v14, %v3136_v19  ;;  %4006 = vmatprep.subr.bf16.mxu0 %v15212_v39  ;;  %4212 = vmatprep.subr.bf16.mxu1 %v15218_v4  ;;  %v17946_v54 = vld [vmem:[#allocation3 + $0x50] sm:$0xff] }
 0x4eb   :  { %3227 = vst [vmem:[#allocation3 + $0x80] sm:$0xff] %v3180_v61  ;;  %v17940_v20 = vpack.c.bf16 %v3180_v61, %v3179_v47 }
 0x4ec   :  { %v3138_v63 = vpop.permute.xlu0 %3137  ;;  %v3393_v3 = vld [vmem:[#allocation3 + $0x60] sm:$0xff]  ;;  %4007 = vmatpush1.bf16.msra.mxu0 %v15210_v0  ;;  %4213 = vmatpush1.bf16.msra.mxu1 %v15216_v31 }
 0x4ed   :  { %v5112_v7 = vld [vmem:[#allocation3 + $0x60] sm:$0xff]  ;;  %3228 = vst.msk [vmem:[#allocation3 + $0x90] sm:$0xff] %vm3219_vm6, %v3138_v63  ;;  %v3140_v13 = vpop.permute.xlu1 %3139  ;;  %v3429_v35 = vpack.c.bf16 %v3393_v3, %v3390_v15  ;;  %4694 = vmatprep.subr.bf16.mxu0 %v15221_v38  ;;  %4900 = vmatprep.subr.bf16.mxu1 %v15224_v60 }
 0x4ee   :  { %v17943_v18 = vpack.c.bf16 %v5112_v7, %v5109_v5  ;;  %v3181_v53 = vsel %vm245_vm2, %v3138_v63, %v3140_v13  ;;  %v5113_v29 = vld [vmem:[#allocation3 + $0x68] sm:$0xff] }
 0x4ef   :  { %3229 = vst [vmem:[#allocation3 + $0x98] sm:$0xff] %v3181_v53  ;;  %3944 = vmatmul.mubr.bf16.gmra.mrb[88].mxu0 %v3429_v35  ;;  %4150 = vmatmul.mubr.bf16.gmra.mrb[88].mxu1 %v3429_v35  ;;  %v3433_v30 = vpack.c.bf16 %v3181_v53, %v3180_v61  ;;  %v17949_v33 = vpack.c.bf16 %v5113_v29, %v17946_v54 }
 0x4f0   :  { %v3142_v44 = vpop.permute.xlu0 %3141  ;;  %v3396_v52 = vld [vmem:[#allocation3 + $0x78] sm:$0xff] }
 0x4f1   :  { %3230 = vst.msk [vmem:[#allocation3 + $0xa8] sm:$0xff] %vm3219_vm6, %v3142_v44  ;;  %v3144_v46 = vpop.permute.xlu1 %3143  ;;  %3953 = vmatprep.mubr.bf16.mxu0 %v3433_v30  ;;  %4159 = vmatprep.mubr.bf16.mxu1 %v3433_v30  ;;  %v17952_v9 = vpack.c.bf16 %v3396_v52, %v3393_v3  ;;  %v5115_v16 = vld [vmem:[#allocation3 + $0x78] sm:$0xff] }
 0x4f2   :  { %v3182_v12 = vsel %vm245_vm2, %v3142_v44, %v3144_v46  ;;  %v17961_v25 = vld [vmem:[#allocation3 + $0x80] sm:$0xff] }
 0x4f3   :  { %3231 = vst [vmem:[#allocation3 + $0xb0] sm:$0xff] %v3182_v12  ;;  %v17955_v17 = vpack.c.bf16 %v3182_v12, %v3181_v53 }
 0x4f4   :  { %v3146_v21 = vpop.permute.xlu0 %3145  ;;  %v3399_v62 = vld [vmem:[#allocation3 + $0x90] sm:$0xff] }
 0x4f5   :  { %v5118_v22 = vld [vmem:[#allocation3 + $0x90] sm:$0xff]  ;;  %3232 = vst.msk [vmem:[#allocation3 + $0xc0] sm:$0xff] %vm3219_vm6, %v3146_v21  ;;  %v3148_v2 = vpop.permute.xlu1 %3147  ;;  %v3432_v1 = vpack.c.bf16 %v3399_v62, %v3396_v52 }
 0x4f6   :  { %v17958_v23 = vpack.c.bf16 %v5118_v22, %v5115_v16  ;;  %v3183_v24 = vsel %vm245_vm2, %v3146_v21, %v3148_v2  ;;  %v5119_v28 = vld [vmem:[#allocation3 + $0x98] sm:$0xff] }
 0x4f7   :  { %3233 = vst [vmem:[#allocation3 + $0xc8] sm:$0xff] %v3183_v24  ;;  %3954 = vmatmul.mubr.bf16.gmra.mrb[92].mxu0 %v3432_v1  ;;  %4160 = vmatmul.mubr.bf16.gmra.mrb[92].mxu1 %v3432_v1  ;;  %v3436_v37 = vpack.c.bf16 %v3183_v24, %v3182_v12  ;;  %v17964_v34 = vpack.c.bf16 %v5119_v28, %v17961_v25 }
 0x4f8   :  { %v3150_v40 = vpop.permute.xlu0 %3149  ;;  %v3402_v8 = vld [vmem:[#allocation3 + $0xa8] sm:$0xff] }
 0x4f9   :  { %3234 = vst.msk [vmem:[#allocation3 + $0xd8] sm:$0xff] %vm3219_vm6, %v3150_v40  ;;  %v3152_v41 = vpop.permute.xlu1 %3151  ;;  %3963 = vmatprep.mubr.bf16.mxu0 %v3436_v37  ;;  %4169 = vmatprep.mubr.bf16.mxu1 %v3436_v37  ;;  %v17967_v43 = vpack.c.bf16 %v3402_v8, %v3399_v62  ;;  %v17972_v42 = vld [vmem:[#allocation3 + $0xa8] sm:$0xff] }
 0x4fa   :  { %v3184_v49 = vsel %vm245_vm2, %v3150_v40, %v3152_v41  ;;  %v17982_v47 = vld [vmem:[#allocation3 + $0xb0] sm:$0xff] }
 0x4fb   :  { %3235 = vst [vmem:[#allocation3 + $0xe0] sm:$0xff] %v3184_v49  ;;  %v17970_v10 = vpack.c.bf16 %v3184_v49, %v3183_v24 }
 0x4fc   :  { %v3154_v32 = vpop.permute.xlu0 %3153  ;;  %v3405_v50 = vld [vmem:[#allocation3 + $0xc0] sm:$0xff] }
 0x4fd   :  { %v17974_v36 = vld [vmem:[#allocation3 + $0xc0] sm:$0xff]  ;;  %3236 = vst.msk [vmem:[#allocation3 + $0xf0] sm:$0xff] %vm3219_vm6, %v3154_v32  ;;  %v3156_v45 = vpop.permute.xlu1 %3155  ;;  %v3435_v51 = vpack.c.bf16 %v3405_v50, %v3402_v8 }
 0x4fe   :  { %v17979_v26 = vpack.c.bf16 %v17974_v36, %v17972_v42  ;;  %v3185_v57 = vsel %vm245_vm2, %v3154_v32, %v3156_v45  ;;  %v17984_v39 = vld [vmem:[#allocation3 + $0xc8] sm:$0xff] }
 0x4ff   :  { %3237 = vst [vmem:[#allocation3 + $0xf8] sm:$0xff] %v3185_v57  ;;  %3964 = vmatmul.mubr.bf16.gmra.mrb[96].mxu0 %v3435_v51  ;;  %4170 = vmatmul.mubr.bf16.gmra.mrb[96].mxu1 %v3435_v51  ;;  %v3439_v4 = vpack.c.bf16 %v3185_v57, %v3184_v49  ;;  %v17988_v6 = vpack.c.bf16 %v17984_v39, %v17982_v47 }
 0x500   :  { %v3158_v14 = vpop.permute.xlu0 %3157  ;;  %v3408_v15 = vld [vmem:[#allocation3 + $0xd8] sm:$0xff] }
 0x501   :  { %3238 = vst.msk [vmem:[#allocation3 + $0x108] sm:$0xff] %vm3219_vm6, %v3158_v14  ;;  %v3160_v0 = vpop.permute.xlu1 %3159  ;;  %3973 = vmatprep.mubr.bf16.mxu0 %v3439_v4  ;;  %4179 = vmatprep.mubr.bf16.mxu1 %v3439_v4  ;;  %v17991_v31 = vpack.c.bf16 %v3408_v15, %v3405_v50  ;;  %v17996_v63 = vld [vmem:[#allocation3 + $0xd8] sm:$0xff] }
 0x502   :  { %v3186_v19 = vsel %vm245_vm2, %v3158_v14, %v3160_v0  ;;  %v18006_v53 = vld [vmem:[#allocation3 + $0xe0] sm:$0xff] }
 0x503   :  { %3239 = vst [vmem:[#allocation3 + $0x110] sm:$0xff] %v3186_v19  ;;  %v17994_v38 = vpack.c.bf16 %v3186_v19, %v3185_v57 }
 0x504   :  { %v3162_v60 = vpop.permute.xlu0 %3161  ;;  %v3411_v61 = vld [vmem:[#allocation3 + $0xf0] sm:$0xff] }
 0x505   :  { %v17998_v3 = vld [vmem:[#allocation3 + $0xf0] sm:$0xff]  ;;  %3240 = vst.msk [vmem:[#allocation3 + $0x120] sm:$0xff] %vm3219_vm6, %v3162_v60  ;;  %v3164_v5 = vpop.permute.xlu1 %3163  ;;  %v3438_v7 = vpack.c.bf16 %v3411_v61, %v3408_v15 }
 0x506   :  { %v18003_v13 = vpack.c.bf16 %v17998_v3, %v17996_v63  ;;  %v3187_v35 = vsel %vm245_vm2, %v3162_v60, %v3164_v5  ;;  %v18008_v29 = vld [vmem:[#allocation3 + $0xf8] sm:$0xff] }
 0x507   :  { %3241 = vst [vmem:[#allocation3 + $0x128] sm:$0xff] %v3187_v35  ;;  %3974 = vmatmul.mubr.bf16.gmra.mrb[100].mxu0 %v3438_v7  ;;  %4180 = vmatmul.mubr.bf16.gmra.mrb[100].mxu1 %v3438_v7  ;;  %v3442_v30 = vpack.c.bf16 %v3187_v35, %v3186_v19  ;;  %v18012_v44 = vpack.c.bf16 %v18008_v29, %v18006_v53 }
 0x508   :  { %18664 = vst [vmem:[#allocation42_spill] sm:$0xff] %v18003_v13  ;;  %v3166_v52 = vpop.permute.xlu0 %3165  ;;  %v3414_v46 = vld [vmem:[#allocation3 + $0x108] sm:$0xff]  ;;  %v3425_v13 = vld [vmem:[#allocation3 + $0x160] sm:$0xff] }
 0x509   :  { %18665 = vst [vmem:[#allocation43_spill] sm:$0xff] %v18012_v44  ;;  %3242 = vst.msk [vmem:[#allocation3 + $0x138] sm:$0xff] %vm3219_vm6, %v3166_v52  ;;  %v3168_v12 = vpop.permute.xlu1 %3167  ;;  %3983 = vmatprep.mubr.bf16.mxu0 %v3442_v30  ;;  %4189 = vmatprep.mubr.bf16.mxu1 %v3442_v30  ;;  %v18015_v21 = vpack.c.bf16 %v3414_v46, %v3411_v61  ;;  %v18020_v1 = vld [vmem:[#allocation3 + $0x108] sm:$0xff]  ;;  %v18643_v30 = vmov 0  }
 0x50a   :  { %v3188_v62 = vsel %vm245_vm2, %v3166_v52, %v3168_v12  ;;  %v18030_v41 = vld [vmem:[#allocation3 + $0x110] sm:$0xff]  ;;  %v18060_v52 = vld [vmem:[#allocation3 + $0x28] sm:$0xff] }
 0x50b   :  { %3243 = vst [vmem:[#allocation3 + $0x140] sm:$0xff] %v3188_v62  ;;  %v18018_v16 = vpack.c.bf16 %v3188_v62, %v3187_v35  ;;  %v15300_v44 = vld [vmem:[#allocation13 + $0x1a8] ss:$16 sps:$4 sm:$0xff]  }
 0x50c   :  { %v3170_v22 = vpop.permute.xlu0 %3169  ;;  %v3417_v2 = vld [vmem:[#allocation3 + $0x120] sm:$0xff] }
 0x50d   :  { %v18022_v24 = vld [vmem:[#allocation3 + $0x120] sm:$0xff]  ;;  %3244 = vst.msk [vmem:[#allocation3 + $0x150] sm:$0xff] %vm3219_vm6, %v3170_v22  ;;  %v3172_v28 = vpop.permute.xlu1 %3171  ;;  %v3441_v37 = vpack.c.bf16 %v3417_v2, %v3414_v46 }
 0x50e   :  { %v18027_v40 = vpack.c.bf16 %v18022_v24, %v18020_v1  ;;  %v3189_v8 = vsel %vm245_vm2, %v3170_v22, %v3172_v28  ;;  %v18032_v49 = vld [vmem:[#allocation3 + $0x128] sm:$0xff]  ;;  %v18062_v46 = vld [vmem:[#allocation3 + $0x40] sm:$0xff] }
 0x50f   :  { %3245 = vst [vmem:[#allocation3 + $0x158] sm:$0xff] %v3189_v8  ;;  %3984 = vmatmul.mubr.bf16.gmra.mrb[104].mxu0 %v3441_v37  ;;  %4190 = vmatmul.mubr.bf16.gmra.mrb[104].mxu1 %v3441_v37  ;;  %v3445_v32 = vpack.c.bf16 %v3189_v8, %v3188_v62  ;;  %v18036_v50 = vpack.c.bf16 %v18032_v49, %v18030_v41  ;;  %v15219_v62 = vld [vmem:[#allocation13] ss:$16 sps:$4 sm:$0xff]   ;;  %v15222_v22 = vld [vmem:[#allocation13 + $0x8] ss:$16 sps:$4 sm:$0xff]  }
 0x510   :  { %18666 = vst [vmem:[#allocation44_spill] sm:$0xff] %v18027_v40  ;;  %v3174_v45 = vpop.permute.xlu0 %3173  ;;  %v3420_v51 = vld [vmem:[#allocation3 + $0x138] sm:$0xff]  ;;  %v3428_v12 = vpack.c.bf16 %v18062_v46, %v18060_v52  ;;  %v15230_v28 = vld [vmem:[#allocation13 + $0x2c] ss:$16 sps:$4 sm:$0xff]   ;;  %v15225_v37 = vld [vmem:[#allocation13 + $0x20] ss:$16 sps:$4 sm:$0xff]  }
 0x511   :  { %18667 = vst [vmem:[#allocation45_spill] sm:$0xff] %v18036_v50  ;;  %3246 = vst.msk [vmem:[#allocation3 + $0x168] sm:$0xff] %vm3219_vm6, %v3174_v45  ;;  %v3176_v57 = vpop.permute.xlu1 %3175  ;;  %3993 = vmatprep.mubr.bf16.mxu0 %v3445_v32  ;;  %4199 = vmatprep.mubr.bf16.mxu1 %v3445_v32  ;;  %v18039_v4 = vpack.c.bf16 %v3420_v51, %v3417_v2  ;;  %v18042_v0 = vld [vmem:[#allocation3 + $0x138] sm:$0xff]  ;;  %v18110_v40 = vld [vmem:[#allocation3 + $0x130] sm:$0xff] }
 0x512   :  { %v3190_v14 = vsel %vm245_vm2, %v3174_v45, %v3176_v57  ;;  %v18050_v5 = vld [vmem:[#allocation3 + $0x140] sm:$0xff]  ;;  %v15227_v2 = vld [vmem:[#allocation13 + $0x24] ss:$16 sps:$4 sm:$0xff]   ;;  %v15228_v8 = vld [vmem:[#allocation13 + $0x28] ss:$16 sps:$4 sm:$0xff]  }
 0x513   :  { %3247 = vst [vmem:[#allocation3 + $0x170] sm:$0xff] %v3190_v14  ;;  %v18068_v32 = vld [vmem:[#allocation3 + $0x58] sm:$0xff]  ;;  %v18070_v45 = vld [vmem:[#allocation3 + $0x70] sm:$0xff] }
 0x514   :  { %v3423_v15 = vld [vmem:[#allocation3 + $0x150] sm:$0xff]  ;;  %v3431_v14 = vpack.c.bf16 %v18070_v45, %v18068_v32 }
 0x515   :  { %v18044_v19 = vld [vmem:[#allocation3 + $0x150] sm:$0xff]  ;;  %v3444_v60 = vpack.c.bf16 %v3423_v15, %v3420_v51  ;;  %v15233_v51 = vld [vmem:[#allocation13 + $0x44] ss:$16 sps:$4 sm:$0xff]  }
 0x516   :  { %v18048_v61 = vpack.c.bf16 %v18044_v19, %v18042_v0  ;;  %v18052_v7 = vld [vmem:[#allocation3 + $0x158] sm:$0xff]  ;;  %v15236_v57 = vld [vmem:[#allocation13 + $0x4c] ss:$16 sps:$4 sm:$0xff]   ;;  %v15231_v15 = vld [vmem:[#allocation13 + $0x40] ss:$16 sps:$4 sm:$0xff]  }
 0x517   :  { %3994 = vmatmul.mubr.bf16.gmra.mrb[108].mxu0 %v3444_v60  ;;  %4200 = vmatmul.mubr.bf16.gmra.mrb[108].mxu1 %v3444_v60  ;;  %v18056_v35 = vpack.c.bf16 %v18052_v7, %v18050_v5  ;;  %v15234_v60 = vld [vmem:[#allocation13 + $0x48] ss:$16 sps:$4 sm:$0xff]   ;;  %v15285_v50 = vld [vmem:[#allocation13 + $0x160] ss:$16 sps:$4 sm:$0xff]  }
 0x518   :  { %18668 = vst [vmem:[#allocation46_spill] sm:$0xff] %v18048_v61  ;;  %4036 = vmatprep.mubr.bf16.mxu0 %v18643_v30  ;;  %4242 = vmatprep.mubr.bf16.mxu1 %v18643_v30  ;;  %v18100_v61 = vld [vmem:[#allocation3 + $0x100] sm:$0xff] }
 0x519   :  { %18669 = vst [vmem:[#allocation47_spill] sm:$0xff] %v18056_v35  ;;  %v15273_v35 = vld [vmem:[#allocation13 + $0x120] ss:$16 sps:$4 sm:$0xff]  }
 0x51f   :  { %13026 = vmatmul.mubr.msk.bf16.vlgmr.msra.gmra.mrb[84].mxu0 %vm245_vm2, %v3428_v12  ;;  %13033 = vmatmul.mubr.msk.bf16.vlgmr.msra.gmra.mrb[84].mxu1 %vm245_vm2, %v3428_v12  ;;  %v15239_v12 = vld [vmem:[#allocation13 + $0x64] ss:$16 sps:$4 sm:$0xff]  }
 0x520   :  { %4695 = vmatpush1.bf16.msra.mxu0 %v15219_v62  ;;  %4901 = vmatpush1.bf16.msra.mxu1 %v15222_v22  ;;  %v15242_v62 = vld [vmem:[#allocation13 + $0x6c] ss:$16 sps:$4 sm:$0xff]   ;;  %v15237_v22 = vld [vmem:[#allocation13 + $0x60] ss:$16 sps:$4 sm:$0xff]  }
 0x521   :  { %4696 = vmatprep.subr.bf16.mxu0 %v15227_v2  ;;  %4902 = vmatprep.subr.bf16.mxu1 %v15230_v28  ;;  %v15240_v2 = vld [vmem:[#allocation13 + $0x68] ss:$16 sps:$4 sm:$0xff]  }
 0x522   :  { %4046 = vmatprep.mubr.bf16.mxu0 %v18643_v30  ;;  %4252 = vmatprep.mubr.bf16.mxu1 %v18643_v30  ;;  %v18078_v28 = vld [vmem:[#allocation3 + $0x88] sm:$0xff]  ;;  %v18080_v30 = vld [vmem:[#allocation3 + $0xa0] sm:$0xff] }
 0x524   :  { %4697 = vmatpush1.bf16.msra.mxu0 %v15225_v37  ;;  %4903 = vmatpush1.bf16.msra.mxu1 %v15228_v8  ;;  %v15245_v37 = vld [vmem:[#allocation13 + $0x84] ss:$16 sps:$4 sm:$0xff]   ;;  %v15248_v8 = vld [vmem:[#allocation13 + $0x8c] ss:$16 sps:$4 sm:$0xff]  }
 0x525   :  { %4698 = vmatprep.subr.bf16.mxu0 %v15233_v51  ;;  %4904 = vmatprep.subr.bf16.mxu1 %v15236_v57  ;;  %v18670_v51 = vmov 0   ;;  %v3434_v57 = vpack.c.bf16 %v18080_v30, %v18078_v28 }
 0x527   :  { %13027 = vmatmul.mubr.msk.bf16.gmra.mrb[88].mxu0 %vm245_vm2, %v3431_v14  ;;  %13034 = vmatmul.mubr.msk.bf16.gmra.mrb[88].mxu1 %vm245_vm2, %v3431_v14  ;;  %v15243_v14 = vld [vmem:[#allocation13 + $0x80] ss:$16 sps:$4 sm:$0xff]  }
 0x528   :  { %4699 = vmatpush1.bf16.msra.mxu0 %v15231_v15  ;;  %4905 = vmatpush1.bf16.msra.mxu1 %v15234_v60  ;;  %v15246_v15 = vld [vmem:[#allocation13 + $0x88] ss:$16 sps:$4 sm:$0xff]   ;;  %v15251_v60 = vld [vmem:[#allocation13 + $0xa4] ss:$16 sps:$4 sm:$0xff]  }
 0x529   :  { %4700 = vmatprep.subr.bf16.mxu0 %v15239_v12  ;;  %4906 = vmatprep.subr.bf16.mxu1 %v15242_v62  ;;  %v15252_v12 = vld [vmem:[#allocation13 + $0xa8] ss:$16 sps:$4 sm:$0xff]  }
 0x52a   :  { %4056 = vmatprep.mubr.bf16.mxu0 %v18670_v51  ;;  %4262 = vmatprep.mubr.bf16.mxu1 %v18670_v51  ;;  %v18088_v62 = vld [vmem:[#allocation3 + $0xb8] sm:$0xff] }
 0x52c   :  { %4701 = vmatpush1.bf16.msra.mxu0 %v15237_v22  ;;  %4907 = vmatpush1.bf16.msra.mxu1 %v15240_v2  ;;  %v15257_v22 = vld [vmem:[#allocation13 + $0xc4] ss:$16 sps:$4 sm:$0xff]   ;;  %v15260_v2 = vld [vmem:[#allocation13 + $0xcc] ss:$16 sps:$4 sm:$0xff]  }
 0x52d   :  { %4702 = vmatprep.subr.bf16.mxu0 %v15245_v37  ;;  %4908 = vmatprep.subr.bf16.mxu1 %v15248_v8  ;;  %v3437_v37 = vpack.c.bf16 %v18090_v56, %v18088_v62  ;;  %v15255_v8 = vld [vmem:[#allocation13 + $0xc0] ss:$16 sps:$4 sm:$0xff]  }
 0x52f   :  { %13028 = vmatmul.mubr.msk.bf16.gmra.mrb[92].mxu0 %vm245_vm2, %v3434_v57  ;;  %13035 = vmatmul.mubr.msk.bf16.gmra.mrb[92].mxu1 %vm245_vm2, %v3434_v57  ;;  %v15258_v57 = vld [vmem:[#allocation13 + $0xc8] ss:$16 sps:$4 sm:$0xff]  }
 0x530   :  { %4703 = vmatpush1.bf16.msra.mxu0 %v15243_v14  ;;  %4909 = vmatpush1.bf16.msra.mxu1 %v15246_v15  ;;  %v15263_v14 = vld [vmem:[#allocation13 + $0xe4] ss:$16 sps:$4 sm:$0xff]   ;;  %v15266_v15 = vld [vmem:[#allocation13 + $0xec] ss:$16 sps:$4 sm:$0xff]  }
 0x531   :  { %4704 = vmatprep.subr.bf16.mxu0 %v15251_v60  ;;  %4910 = vmatprep.subr.bf16.mxu1 %v15254_v59  ;;  %v15264_v59 = vld [vmem:[#allocation13 + $0xe8] ss:$16 sps:$4 sm:$0xff]  }
 0x532   :  { %4066 = vmatprep.mubr.bf16.mxu0 %v18670_v51  ;;  %4272 = vmatprep.mubr.bf16.mxu1 %v18670_v51  ;;  %v18098_v60 = vld [vmem:[#allocation3 + $0xe8] sm:$0xff] }
 0x534   :  { %4705 = vmatpush1.bf16.msra.mxu0 %v15249_v58  ;;  %4911 = vmatpush1.bf16.msra.mxu1 %v15252_v12  ;;  %v15269_v58 = vld [vmem:[#allocation13 + $0x104] ss:$16 sps:$4 sm:$0xff]   ;;  %v15272_v12 = vld [vmem:[#allocation13 + $0x10c] ss:$16 sps:$4 sm:$0xff]  }
 0x535   :  { %4706 = vmatprep.subr.bf16.mxu0 %v15257_v22  ;;  %4912 = vmatprep.subr.bf16.mxu1 %v15260_v2  ;;  %v3440_v22 = vpack.c.bf16 %v18100_v61, %v18098_v60  ;;  %v15267_v2 = vld [vmem:[#allocation13 + $0x100] ss:$16 sps:$4 sm:$0xff]  }
 0x537   :  { %13029 = vmatmul.mubr.msk.bf16.gmra.mrb[96].mxu0 %vm245_vm2, %v3437_v37  ;;  %13036 = vmatmul.mubr.msk.bf16.gmra.mrb[96].mxu1 %vm245_vm2, %v3437_v37  ;;  %v15270_v37 = vld [vmem:[#allocation13 + $0x108] ss:$16 sps:$4 sm:$0xff]  }
 0x538   :  { %4707 = vmatpush1.bf16.msra.mxu0 %v15255_v8  ;;  %4913 = vmatpush1.bf16.msra.mxu1 %v15258_v57  ;;  %v15275_v8 = vld [vmem:[#allocation13 + $0x124] ss:$16 sps:$4 sm:$0xff]   ;;  %v15278_v57 = vld [vmem:[#allocation13 + $0x12c] ss:$16 sps:$4 sm:$0xff]  }
 0x539   :  { %4708 = vmatprep.subr.bf16.mxu0 %v15263_v14  ;;  %4914 = vmatprep.subr.bf16.mxu1 %v15266_v15  ;;  %v15276_v14 = vld [vmem:[#allocation13 + $0x128] ss:$16 sps:$4 sm:$0xff]  }
 0x53a   :  { %4076 = vmatprep.mubr.bf16.mxu0 %v18670_v51  ;;  %4282 = vmatprep.mubr.bf16.mxu1 %v18670_v51  ;;  %v18108_v15 = vld [vmem:[#allocation3 + $0x118] sm:$0xff] }
 0x53c   :  { %4709 = vmatpush1.bf16.msra.mxu0 %v15261_v55  ;;  %4915 = vmatpush1.bf16.msra.mxu1 %v15264_v59  ;;  %v15281_v55 = vld [vmem:[#allocation13 + $0x144] ss:$16 sps:$4 sm:$0xff]   ;;  %v15284_v59 = vld [vmem:[#allocation13 + $0x14c] ss:$16 sps:$4 sm:$0xff]  }
 0x53d   :  { %4710 = vmatprep.subr.bf16.mxu0 %v15269_v58  ;;  %4916 = vmatprep.subr.bf16.mxu1 %v15272_v12  ;;  %v3443_v58 = vpack.c.bf16 %v18110_v40, %v18108_v15  ;;  %v15279_v12 = vld [vmem:[#allocation13 + $0x140] ss:$16 sps:$4 sm:$0xff]  }
 0x53f   :  { %13030 = vmatmul.mubr.msk.bf16.gmra.mrb[100].mxu0 %vm245_vm2, %v3440_v22  ;;  %13037 = vmatmul.mubr.msk.bf16.gmra.mrb[100].mxu1 %vm245_vm2, %v3440_v22  ;;  %v15282_v22 = vld [vmem:[#allocation13 + $0x148] ss:$16 sps:$4 sm:$0xff]  }
 0x540   :  { %4711 = vmatpush1.bf16.msra.mxu0 %v15267_v2  ;;  %4917 = vmatpush1.bf16.msra.mxu1 %v15270_v37  ;;  %v15287_v2 = vld [vmem:[#allocation13 + $0x164] ss:$16 sps:$4 sm:$0xff]   ;;  %v15290_v37 = vld [vmem:[#allocation13 + $0x16c] ss:$16 sps:$4 sm:$0xff]  }
 0x541   :  { %4712 = vmatprep.subr.bf16.mxu0 %v15275_v8  ;;  %4918 = vmatprep.subr.bf16.mxu1 %v15278_v57  ;;  %v15288_v8 = vld [vmem:[#allocation13 + $0x168] ss:$16 sps:$4 sm:$0xff]  }
 0x542   :  { %4086 = vmatprep.mubr.bf16.mxu0 %v18670_v51  ;;  %4292 = vmatprep.mubr.bf16.mxu1 %v18670_v51  ;;  %v18118_v57 = vld [vmem:[#allocation3 + $0x148] sm:$0xff] }
 0x544   :  { %4713 = vmatpush1.bf16.msra.mxu0 %v15273_v35  ;;  %4919 = vmatpush1.bf16.msra.mxu1 %v15276_v14  ;;  %v15293_v35 = vld [vmem:[#allocation13 + $0x184] ss:$16 sps:$4 sm:$0xff]   ;;  %v15296_v14 = vld [vmem:[#allocation13 + $0x18c] ss:$16 sps:$4 sm:$0xff]  }
 0x545   :  { %4714 = vmatprep.subr.bf16.mxu0 %v15281_v55  ;;  %4920 = vmatprep.subr.bf16.mxu1 %v15284_v59  ;;  %v3446_v55 = vpack.c.bf16 %v3425_v13, %v18118_v57  ;;  %v15291_v59 = vld [vmem:[#allocation13 + $0x180] ss:$16 sps:$4 sm:$0xff]   ;;  %v15305_v13 = vld [vmem:[#allocation13 + $0x1c4] ss:$16 sps:$4 sm:$0xff]  }
 0x547   :  { %13031 = vmatmul.mubr.msk.bf16.gmra.mrb[104].mxu0 %vm245_vm2, %v3443_v58  ;;  %13038 = vmatmul.mubr.msk.bf16.gmra.mrb[104].mxu1 %vm245_vm2, %v3443_v58  ;;  %v15294_v58 = vld [vmem:[#allocation13 + $0x188] ss:$16 sps:$4 sm:$0xff]  }
 0x548   :  { %4715 = vmatpush1.bf16.msra.mxu0 %v15279_v12  ;;  %4921 = vmatpush1.bf16.msra.mxu1 %v15282_v22  ;;  %v15299_v12 = vld [vmem:[#allocation13 + $0x1a4] ss:$16 sps:$4 sm:$0xff]   ;;  %v15302_v22 = vld [vmem:[#allocation13 + $0x1ac] ss:$16 sps:$4 sm:$0xff]  }
 0x549   :  { %4716 = vmatprep.subr.bf16.mxu0 %v15287_v2  ;;  %4922 = vmatprep.subr.bf16.mxu1 %v15290_v37  ;;  %v3291_v2 = vpack.c.bf16 %v17926_v48, %v17926_v48  ;;  %v15297_v37 = vld [vmem:[#allocation13 + $0x1a0] ss:$16 sps:$4 sm:$0xff]   ;;  %v15311_v48 = vld [vmem:[#allocation13 + $0x1e4] ss:$16 sps:$4 sm:$0xff]  }
 0x54a   :  { %4096 = vmatprep.mubr.bf16.mxu0 %v18670_v51  ;;  %4302 = vmatprep.mubr.bf16.mxu1 %v18670_v51 }
 0x54c   :  { %4717 = vmatpush1.bf16.msra.mxu0 %v15285_v50  ;;  %4923 = vmatpush1.bf16.msra.mxu1 %v15288_v8  ;;  %v15308_v50 = vld [vmem:[#allocation13 + $0x1cc] ss:$16 sps:$4 sm:$0xff]   ;;  %v15303_v8 = vld [vmem:[#allocation13 + $0x1c0] ss:$16 sps:$4 sm:$0xff]  }
 0x54d   :  { %4718 = vmatprep.subr.bf16.mxu0 %v15293_v35  ;;  %4924 = vmatprep.subr.bf16.mxu1 %v15296_v14  ;;  %v15306_v35 = vld [vmem:[#allocation13 + $0x1c8] ss:$16 sps:$4 sm:$0xff]   ;;  %v15314_v14 = vld [vmem:[#allocation13 + $0x1ec] ss:$16 sps:$4 sm:$0xff]  }
 0x54f   :  { %13032 = vmatmul.mubr.msk.bf16.gmra.mrb[108].mxu0 %vm245_vm2, %v3446_v55  ;;  %13039 = vmatmul.mubr.msk.bf16.gmra.mrb[108].mxu1 %vm245_vm2, %v3446_v55  ;;  %v15309_v55 = vld [vmem:[#allocation13 + $0x1e0] ss:$16 sps:$4 sm:$0xff]  }
 0x550   :  { %4719 = vmatpush1.bf16.msra.mxu0 %v15291_v59  ;;  %4925 = vmatpush1.bf16.msra.mxu1 %v15294_v58  ;;  %v15312_v59 = vld [vmem:[#allocation13 + $0x1e8] ss:$16 sps:$4 sm:$0xff]   ;;  %v15317_v58 = vld [vmem:[#allocation13 + $0x204] ss:$16 sps:$4 sm:$0xff]  }
 0x551   :  { %4720 = vmatprep.subr.bf16.mxu0 %v15299_v12  ;;  %4926 = vmatprep.subr.bf16.mxu1 %v15302_v22  ;;  %v15323_v12 = vld [vmem:[#allocation13 + $0x20c] ss:$16 sps:$4 sm:$0xff]   ;;  %v15315_v22 = vld [vmem:[#allocation13 + $0x200] ss:$16 sps:$4 sm:$0xff]  }
 0x552   :  { %4726 = vmatprep.mubr.bf16.mxu0 %v3291_v2  ;;  %4932 = vmatprep.mubr.bf16.mxu1 %v3291_v2 }
 0x554   :  { %4721 = vmatpush1.bf16.msra.mxu0 %v15297_v37  ;;  %4927 = vmatpush1.bf16.msra.mxu1 %v15300_v44  ;;  %v15320_v37 = vld [vmem:[#allocation13 + $0x224] ss:$16 sps:$4 sm:$0xff]   ;;  %v15321_v44 = vld [vmem:[#allocation13 + $0x208] ss:$16 sps:$4 sm:$0xff]  }
 0x555   :  { %4722 = vmatprep.subr.bf16.mxu0 %v15305_v13  ;;  %4928 = vmatprep.subr.bf16.mxu1 %v15308_v50  ;;  %v15326_v13 = vld [vmem:[#allocation13 + $0x22c] ss:$16 sps:$4 sm:$0xff]   ;;  %v15318_v50 = vld [vmem:[#allocation13 + $0x220] ss:$16 sps:$4 sm:$0xff]  }
 0x558   :  { %4723 = vmatpush1.bf16.msra.mxu0 %v15303_v8  ;;  %4929 = vmatpush1.bf16.msra.mxu1 %v15306_v35  ;;  %v15329_v8 = vld [vmem:[#allocation13 + $0x484] ss:$16 sps:$4 sm:$0xff]   ;;  %v15324_v35 = vld [vmem:[#allocation13 + $0x228] ss:$16 sps:$4 sm:$0xff]  }
 0x559   :  { %4724 = vmatprep.subr.bf16.mxu0 %v15311_v48  ;;  %4930 = vmatprep.subr.bf16.mxu1 %v15314_v14  ;;  %v15332_v48 = vld [vmem:[#allocation13 + $0x48c] ss:$16 sps:$4 sm:$0xff]  }
 0x55a   :  { %v15350_v14 = vld [vmem:[#allocation13 + $0x4ec] ss:$16 sps:$4 sm:$0xff]  }
 0x55c   :  { %4725 = vmatpush1.bf16.msra.mxu0 %v15309_v55  ;;  %4931 = vmatpush1.bf16.msra.mxu1 %v15312_v59  ;;  %v15345_v55 = vld [vmem:[#allocation13 + $0x4e0] ss:$16 sps:$4 sm:$0xff]   ;;  %v15348_v59 = vld [vmem:[#allocation13 + $0x4e8] ss:$16 sps:$4 sm:$0xff]  }
 0x55d   :  { %4797 = vmatprep.subr.bf16.mxu0 %v15317_v58  ;;  %5003 = vmatprep.subr.bf16.mxu1 %v15323_v12  ;;  %v15353_v58 = vld [vmem:[#allocation13 + $0x504] ss:$16 sps:$4 sm:$0xff]   ;;  %v15351_v12 = vld [vmem:[#allocation13 + $0x500] ss:$16 sps:$4 sm:$0xff]  }
 0x55f   :  { %4727 = vmatmul.mubr.bf16.vlgmr.msra.gmra.mrb[84].mxu0 %v3291_v2  ;;  %4933 = vmatmul.mubr.bf16.vlgmr.msra.gmra.mrb[84].mxu1 %v3291_v2  ;;  %v15347_v2 = vld [vmem:[#allocation13 + $0x4e4] ss:$16 sps:$4 sm:$0xff]  }
 0x560   :  { %4736 = vmatprep.mubr.bf16.mxu0 %v17931_v11  ;;  %4798 = vmatpush1.bf16.msra.mxu0 %v15315_v22  ;;  %v15354_v22 = vld [vmem:[#allocation13 + $0x508] ss:$16 sps:$4 sm:$0xff]  }
 0x561   :  { %4942 = vmatprep.mubr.bf16.mxu1 %v17931_v11  ;;  %4799 = vmatprep.subr.bf16.mxu0 %v15320_v37  ;;  %v3250_v11 = vld [vmem:[#allocation3 + $0x10] sm:$0xff]  ;;  %v15359_v37 = vld [vmem:[#allocation13 + $0x524] ss:$16 sps:$4 sm:$0xff]  }
 0x562   :  { %5004 = vmatpush1.bf16.msra.mxu1 %v15321_v44  ;;  %v15362_v44 = vld [vmem:[#allocation13 + $0x52c] ss:$16 sps:$4 sm:$0xff]  }
 0x563   :  { %5005 = vmatprep.subr.bf16.mxu1 %v15326_v13  ;;  %v15357_v13 = vld [vmem:[#allocation13 + $0x520] ss:$16 sps:$4 sm:$0xff]  }
 0x564   :  { %4800 = vmatpush1.bf16.msra.mxu0 %v15318_v50  ;;  %v15360_v50 = vld [vmem:[#allocation13 + $0x528] ss:$16 sps:$4 sm:$0xff]  }
 0x565   :  { %5623 = vmatprep.subr.bf16.mxu0 %v15329_v8  ;;  %v15365_v8 = vld [vmem:[#allocation13 + $0x544] ss:$16 sps:$4 sm:$0xff]  }
 0x566   :  { %5006 = vmatpush1.bf16.msra.mxu1 %v15324_v35  ;;  %v15363_v35 = vld [vmem:[#allocation13 + $0x540] ss:$16 sps:$4 sm:$0xff]  }
 0x567   :  { %4737 = vmatmul.mubr.bf16.gmra.mrb[88].mxu0 %v17937_v27  ;;  %4943 = vmatmul.mubr.bf16.gmra.mrb[88].mxu1 %v17937_v27  ;;  %v3292_v27 = vpack.c.bf16 %v18060_v52, %v3250_v11  ;;  %v15342_v52 = vld [vmem:[#allocation13 + $0x4c8] ss:$16 sps:$4 sm:$0xff]   ;;  %v15371_v11 = vld [vmem:[#allocation13 + $0x564] ss:$16 sps:$4 sm:$0xff]  }
 0x568   :  { %4746 = vmatprep.mubr.bf16.mxu0 %v17940_v20  ;;  %4952 = vmatprep.mubr.bf16.mxu1 %v17940_v20  ;;  %v15327_v20 = vld [vmem:[#allocation13 + $0x480] ss:$16 sps:$4 sm:$0xff]  }
 0x569   :  { %5829 = vmatprep.subr.bf16.mxu1 %v15332_v48  ;;  %v15366_v48 = vld [vmem:[#allocation13 + $0x548] ss:$16 sps:$4 sm:$0xff]  }
 0x56f   :  { %4747 = vmatmul.mubr.bf16.gmra.mrb[92].mxu0 %v17952_v9  ;;  %4953 = vmatmul.mubr.bf16.gmra.mrb[92].mxu1 %v17952_v9  ;;  %v15330_v9 = vld [vmem:[#allocation13 + $0x488] ss:$16 sps:$4 sm:$0xff]  }
 0x570   :  { %4756 = vmatprep.mubr.bf16.mxu0 %v17955_v17  ;;  %4962 = vmatprep.mubr.bf16.mxu1 %v17955_v17  ;;  %v15335_v17 = vld [vmem:[#allocation13 + $0x4a4] ss:$16 sps:$4 sm:$0xff]  }
 0x577   :  { %4757 = vmatmul.mubr.bf16.gmra.mrb[96].mxu0 %v17967_v43  ;;  %4963 = vmatmul.mubr.bf16.gmra.mrb[96].mxu1 %v17967_v43  ;;  %v15338_v43 = vld [vmem:[#allocation13 + $0x4ac] ss:$16 sps:$4 sm:$0xff]  }
 0x578   :  { %4766 = vmatprep.mubr.bf16.mxu0 %v17970_v10  ;;  %4972 = vmatprep.mubr.bf16.mxu1 %v17970_v10  ;;  %v15333_v10 = vld [vmem:[#allocation13 + $0x4a0] ss:$16 sps:$4 sm:$0xff]  }
 0x57f   :  { %4767 = vmatmul.mubr.bf16.gmra.mrb[100].mxu0 %v17991_v31  ;;  %4973 = vmatmul.mubr.bf16.gmra.mrb[100].mxu1 %v17991_v31  ;;  %v15336_v31 = vld [vmem:[#allocation13 + $0x4a8] ss:$16 sps:$4 sm:$0xff]  }
 0x580   :  { %4776 = vmatprep.mubr.bf16.mxu0 %v17994_v38  ;;  %4982 = vmatprep.mubr.bf16.mxu1 %v17994_v38  ;;  %v15341_v38 = vld [vmem:[#allocation13 + $0x4c4] ss:$16 sps:$4 sm:$0xff]  }
 0x587   :  { %4777 = vmatmul.mubr.bf16.gmra.mrb[104].mxu0 %v18015_v21  ;;  %4983 = vmatmul.mubr.bf16.gmra.mrb[104].mxu1 %v18015_v21  ;;  %v15344_v21 = vld [vmem:[#allocation13 + $0x4cc] ss:$16 sps:$4 sm:$0xff]  }
 0x588   :  { %4786 = vmatprep.mubr.bf16.mxu0 %v18018_v16  ;;  %4992 = vmatprep.mubr.bf16.mxu1 %v18018_v16  ;;  %v3295_v16 = vpack.c.bf16 %v18068_v32, %v18062_v46  ;;  %v15356_v46 = vld [vmem:[#allocation13 + $0x50c] ss:$16 sps:$4 sm:$0xff]   ;;  %v3298_v32 = vpack.c.bf16 %v18078_v28, %v18070_v45  ;;  %v3301_v28 = vpack.c.bf16 %v18088_v62, %v18080_v30 }
 0x589   :  { %v15368_v45 = vld [vmem:[#allocation13 + $0x54c] ss:$16 sps:$4 sm:$0xff]   ;;  %v3304_v62 = vpack.c.bf16 %v18098_v60, %v18090_v56  ;;  %v3307_v60 = vpack.c.bf16 %v18108_v15, %v18100_v61  ;;  %v3310_v15 = vpack.c.bf16 %v18118_v57, %v18110_v40  ;;  %v15413_v40 = vld [vmem:[#allocation13 + $0x644] ss:$16 sps:$4 sm:$0xff]  }
 0x58a   :  { %v15380_v30 = vld [vmem:[#allocation13 + $0x58c] ss:$16 sps:$4 sm:$0xff]  }
 0x58b   :  { %v15392_v56 = vld [vmem:[#allocation13 + $0x5cc] ss:$16 sps:$4 sm:$0xff]  }
 0x58c   :  { %v15404_v61 = vld [vmem:[#allocation13 + $0x60c] ss:$16 sps:$4 sm:$0xff]  }
 0x58d   :  { %v15416_v57 = vld [vmem:[#allocation13 + $0x64c] ss:$16 sps:$4 sm:$0xff]  }
 0x58f   :  { %4787 = vmatmul.mubr.bf16.gmra.mrb[108].mxu0 %v18039_v4  ;;  %4993 = vmatmul.mubr.bf16.gmra.mrb[108].mxu1 %v18039_v4  ;;  %v15339_v4 = vld [vmem:[#allocation13 + $0x4c0] ss:$16 sps:$4 sm:$0xff]  }
 0x590   :  { %4829 = vmatprep.mubr.bf16.mxu0 %v18670_v51  ;;  %5035 = vmatprep.mubr.bf16.mxu1 %v18670_v51 }
 0x597   :  { %13112 = vmatmul.mubr.msk.bf16.vlgmr.msra.gmra.mrb[84].mxu0 %vm245_vm2, %v3292_v27  ;;  %13119 = vmatmul.mubr.msk.bf16.vlgmr.msra.gmra.mrb[84].mxu1 %vm245_vm2, %v3292_v27  ;;  %v15374_v27 = vld [vmem:[#allocation13 + $0x56c] ss:$16 sps:$4 sm:$0xff]  }
 0x598   :  { %5624 = vmatpush1.bf16.msra.mxu0 %v15327_v20  ;;  %5830 = vmatpush1.bf16.msra.mxu1 %v15330_v9  ;;  %v15369_v20 = vld [vmem:[#allocation13 + $0x560] ss:$16 sps:$4 sm:$0xff]   ;;  %v15372_v9 = vld [vmem:[#allocation13 + $0x568] ss:$16 sps:$4 sm:$0xff]  }
 0x599   :  { %5625 = vmatprep.subr.bf16.mxu0 %v15335_v17  ;;  %5831 = vmatprep.subr.bf16.mxu1 %v15338_v43  ;;  %v15377_v17 = vld [vmem:[#allocation13 + $0x584] ss:$16 sps:$4 sm:$0xff]   ;;  %v15375_v43 = vld [vmem:[#allocation13 + $0x580] ss:$16 sps:$4 sm:$0xff]  }
 0x59a   :  { %4839 = vmatprep.mubr.bf16.mxu0 %v18670_v51  ;;  %5045 = vmatprep.mubr.bf16.mxu1 %v18670_v51 }
 0x59c   :  { %5626 = vmatpush1.bf16.msra.mxu0 %v15333_v10  ;;  %5832 = vmatpush1.bf16.msra.mxu1 %v15336_v31  ;;  %v15378_v10 = vld [vmem:[#allocation13 + $0x588] ss:$16 sps:$4 sm:$0xff]   ;;  %v15383_v31 = vld [vmem:[#allocation13 + $0x5a4] ss:$16 sps:$4 sm:$0xff]  }
 0x59d   :  { %5627 = vmatprep.subr.bf16.mxu0 %v15341_v38  ;;  %5833 = vmatprep.subr.bf16.mxu1 %v15344_v21  ;;  %v15386_v38 = vld [vmem:[#allocation13 + $0x5ac] ss:$16 sps:$4 sm:$0xff]   ;;  %v15381_v21 = vld [vmem:[#allocation13 + $0x5a0] ss:$16 sps:$4 sm:$0xff]  }
 0x59f   :  { %13113 = vmatmul.mubr.msk.bf16.gmra.mrb[88].mxu0 %vm245_vm2, %v3295_v16  ;;  %13120 = vmatmul.mubr.msk.bf16.gmra.mrb[88].mxu1 %vm245_vm2, %v3295_v16  ;;  %v15384_v16 = vld [vmem:[#allocation13 + $0x5a8] ss:$16 sps:$4 sm:$0xff]  }
 0x5a0   :  { %5628 = vmatpush1.bf16.msra.mxu0 %v15339_v4  ;;  %5834 = vmatpush1.bf16.msra.mxu1 %v15342_v52  ;;  %v15389_v4 = vld [vmem:[#allocation13 + $0x5c4] ss:$16 sps:$4 sm:$0xff]   ;;  %v15387_v52 = vld [vmem:[#allocation13 + $0x5c0] ss:$16 sps:$4 sm:$0xff]  }
 0x5a1   :  { %5629 = vmatprep.subr.bf16.mxu0 %v15347_v2  ;;  %5835 = vmatprep.subr.bf16.mxu1 %v15350_v14  ;;  %v15390_v2 = vld [vmem:[#allocation13 + $0x5c8] ss:$16 sps:$4 sm:$0xff]   ;;  %v15395_v14 = vld [vmem:[#allocation13 + $0x5e4] ss:$16 sps:$4 sm:$0xff]  }
 0x5a2   :  { %4849 = vmatprep.mubr.bf16.mxu0 %v18670_v51  ;;  %5055 = vmatprep.mubr.bf16.mxu1 %v18670_v51 }
 0x5a4   :  { %5630 = vmatpush1.bf16.msra.mxu0 %v15345_v55  ;;  %5836 = vmatpush1.bf16.msra.mxu1 %v15348_v59  ;;  %v15398_v55 = vld [vmem:[#allocation13 + $0x5ec] ss:$16 sps:$4 sm:$0xff]   ;;  %v15393_v59 = vld [vmem:[#allocation13 + $0x5e0] ss:$16 sps:$4 sm:$0xff]  }
 0x5a5   :  { %5631 = vmatprep.subr.bf16.mxu0 %v15353_v58  ;;  %5837 = vmatprep.subr.bf16.mxu1 %v15356_v46  ;;  %v15396_v58 = vld [vmem:[#allocation13 + $0x5e8] ss:$16 sps:$4 sm:$0xff]   ;;  %v15401_v46 = vld [vmem:[#allocation13 + $0x604] ss:$16 sps:$4 sm:$0xff]  }
 0x5a7   :  { %13114 = vmatmul.mubr.msk.bf16.gmra.mrb[92].mxu0 %vm245_vm2, %v3298_v32  ;;  %13121 = vmatmul.mubr.msk.bf16.gmra.mrb[92].mxu1 %vm245_vm2, %v3298_v32  ;;  %v15399_v32 = vld [vmem:[#allocation13 + $0x600] ss:$16 sps:$4 sm:$0xff]  }
 0x5a8   :  { %5632 = vmatpush1.bf16.msra.mxu0 %v15351_v12  ;;  %5838 = vmatpush1.bf16.msra.mxu1 %v15354_v22  ;;  %v15402_v12 = vld [vmem:[#allocation13 + $0x608] ss:$16 sps:$4 sm:$0xff]  }
 0x5a9   :  { %5633 = vmatprep.subr.bf16.mxu0 %v15359_v37  ;;  %5839 = vmatprep.subr.bf16.mxu1 %v15362_v44  ;;  %v5107_v22 = vld [vmem:[#allocation3 + $0x38] sm:$0xff]  ;;  %v15410_v44 = vld [vmem:[#allocation13 + $0x62c] ss:$16 sps:$4 sm:$0xff]  }
 0x5aa   :  { %4859 = vmatprep.mubr.bf16.mxu0 %v18670_v51  ;;  %5065 = vmatprep.mubr.bf16.mxu1 %v18670_v51  ;;  %v15407_v37 = vld [vmem:[#allocation13 + $0x624] ss:$16 sps:$4 sm:$0xff]  }
 0x5ac   :  { %5634 = vmatpush1.bf16.msra.mxu0 %v15357_v13  ;;  %5840 = vmatpush1.bf16.msra.mxu1 %v15360_v50  ;;  %v5149_v13 = vpack.c.bf16 %v17946_v54, %v5107_v22  ;;  %v15405_v50 = vld [vmem:[#allocation13 + $0x620] ss:$16 sps:$4 sm:$0xff]   ;;  %v15449_v22 = vld [vmem:[#allocation13 + $0x704] ss:$16 sps:$4 sm:$0xff]  }
 0x5ad   :  { %5635 = vmatprep.subr.bf16.mxu0 %v15365_v8  ;;  %5841 = vmatprep.subr.bf16.mxu1 %v15368_v45  ;;  %v15408_v8 = vld [vmem:[#allocation13 + $0x628] ss:$16 sps:$4 sm:$0xff]   ;;  %v15411_v45 = vld [vmem:[#allocation13 + $0x640] ss:$16 sps:$4 sm:$0xff]  }
 0x5ae   :  { %v15417_v54 = vld [vmem:[#allocation13 + $0x660] ss:$16 sps:$4 sm:$0xff]  }
 0x5af   :  { %13115 = vmatmul.mubr.msk.bf16.gmra.mrb[96].mxu0 %vm245_vm2, %v3301_v28  ;;  %13122 = vmatmul.mubr.msk.bf16.gmra.mrb[96].mxu1 %vm245_vm2, %v3301_v28  ;;  %v15414_v28 = vld [vmem:[#allocation13 + $0x648] ss:$16 sps:$4 sm:$0xff]  }
 0x5b0   :  { %5636 = vmatpush1.bf16.msra.mxu0 %v15363_v35  ;;  %5842 = vmatpush1.bf16.msra.mxu1 %v15366_v48  ;;  %v15419_v35 = vld [vmem:[#allocation13 + $0x664] ss:$16 sps:$4 sm:$0xff]   ;;  %v15422_v48 = vld [vmem:[#allocation13 + $0x66c] ss:$16 sps:$4 sm:$0xff]  }
 0x5b1   :  { %5637 = vmatprep.subr.bf16.mxu0 %v15371_v11  ;;  %5843 = vmatprep.subr.bf16.mxu1 %v15374_v27  ;;  %v15420_v11 = vld [vmem:[#allocation13 + $0x668] ss:$16 sps:$4 sm:$0xff]   ;;  %v15425_v27 = vld [vmem:[#allocation13 + $0x684] ss:$16 sps:$4 sm:$0xff]  }
 0x5b2   :  { %4869 = vmatprep.mubr.bf16.mxu0 %v18670_v51  ;;  %5075 = vmatprep.mubr.bf16.mxu1 %v18670_v51 }
 0x5b4   :  { %5638 = vmatpush1.bf16.msra.mxu0 %v15369_v20  ;;  %5844 = vmatpush1.bf16.msra.mxu1 %v15372_v9  ;;  %v15431_v20 = vld [vmem:[#allocation13 + $0x68c] ss:$16 sps:$4 sm:$0xff]  }
 0x5b5   :  { %5639 = vmatprep.subr.bf16.mxu0 %v15377_v17  ;;  %5845 = vmatprep.subr.bf16.mxu1 %v15380_v30  ;;  %v5106_v9 = vld [vmem:[#allocation3 + $0x30] sm:$0xff]  ;;  %v16474_v30 = vld [vmem:[#allocation3 + $0x48] sm:$0xff] }
 0x5b6   :  { %v15423_v17 = vld [vmem:[#allocation13 + $0x680] ss:$16 sps:$4 sm:$0xff]  }
 0x5b7   :  { %13116 = vmatmul.mubr.msk.bf16.gmra.mrb[100].mxu0 %vm245_vm2, %v3304_v62  ;;  %13123 = vmatmul.mubr.msk.bf16.gmra.mrb[100].mxu1 %vm245_vm2, %v3304_v62  ;;  %v5148_v62 = vpack.c.bf16 %v16474_v30, %v5106_v9  ;;  %v15467_v9 = vld [vmem:[#allocation13 + $0x764] ss:$16 sps:$4 sm:$0xff]   ;;  %v15465_v30 = vld [vmem:[#allocation13 + $0x760] ss:$16 sps:$4 sm:$0xff]  }
 0x5b8   :  { %5640 = vmatpush1.bf16.msra.mxu0 %v15375_v43  ;;  %5846 = vmatpush1.bf16.msra.mxu1 %v15378_v10  ;;  %v15428_v43 = vld [vmem:[#allocation13 + $0x6a4] ss:$16 sps:$4 sm:$0xff]  }
 0x5b9   :  { %5641 = vmatprep.subr.bf16.mxu0 %v15383_v31  ;;  %5847 = vmatprep.subr.bf16.mxu1 %v15386_v38  ;;  %v16475_v10 = vld [vmem:[#allocation3 + $0x68] sm:$0xff] }
 0x5ba   :  { %4879 = vmatprep.mubr.bf16.mxu0 %v18670_v51  ;;  %5085 = vmatprep.mubr.bf16.mxu1 %v18670_v51  ;;  %v5152_v31 = vpack.c.bf16 %v17961_v25, %v16475_v10  ;;  %v15429_v38 = vld [vmem:[#allocation13 + $0x688] ss:$16 sps:$4 sm:$0xff]  }
 0x5bb   :  { %v16478_v25 = vld [vmem:[#allocation3 + $0x98] sm:$0xff]  ;;  %v18245_v10 = vld [vmem:[#allocation3 + $0xe8] sm:$0xff] }
 0x5bc   :  { %5642 = vmatpush1.bf16.msra.mxu0 %v15381_v21  ;;  %5848 = vmatpush1.bf16.msra.mxu1 %v15384_v16  ;;  %v15434_v21 = vld [vmem:[#allocation13 + $0x6ac] ss:$16 sps:$4 sm:$0xff]   ;;  %v15426_v16 = vld [vmem:[#allocation13 + $0x6a0] ss:$16 sps:$4 sm:$0xff]  }
 0x5bd   :  { %5643 = vmatprep.subr.bf16.mxu0 %v15389_v4  ;;  %5849 = vmatprep.subr.bf16.mxu1 %v15392_v56  ;;  %v15437_v4 = vld [vmem:[#allocation13 + $0x6c4] ss:$16 sps:$4 sm:$0xff]   ;;  %v15432_v56 = vld [vmem:[#allocation13 + $0x6a8] ss:$16 sps:$4 sm:$0xff]  }
 0x5bf   :  { %13117 = vmatmul.mubr.msk.bf16.gmra.mrb[104].mxu0 %vm245_vm2, %v3307_v60  ;;  %13124 = vmatmul.mubr.msk.bf16.gmra.mrb[104].mxu1 %vm245_vm2, %v3307_v60  ;;  %v16476_v60 = vld [vmem:[#allocation3 + $0x60] sm:$0xff] }
 0x5c0   :  { %5644 = vmatpush1.bf16.msra.mxu0 %v15387_v52  ;;  %5850 = vmatpush1.bf16.msra.mxu1 %v15390_v2  ;;  %v16477_v52 = vld [vmem:[#allocation3 + $0x78] sm:$0xff] }
 0x5c1   :  { %5645 = vmatprep.subr.bf16.mxu0 %v15395_v14  ;;  %5851 = vmatprep.subr.bf16.mxu1 %v15398_v55  ;;  %v5151_v2 = vpack.c.bf16 %v16477_v52, %v16476_v60  ;;  %v15440_v14 = vld [vmem:[#allocation13 + $0x6cc] ss:$16 sps:$4 sm:$0xff]   ;;  %v5155_v55 = vpack.c.bf16 %v17982_v47, %v16478_v25  ;;  %v5161_v47 = vpack.c.bf16 %v18030_v41, %v18008_v29  ;;  %v15477_v52 = vld [vmem:[#allocation13 + $0x7a0] ss:$16 sps:$4 sm:$0xff]   ;;  %v18255_v25 = vld [vmem:[#allocation3 + $0x118] sm:$0xff] }
 0x5c2   :  { %4889 = vmatprep.mubr.bf16.mxu0 %v18670_v51  ;;  %5095 = vmatprep.mubr.bf16.mxu1 %v18670_v51  ;;  %v15482_v60 = vld [vmem:[#allocation13 + $0x7ac] ss:$16 sps:$4 sm:$0xff]  }
 0x5c4   :  { %5646 = vmatpush1.bf16.msra.mxu0 %v15393_v59  ;;  %5852 = vmatpush1.bf16.msra.mxu1 %v15396_v58  ;;  %v16479_v59 = vld [vmem:[#allocation3 + $0x90] sm:$0xff] }
 0x5c5   :  { %5647 = vmatprep.subr.bf16.mxu0 %v15401_v46  ;;  %5853 = vmatprep.subr.bf16.mxu1 %v15404_v61  ;;  %v5154_v58 = vpack.c.bf16 %v17972_v42, %v16479_v59  ;;  %v5158_v46 = vpack.c.bf16 %v18006_v53, %v17984_v39  ;;  %v5157_v61 = vpack.c.bf16 %v17996_v63, %v17974_v36  ;;  %v18206_v53 = vld [vmem:[#allocation3 + $0x170] sm:$0xff] }
 0x5c6   :  { %v5160_v42 = vpack.c.bf16 %v18020_v1, %v17998_v3  ;;  %v5164_v39 = vpack.c.bf16 %v18050_v5, %v18032_v49  ;;  %v5163_v36 = vpack.c.bf16 %v18042_v0, %v18022_v24  ;;  %v5167_v63 = vpack.c.bf16 %v18206_v53, %v18052_v7  ;;  %v18212_v3 = vld [vmem:[#allocation3 + $0x168] sm:$0xff]  ;;  %v5108_v1 = vld [vmem:[#allocation3 + $0x40] sm:$0xff]  ;;  %v18218_v24 = vld [vmem:[#allocation3 + $0x58] sm:$0xff] }
 0x5c7   :  { %13118 = vmatmul.mubr.msk.bf16.gmra.mrb[108].mxu0 %vm245_vm2, %v3310_v15  ;;  %13125 = vmatmul.mubr.msk.bf16.gmra.mrb[108].mxu1 %vm245_vm2, %v3310_v15  ;;  %v5166_v29 = vpack.c.bf16 %v18212_v3, %v18044_v19  ;;  %v5150_v41 = vpack.c.bf16 %v18218_v24, %v5108_v1  ;;  %v15435_v49 = vld [vmem:[#allocation13 + $0x6c0] ss:$16 sps:$4 sm:$0xff]   ;;  %v15438_v0 = vld [vmem:[#allocation13 + $0x6c8] ss:$16 sps:$4 sm:$0xff]   ;;  %v15443_v5 = vld [vmem:[#allocation13 + $0x6e4] ss:$16 sps:$4 sm:$0xff]  }
 0x5c8   :  { %5648 = vmatpush1.bf16.msra.mxu0 %v15399_v32  ;;  %5854 = vmatpush1.bf16.msra.mxu1 %v15402_v12  ;;  %v15446_v7 = vld [vmem:[#allocation13 + $0x6ec] ss:$16 sps:$4 sm:$0xff]   ;;  %v15441_v19 = vld [vmem:[#allocation13 + $0x6e0] ss:$16 sps:$4 sm:$0xff]   ;;  %v15444_v15 = vld [vmem:[#allocation13 + $0x6e8] ss:$16 sps:$4 sm:$0xff]  }
 0x5c9   :  { %5655 = vmatprep.mubr.bf16.mxu0 %v5149_v13  ;;  %5861 = vmatprep.mubr.bf16.mxu1 %v5149_v13  ;;  %v18223_v32 = vld [vmem:[#allocation3 + $0x70] sm:$0xff]  ;;  %v18225_v12 = vld [vmem:[#allocation3 + $0x88] sm:$0xff] }
 0x5ca   :  { %5649 = vmatprep.subr.bf16.mxu0 %v15407_v37  ;;  %5855 = vmatprep.subr.bf16.mxu1 %v15410_v44  ;;  %v15452_v37 = vld [vmem:[#allocation13 + $0x70c] ss:$16 sps:$4 sm:$0xff]   ;;  %v5153_v44 = vpack.c.bf16 %v18225_v12, %v18223_v32  ;;  %v15447_v13 = vld [vmem:[#allocation13 + $0x700] ss:$16 sps:$4 sm:$0xff]   ;;  %v15497_v1 = vld [vmem:[#allocation13 + $0x804] ss:$16 sps:$4 sm:$0xff]  }
 0x5cb   :  { %v15488_v59 = vld [vmem:[#allocation13 + $0x7cc] ss:$16 sps:$4 sm:$0xff]  }
 0x5cc   :  { %5650 = vmatpush1.bf16.msra.mxu0 %v15405_v50  ;;  %5856 = vmatpush1.bf16.msra.mxu1 %v15408_v8  ;;  %v15450_v50 = vld [vmem:[#allocation13 + $0x708] ss:$16 sps:$4 sm:$0xff]   ;;  %v15455_v8 = vld [vmem:[#allocation13 + $0x724] ss:$16 sps:$4 sm:$0xff]  }
 0x5cd   :  { %5651 = vmatprep.subr.bf16.mxu0 %v15413_v40  ;;  %5857 = vmatprep.subr.bf16.mxu1 %v15416_v57  ;;  %v15458_v40 = vld [vmem:[#allocation13 + $0x72c] ss:$16 sps:$4 sm:$0xff]   ;;  %v15453_v57 = vld [vmem:[#allocation13 + $0x720] ss:$16 sps:$4 sm:$0xff]  }
 0x5d0   :  { %5652 = vmatpush1.bf16.msra.mxu0 %v15411_v45  ;;  %5858 = vmatpush1.bf16.msra.mxu1 %v15414_v28  ;;  %v15456_v45 = vld [vmem:[#allocation13 + $0x728] ss:$16 sps:$4 sm:$0xff]   ;;  %v18233_v28 = vld [vmem:[#allocation3 + $0xa0] sm:$0xff] }
 0x5d1   :  { %5653 = vmatprep.subr.bf16.mxu0 %v15419_v35  ;;  %5859 = vmatprep.subr.bf16.mxu1 %v15422_v48  ;;  %v18235_v35 = vld [vmem:[#allocation3 + $0xb8] sm:$0xff] }
 0x5d2   :  { %v15461_v48 = vld [vmem:[#allocation13 + $0x744] ss:$16 sps:$4 sm:$0xff]  }
 0x5d4   :  { %5654 = vmatpush1.bf16.msra.mxu0 %v15417_v54  ;;  %5860 = vmatpush1.bf16.msra.mxu1 %v15420_v11  ;;  %v15464_v54 = vld [vmem:[#allocation13 + $0x74c] ss:$16 sps:$4 sm:$0xff]   ;;  %v5156_v11 = vpack.c.bf16 %v18235_v35, %v18233_v28 }
 0x5d5   :  { %5726 = vmatprep.subr.bf16.mxu0 %v15425_v27  ;;  %5932 = vmatprep.subr.bf16.mxu1 %v15431_v20  ;;  %v15459_v27 = vld [vmem:[#allocation13 + $0x740] ss:$16 sps:$4 sm:$0xff]   ;;  %v15462_v20 = vld [vmem:[#allocation13 + $0x748] ss:$16 sps:$4 sm:$0xff]  }
 0x5d7   :  { %5656 = vmatmul.mubr.bf16.vlgmr.msra.gmra.mrb[84].mxu0 %v5148_v62  ;;  %5862 = vmatmul.mubr.bf16.vlgmr.msra.gmra.mrb[84].mxu1 %v5148_v62  ;;  %v15468_v62 = vld [vmem:[#allocation13 + $0x768] ss:$16 sps:$4 sm:$0xff]  }
 0x5d8   :  { %5665 = vmatprep.mubr.bf16.mxu0 %v5152_v31  ;;  %5727 = vmatpush1.bf16.msra.mxu0 %v15423_v17  ;;  %v15470_v17 = vld [vmem:[#allocation13 + $0x76c] ss:$16 sps:$4 sm:$0xff]  }
 0x5d9   :  { %5871 = vmatprep.mubr.bf16.mxu1 %v5152_v31  ;;  %5728 = vmatprep.subr.bf16.mxu0 %v15428_v43  ;;  %v18243_v43 = vld [vmem:[#allocation3 + $0xd0] sm:$0xff]  ;;  %v15473_v31 = vld [vmem:[#allocation13 + $0x784] ss:$16 sps:$4 sm:$0xff]  }
 0x5da   :  { %5933 = vmatpush1.bf16.msra.mxu1 %v15429_v38  ;;  %v15476_v38 = vld [vmem:[#allocation13 + $0x78c] ss:$16 sps:$4 sm:$0xff]  }
 0x5db   :  { %5934 = vmatprep.subr.bf16.mxu1 %v15434_v21  ;;  %v5159_v21 = vpack.c.bf16 %v18245_v10, %v18243_v43 }
 0x5dc   :  { %5729 = vmatpush1.bf16.msra.mxu0 %v15426_v16  ;;  %v15471_v16 = vld [vmem:[#allocation13 + $0x780] ss:$16 sps:$4 sm:$0xff]  }
 0x5dd   :  { %6609 = vmatprep.subr.bf16.mxu0 %v15437_v4  ;;  %v15474_v4 = vld [vmem:[#allocation13 + $0x788] ss:$16 sps:$4 sm:$0xff]  }
 0x5de   :  { %5935 = vmatpush1.bf16.msra.mxu1 %v15432_v56  ;;  %v15479_v56 = vld [vmem:[#allocation13 + $0x7a4] ss:$16 sps:$4 sm:$0xff]  }
 0x5df   :  { %5666 = vmatmul.mubr.bf16.gmra.mrb[88].mxu0 %v5151_v2  ;;  %5872 = vmatmul.mubr.bf16.gmra.mrb[88].mxu1 %v5151_v2  ;;  %v15480_v2 = vld [vmem:[#allocation13 + $0x7a8] ss:$16 sps:$4 sm:$0xff]  }
 0x5e0   :  { %5675 = vmatprep.mubr.bf16.mxu0 %v5155_v55  ;;  %5881 = vmatprep.mubr.bf16.mxu1 %v5155_v55  ;;  %v15485_v55 = vld [vmem:[#allocation13 + $0x7c4] ss:$16 sps:$4 sm:$0xff]  }
 0x5e1   :  { %6815 = vmatprep.subr.bf16.mxu1 %v15440_v14  ;;  %v18253_v14 = vld [vmem:[#allocation3 + $0x100] sm:$0xff] }
 0x5e7   :  { %5676 = vmatmul.mubr.bf16.gmra.mrb[92].mxu0 %v5154_v58  ;;  %5882 = vmatmul.mubr.bf16.gmra.mrb[92].mxu1 %v5154_v58  ;;  %v5162_v58 = vpack.c.bf16 %v18255_v25, %v18253_v14 }
 0x5e8   :  { %5685 = vmatprep.mubr.bf16.mxu0 %v5158_v46  ;;  %5891 = vmatprep.mubr.bf16.mxu1 %v5158_v46  ;;  %v15483_v46 = vld [vmem:[#allocation13 + $0x7c0] ss:$16 sps:$4 sm:$0xff]  }
 0x5ef   :  { %5686 = vmatmul.mubr.bf16.gmra.mrb[96].mxu0 %v5157_v61  ;;  %5892 = vmatmul.mubr.bf16.gmra.mrb[96].mxu1 %v5157_v61  ;;  %v15486_v61 = vld [vmem:[#allocation13 + $0x7c8] ss:$16 sps:$4 sm:$0xff]  }
 0x5f0   :  { %5695 = vmatprep.mubr.bf16.mxu0 %v5161_v47  ;;  %5901 = vmatprep.mubr.bf16.mxu1 %v5161_v47  ;;  %v15491_v47 = vld [vmem:[#allocation13 + $0x7e4] ss:$16 sps:$4 sm:$0xff]  }
 0x5f7   :  { %5696 = vmatmul.mubr.bf16.gmra.mrb[100].mxu0 %v5160_v42  ;;  %5902 = vmatmul.mubr.bf16.gmra.mrb[100].mxu1 %v5160_v42  ;;  %v15494_v42 = vld [vmem:[#allocation13 + $0x7ec] ss:$16 sps:$4 sm:$0xff]  }
 0x5f8   :  { %5705 = vmatprep.mubr.bf16.mxu0 %v5164_v39  ;;  %5911 = vmatprep.mubr.bf16.mxu1 %v5164_v39  ;;  %v15489_v39 = vld [vmem:[#allocation13 + $0x7e0] ss:$16 sps:$4 sm:$0xff]  }
 0x5ff   :  { %5706 = vmatmul.mubr.bf16.gmra.mrb[104].mxu0 %v5163_v36  ;;  %5912 = vmatmul.mubr.bf16.gmra.mrb[104].mxu1 %v5163_v36  ;;  %v15492_v36 = vld [vmem:[#allocation13 + $0x7e8] ss:$16 sps:$4 sm:$0xff]  }
 0x600   :  { %5715 = vmatprep.mubr.bf16.mxu0 %v5167_v63  ;;  %5921 = vmatprep.mubr.bf16.mxu1 %v5167_v63  ;;  %v18263_v63 = vld [vmem:[#allocation3 + $0x130] sm:$0xff] }
 0x607   :  { %5716 = vmatmul.mubr.bf16.gmra.mrb[108].mxu0 %v5166_v29  ;;  %5922 = vmatmul.mubr.bf16.gmra.mrb[108].mxu1 %v5166_v29  ;;  %v18265_v29 = vld [vmem:[#allocation3 + $0x148] sm:$0xff] }
 0x608   :  { %5758 = vmatprep.mubr.bf16.mxu0 %v18670_v51  ;;  %5964 = vmatprep.mubr.bf16.mxu1 %v18670_v51 }
 0x60f   :  { %13198 = vmatmul.mubr.msk.bf16.vlgmr.msra.gmra.mrb[84].mxu0 %vm245_vm2, %v5150_v41  ;;  %13205 = vmatmul.mubr.msk.bf16.vlgmr.msra.gmra.mrb[84].mxu1 %vm245_vm2, %v5150_v41  ;;  %v15500_v41 = vld [vmem:[#allocation13 + $0x80c] ss:$16 sps:$4 sm:$0xff]  }
 0x610   :  { %6610 = vmatpush1.bf16.msra.mxu0 %v15435_v49  ;;  %6816 = vmatpush1.bf16.msra.mxu1 %v15438_v0  ;;  %v5165_v49 = vpack.c.bf16 %v18265_v29, %v18263_v63  ;;  %v15495_v0 = vld [vmem:[#allocation13 + $0x800] ss:$16 sps:$4 sm:$0xff]  }
 0x611   :  { %6611 = vmatprep.subr.bf16.mxu0 %v15443_v5  ;;  %6817 = vmatprep.subr.bf16.mxu1 %v15446_v7  ;;  %v15498_v5 = vld [vmem:[#allocation13 + $0x808] ss:$16 sps:$4 sm:$0xff]   ;;  %v15503_v7 = vld [vmem:[#allocation13 + $0x824] ss:$16 sps:$4 sm:$0xff]  }
 0x612   :  { %5768 = vmatprep.mubr.bf16.mxu0 %v18670_v51  ;;  %5974 = vmatprep.mubr.bf16.mxu1 %v18670_v51 }
 0x614   :  { %6612 = vmatpush1.bf16.msra.mxu0 %v15441_v19  ;;  %6818 = vmatpush1.bf16.msra.mxu1 %v15444_v15  ;;  %v15506_v19 = vld [vmem:[#allocation13 + $0x82c] ss:$16 sps:$4 sm:$0xff]   ;;  %v15501_v15 = vld [vmem:[#allocation13 + $0x820] ss:$16 sps:$4 sm:$0xff]  }
 0x615   :  { %6613 = vmatprep.subr.bf16.mxu0 %v15449_v22  ;;  %6819 = vmatprep.subr.bf16.mxu1 %v15452_v37  ;;  %v15504_v22 = vld [vmem:[#allocation13 + $0x828] ss:$16 sps:$4 sm:$0xff]   ;;  %v18273_v37 = vld [vmem:[#allocation3 + $0x160] sm:$0xff] }
 0x617   :  { %13199 = vmatmul.mubr.msk.bf16.gmra.mrb[88].mxu0 %vm245_vm2, %v5153_v44  ;;  %13206 = vmatmul.mubr.msk.bf16.gmra.mrb[88].mxu1 %vm245_vm2, %v5153_v44  ;;  %v18275_v44 = vld [vmem:[#allocation3 + $0x178] sm:$0xff] }
 0x618   :  { %6614 = vmatpush1.bf16.msra.mxu0 %v15447_v13  ;;  %6820 = vmatpush1.bf16.msra.mxu1 %v15450_v50  ;;  %v15509_v13 = vld [vmem:[#allocation13 + $0x844] ss:$16 sps:$4 sm:$0xff]   ;;  %v15512_v50 = vld [vmem:[#allocation13 + $0x84c] ss:$16 sps:$4 sm:$0xff]  }
 0x619   :  { %6615 = vmatprep.subr.bf16.mxu0 %v15455_v8  ;;  %6821 = vmatprep.subr.bf16.mxu1 %v15458_v40  ;;  %v18281_v8 = vpack.c.bf16 %v18275_v44, %v18273_v37  ;;  %v15507_v40 = vld [vmem:[#allocation13 + $0x840] ss:$16 sps:$4 sm:$0xff]  }
 0x61a   :  { %5778 = vmatprep.mubr.bf16.mxu0 %v18670_v51  ;;  %5984 = vmatprep.mubr.bf16.mxu1 %v18670_v51 }
 0x61c   :  { %6616 = vmatpush1.bf16.msra.mxu0 %v15453_v57  ;;  %6822 = vmatpush1.bf16.msra.mxu1 %v15456_v45  ;;  %v15510_v57 = vld [vmem:[#allocation13 + $0x848] ss:$16 sps:$4 sm:$0xff]   ;;  %v15515_v45 = vld [vmem:[#allocation13 + $0x864] ss:$16 sps:$4 sm:$0xff]  }
 0x61d   :  { %6617 = vmatprep.subr.bf16.mxu0 %v15461_v48  ;;  %6823 = vmatprep.subr.bf16.mxu1 %v15464_v54  ;;  %v15518_v48 = vld [vmem:[#allocation13 + $0x86c] ss:$16 sps:$4 sm:$0xff]   ;;  %v15513_v54 = vld [vmem:[#allocation13 + $0x860] ss:$16 sps:$4 sm:$0xff]  }
 0x61f   :  { %13200 = vmatmul.mubr.msk.bf16.gmra.mrb[92].mxu0 %vm245_vm2, %v5156_v11  ;;  %13207 = vmatmul.mubr.msk.bf16.gmra.mrb[92].mxu1 %vm245_vm2, %v5156_v11  ;;  %v15516_v11 = vld [vmem:[#allocation13 + $0x868] ss:$16 sps:$4 sm:$0xff]  }
 0x620   :  { %6618 = vmatpush1.bf16.msra.mxu0 %v15459_v27  ;;  %6824 = vmatpush1.bf16.msra.mxu1 %v15462_v20  ;;  %v15521_v27 = vld [vmem:[#allocation13 + $0x884] ss:$16 sps:$4 sm:$0xff]   ;;  %v15524_v20 = vld [vmem:[#allocation13 + $0x88c] ss:$16 sps:$4 sm:$0xff]  }
 0x621   :  { %6619 = vmatprep.subr.bf16.mxu0 %v15467_v9  ;;  %6825 = vmatprep.subr.bf16.mxu1 %v15470_v17  ;;  %v15519_v9 = vld [vmem:[#allocation13 + $0x880] ss:$16 sps:$4 sm:$0xff]   ;;  %v15522_v17 = vld [vmem:[#allocation13 + $0x888] ss:$16 sps:$4 sm:$0xff]  }
 0x622   :  { %5788 = vmatprep.mubr.bf16.mxu0 %v18670_v51  ;;  %5994 = vmatprep.mubr.bf16.mxu1 %v18670_v51 }
 0x624   :  { %6620 = vmatpush1.bf16.msra.mxu0 %v15465_v30  ;;  %6826 = vmatpush1.bf16.msra.mxu1 %v15468_v62  ;;  %v15527_v30 = vld [vmem:[#allocation13 + $0x8a4] ss:$16 sps:$4 sm:$0xff]   ;;  %v15530_v62 = vld [vmem:[#allocation13 + $0x8ac] ss:$16 sps:$4 sm:$0xff]  }
 0x625   :  { %6621 = vmatprep.subr.bf16.mxu0 %v15473_v31  ;;  %6827 = vmatprep.subr.bf16.mxu1 %v15476_v38  ;;  %v15525_v31 = vld [vmem:[#allocation13 + $0x8a0] ss:$16 sps:$4 sm:$0xff]   ;;  %v15528_v38 = vld [vmem:[#allocation13 + $0x8a8] ss:$16 sps:$4 sm:$0xff]  }
 0x627   :  { %13201 = vmatmul.mubr.msk.bf16.gmra.mrb[96].mxu0 %vm245_vm2, %v5159_v21  ;;  %13208 = vmatmul.mubr.msk.bf16.gmra.mrb[96].mxu1 %vm245_vm2, %v5159_v21  ;;  %v15533_v21 = vld [vmem:[#allocation13 + $0x8c4] ss:$16 sps:$4 sm:$0xff]  }
 0x628   :  { %6622 = vmatpush1.bf16.msra.mxu0 %v15471_v16  ;;  %6828 = vmatpush1.bf16.msra.mxu1 %v15474_v4  ;;  %v15531_v16 = vld [vmem:[#allocation13 + $0x8c0] ss:$16 sps:$4 sm:$0xff]   ;;  %v15536_v4 = vld [vmem:[#allocation13 + $0x8e4] ss:$16 sps:$4 sm:$0xff]  }
 0x629   :  { %6623 = vmatprep.subr.bf16.mxu0 %v15479_v56  ;;  %6829 = vmatprep.subr.bf16.mxu1 %v15482_v60  ;;  %v15537_v56 = vld [vmem:[#allocation13 + $0x8c8] ss:$16 sps:$4 sm:$0xff]   ;;  %v15542_v60 = vld [vmem:[#allocation13 + $0x8ec] ss:$16 sps:$4 sm:$0xff]  }
 0x62a   :  { %5798 = vmatprep.mubr.bf16.mxu0 %v18670_v51  ;;  %6004 = vmatprep.mubr.bf16.mxu1 %v18670_v51 }
 0x62c   :  { %6624 = vmatpush1.bf16.msra.mxu0 %v15477_v52  ;;  %6830 = vmatpush1.bf16.msra.mxu1 %v15480_v2  ;;  %v15534_v52 = vld [vmem:[#allocation13 + $0x8e0] ss:$16 sps:$4 sm:$0xff]   ;;  %v15545_v2 = vld [vmem:[#allocation13 + $0x904] ss:$16 sps:$4 sm:$0xff]  }
 0x62d   :  { %6625 = vmatprep.subr.bf16.mxu0 %v15485_v55  ;;  %6831 = vmatprep.subr.bf16.mxu1 %v15488_v59  ;;  %v15540_v55 = vld [vmem:[#allocation13 + $0x8e8] ss:$16 sps:$4 sm:$0xff]   ;;  %v15548_v59 = vld [vmem:[#allocation13 + $0x90c] ss:$16 sps:$4 sm:$0xff]  }
 0x62f   :  { %13202 = vmatmul.mubr.msk.bf16.gmra.mrb[100].mxu0 %vm245_vm2, %v5162_v58  ;;  %13209 = vmatmul.mubr.msk.bf16.gmra.mrb[100].mxu1 %vm245_vm2, %v5162_v58  ;;  %v18673_v58 = vld [vmem:[#allocation45_spill] sm:$0xff] }
 0x630   :  { %6626 = vmatpush1.bf16.msra.mxu0 %v15483_v46  ;;  %6832 = vmatpush1.bf16.msra.mxu1 %v15486_v61  ;;  %v18676_v61 = vld [vmem:[#allocation46_spill] sm:$0xff] }
 0x631   :  { %6627 = vmatprep.subr.bf16.mxu0 %v15491_v47  ;;  %6833 = vmatprep.subr.bf16.mxu1 %v15494_v42  ;;  %v6136_v42 = vpack.c.bf16 %v18223_v32, %v18218_v24  ;;  %v6139_v24 = vpack.c.bf16 %v18233_v28, %v18225_v12  ;;  %v15555_v32 = vld [vmem:[#allocation13 + $0x940] ss:$16 sps:$4 sm:$0xff]   ;;  %v15572_v12 = vld [vmem:[#allocation13 + $0x98c] ss:$16 sps:$4 sm:$0xff]   ;;  %v6142_v28 = vpack.c.bf16 %v18243_v43, %v18235_v35 }
 0x632   :  { %5808 = vmatprep.mubr.bf16.mxu0 %v18670_v51  ;;  %6014 = vmatprep.mubr.bf16.mxu1 %v18670_v51  ;;  %v15584_v35 = vld [vmem:[#allocation13 + $0x9cc] ss:$16 sps:$4 sm:$0xff]   ;;  %v6145_v43 = vpack.c.bf16 %v18253_v14, %v18245_v10  ;;  %v6148_v14 = vpack.c.bf16 %v18263_v63, %v18255_v25  ;;  %v6151_v63 = vpack.c.bf16 %v18273_v37, %v18265_v29  ;;  %v15617_v29 = vld [vmem:[#allocation13 + $0xa84] ss:$16 sps:$4 sm:$0xff]  }
 0x633   :  { %v15596_v10 = vld [vmem:[#allocation13 + $0xa0c] ss:$16 sps:$4 sm:$0xff]  }
 0x634   :  { %6628 = vmatpush1.bf16.msra.mxu0 %v15489_v39  ;;  %6834 = vmatpush1.bf16.msra.mxu1 %v15492_v36  ;;  %v15543_v39 = vld [vmem:[#allocation13 + $0x900] ss:$16 sps:$4 sm:$0xff]   ;;  %v15551_v36 = vld [vmem:[#allocation13 + $0x924] ss:$16 sps:$4 sm:$0xff]   ;;  %v15608_v25 = vld [vmem:[#allocation13 + $0xa4c] ss:$16 sps:$4 sm:$0xff]  }
 0x635   :  { %6629 = vmatprep.subr.bf16.mxu0 %v15497_v1  ;;  %6835 = vmatprep.subr.bf16.mxu1 %v15500_v41  ;;  %v15554_v1 = vld [vmem:[#allocation13 + $0x92c] ss:$16 sps:$4 sm:$0xff]   ;;  %v15552_v41 = vld [vmem:[#allocation13 + $0x928] ss:$16 sps:$4 sm:$0xff]  }
 0x636   :  { %v15620_v37 = vld [vmem:[#allocation13 + $0xa8c] ss:$16 sps:$4 sm:$0xff]  }
 0x637   :  { %13203 = vmatmul.mubr.msk.bf16.gmra.mrb[104].mxu0 %vm245_vm2, %v5165_v49  ;;  %13210 = vmatmul.mubr.msk.bf16.gmra.mrb[104].mxu1 %vm245_vm2, %v5165_v49  ;;  %v15557_v49 = vld [vmem:[#allocation13 + $0x944] ss:$16 sps:$4 sm:$0xff]  }
 0x638   :  { %6630 = vmatpush1.bf16.msra.mxu0 %v15495_v0  ;;  %6836 = vmatpush1.bf16.msra.mxu1 %v15498_v5  ;;  %v15560_v0 = vld [vmem:[#allocation13 + $0x94c] ss:$16 sps:$4 sm:$0xff]   ;;  %v15558_v5 = vld [vmem:[#allocation13 + $0x948] ss:$16 sps:$4 sm:$0xff]  }
 0x639   :  { %6631 = vmatprep.subr.bf16.mxu0 %v15503_v7  ;;  %6837 = vmatprep.subr.bf16.mxu1 %v15506_v19  ;;  %v15563_v7 = vld [vmem:[#allocation13 + $0x964] ss:$16 sps:$4 sm:$0xff]   ;;  %v15566_v19 = vld [vmem:[#allocation13 + $0x96c] ss:$16 sps:$4 sm:$0xff]  }
 0x63a   :  { %5818 = vmatprep.mubr.bf16.mxu0 %v18670_v51  ;;  %6024 = vmatprep.mubr.bf16.mxu1 %v18670_v51 }
 0x63c   :  { %6632 = vmatpush1.bf16.msra.mxu0 %v15501_v15  ;;  %6838 = vmatpush1.bf16.msra.mxu1 %v15504_v22  ;;  %v15561_v15 = vld [vmem:[#allocation13 + $0x960] ss:$16 sps:$4 sm:$0xff]   ;;  %v15564_v22 = vld [vmem:[#allocation13 + $0x968] ss:$16 sps:$4 sm:$0xff]  }
 0x63d   :  { %6633 = vmatprep.subr.bf16.mxu0 %v15509_v13  ;;  %6839 = vmatprep.subr.bf16.mxu1 %v15512_v50  ;;  %v15569_v13 = vld [vmem:[#allocation13 + $0x984] ss:$16 sps:$4 sm:$0xff]   ;;  %v15567_v50 = vld [vmem:[#allocation13 + $0x980] ss:$16 sps:$4 sm:$0xff]  }
 0x63f   :  { %13204 = vmatmul.mubr.msk.bf16.gmra.mrb[108].mxu0 %vm245_vm2, %v18281_v8  ;;  %13211 = vmatmul.mubr.msk.bf16.gmra.mrb[108].mxu1 %vm245_vm2, %v18281_v8 }
 0x640   :  { %6634 = vmatpush1.bf16.msra.mxu0 %v15507_v40  ;;  %6840 = vmatpush1.bf16.msra.mxu1 %v15510_v57  ;;  %v15570_v40 = vld [vmem:[#allocation13 + $0x988] ss:$16 sps:$4 sm:$0xff]   ;;  %v15575_v57 = vld [vmem:[#allocation13 + $0x9a4] ss:$16 sps:$4 sm:$0xff]  }
 0x641   :  { %6641 = vmatprep.mubr.bf16.mxu0 %v17949_v33  ;;  %6847 = vmatprep.mubr.bf16.mxu1 %v17949_v33  ;;  %v15539_v33 = vld [vmem:[#allocation13 + $0x8cc] ss:$16 sps:$4 sm:$0xff]  }
 0x642   :  { %6635 = vmatprep.subr.bf16.mxu0 %v15515_v45  ;;  %6841 = vmatprep.subr.bf16.mxu1 %v15518_v48  ;;  %v15578_v45 = vld [vmem:[#allocation13 + $0x9ac] ss:$16 sps:$4 sm:$0xff]   ;;  %v15573_v48 = vld [vmem:[#allocation13 + $0x9a0] ss:$16 sps:$4 sm:$0xff]  }
 0x644   :  { %6636 = vmatpush1.bf16.msra.mxu0 %v15513_v54  ;;  %6842 = vmatpush1.bf16.msra.mxu1 %v15516_v11  ;;  %v15576_v54 = vld [vmem:[#allocation13 + $0x9a8] ss:$16 sps:$4 sm:$0xff]   ;;  %v15581_v11 = vld [vmem:[#allocation13 + $0x9c4] ss:$16 sps:$4 sm:$0xff]  }
 0x645   :  { %6637 = vmatprep.subr.bf16.mxu0 %v15521_v27  ;;  %6843 = vmatprep.subr.bf16.mxu1 %v15524_v20  ;;  %v15579_v27 = vld [vmem:[#allocation13 + $0x9c0] ss:$16 sps:$4 sm:$0xff]   ;;  %v15582_v20 = vld [vmem:[#allocation13 + $0x9c8] ss:$16 sps:$4 sm:$0xff]  }
 0x648   :  { %6638 = vmatpush1.bf16.msra.mxu0 %v15519_v9  ;;  %6844 = vmatpush1.bf16.msra.mxu1 %v15522_v17  ;;  %v15587_v9 = vld [vmem:[#allocation13 + $0x9e4] ss:$16 sps:$4 sm:$0xff]   ;;  %v15590_v17 = vld [vmem:[#allocation13 + $0x9ec] ss:$16 sps:$4 sm:$0xff]  }
 0x649   :  { %6639 = vmatprep.subr.bf16.mxu0 %v15527_v30  ;;  %6845 = vmatprep.subr.bf16.mxu1 %v15530_v62  ;;  %v15585_v30 = vld [vmem:[#allocation13 + $0x9e0] ss:$16 sps:$4 sm:$0xff]   ;;  %v15588_v62 = vld [vmem:[#allocation13 + $0x9e8] ss:$16 sps:$4 sm:$0xff]  }
 0x64c   :  { %6640 = vmatpush1.bf16.msra.mxu0 %v15525_v31  ;;  %6846 = vmatpush1.bf16.msra.mxu1 %v15528_v38  ;;  %v15593_v31 = vld [vmem:[#allocation13 + $0xa04] ss:$16 sps:$4 sm:$0xff]   ;;  %v15591_v38 = vld [vmem:[#allocation13 + $0xa00] ss:$16 sps:$4 sm:$0xff]  }
 0x64d   :  { %6712 = vmatprep.subr.bf16.mxu0 %v15533_v21  ;;  %6918 = vmatprep.subr.bf16.mxu1 %v15539_v33  ;;  %v15594_v21 = vld [vmem:[#allocation13 + $0xa08] ss:$16 sps:$4 sm:$0xff]   ;;  %v15599_v33 = vld [vmem:[#allocation13 + $0xa24] ss:$16 sps:$4 sm:$0xff]  }
 0x64f   :  { %6642 = vmatmul.mubr.bf16.vlgmr.msra.gmra.mrb[84].mxu0 %v17943_v18  ;;  %6848 = vmatmul.mubr.bf16.vlgmr.msra.gmra.mrb[84].mxu1 %v17943_v18  ;;  %v18671_v18 = vld [vmem:[#allocation43_spill] sm:$0xff] }
 0x650   :  { %6651 = vmatprep.mubr.bf16.mxu0 %v17964_v34  ;;  %6713 = vmatpush1.bf16.msra.mxu0 %v15531_v16  ;;  %v15602_v16 = vld [vmem:[#allocation13 + $0xa2c] ss:$16 sps:$4 sm:$0xff]  }
 0x651   :  { %6857 = vmatprep.mubr.bf16.mxu1 %v17964_v34  ;;  %6714 = vmatprep.subr.bf16.mxu0 %v15536_v4  ;;  %v18672_v34 = vld [vmem:[#allocation42_spill] sm:$0xff]  ;;  %v15597_v4 = vld [vmem:[#allocation13 + $0xa20] ss:$16 sps:$4 sm:$0xff]  }
 0x652   :  { %6919 = vmatpush1.bf16.msra.mxu1 %v15537_v56  ;;  %v15600_v56 = vld [vmem:[#allocation13 + $0xa28] ss:$16 sps:$4 sm:$0xff]  }
 0x653   :  { %6920 = vmatprep.subr.bf16.mxu1 %v15542_v60  ;;  %v15605_v60 = vld [vmem:[#allocation13 + $0xa44] ss:$16 sps:$4 sm:$0xff]  }
 0x654   :  { %6715 = vmatpush1.bf16.msra.mxu0 %v15534_v52  ;;  %v15603_v52 = vld [vmem:[#allocation13 + $0xa40] ss:$16 sps:$4 sm:$0xff]  }
 0x655   :  { %7595 = vmatprep.subr.bf16.mxu0 %v15545_v2  ;;  %v15606_v2 = vld [vmem:[#allocation13 + $0xa48] ss:$16 sps:$4 sm:$0xff]  }
 0x656   :  { %6921 = vmatpush1.bf16.msra.mxu1 %v15540_v55  ;;  %v15611_v55 = vld [vmem:[#allocation13 + $0xa64] ss:$16 sps:$4 sm:$0xff]  }
 0x657   :  { %6652 = vmatmul.mubr.bf16.gmra.mrb[88].mxu0 %v17958_v23  ;;  %6858 = vmatmul.mubr.bf16.gmra.mrb[88].mxu1 %v17958_v23  ;;  %v18674_v23 = vld [vmem:[#allocation44_spill] sm:$0xff] }
 0x658   :  { %6661 = vmatprep.mubr.bf16.mxu0 %v17988_v6  ;;  %6867 = vmatprep.mubr.bf16.mxu1 %v17988_v6  ;;  %v18675_v6 = vld [vmem:[#allocation47_spill] sm:$0xff] }
 0x659   :  { %7801 = vmatprep.subr.bf16.mxu1 %v15548_v59  ;;  %v15614_v59 = vld [vmem:[#allocation13 + $0xa6c] ss:$16 sps:$4 sm:$0xff]  }
 0x65f   :  { %6662 = vmatmul.mubr.bf16.gmra.mrb[92].mxu0 %v17979_v26  ;;  %6868 = vmatmul.mubr.bf16.gmra.mrb[92].mxu1 %v17979_v26  ;;  %v18309_v26 = vld [vmem:[#allocation3] sm:$0xff] }
 0x660   :  { %6671 = vmatprep.mubr.bf16.mxu0 %v18671_v18  ;;  %6877 = vmatprep.mubr.bf16.mxu1 %v18671_v18  ;;  %v6153_v46 = vpack.c.bf16 %v18309_v26, %v18206_v53  ;;  %v6152_v47 = vpack.c.bf16 %v18309_v26, %v18212_v3  ;;  %v15546_v53 = vld [vmem:[#allocation13 + $0x908] ss:$16 sps:$4 sm:$0xff]   ;;  %v15549_v3 = vld [vmem:[#allocation13 + $0x920] ss:$16 sps:$4 sm:$0xff]  }
 0x661   :  { %v15609_v18 = vld [vmem:[#allocation13 + $0xa60] ss:$16 sps:$4 sm:$0xff]  }
 0x667   :  { %6672 = vmatmul.mubr.bf16.gmra.mrb[96].mxu0 %v18672_v34  ;;  %6878 = vmatmul.mubr.bf16.gmra.mrb[96].mxu1 %v18672_v34  ;;  %v15612_v34 = vld [vmem:[#allocation13 + $0xa68] ss:$16 sps:$4 sm:$0xff]  }
 0x668   :  { %6681 = vmatprep.mubr.bf16.mxu0 %v18673_v58  ;;  %6887 = vmatprep.mubr.bf16.mxu1 %v18673_v58  ;;  %v18353_v58 = vld [vmem:[#allocation3 + $0x190] sm:$0xff] }
 0x66f   :  { %6682 = vmatmul.mubr.bf16.gmra.mrb[100].mxu0 %v18674_v23  ;;  %6888 = vmatmul.mubr.bf16.gmra.mrb[100].mxu1 %v18674_v23  ;;  %v6154_v23 = vpack.c.bf16 %v18353_v58, %v18275_v44  ;;  %v15629_v44 = vld [vmem:[#allocation13 + $0xac4] ss:$16 sps:$4 sm:$0xff]  }
 0x670   :  { %6691 = vmatprep.mubr.bf16.mxu0 %v18675_v6  ;;  %6897 = vmatprep.mubr.bf16.mxu1 %v18675_v6  ;;  %v15615_v6 = vld [vmem:[#allocation13 + $0xa80] ss:$16 sps:$4 sm:$0xff]  }
 0x677   :  { %6692 = vmatmul.mubr.bf16.gmra.mrb[104].mxu0 %v18676_v61  ;;  %6898 = vmatmul.mubr.bf16.gmra.mrb[104].mxu1 %v18676_v61  ;;  %v7082_v61 = vld [vmem:[#allocation3 + $0x80] sm:$0xff] }
 0x678   :  { %6701 = vmatprep.mubr.bf16.mxu0 %v6153_v46  ;;  %6907 = vmatprep.mubr.bf16.mxu1 %v6153_v46  ;;  %v15618_v46 = vld [vmem:[#allocation13 + $0xa88] ss:$16 sps:$4 sm:$0xff]  }
 0x67f   :  { %6702 = vmatmul.mubr.bf16.gmra.mrb[108].mxu0 %v6152_v47  ;;  %6908 = vmatmul.mubr.bf16.gmra.mrb[108].mxu1 %v6152_v47  ;;  %v7079_v47 = vld [vmem:[#allocation3 + $0x68] sm:$0xff] }
 0x680   :  { %6744 = vmatprep.mubr.bf16.mxu0 %v18670_v51  ;;  %6950 = vmatprep.mubr.bf16.mxu1 %v18670_v51 }
 0x687   :  { %13284 = vmatmul.mubr.msk.bf16.vlgmr.msra.gmra.mrb[84].mxu0 %vm245_vm2, %v6136_v42  ;;  %13291 = vmatmul.mubr.msk.bf16.vlgmr.msra.gmra.mrb[84].mxu1 %vm245_vm2, %v6136_v42  ;;  %v15623_v42 = vld [vmem:[#allocation13 + $0xaa4] ss:$16 sps:$4 sm:$0xff]  }
 0x688   :  { %7596 = vmatpush1.bf16.msra.mxu0 %v15543_v39  ;;  %7802 = vmatpush1.bf16.msra.mxu1 %v15546_v53  ;;  %v15626_v39 = vld [vmem:[#allocation13 + $0xaac] ss:$16 sps:$4 sm:$0xff]   ;;  %v7121_v53 = vpack.c.bf16 %v7082_v61, %v7079_v47  ;;  %v7083_v61 = vld [vmem:[#allocation3 + $0x88] sm:$0xff] }
 0x689   :  { %7597 = vmatprep.subr.bf16.mxu0 %v15551_v36  ;;  %7803 = vmatprep.subr.bf16.mxu1 %v15554_v1  ;;  %v15621_v36 = vld [vmem:[#allocation13 + $0xaa0] ss:$16 sps:$4 sm:$0xff]   ;;  %v15624_v1 = vld [vmem:[#allocation13 + $0xaa8] ss:$16 sps:$4 sm:$0xff]  }
 0x68a   :  { %6754 = vmatprep.mubr.bf16.mxu0 %v18670_v51  ;;  %6960 = vmatprep.mubr.bf16.mxu1 %v18670_v51 }
 0x68c   :  { %7598 = vmatpush1.bf16.msra.mxu0 %v15549_v3  ;;  %7804 = vmatpush1.bf16.msra.mxu1 %v15552_v41  ;;  %v15632_v3 = vld [vmem:[#allocation13 + $0xacc] ss:$16 sps:$4 sm:$0xff]   ;;  %v15627_v41 = vld [vmem:[#allocation13 + $0xac0] ss:$16 sps:$4 sm:$0xff]  }
 0x68d   :  { %7599 = vmatprep.subr.bf16.mxu0 %v15557_v49  ;;  %7805 = vmatprep.subr.bf16.mxu1 %v15560_v0  ;;  %v15630_v49 = vld [vmem:[#allocation13 + $0xac8] ss:$16 sps:$4 sm:$0xff]   ;;  %v15635_v0 = vld [vmem:[#allocation13 + $0xae4] ss:$16 sps:$4 sm:$0xff]  }
 0x68f   :  { %13285 = vmatmul.mubr.msk.bf16.gmra.mrb[88].mxu0 %vm245_vm2, %v6139_v24  ;;  %13292 = vmatmul.mubr.msk.bf16.gmra.mrb[88].mxu1 %vm245_vm2, %v6139_v24  ;;  %v15638_v24 = vld [vmem:[#allocation13 + $0xaec] ss:$16 sps:$4 sm:$0xff]  }
 0x690   :  { %7600 = vmatpush1.bf16.msra.mxu0 %v15555_v32  ;;  %7806 = vmatpush1.bf16.msra.mxu1 %v15558_v5  ;;  %v15633_v32 = vld [vmem:[#allocation13 + $0xae0] ss:$16 sps:$4 sm:$0xff]   ;;  %v15636_v5 = vld [vmem:[#allocation13 + $0xae8] ss:$16 sps:$4 sm:$0xff]  }
 0x691   :  { %7601 = vmatprep.subr.bf16.mxu0 %v15563_v7  ;;  %7807 = vmatprep.subr.bf16.mxu1 %v15566_v19  ;;  %v15641_v7 = vld [vmem:[#allocation13 + $0xb04] ss:$16 sps:$4 sm:$0xff]   ;;  %v15647_v19 = vld [vmem:[#allocation13 + $0xb0c] ss:$16 sps:$4 sm:$0xff]  }
 0x692   :  { %6764 = vmatprep.mubr.bf16.mxu0 %v18670_v51  ;;  %6970 = vmatprep.mubr.bf16.mxu1 %v18670_v51 }
 0x694   :  { %7602 = vmatpush1.bf16.msra.mxu0 %v15561_v15  ;;  %7808 = vmatpush1.bf16.msra.mxu1 %v15564_v22  ;;  %v7081_v15 = vld [vmem:[#allocation3 + $0x78] sm:$0xff]  ;;  %v7088_v22 = vld [vmem:[#allocation3 + $0xb0] sm:$0xff] }
 0x695   :  { %7603 = vmatprep.subr.bf16.mxu0 %v15569_v13  ;;  %7809 = vmatprep.subr.bf16.mxu1 %v15572_v12  ;;  %v7078_v13 = vld [vmem:[#allocation3 + $0x60] sm:$0xff] }
 0x696   :  { %v15639_v12 = vld [vmem:[#allocation13 + $0xb00] ss:$16 sps:$4 sm:$0xff]  }
 0x697   :  { %13286 = vmatmul.mubr.msk.bf16.gmra.mrb[92].mxu0 %vm245_vm2, %v6142_v28  ;;  %13293 = vmatmul.mubr.msk.bf16.gmra.mrb[92].mxu1 %vm245_vm2, %v6142_v28  ;;  %v7120_v28 = vpack.c.bf16 %v7081_v15, %v7078_v13  ;;  %v7095_v15 = vld [vmem:[#allocation3 + $0xe8] sm:$0xff] }
 0x698   :  { %7604 = vmatpush1.bf16.msra.mxu0 %v15567_v50  ;;  %7810 = vmatpush1.bf16.msra.mxu1 %v15570_v40  ;;  %v7085_v50 = vld [vmem:[#allocation3 + $0x98] sm:$0xff]  ;;  %v15672_v13 = vld [vmem:[#allocation18 + $0x30] ss:$8 sps:$4 sm:$0xff]  }
 0x699   :  { %7605 = vmatprep.subr.bf16.mxu0 %v15575_v57  ;;  %7811 = vmatprep.subr.bf16.mxu1 %v15578_v45  ;;  %v15644_v40 = vld [vmem:[#allocation13 + $0xb24] ss:$16 sps:$4 sm:$0xff]   ;;  %v7124_v57 = vpack.c.bf16 %v7088_v22, %v7085_v50  ;;  %v15645_v45 = vld [vmem:[#allocation13 + $0xb08] ss:$16 sps:$4 sm:$0xff]  }
 0x69a   :  { %6774 = vmatprep.mubr.bf16.mxu0 %v18670_v51  ;;  %6980 = vmatprep.mubr.bf16.mxu1 %v18670_v51  ;;  %v15669_v22 = vld [vmem:[#allocation16 + $0x30] ss:$8 sps:$4 sm:$0xff]  }
 0x69c   :  { %7606 = vmatpush1.bf16.msra.mxu0 %v15573_v48  ;;  %7812 = vmatpush1.bf16.msra.mxu1 %v15576_v54  ;;  %v15650_v48 = vld [vmem:[#allocation13 + $0xb2c] ss:$16 sps:$4 sm:$0xff]   ;;  %v15642_v54 = vld [vmem:[#allocation13 + $0xb20] ss:$16 sps:$4 sm:$0xff]  }
 0x69d   :  { %7607 = vmatprep.subr.bf16.mxu0 %v15581_v11  ;;  %7813 = vmatprep.subr.bf16.mxu1 %v15584_v35  ;;  %v15653_v11 = vld [vmem:[#allocation16 + $0x4] ss:$8 sps:$4 sm:$0xff]   ;;  %v7087_v35 = vld [vmem:[#allocation3 + $0xa8] sm:$0xff] }
 0x69f   :  { %13287 = vmatmul.mubr.msk.bf16.gmra.mrb[96].mxu0 %vm245_vm2, %v6145_v43  ;;  %13294 = vmatmul.mubr.msk.bf16.gmra.mrb[96].mxu1 %vm245_vm2, %v6145_v43  ;;  %v15648_v43 = vld [vmem:[#allocation13 + $0xb28] ss:$16 sps:$4 sm:$0xff]  }
 0x6a0   :  { %7608 = vmatpush1.bf16.msra.mxu0 %v15579_v27  ;;  %7814 = vmatpush1.bf16.msra.mxu1 %v15582_v20  ;;  %v7094_v27 = vld [vmem:[#allocation3 + $0xe0] sm:$0xff]  ;;  %v7084_v20 = vld [vmem:[#allocation3 + $0x90] sm:$0xff] }
 0x6a1   :  { %7609 = vmatprep.subr.bf16.mxu0 %v15587_v9  ;;  %7815 = vmatprep.subr.bf16.mxu1 %v15590_v17  ;;  %v7123_v9 = vpack.c.bf16 %v7087_v35, %v7084_v20  ;;  %v7091_v17 = vld [vmem:[#allocation3 + $0xc8] sm:$0xff]  ;;  %v15692_v20 = vld [vmem:[#allocation18 + $0x64] ss:$8 sps:$4 sm:$0xff]  }
 0x6a2   :  { %6784 = vmatprep.mubr.bf16.mxu0 %v18670_v51  ;;  %6990 = vmatprep.mubr.bf16.mxu1 %v18670_v51  ;;  %v15681_v35 = vld [vmem:[#allocation16 + $0x50] ss:$8 sps:$4 sm:$0xff]  }
 0x6a4   :  { %7610 = vmatpush1.bf16.msra.mxu0 %v15585_v30  ;;  %7816 = vmatpush1.bf16.msra.mxu1 %v15588_v62  ;;  %v15656_v30 = vld [vmem:[#allocation18 + $0x4] ss:$8 sps:$4 sm:$0xff]   ;;  %v7127_v62 = vpack.c.bf16 %v7094_v27, %v7091_v17  ;;  %v15687_v17 = vld [vmem:[#allocation16 + $0x60] ss:$8 sps:$4 sm:$0xff]  }
 0x6a5   :  { %7611 = vmatprep.subr.bf16.mxu0 %v15593_v31  ;;  %7817 = vmatprep.subr.bf16.mxu1 %v15596_v10  ;;  %v7093_v31 = vld [vmem:[#allocation3 + $0xd8] sm:$0xff]  ;;  %v7100_v10 = vld [vmem:[#allocation3 + $0x110] sm:$0xff] }
 0x6a6   :  { %v15689_v27 = vld [vmem:[#allocation16 + $0x64] ss:$8 sps:$4 sm:$0xff]  }
 0x6a7   :  { %13288 = vmatmul.mubr.msk.bf16.gmra.mrb[100].mxu0 %vm245_vm2, %v6148_v14  ;;  %13295 = vmatmul.mubr.msk.bf16.gmra.mrb[100].mxu1 %vm245_vm2, %v6148_v14  ;;  %v7090_v14 = vld [vmem:[#allocation3 + $0xc0] sm:$0xff] }
 0x6a8   :  { %7612 = vmatpush1.bf16.msra.mxu0 %v15591_v38  ;;  %7818 = vmatpush1.bf16.msra.mxu1 %v15594_v21  ;;  %v7126_v38 = vpack.c.bf16 %v7093_v31, %v7090_v14  ;;  %v7097_v21 = vld [vmem:[#allocation3 + $0xf8] sm:$0xff]  ;;  %v15698_v31 = vld [vmem:[#allocation18 + $0x74] ss:$8 sps:$4 sm:$0xff]  }
 0x6a9   :  { %7613 = vmatprep.subr.bf16.mxu0 %v15599_v33  ;;  %7819 = vmatprep.subr.bf16.mxu1 %v15602_v16  ;;  %v7130_v33 = vpack.c.bf16 %v7100_v10, %v7097_v21  ;;  %v7099_v16 = vld [vmem:[#allocation3 + $0x108] sm:$0xff]  ;;  %v7104_v10 = vld [vmem:[#allocation3 + $0x130] sm:$0xff] }
 0x6aa   :  { %6794 = vmatprep.mubr.bf16.mxu0 %v18670_v51  ;;  %7000 = vmatprep.mubr.bf16.mxu1 %v18670_v51  ;;  %v7107_v14 = vld [vmem:[#allocation3 + $0x148] sm:$0xff] }
 0x6ab   :  { %v15696_v21 = vld [vmem:[#allocation18 + $0x70] ss:$8 sps:$4 sm:$0xff]  }
 0x6ac   :  { %7614 = vmatpush1.bf16.msra.mxu0 %v15597_v4  ;;  %7820 = vmatpush1.bf16.msra.mxu1 %v15600_v56  ;;  %v7106_v4 = vld [vmem:[#allocation3 + $0x140] sm:$0xff]  ;;  %v7096_v56 = vld [vmem:[#allocation3 + $0xf0] sm:$0xff] }
 0x6ad   :  { %7615 = vmatprep.subr.bf16.mxu0 %v15605_v60  ;;  %7821 = vmatprep.subr.bf16.mxu1 %v15608_v25  ;;  %v7129_v60 = vpack.c.bf16 %v7099_v16, %v7096_v56  ;;  %v7103_v25 = vld [vmem:[#allocation3 + $0x128] sm:$0xff]  ;;  %v15704_v16 = vld [vmem:[#allocation18 + $0x84] ss:$8 sps:$4 sm:$0xff]   ;;  %v15699_v56 = vld [vmem:[#allocation16 + $0x80] ss:$8 sps:$4 sm:$0xff]  }
 0x6af   :  { %13289 = vmatmul.mubr.msk.bf16.gmra.mrb[104].mxu0 %vm245_vm2, %v6151_v63  ;;  %13296 = vmatmul.mubr.msk.bf16.gmra.mrb[104].mxu1 %vm245_vm2, %v6151_v63  ;;  %v7133_v63 = vpack.c.bf16 %v7106_v4, %v7103_v25  ;;  %v7134_v4 = vpack.c.bf16 %v7107_v14, %v7104_v10  ;;  %v15707_v25 = vld [vmem:[#allocation16 + $0x94] ss:$8 sps:$4 sm:$0xff]  }
 0x6b0   :  { %7616 = vmatpush1.bf16.msra.mxu0 %v15603_v52  ;;  %7822 = vmatpush1.bf16.msra.mxu1 %v15606_v2  ;;  %v7105_v52 = vld [vmem:[#allocation3 + $0x138] sm:$0xff]  ;;  %v7112_v2 = vld [vmem:[#allocation3 + $0x170] sm:$0xff] }
 0x6b1   :  { %7617 = vmatprep.subr.bf16.mxu0 %v15611_v55  ;;  %7823 = vmatprep.subr.bf16.mxu1 %v15614_v59  ;;  %v7102_v55 = vld [vmem:[#allocation3 + $0x120] sm:$0xff] }
 0x6b2   :  { %6804 = vmatprep.mubr.bf16.mxu0 %v18670_v51  ;;  %7010 = vmatprep.mubr.bf16.mxu1 %v18670_v51  ;;  %v7132_v59 = vpack.c.bf16 %v7105_v52, %v7102_v55  ;;  %v15705_v52 = vld [vmem:[#allocation16 + $0x90] ss:$8 sps:$4 sm:$0xff]   ;;  %v15713_v55 = vld [vmem:[#allocation16 + $0xa4] ss:$8 sps:$4 sm:$0xff]  }
 0x6b4   :  { %7618 = vmatpush1.bf16.msra.mxu0 %v15609_v18  ;;  %7824 = vmatpush1.bf16.msra.mxu1 %v15612_v34  ;;  %v7109_v18 = vld [vmem:[#allocation3 + $0x158] sm:$0xff] }
 0x6b5   :  { %7619 = vmatprep.subr.bf16.mxu0 %v15617_v29  ;;  %7825 = vmatprep.subr.bf16.mxu1 %v15620_v37  ;;  %v7136_v34 = vpack.c.bf16 %v7112_v2, %v7109_v18  ;;  %v7111_v29 = vld [vmem:[#allocation3 + $0x168] sm:$0xff]  ;;  %v7108_v37 = vld [vmem:[#allocation3 + $0x150] sm:$0xff]  ;;  %v15711_v18 = vld [vmem:[#allocation16 + $0xa0] ss:$8 sps:$4 sm:$0xff]  }
 0x6b6   :  { %v15708_v2 = vld [vmem:[#allocation18 + $0x90] ss:$8 sps:$4 sm:$0xff]  }
 0x6b7   :  { %13290 = vmatmul.mubr.msk.bf16.gmra.mrb[108].mxu0 %vm245_vm2, %v6154_v23  ;;  %13297 = vmatmul.mubr.msk.bf16.gmra.mrb[108].mxu1 %vm245_vm2, %v6154_v23  ;;  %v7139_v23 = vpack.c.bf16 %v18309_v26, %v18309_v26  ;;  %v7086_v26 = vld [vmem:[#allocation3 + $0xa0] sm:$0xff] }
 0x6b8   :  { %7620 = vmatpush1.bf16.msra.mxu0 %v15615_v6  ;;  %7826 = vmatpush1.bf16.msra.mxu1 %v15618_v46  ;;  %v7135_v6 = vpack.c.bf16 %v7111_v29, %v7108_v37  ;;  %v7080_v46 = vld [vmem:[#allocation3 + $0x70] sm:$0xff]  ;;  %v7119_v29 = vld [vmem:[#allocation3 + $0x1a8] sm:$0xff] }
 0x6b9   :  { %7627 = vmatprep.mubr.bf16.mxu0 %v7121_v53  ;;  %7833 = vmatprep.mubr.bf16.mxu1 %v7121_v53  ;;  %v7122_v47 = vpack.c.bf16 %v7083_v61, %v7080_v46  ;;  %v15659_v53 = vld [vmem:[#allocation16 + $0x14] ss:$8 sps:$4 sm:$0xff]   ;;  %v7140_v37 = vpack.c.bf16 %v7119_v29, %v18353_v58  ;;  %v15717_v46 = vld [vmem:[#allocation16 + $0xb0] ss:$8 sps:$4 sm:$0xff]  }
 0x6ba   :  { %7621 = vmatprep.subr.bf16.mxu0 %v15623_v42  ;;  %7827 = vmatprep.subr.bf16.mxu1 %v15626_v39  ;;  %v15651_v42 = vld [vmem:[#allocation16] ss:$8 sps:$4 sm:$0xff]   ;;  %v15720_v61 = vld [vmem:[#allocation18 + $0xb0] ss:$8 sps:$4 sm:$0xff]   ;;  %v15731_v58 = vld [vmem:[#allocation16 + $0xd4] ss:$8 sps:$4 sm:$0xff]  }
 0x6bb   :  { %v15654_v39 = vld [vmem:[#allocation18] ss:$8 sps:$4 sm:$0xff]  }
 0x6bc   :  { %7622 = vmatpush1.bf16.msra.mxu0 %v15621_v36  ;;  %7828 = vmatpush1.bf16.msra.mxu1 %v15624_v1  ;;  %v15662_v36 = vld [vmem:[#allocation18 + $0x14] ss:$8 sps:$4 sm:$0xff]   ;;  %v7089_v1 = vld [vmem:[#allocation3 + $0xb8] sm:$0xff] }
 0x6bd   :  { %7623 = vmatprep.subr.bf16.mxu0 %v15629_v44  ;;  %7829 = vmatprep.subr.bf16.mxu1 %v15632_v3  ;;  %v15657_v44 = vld [vmem:[#allocation16 + $0x10] ss:$8 sps:$4 sm:$0xff]  }
 0x6be   :  { %v15660_v3 = vld [vmem:[#allocation18 + $0x10] ss:$8 sps:$4 sm:$0xff]  }
 0x6c0   :  { %7624 = vmatpush1.bf16.msra.mxu0 %v15627_v41  ;;  %7830 = vmatpush1.bf16.msra.mxu1 %v15630_v49  ;;  %v15665_v41 = vld [vmem:[#allocation16 + $0x24] ss:$8 sps:$4 sm:$0xff]  }
 0x6c1   :  { %7625 = vmatprep.subr.bf16.mxu0 %v15635_v0  ;;  %7831 = vmatprep.subr.bf16.mxu1 %v15638_v24  ;;  %v15668_v49 = vld [vmem:[#allocation18 + $0x24] ss:$8 sps:$4 sm:$0xff]   ;;  %v7125_v0 = vpack.c.bf16 %v7089_v1, %v7086_v26  ;;  %v15663_v24 = vld [vmem:[#allocation16 + $0x20] ss:$8 sps:$4 sm:$0xff]  }
 0x6c2   :  { %v15737_v26 = vld [vmem:[#allocation16 + $0xe4] ss:$8 sps:$4 sm:$0xff]  }
 0x6c3   :  { %v15740_v1 = vld [vmem:[#allocation18 + $0xe4] ss:$8 sps:$4 sm:$0xff]  }
 0x6c4   :  { %7626 = vmatpush1.bf16.msra.mxu0 %v15633_v32  ;;  %7832 = vmatpush1.bf16.msra.mxu1 %v15636_v5  ;;  %v15666_v32 = vld [vmem:[#allocation18 + $0x20] ss:$8 sps:$4 sm:$0xff]   ;;  %v15671_v5 = vld [vmem:[#allocation16 + $0x34] ss:$8 sps:$4 sm:$0xff]  }
 0x6c5   :  { %7698 = vmatprep.subr.bf16.mxu0 %v15641_v7  ;;  %7904 = vmatprep.subr.bf16.mxu1 %v15647_v19  ;;  %v15674_v7 = vld [vmem:[#allocation18 + $0x34] ss:$8 sps:$4 sm:$0xff]  }
 0x6c6   :  { %v7092_v19 = vld [vmem:[#allocation3 + $0xd0] sm:$0xff] }
 0x6c7   :  { %7628 = vmatmul.mubr.bf16.vlgmr.msra.gmra.mrb[84].mxu0 %v7120_v28  ;;  %7834 = vmatmul.mubr.bf16.vlgmr.msra.gmra.mrb[84].mxu1 %v7120_v28  ;;  %v15680_v28 = vld [vmem:[#allocation18 + $0x44] ss:$8 sps:$4 sm:$0xff]   ;;  %v7128_v50 = vpack.c.bf16 %v7095_v15, %v7092_v19  ;;  %v18677_v19 = vld [vmem:[#allocation38_spill] sm:$0xff] }
 0x6c8   :  { %7637 = vmatprep.mubr.bf16.mxu0 %v7124_v57  ;;  %7699 = vmatpush1.bf16.msra.mxu0 %v15639_v12  ;;  %v15677_v12 = vld [vmem:[#allocation16 + $0x44] ss:$8 sps:$4 sm:$0xff]  }
 0x6c9   :  { %7843 = vmatprep.mubr.bf16.mxu1 %v7124_v57  ;;  %7700 = vmatprep.subr.bf16.mxu0 %v15644_v40  ;;  %v15675_v40 = vld [vmem:[#allocation16 + $0x40] ss:$8 sps:$4 sm:$0xff]  }
 0x6ca   :  { %7905 = vmatpush1.bf16.msra.mxu1 %v15645_v45  ;;  %v15678_v57 = vld [vmem:[#allocation18 + $0x40] ss:$8 sps:$4 sm:$0xff]   ;;  %v15683_v45 = vld [vmem:[#allocation16 + $0x54] ss:$8 sps:$4 sm:$0xff]  }
 0x6cb   :  { %7906 = vmatprep.subr.bf16.mxu1 %v15650_v48  ;;  %v15686_v48 = vld [vmem:[#allocation18 + $0x54] ss:$8 sps:$4 sm:$0xff]  }
 0x6cc   :  { %7701 = vmatpush1.bf16.msra.mxu0 %v15642_v54  ;;  %v7098_v54 = vld [vmem:[#allocation3 + $0x100] sm:$0xff] }
 0x6cd   :  { %8589 = vmatprep.subr.bf16.mxu0 %v15653_v11  ;;  %v7101_v11 = vld [vmem:[#allocation3 + $0x118] sm:$0xff] }
 0x6ce   :  { %7907 = vmatpush1.bf16.msra.mxu1 %v15648_v43  ;;  %v15684_v43 = vld [vmem:[#allocation18 + $0x50] ss:$8 sps:$4 sm:$0xff]  }
 0x6cf   :  { %7638 = vmatmul.mubr.bf16.gmra.mrb[88].mxu0 %v7123_v9  ;;  %7844 = vmatmul.mubr.bf16.gmra.mrb[88].mxu1 %v7123_v9  ;;  %v7131_v9 = vpack.c.bf16 %v7101_v11, %v7098_v54 }
 0x6d0   :  { %7647 = vmatprep.mubr.bf16.mxu0 %v7127_v62  ;;  %7853 = vmatprep.mubr.bf16.mxu1 %v7127_v62  ;;  %v15695_v62 = vld [vmem:[#allocation16 + $0x74] ss:$8 sps:$4 sm:$0xff]  }
 0x6d1   :  { %9067 = vmatprep.subr.bf16.mxu1 %v15656_v30  ;;  %v15690_v30 = vld [vmem:[#allocation18 + $0x60] ss:$8 sps:$4 sm:$0xff]  }
 0x6d7   :  { %7648 = vmatmul.mubr.bf16.gmra.mrb[92].mxu0 %v7126_v38  ;;  %7854 = vmatmul.mubr.bf16.gmra.mrb[92].mxu1 %v7126_v38  ;;  %v15693_v38 = vld [vmem:[#allocation16 + $0x70] ss:$8 sps:$4 sm:$0xff]  }
 0x6d8   :  { %7657 = vmatprep.mubr.bf16.mxu0 %v7130_v33  ;;  %7863 = vmatprep.mubr.bf16.mxu1 %v7130_v33  ;;  %v15701_v33 = vld [vmem:[#allocation16 + $0x84] ss:$8 sps:$4 sm:$0xff]  }
 0x6df   :  { %7658 = vmatmul.mubr.bf16.gmra.mrb[96].mxu0 %v7129_v60  ;;  %7864 = vmatmul.mubr.bf16.gmra.mrb[96].mxu1 %v7129_v60  ;;  %v15702_v60 = vld [vmem:[#allocation18 + $0x80] ss:$8 sps:$4 sm:$0xff]  }
 0x6e0   :  { %7667 = vmatprep.mubr.bf16.mxu0 %v7133_v63  ;;  %7873 = vmatprep.mubr.bf16.mxu1 %v7133_v63  ;;  %v15710_v63 = vld [vmem:[#allocation18 + $0x94] ss:$8 sps:$4 sm:$0xff]  }
 0x6e7   :  { %7668 = vmatmul.mubr.bf16.gmra.mrb[100].mxu0 %v7132_v59  ;;  %7874 = vmatmul.mubr.bf16.gmra.mrb[100].mxu1 %v7132_v59  ;;  %v15716_v59 = vld [vmem:[#allocation18 + $0xa4] ss:$8 sps:$4 sm:$0xff]  }
 0x6e8   :  { %7677 = vmatprep.mubr.bf16.mxu0 %v7136_v34  ;;  %7883 = vmatprep.mubr.bf16.mxu1 %v7136_v34  ;;  %v15714_v34 = vld [vmem:[#allocation18 + $0xa0] ss:$8 sps:$4 sm:$0xff]  }
 0x6ef   :  { %7678 = vmatmul.mubr.bf16.gmra.mrb[104].mxu0 %v7135_v6  ;;  %7884 = vmatmul.mubr.bf16.gmra.mrb[104].mxu1 %v7135_v6  ;;  %v15722_v6 = vld [vmem:[#allocation18 + $0xb4] ss:$8 sps:$4 sm:$0xff]  }
 0x6f0   :  { %7687 = vmatprep.mubr.bf16.mxu0 %v7139_v23  ;;  %7893 = vmatprep.mubr.bf16.mxu1 %v7139_v23 }
 0x6f7   :  { %7688 = vmatmul.mubr.bf16.gmra.mrb[108].mxu0 %v7139_v23  ;;  %7894 = vmatmul.mubr.bf16.gmra.mrb[108].mxu1 %v7139_v23  ;;  %v15719_v23 = vld [vmem:[#allocation16 + $0xb4] ss:$8 sps:$4 sm:$0xff]  }
 0x6f8   :  { %7730 = vmatprep.mubr.bf16.mxu0 %v18670_v51  ;;  %7936 = vmatprep.mubr.bf16.mxu1 %v18670_v51 }
 0x6ff   :  { %13370 = vmatmul.mubr.msk.bf16.vlgmr.msra.gmra.mrb[84].mxu0 %vm245_vm2, %v7122_v47  ;;  %13377 = vmatmul.mubr.msk.bf16.vlgmr.msra.gmra.mrb[84].mxu1 %vm245_vm2, %v7122_v47  ;;  %v15728_v47 = vld [vmem:[#allocation18 + $0xc4] ss:$8 sps:$4 sm:$0xff]  }
 0x700   :  { %7740 = vmatprep.mubr.bf16.mxu0 %v18670_v51  ;;  %7946 = vmatprep.mubr.bf16.mxu1 %v18670_v51 }
 0x701   :  { %8590 = vmatpush1.bf16.msra.mxu0 %v15651_v42  ;;  %9068 = vmatpush1.bf16.msra.mxu1 %v15654_v39  ;;  %v15726_v42 = vld [vmem:[#allocation18 + $0xc0] ss:$8 sps:$4 sm:$0xff]   ;;  %v15734_v39 = vld [vmem:[#allocation18 + $0xd4] ss:$8 sps:$4 sm:$0xff]  }
 0x702   :  { %8591 = vmatprep.subr.bf16.mxu0 %v15659_v53  ;;  %9069 = vmatprep.subr.bf16.mxu1 %v15662_v36  ;;  %v15729_v53 = vld [vmem:[#allocation16 + $0xd0] ss:$8 sps:$4 sm:$0xff]  }
 0x703   :  { %v15732_v36 = vld [vmem:[#allocation18 + $0xd0] ss:$8 sps:$4 sm:$0xff]  }
 0x705   :  { %8592 = vmatpush1.bf16.msra.mxu0 %v15657_v44  ;;  %9070 = vmatpush1.bf16.msra.mxu1 %v15660_v3  ;;  %v15735_v44 = vld [vmem:[#allocation16 + $0xe0] ss:$8 sps:$4 sm:$0xff]  }
 0x706   :  { %8593 = vmatprep.subr.bf16.mxu0 %v15665_v41  ;;  %9071 = vmatprep.subr.bf16.mxu1 %v15668_v49  ;;  %v15738_v3 = vld [vmem:[#allocation18 + $0xe0] ss:$8 sps:$4 sm:$0xff]   ;;  %v15743_v41 = vld [vmem:[#allocation16 + $0xf4] ss:$8 sps:$4 sm:$0xff]  }
 0x707   :  { %13371 = vmatmul.mubr.msk.bf16.gmra.mrb[88].mxu0 %vm245_vm2, %v7125_v0  ;;  %13378 = vmatmul.mubr.msk.bf16.gmra.mrb[88].mxu1 %vm245_vm2, %v7125_v0  ;;  %v15746_v49 = vld [vmem:[#allocation18 + $0xf4] ss:$8 sps:$4 sm:$0xff]   ;;  %v15741_v0 = vld [vmem:[#allocation16 + $0xf0] ss:$8 sps:$4 sm:$0xff]  }
 0x708   :  { %7750 = vmatprep.mubr.bf16.mxu0 %v18670_v51  ;;  %7956 = vmatprep.mubr.bf16.mxu1 %v18670_v51 }
 0x709   :  { %8594 = vmatpush1.bf16.msra.mxu0 %v15663_v24  ;;  %9072 = vmatpush1.bf16.msra.mxu1 %v15666_v32  ;;  %v15744_v24 = vld [vmem:[#allocation18 + $0xf0] ss:$8 sps:$4 sm:$0xff]   ;;  %v15749_v32 = vld [vmem:[#allocation16 + $0x104] ss:$8 sps:$4 sm:$0xff]  }
 0x70a   :  { %8595 = vmatprep.subr.bf16.mxu0 %v15671_v5  ;;  %9073 = vmatprep.subr.bf16.mxu1 %v15674_v7  ;;  %v15752_v5 = vld [vmem:[#allocation18 + $0x104] ss:$8 sps:$4 sm:$0xff]   ;;  %v8063_v7 = vld [vmem:[#allocation15] sm:$0xf] }
 0x70b   :  { %v18395_v15 = vrot.slane %v8063_v7, %v18677_v19 }
 0x70d   :  { %8596 = vmatpush1.bf16.msra.mxu0 %v15669_v22  ;;  %9074 = vmatpush1.bf16.msra.mxu1 %v15672_v13  ;;  %v18678_v22 = vld [vmem:[#allocation39_spill] sm:$0xff] }
 0x70e   :  { %8597 = vmatprep.subr.bf16.mxu0 %v15677_v12  ;;  %9075 = vmatprep.subr.bf16.mxu1 %v15680_v28  ;;  %v18398_v13 = vrot.slane %v8063_v7, %v18678_v22  ;;  %v18679_v12 = vld [vmem:[#allocation40_spill] sm:$0xff] }
 0x70f   :  { %13372 = vmatmul.mubr.msk.bf16.gmra.mrb[92].mxu0 %vm245_vm2, %v7128_v50  ;;  %13379 = vmatmul.mubr.msk.bf16.gmra.mrb[92].mxu1 %vm245_vm2, %v7128_v50  ;;  %v18401_v28 = vrot.slane %v8063_v7, %v18679_v12  ;;  %v18680_v50 = vld [vmem:[#allocation41_spill] sm:$0xff] }
 0x710   :  { %7760 = vmatprep.mubr.bf16.mxu0 %v18670_v51  ;;  %7966 = vmatprep.mubr.bf16.mxu1 %v18670_v51 }
 0x711   :  { %8598 = vmatpush1.bf16.msra.mxu0 %v15675_v40  ;;  %9076 = vmatpush1.bf16.msra.mxu1 %v15678_v57  ;;  %v18404_v40 = vrot.slane %v8063_v7, %v18680_v50 }
 0x712   :  { %8599 = vmatprep.subr.bf16.mxu0 %v15683_v45  ;;  %9077 = vmatprep.subr.bf16.mxu1 %v15686_v48 }
 0x715   :  { %8600 = vmatpush1.bf16.msra.mxu0 %v15681_v35  ;;  %9078 = vmatpush1.bf16.msra.mxu1 %v15684_v43 }
 0x716   :  { %8601 = vmatprep.subr.bf16.mxu0 %v15689_v27  ;;  %9079 = vmatprep.subr.bf16.mxu1 %v15692_v20 }
 0x717   :  { %13373 = vmatmul.mubr.msk.bf16.gmra.mrb[96].mxu0 %vm245_vm2, %v7131_v9  ;;  %13380 = vmatmul.mubr.msk.bf16.gmra.mrb[96].mxu1 %vm245_vm2, %v7131_v9 }
 0x718   :  { %7770 = vmatprep.mubr.bf16.mxu0 %v18670_v51  ;;  %7976 = vmatprep.mubr.bf16.mxu1 %v18670_v51 }
 0x719   :  { %8602 = vmatpush1.bf16.msra.mxu0 %v15687_v17  ;;  %9080 = vmatpush1.bf16.msra.mxu1 %v15690_v30 }
 0x71a   :  { %8603 = vmatprep.subr.bf16.mxu0 %v15695_v62  ;;  %9081 = vmatprep.subr.bf16.mxu1 %v15698_v31 }
 0x71d   :  { %8604 = vmatpush1.bf16.msra.mxu0 %v15693_v38  ;;  %9082 = vmatpush1.bf16.msra.mxu1 %v15696_v21 }
 0x71e   :  { %8605 = vmatprep.subr.bf16.mxu0 %v15701_v33  ;;  %9083 = vmatprep.subr.bf16.mxu1 %v15704_v16 }
 0x71f   :  { %13374 = vmatmul.mubr.msk.bf16.gmra.mrb[100].mxu0 %vm245_vm2, %v7134_v4  ;;  %13381 = vmatmul.mubr.msk.bf16.gmra.mrb[100].mxu1 %vm245_vm2, %v7134_v4 }
 0x720   :  { %7780 = vmatprep.mubr.bf16.mxu0 %v18670_v51  ;;  %7986 = vmatprep.mubr.bf16.mxu1 %v18670_v51 }
 0x721   :  { %8606 = vmatpush1.bf16.msra.mxu0 %v15699_v56  ;;  %9084 = vmatpush1.bf16.msra.mxu1 %v15702_v60 }
 0x722   :  { %8607 = vmatprep.subr.bf16.mxu0 %v15707_v25  ;;  %9085 = vmatprep.subr.bf16.mxu1 %v15710_v63 }
 0x725   :  { %8608 = vmatpush1.bf16.msra.mxu0 %v15705_v52  ;;  %9086 = vmatpush1.bf16.msra.mxu1 %v15708_v2 }
 0x726   :  { %8609 = vmatprep.subr.bf16.mxu0 %v15713_v55  ;;  %9087 = vmatprep.subr.bf16.mxu1 %v15716_v59 }
 0x727   :  { %13375 = vmatmul.mubr.msk.bf16.gmra.mrb[104].mxu0 %vm245_vm2, %v18281_v8  ;;  %13382 = vmatmul.mubr.msk.bf16.gmra.mrb[104].mxu1 %vm245_vm2, %v18281_v8  ;;  %v15725_v8 = vld [vmem:[#allocation16 + $0xc4] ss:$8 sps:$4 sm:$0xff]  }
 0x728   :  { %7790 = vmatprep.mubr.bf16.mxu0 %v18670_v51  ;;  %7996 = vmatprep.mubr.bf16.mxu1 %v18670_v51  ;;  %v15723_v51 = vld [vmem:[#allocation16 + $0xc0] ss:$8 sps:$4 sm:$0xff]  }
 0x729   :  { %8610 = vmatpush1.bf16.msra.mxu0 %v15711_v18  ;;  %9088 = vmatpush1.bf16.msra.mxu1 %v15714_v34 }
 0x72a   :  { %8611 = vmatprep.subr.bf16.mxu0 %v15719_v23  ;;  %9089 = vmatprep.subr.bf16.mxu1 %v15722_v6 }
 0x72d   :  { %8612 = vmatpush1.bf16.msra.mxu0 %v15717_v46  ;;  %9090 = vmatpush1.bf16.msra.mxu1 %v15720_v61 }
 0x72e   :  { %8613 = vmatprep.subr.bf16.mxu0 %v15725_v8  ;;  %9091 = vmatprep.subr.bf16.mxu1 %v15728_v47 }
 0x72f   :  { %13376 = vmatmul.mubr.msk.bf16.gmra.mrb[108].mxu0 %vm245_vm2, %v7140_v37  ;;  %13383 = vmatmul.mubr.msk.bf16.gmra.mrb[108].mxu1 %vm245_vm2, %v7140_v37 }
 0x731   :  { %8614 = vmatpush1.bf16.msra.mxu0 %v15723_v51  ;;  %9092 = vmatpush1.bf16.msra.mxu1 %v15726_v42 }
 0x732   :  { %8615 = vmatprep.subr.bf16.mxu0 %v15731_v58  ;;  %9093 = vmatprep.subr.bf16.mxu1 %v15734_v39 }
 0x735   :  { %8616 = vmatpush1.bf16.msra.mxu0 %v15729_v53  ;;  %9094 = vmatpush1.bf16.msra.mxu1 %v15732_v36 }
 0x736   :  { %8617 = vmatprep.subr.bf16.mxu0 %v15737_v26  ;;  %9095 = vmatprep.subr.bf16.mxu1 %v15740_v1 }
 0x739   :  { %8618 = vmatpush1.bf16.msra.mxu0 %v15735_v44  ;;  %9096 = vmatpush1.bf16.msra.mxu1 %v15738_v3 }
 0x73a   :  { %8619 = vmatprep.subr.bf16.mxu0 %v15743_v41  ;;  %9097 = vmatprep.subr.bf16.mxu1 %v15746_v49 }
 0x73d   :  { %8620 = vmatpush1.bf16.msra.mxu0 %v15741_v0  ;;  %9098 = vmatpush1.bf16.msra.mxu1 %v15744_v24 }
 0x73e   :  { %8660 = vmatprep.subr.bf16.mxu0 %v15749_v32  ;;  %9138 = vmatprep.subr.bf16.mxu1 %v15752_v5 }
 0x7d2   :  { %v7732_v57 = vpop.f32.mrb[84].mxu0  ;;  %v7938_v45 = vpop.f32.mrb[84].mxu1 }
 0x7d3   :  { %v8085_v48 = vadd.f32 %v18395_v15, %v7732_v57  ;;  %v8087_v54 = vadd.f32 %v18398_v13, %v7938_v45  ;;  %v7734_v11 = vpop.f32.mrb[85].mxu0  ;;  %v7940_v35 = vpop.f32.mrb[85].mxu1 }
 0x7d4   :  { %v8086_v43 = vadd.f32 %v18401_v28, %v7734_v11  ;;  %v8088_v27 = vadd.f32 %v18404_v40, %v7940_v35  ;;  %v7736_v20 = vpop.f32.mrb[86].mxu0  ;;  %v7942_v9 = vpop.f32.mrb[86].mxu1 }
 0x7d5   :  { %v8089_v17 = vadd.f32 %v18395_v15, %v7736_v20  ;;  %v8091_v30 = vadd.f32 %v18398_v13, %v7942_v9  ;;  %v7738_v62 = vpop.f32.mrb[87].mxu0  ;;  %v7944_v31 = vpop.f32.mrb[87].mxu1  ;;  %v8141_v38 = vmax.f32 %v8085_v48, 0.0  ;;  %v8143_v21 = vmax.f32 %v8087_v54, 0.0 }
 0x7d6   :  { %v8090_v10 = vadd.f32 %v18401_v28, %v7738_v62  ;;  %v8092_v14 = vadd.f32 %v18404_v40, %v7944_v31  ;;  %v8142_v4 = vmax.f32 %v8086_v43, 0.0  ;;  %v8144_v56 = vmax.f32 %v8088_v27, 0.0 }
 0x7d7   :  { %v8145_v33 = vmax.f32 %v8089_v17, 0.0  ;;  %v8147_v16 = vmax.f32 %v8091_v30, 0.0 }
 0x7d8   :  { %v8146_v60 = vmax.f32 %v8090_v10, 0.0  ;;  %v8148_v25 = vmax.f32 %v8092_v14, 0.0  ;;  %v15747_v10 = vld [vmem:[#allocation16 + $0x100] ss:$8 sps:$4 sm:$0xff]  }
 0x7d9   :  { %v8197_v63 = vmax.f32 %v8141_v38, %v8145_v33  ;;  %v8199_v52 = vmax.f32 %v8143_v21, %v8147_v16  ;;  %v15750_v14 = vld [vmem:[#allocation18 + $0x100] ss:$8 sps:$4 sm:$0xff]  }
 0x7da   :  { %v8198_v2 = vmax.f32 %v8142_v4, %v8146_v60  ;;  %v8200_v55 = vmax.f32 %v8144_v56, %v8148_v25  ;;  %v7742_v59 = vpop.f32.mrb[88].mxu0  ;;  %v7948_v18 = vpop.f32.mrb[88].mxu1  ;;  %v15755_v4 = vld [vmem:[#allocation16 + $0x114] ss:$8 sps:$4 sm:$0xff]  }
 0x7db   :  { %v8093_v34 = vadd.f32 %v18395_v15, %v7742_v59  ;;  %v8095_v29 = vadd.f32 %v18398_v13, %v7948_v18  ;;  %v7744_v37 = vpop.f32.mrb[89].mxu0  ;;  %v7950_v23 = vpop.f32.mrb[89].mxu1  ;;  %v15758_v56 = vld [vmem:[#allocation18 + $0x114] ss:$8 sps:$4 sm:$0xff]   ;;  %v15753_v59 = vld [vmem:[#allocation16 + $0x110] ss:$8 sps:$4 sm:$0xff]  }
 0x7dc   :  { %v8094_v6 = vadd.f32 %v18401_v28, %v7744_v37  ;;  %v8096_v46 = vadd.f32 %v18404_v40, %v7950_v23  ;;  %v7746_v61 = vpop.f32.mrb[90].mxu0  ;;  %v7952_v8 = vpop.f32.mrb[90].mxu1  ;;  %v15756_v23 = vld [vmem:[#allocation18 + $0x110] ss:$8 sps:$4 sm:$0xff]  }
 0x7dd   :  { %v8097_v47 = vadd.f32 %v18395_v15, %v7746_v61  ;;  %v8099_v51 = vadd.f32 %v18398_v13, %v7952_v8  ;;  %v7748_v42 = vpop.f32.mrb[91].mxu0  ;;  %v7954_v58 = vpop.f32.mrb[91].mxu1  ;;  %v8149_v36 = vmax.f32 %v8093_v34, 0.0  ;;  %v8151_v26 = vmax.f32 %v8095_v29, 0.0  ;;  %v15761_v61 = vld [vmem:[#allocation16 + $0x124] ss:$8 sps:$4 sm:$0xff]  }
 0x7de   :  { %v8098_v39 = vadd.f32 %v18401_v28, %v7748_v42  ;;  %v8100_v53 = vadd.f32 %v18404_v40, %v7954_v58  ;;  %v8150_v3 = vmax.f32 %v8094_v6, 0.0  ;;  %v8152_v41 = vmax.f32 %v8096_v46, 0.0  ;;  %v15764_v8 = vld [vmem:[#allocation18 + $0x124] ss:$8 sps:$4 sm:$0xff]  }
 0x7df   :  { %v8153_v1 = vmax.f32 %v8097_v47, 0.0  ;;  %v8155_v44 = vmax.f32 %v8099_v51, 0.0 }
 0x7e0   :  { %v8154_v49 = vmax.f32 %v8098_v39, 0.0  ;;  %v8156_v0 = vmax.f32 %v8100_v53, 0.0 }
 0x7e1   :  { %v8201_v24 = vmax.f32 %v8149_v36, %v8153_v1  ;;  %v8203_v32 = vmax.f32 %v8151_v26, %v8155_v44 }
 0x7e2   :  { %v8202_v5 = vmax.f32 %v8150_v3, %v8154_v49  ;;  %v8204_v7 = vmax.f32 %v8152_v41, %v8156_v0  ;;  %v7752_v57 = vpop.f32.mrb[92].mxu0  ;;  %v7958_v45 = vpop.f32.mrb[92].mxu1  ;;  %v15759_v49 = vld [vmem:[#allocation16 + $0x120] ss:$8 sps:$4 sm:$0xff]  }
 0x7e3   :  { %v8225_v48 = vpack.c.bf16 %v8201_v24, %v8197_v63  ;;  %v18422_v54 = vpack.c.bf16 %v8203_v32, %v8199_v52  ;;  %v8101_v11 = vadd.f32 %v18395_v15, %v7752_v57  ;;  %v8103_v35 = vadd.f32 %v18398_v13, %v7958_v45  ;;  %v7754_v43 = vpop.f32.mrb[93].mxu0  ;;  %v7960_v27 = vpop.f32.mrb[93].mxu1  ;;  %v15762_v0 = vld [vmem:[#allocation18 + $0x120] ss:$8 sps:$4 sm:$0xff]   ;;  %v15767_v57 = vld [vmem:[#allocation16 + $0x134] ss:$8 sps:$4 sm:$0xff]  }
 0x7e4   :  { %v18426_v20 = vpack.c.bf16 %v8204_v7, %v8200_v55  ;;  %v8102_v9 = vadd.f32 %v18401_v28, %v7754_v43  ;;  %v8104_v17 = vadd.f32 %v18404_v40, %v7960_v27  ;;  %v7756_v30 = vpop.f32.mrb[94].mxu0  ;;  %v7962_v62 = vpop.f32.mrb[94].mxu1  ;;  %v8226_v31 = vpack.c.bf16 %v8202_v5, %v8198_v2  ;;  %v15770_v45 = vld [vmem:[#allocation18 + $0x134] ss:$8 sps:$4 sm:$0xff]  }
 0x7e5   :  { %v8105_v38 = vadd.f32 %v18395_v15, %v7756_v30  ;;  %v8107_v21 = vadd.f32 %v18398_v13, %v7962_v62  ;;  %v7758_v33 = vpop.f32.mrb[95].mxu0  ;;  %v7964_v16 = vpop.f32.mrb[95].mxu1  ;;  %v8157_v63 = vmax.f32 %v8101_v11, 0.0  ;;  %v8159_v52 = vmax.f32 %v8103_v35, 0.0 }
 0x7e6   :  { %v8106_v60 = vadd.f32 %v18401_v28, %v7758_v33  ;;  %v8108_v25 = vadd.f32 %v18404_v40, %v7964_v16  ;;  %8621 = vmatprep.mubr.bf16.mxu0 %v8226_v31  ;;  %9099 = vmatprep.mubr.bf16.mxu1 %v8226_v31  ;;  %v8158_v18 = vmax.f32 %v8102_v9, 0.0  ;;  %v8160_v34 = vmax.f32 %v8104_v17, 0.0  ;;  %v15765_v17 = vld [vmem:[#allocation16 + $0x130] ss:$8 sps:$4 sm:$0xff]   ;;  %v15773_v33 = vld [vmem:[#allocation16 + $0x144] ss:$8 sps:$4 sm:$0xff]  }
 0x7e7   :  { %v8161_v55 = vmax.f32 %v8105_v38, 0.0  ;;  %v8163_v2 = vmax.f32 %v8107_v21, 0.0  ;;  %8622 = vmatmul.mubr.bf16.vlgmr.msra.gmra.mrb[112].mxu0 %v8225_v48  ;;  %9100 = vmatmul.mubr.bf16.vlgmr.msra.gmra.mrb[112].mxu1 %v8225_v48  ;;  %v15776_v16 = vld [vmem:[#allocation18 + $0x144] ss:$8 sps:$4 sm:$0xff]  }
 0x7e8   :  { %v8162_v29 = vmax.f32 %v8106_v60, 0.0  ;;  %v8164_v37 = vmax.f32 %v8108_v25, 0.0  ;;  %8661 = vmatpush1.bf16.msra.mxu0 %v15747_v10  ;;  %9139 = vmatpush1.bf16.msra.mxu1 %v15750_v14  ;;  %v15768_v14 = vld [vmem:[#allocation18 + $0x130] ss:$8 sps:$4 sm:$0xff]  }
 0x7e9   :  { %v8205_v6 = vmax.f32 %v8157_v63, %v8161_v55  ;;  %v8207_v46 = vmax.f32 %v8159_v52, %v8163_v2  ;;  %8662 = vmatprep.subr.bf16.mxu0 %v15755_v4  ;;  %9140 = vmatprep.subr.bf16.mxu1 %v15758_v56 }
 0x7ea   :  { %v18434_v47 = vmax.f32 %v8158_v18, %v8162_v29  ;;  %v8208_v51 = vmax.f32 %v8160_v34, %v8164_v37  ;;  %v7762_v42 = vpop.f32.mrb[96].mxu0  ;;  %v7968_v58 = vpop.f32.mrb[96].mxu1 }
 0x7eb   :  { %v8109_v39 = vadd.f32 %v18395_v15, %v7762_v42  ;;  %v8111_v53 = vadd.f32 %v18398_v13, %v7968_v58  ;;  %v7764_v36 = vpop.f32.mrb[97].mxu0  ;;  %v7970_v26 = vpop.f32.mrb[97].mxu1  ;;  %v15774_v42 = vld [vmem:[#allocation18 + $0x140] ss:$8 sps:$4 sm:$0xff]  }
 0x7ec   :  { %v8110_v1 = vadd.f32 %v18401_v28, %v7764_v36  ;;  %v8112_v44 = vadd.f32 %v18404_v40, %v7970_v26  ;;  %v7766_v3 = vpop.f32.mrb[98].mxu0  ;;  %v7972_v41 = vpop.f32.mrb[98].mxu1  ;;  %8663 = vmatpush1.bf16.msra.mxu0 %v15753_v59  ;;  %9141 = vmatpush1.bf16.msra.mxu1 %v15756_v23  ;;  %v15779_v26 = vld [vmem:[#allocation16 + $0x154] ss:$8 sps:$4 sm:$0xff]  }
 0x7ed   :  { %v8113_v24 = vadd.f32 %v18395_v15, %v7766_v3  ;;  %v8115_v32 = vadd.f32 %v18398_v13, %v7972_v41  ;;  %v7768_v5 = vpop.f32.mrb[99].mxu0  ;;  %v7974_v7 = vpop.f32.mrb[99].mxu1  ;;  %8664 = vmatprep.subr.bf16.mxu0 %v15761_v61  ;;  %9142 = vmatprep.subr.bf16.mxu1 %v15764_v8  ;;  %v8165_v35 = vmax.f32 %v8109_v39, 0.0  ;;  %v8167_v43 = vmax.f32 %v8111_v53, 0.0  ;;  %v15771_v8 = vld [vmem:[#allocation16 + $0x140] ss:$8 sps:$4 sm:$0xff]  }
 0x7ee   :  { %v8114_v48 = vadd.f32 %v18401_v28, %v7768_v5  ;;  %v8116_v11 = vadd.f32 %v18404_v40, %v7974_v7  ;;  %v8166_v30 = vmax.f32 %v8110_v1, 0.0  ;;  %v8168_v62 = vmax.f32 %v8112_v44, 0.0  ;;  %v15782_v1 = vld [vmem:[#allocation18 + $0x154] ss:$8 sps:$4 sm:$0xff]  }
 0x7ef   :  { %v8169_v27 = vmax.f32 %v8113_v24, 0.0  ;;  %v8171_v9 = vmax.f32 %v8115_v32, 0.0 }
 0x7f0   :  { %v8170_v31 = vmax.f32 %v8114_v48, 0.0  ;;  %v8172_v10 = vmax.f32 %v8116_v11, 0.0  ;;  %8665 = vmatpush1.bf16.msra.mxu0 %v15759_v49  ;;  %9143 = vmatpush1.bf16.msra.mxu1 %v15762_v0  ;;  %v15777_v0 = vld [vmem:[#allocation16 + $0x150] ss:$8 sps:$4 sm:$0xff]   ;;  %v15785_v11 = vld [vmem:[#allocation16 + $0x164] ss:$8 sps:$4 sm:$0xff]  }
 0x7f1   :  { %v8209_v38 = vmax.f32 %v8165_v35, %v8169_v27  ;;  %v8211_v21 = vmax.f32 %v8167_v43, %v8171_v9  ;;  %8666 = vmatprep.subr.bf16.mxu0 %v15767_v57  ;;  %9144 = vmatprep.subr.bf16.mxu1 %v15770_v45  ;;  %v15780_v57 = vld [vmem:[#allocation18 + $0x150] ss:$8 sps:$4 sm:$0xff]   ;;  %v15788_v35 = vld [vmem:[#allocation18 + $0x164] ss:$8 sps:$4 sm:$0xff]  }
 0x7f2   :  { %v8210_v4 = vmax.f32 %v8166_v30, %v8170_v31  ;;  %v8212_v56 = vmax.f32 %v8168_v62, %v8172_v10  ;;  %v7772_v60 = vpop.f32.mrb[100].mxu0  ;;  %v7978_v25 = vpop.f32.mrb[100].mxu1 }
 0x7f3   :  { %v8117_v63 = vadd.f32 %v18395_v15, %v7772_v60  ;;  %v8119_v52 = vadd.f32 %v18398_v13, %v7978_v25  ;;  %v7774_v55 = vpop.f32.mrb[101].mxu0  ;;  %v7980_v2 = vpop.f32.mrb[101].mxu1  ;;  %v8229_v59 = vpack.c.bf16 %v8209_v38, %v8205_v6  ;;  %v18446_v18 = vpack.c.bf16 %v8211_v21, %v8207_v46 }
 0x7f4   :  { %v18448_v34 = vpack.c.bf16 %v8212_v56, %v8208_v51  ;;  %v8118_v29 = vadd.f32 %v18401_v28, %v7774_v55  ;;  %v8120_v37 = vadd.f32 %v18404_v40, %v7980_v2  ;;  %v7776_v23 = vpop.f32.mrb[102].mxu0  ;;  %v7982_v61 = vpop.f32.mrb[102].mxu1  ;;  %8667 = vmatpush1.bf16.msra.mxu0 %v15765_v17  ;;  %9145 = vmatpush1.bf16.msra.mxu1 %v15768_v14 }
 0x7f5   :  { %v8121_v58 = vadd.f32 %v18395_v15, %v7776_v23  ;;  %v8123_v39 = vadd.f32 %v18398_v13, %v7982_v61  ;;  %v7778_v53 = vpop.f32.mrb[103].mxu0  ;;  %v7984_v6 = vpop.f32.mrb[103].mxu1  ;;  %8668 = vmatprep.subr.bf16.mxu0 %v15773_v33  ;;  %9146 = vmatprep.subr.bf16.mxu1 %v15776_v16  ;;  %v8173_v46 = vmax.f32 %v8117_v63, 0.0  ;;  %v8175_v44 = vmax.f32 %v8119_v52, 0.0  ;;  %v15783_v33 = vld [vmem:[#allocation16 + $0x160] ss:$8 sps:$4 sm:$0xff]  }
 0x7f6   :  { %v8122_v51 = vadd.f32 %v18401_v28, %v7778_v53  ;;  %v8124_v36 = vadd.f32 %v18404_v40, %v7984_v6  ;;  %v8230_v49 = vpack.c.bf16 %v8210_v4, %v18434_v47  ;;  %v8174_v24 = vmax.f32 %v8118_v29, 0.0  ;;  %v15786_v16 = vld [vmem:[#allocation18 + $0x160] ss:$8 sps:$4 sm:$0xff]   ;;  %v15791_v63 = vld [vmem:[#allocation16 + $0x174] ss:$8 sps:$4 sm:$0xff]  }
 0x7f7   :  { %v8177_v3 = vmax.f32 %v8121_v58, 0.0  ;;  %v8179_v41 = vmax.f32 %v8123_v39, 0.0  ;;  %v8176_v32 = vmax.f32 %v8120_v37, 0.0  ;;  %v15794_v52 = vld [vmem:[#allocation18 + $0x174] ss:$8 sps:$4 sm:$0xff]  }
 0x7f8   :  { %v8178_v5 = vmax.f32 %v8122_v51, 0.0  ;;  %v8180_v7 = vmax.f32 %v8124_v36, 0.0  ;;  %8669 = vmatpush1.bf16.msra.mxu0 %v15771_v8  ;;  %9147 = vmatpush1.bf16.msra.mxu1 %v15774_v42  ;;  %v15789_v61 = vld [vmem:[#allocation16 + $0x170] ss:$8 sps:$4 sm:$0xff]   ;;  %v15797_v51 = vld [vmem:[#allocation16 + $0x184] ss:$8 sps:$4 sm:$0xff]  }
 0x7f9   :  { %v8213_v45 = vmax.f32 %v8173_v46, %v8177_v3  ;;  %v8215_v48 = vmax.f32 %v8175_v44, %v8179_v41  ;;  %8631 = vmatprep.mubr.bf16.mxu0 %v8230_v49  ;;  %9109 = vmatprep.mubr.bf16.mxu1 %v8230_v49  ;;  %v15792_v53 = vld [vmem:[#allocation18 + $0x170] ss:$8 sps:$4 sm:$0xff]   ;;  %v15800_v36 = vld [vmem:[#allocation18 + $0x184] ss:$8 sps:$4 sm:$0xff]  }
 0x7fa   :  { %v18457_v43 = vmax.f32 %v8174_v24, %v8178_v5  ;;  %v8216_v27 = vmax.f32 %v8176_v32, %v8180_v7  ;;  %8632 = vmatmul.mubr.bf16.gmra.mrb[116].mxu0 %v8229_v59  ;;  %9110 = vmatmul.mubr.bf16.gmra.mrb[116].mxu1 %v8229_v59  ;;  %v7782_v47 = vpop.f32.mrb[104].mxu0  ;;  %v7988_v9 = vpop.f32.mrb[104].mxu1 }
 0x7fb   :  { %v8125_v17 = vadd.f32 %v18395_v15, %v7782_v47  ;;  %v8127_v30 = vadd.f32 %v18398_v13, %v7988_v9  ;;  %v7784_v62 = vpop.f32.mrb[105].mxu0  ;;  %v7990_v31 = vpop.f32.mrb[105].mxu1  ;;  %8670 = vmatprep.subr.bf16.mxu0 %v15779_v26  ;;  %9148 = vmatprep.subr.bf16.mxu1 %v15782_v1  ;;  %v15795_v9 = vld [vmem:[#allocation16 + $0x180] ss:$8 sps:$4 sm:$0xff]  }
 0x7fc   :  { %v8126_v10 = vadd.f32 %v18401_v28, %v7784_v62  ;;  %v8128_v14 = vadd.f32 %v18404_v40, %v7990_v31  ;;  %v7786_v38 = vpop.f32.mrb[106].mxu0  ;;  %v7992_v21 = vpop.f32.mrb[106].mxu1  ;;  %8671 = vmatpush1.bf16.msra.mxu0 %v15777_v0  ;;  %9149 = vmatpush1.bf16.msra.mxu1 %v15780_v57 }
 0x7fd   :  { %v8129_v4 = vadd.f32 %v18395_v15, %v7786_v38  ;;  %v8131_v56 = vadd.f32 %v18398_v13, %v7992_v21  ;;  %v7788_v60 = vpop.f32.mrb[107].mxu0  ;;  %v7994_v25 = vpop.f32.mrb[107].mxu1  ;;  %8672 = vmatprep.subr.bf16.mxu0 %v15785_v11  ;;  %9150 = vmatprep.subr.bf16.mxu1 %v15788_v35  ;;  %v8181_v59 = vmax.f32 %v8125_v17, 0.0  ;;  %v8183_v29 = vmax.f32 %v8127_v30, 0.0  ;;  %v15798_v17 = vld [vmem:[#allocation18 + $0x180] ss:$8 sps:$4 sm:$0xff]  }
 0x7fe   :  { %v8130_v55 = vadd.f32 %v18401_v28, %v7788_v60  ;;  %v8132_v2 = vadd.f32 %v18404_v40, %v7994_v25  ;;  %v8182_v8 = vmax.f32 %v8126_v10, 0.0  ;;  %v8184_v42 = vmax.f32 %v8128_v14, 0.0  ;;  %v15801_v14 = vld [vmem:[#allocation16 + $0x190] ss:$8 sps:$4 sm:$0xff]   ;;  %v15803_v38 = vld [vmem:[#allocation16 + $0x194] ss:$8 sps:$4 sm:$0xff]  }
 0x7ff   :  { %v8185_v37 = vmax.f32 %v8129_v4, 0.0  ;;  %v8187_v23 = vmax.f32 %v8131_v56, 0.0  ;;  %v15806_v56 = vld [vmem:[#allocation18 + $0x194] ss:$8 sps:$4 sm:$0xff]  }
 0x800   :  { %v8186_v58 = vmax.f32 %v8130_v55, 0.0  ;;  %v8188_v39 = vmax.f32 %v8132_v2, 0.0  ;;  %8673 = vmatpush1.bf16.msra.mxu0 %v15783_v33  ;;  %9151 = vmatpush1.bf16.msra.mxu1 %v15786_v16 }
 0x801   :  { %v8217_v6 = vmax.f32 %v8181_v59, %v8185_v37  ;;  %v8219_v46 = vmax.f32 %v8183_v29, %v8187_v23  ;;  %8674 = vmatprep.subr.bf16.mxu0 %v15791_v63  ;;  %9152 = vmatprep.subr.bf16.mxu1 %v15794_v52  ;;  %v15804_v63 = vld [vmem:[#allocation18 + $0x190] ss:$8 sps:$4 sm:$0xff]   ;;  %v15807_v29 = vld [vmem:[#allocation16 + $0x1a0] ss:$8 sps:$4 sm:$0xff]   ;;  %v15815_v23 = vld [vmem:[#allocation16 + $0x1b4] ss:$8 sps:$4 sm:$0xff]  }
 0x802   :  { %v8218_v26 = vmax.f32 %v8182_v8, %v8186_v58  ;;  %v8220_v1 = vmax.f32 %v8184_v42, %v8188_v39  ;;  %v7792_v44 = vpop.f32.mrb[108].mxu0  ;;  %v7998_v3 = vpop.f32.mrb[108].mxu1  ;;  %v15810_v37 = vld [vmem:[#allocation18 + $0x1a0] ss:$8 sps:$4 sm:$0xff]   ;;  %v15813_v42 = vld [vmem:[#allocation16 + $0x1b0] ss:$8 sps:$4 sm:$0xff]  }
 0x803   :  { %v8133_v41 = vadd.f32 %v18395_v15, %v7792_v44  ;;  %v8135_v49 = vadd.f32 %v18398_v13, %v7998_v3  ;;  %v7794_v0 = vpop.f32.mrb[109].mxu0  ;;  %v8000_v24 = vpop.f32.mrb[109].mxu1  ;;  %v8233_v32 = vpack.c.bf16 %v8217_v6, %v8213_v45  ;;  %v18469_v5 = vpack.c.bf16 %v8219_v46, %v8215_v48  ;;  %v15816_v58 = vld [vmem:[#allocation18 + $0x1b0] ss:$8 sps:$4 sm:$0xff]   ;;  %v15821_v39 = vld [vmem:[#allocation19 + $0x1c4] ss:$16 sps:$4 sm:$0xff]  }
 0x804   :  { %v18471_v7 = vpack.c.bf16 %v8220_v1, %v8216_v27  ;;  %v8134_v57 = vadd.f32 %v18401_v28, %v7794_v0  ;;  %v8136_v11 = vadd.f32 %v18404_v40, %v8000_v24  ;;  %v7796_v35 = vpop.f32.mrb[110].mxu0  ;;  %v8002_v47 = vpop.f32.mrb[110].mxu1  ;;  %8675 = vmatpush1.bf16.msra.mxu0 %v15789_v61  ;;  %9153 = vmatpush1.bf16.msra.mxu1 %v15792_v53  ;;  %v15818_v61 = vld [vmem:[#allocation18 + $0x1b4] ss:$8 sps:$4 sm:$0xff]   ;;  %v15819_v6 = vld [vmem:[#allocation19 + $0x1c0] ss:$16 sps:$4 sm:$0xff]  }
 0x805   :  { %v8137_v30 = vadd.f32 %v18395_v15, %v7796_v35  ;;  %v8139_v62 = vadd.f32 %v18398_v13, %v8002_v47  ;;  %v7798_v31 = vpop.f32.mrb[111].mxu0  ;;  %v8004_v45 = vpop.f32.mrb[111].mxu1  ;;  %8676 = vmatprep.subr.bf16.mxu0 %v15797_v51  ;;  %9154 = vmatprep.subr.bf16.mxu1 %v15800_v36  ;;  %v8189_v48 = vmax.f32 %v8133_v41, 0.0  ;;  %v8191_v21 = vmax.f32 %v8135_v49, 0.0  ;;  %v15824_v53 = vld [vmem:[#allocation19 + $0x1cc] ss:$16 sps:$4 sm:$0xff]  }
 0x806   :  { %v8138_v27 = vadd.f32 %v18401_v28, %v7798_v31  ;;  %v8140_v10 = vadd.f32 %v18404_v40, %v8004_v45  ;;  %v8234_v4 = vpack.c.bf16 %v8218_v26, %v18457_v43  ;;  %v8190_v15 = vmax.f32 %v8134_v57, 0.0  ;;  %v15809_v28 = vld [vmem:[#allocation16 + $0x1a4] ss:$8 sps:$4 sm:$0xff]   ;;  %v15822_v46 = vld [vmem:[#allocation19 + $0x1c8] ss:$16 sps:$4 sm:$0xff]  }
 0x807   :  { %v8193_v33 = vmax.f32 %v8137_v30, 0.0  ;;  %v8195_v16 = vmax.f32 %v8139_v62, 0.0  ;;  %v8192_v60 = vmax.f32 %v8136_v11, 0.0  ;;  %v15812_v40 = vld [vmem:[#allocation18 + $0x1a4] ss:$8 sps:$4 sm:$0xff]  }
 0x808   :  { %v8194_v13 = vmax.f32 %v8138_v27, 0.0  ;;  %v8196_v25 = vmax.f32 %v8140_v10, 0.0  ;;  %8677 = vmatpush1.bf16.msra.mxu0 %v15795_v9  ;;  %9155 = vmatpush1.bf16.msra.mxu1 %v15798_v17  ;;  %v15827_v51 = vld [vmem:[#allocation19 + $0x1e4] ss:$16 sps:$4 sm:$0xff]   ;;  %v15830_v36 = vld [vmem:[#allocation19 + $0x1ec] ss:$16 sps:$4 sm:$0xff]  }
 0x809   :  { %v8221_v52 = vmax.f32 %v8189_v48, %v8193_v33  ;;  %v18480_v55 = vmax.f32 %v8191_v21, %v8195_v16  ;;  %8641 = vmatprep.mubr.bf16.mxu0 %v8234_v4  ;;  %9119 = vmatprep.mubr.bf16.mxu1 %v8234_v4  ;;  %v15828_v26 = vld [vmem:[#allocation19 + $0x1e8] ss:$16 sps:$4 sm:$0xff]   ;;  %v15833_v1 = vld [vmem:[#allocation19 + $0x204] ss:$16 sps:$4 sm:$0xff]   ;;  %v15836_v44 = vld [vmem:[#allocation19 + $0x20c] ss:$16 sps:$4 sm:$0xff]  }
 0x80a   :  { %v8222_v2 = vmax.f32 %v8190_v15, %v8194_v13  ;;  %v18482_v59 = vmax.f32 %v8192_v60, %v8196_v25  ;;  %8642 = vmatmul.mubr.bf16.gmra.mrb[120].mxu0 %v8233_v32  ;;  %9120 = vmatmul.mubr.bf16.gmra.mrb[120].mxu1 %v8233_v32  ;;  %v15831_v3 = vld [vmem:[#allocation19 + $0x200] ss:$16 sps:$4 sm:$0xff]   ;;  %v15834_v41 = vld [vmem:[#allocation19 + $0x208] ss:$16 sps:$4 sm:$0xff]   ;;  %v15842_v49 = vld [vmem:[#allocation19 + $0x22c] ss:$16 sps:$4 sm:$0xff]  }
 0x80b   :  { %8678 = vmatprep.subr.bf16.mxu0 %v15803_v38  ;;  %9156 = vmatprep.subr.bf16.mxu1 %v15806_v56  ;;  %v8237_v8 = vpack.c.bf16 %v8221_v52, %v8221_v52  ;;  %v15840_v0 = vld [vmem:[#allocation19 + $0x228] ss:$16 sps:$4 sm:$0xff]   ;;  %v15845_v24 = vld [vmem:[#allocation19 + $0x244] ss:$16 sps:$4 sm:$0xff]   ;;  %v15848_v32 = vld [vmem:[#allocation19 + $0x24c] ss:$16 sps:$4 sm:$0xff]   ;;  %v8239_v62 = vpack.c.bf16 %v18480_v55, %v18480_v55 }
 0x80c   :  { %v8238_v43 = vpack.c.bf16 %v8222_v2, %v8222_v2  ;;  %8679 = vmatpush1.bf16.msra.mxu0 %v15801_v14  ;;  %9157 = vmatpush1.bf16.msra.mxu1 %v15804_v63  ;;  %v15843_v57 = vld [vmem:[#allocation19 + $0x240] ss:$16 sps:$4 sm:$0xff]   ;;  %v15846_v11 = vld [vmem:[#allocation19 + $0x248] ss:$16 sps:$4 sm:$0xff]   ;;  %v15851_v35 = vld [vmem:[#allocation19 + $0x264] ss:$16 sps:$4 sm:$0xff]  }
 0x80d   :  { %8680 = vmatprep.subr.bf16.mxu0 %v15809_v28  ;;  %9158 = vmatprep.subr.bf16.mxu1 %v15812_v40  ;;  %v15854_v47 = vld [vmem:[#allocation19 + $0x26c] ss:$16 sps:$4 sm:$0xff]   ;;  %v15852_v9 = vld [vmem:[#allocation19 + $0x268] ss:$16 sps:$4 sm:$0xff]   ;;  %v15857_v17 = vld [vmem:[#allocation19 + $0x284] ss:$16 sps:$4 sm:$0xff]  }
 0x80e   :  { %8651 = vmatprep.mubr.bf16.mxu0 %v8238_v43  ;;  %9129 = vmatprep.mubr.bf16.mxu1 %v8238_v43  ;;  %v15860_v30 = vld [vmem:[#allocation19 + $0x28c] ss:$16 sps:$4 sm:$0xff]   ;;  %v15855_v31 = vld [vmem:[#allocation19 + $0x280] ss:$16 sps:$4 sm:$0xff]   ;;  %v15858_v45 = vld [vmem:[#allocation19 + $0x288] ss:$16 sps:$4 sm:$0xff]  }
 0x80f   :  { %v15866_v48 = vld [vmem:[#allocation19 + $0x2ac] ss:$16 sps:$4 sm:$0xff]   ;;  %v15861_v27 = vld [vmem:[#allocation19 + $0x2a0] ss:$16 sps:$4 sm:$0xff]   ;;  %v15864_v10 = vld [vmem:[#allocation19 + $0x2a8] ss:$16 sps:$4 sm:$0xff]  }
 0x810   :  { %8681 = vmatpush1.bf16.msra.mxu0 %v15807_v29  ;;  %9159 = vmatpush1.bf16.msra.mxu1 %v15810_v37  ;;  %v15869_v14 = vld [vmem:[#allocation19 + $0x2c4] ss:$16 sps:$4 sm:$0xff]   ;;  %v15872_v38 = vld [vmem:[#allocation19 + $0x2cc] ss:$16 sps:$4 sm:$0xff]   ;;  %v15867_v21 = vld [vmem:[#allocation19 + $0x2c0] ss:$16 sps:$4 sm:$0xff]  }
 0x811   :  { %8682 = vmatprep.subr.bf16.mxu0 %v15815_v23  ;;  %9160 = vmatprep.subr.bf16.mxu1 %v15818_v61  ;;  %v15870_v33 = vld [vmem:[#allocation19 + $0x2c8] ss:$16 sps:$4 sm:$0xff]   ;;  %v15875_v16 = vld [vmem:[#allocation19 + $0x2e4] ss:$16 sps:$4 sm:$0xff]   ;;  %v15878_v4 = vld [vmem:[#allocation19 + $0x2ec] ss:$16 sps:$4 sm:$0xff]  }
 0x812   :  { %8652 = vmatmul.mubr.bf16.gmra.mrb[124].mxu0 %v8237_v8  ;;  %9130 = vmatmul.mubr.bf16.gmra.mrb[124].mxu1 %v8237_v8  ;;  %v15873_v56 = vld [vmem:[#allocation19 + $0x2e0] ss:$16 sps:$4 sm:$0xff]   ;;  %v15876_v15 = vld [vmem:[#allocation19 + $0x2e8] ss:$16 sps:$4 sm:$0xff]   ;;  %v15881_v60 = vld [vmem:[#allocation19 + $0x304] ss:$16 sps:$4 sm:$0xff]  }
 0x813   :  { %13440 = vmatprep.mubr.msk.bf16.mxu0 %vm986_vm4, %v18426_v20  ;;  %13500 = vmatprep.mubr.msk.bf16.mxu1 %vm986_vm4, %v18426_v20  ;;  %v15825_v20 = vld [vmem:[#allocation19 + $0x1e0] ss:$16 sps:$4 sm:$0xff]   ;;  %v15884_v13 = vld [vmem:[#allocation19 + $0x30c] ss:$16 sps:$4 sm:$0xff]   ;;  %v15882_v63 = vld [vmem:[#allocation19 + $0x308] ss:$16 sps:$4 sm:$0xff]  }
 0x814   :  { %8683 = vmatpush1.bf16.msra.mxu0 %v15813_v42  ;;  %9161 = vmatpush1.bf16.msra.mxu1 %v15816_v58  ;;  %v15879_v25 = vld [vmem:[#allocation19 + $0x300] ss:$16 sps:$4 sm:$0xff]   ;;  %v15887_v52 = vld [vmem:[#allocation19 + $0x324] ss:$16 sps:$4 sm:$0xff]   ;;  %v15890_v55 = vld [vmem:[#allocation19 + $0x32c] ss:$16 sps:$4 sm:$0xff]  }
 0x815   :  { %9652 = vmatprep.subr.bf16.mxu0 %v15821_v39  ;;  %9693 = vmatprep.subr.bf16.mxu1 %v15824_v53  ;;  %v15885_v28 = vld [vmem:[#allocation19 + $0x320] ss:$16 sps:$4 sm:$0xff]   ;;  %v15888_v40 = vld [vmem:[#allocation19 + $0x328] ss:$16 sps:$4 sm:$0xff]   ;;  %v15893_v2 = vld [vmem:[#allocation19 + $0x344] ss:$16 sps:$4 sm:$0xff]  }
 0x816   :  { %v15891_v43 = vld [vmem:[#allocation19 + $0x340] ss:$16 sps:$4 sm:$0xff]   ;;  %v15894_v29 = vld [vmem:[#allocation19 + $0x348] ss:$16 sps:$4 sm:$0xff]   ;;  %v15899_v37 = vld [vmem:[#allocation19 + $0x364] ss:$16 sps:$4 sm:$0xff]  }
 0x817   :  { %v15902_v23 = vld [vmem:[#allocation19 + $0x36c] ss:$16 sps:$4 sm:$0xff]   ;;  %v15897_v61 = vld [vmem:[#allocation19 + $0x360] ss:$16 sps:$4 sm:$0xff]   ;;  %v15900_v8 = vld [vmem:[#allocation19 + $0x368] ss:$16 sps:$4 sm:$0xff]  }
 0x818   :  { %v15905_v42 = vld [vmem:[#allocation19 + $0x4] ss:$16 sps:$4 sm:$0xff]   ;;  %v15908_v58 = vld [vmem:[#allocation19 + $0xc] ss:$16 sps:$4 sm:$0xff]  }
 0x81a   :  { %8693 = vmatmul.mubr.bf16.vlgmr.msra.gmra.mrb[112].mxu0 %v18422_v54  ;;  %9171 = vmatmul.mubr.bf16.vlgmr.msra.gmra.mrb[112].mxu1 %v18422_v54  ;;  %v15839_v54 = vld [vmem:[#allocation19 + $0x224] ss:$16 sps:$4 sm:$0xff]  }
 0x81b   :  { %13441 = vmatprep.mubr.msk.bf16.mxu0 %vm986_vm4, %v18448_v34  ;;  %13501 = vmatprep.mubr.msk.bf16.mxu1 %vm986_vm4, %v18448_v34  ;;  %v15837_v34 = vld [vmem:[#allocation19 + $0x220] ss:$16 sps:$4 sm:$0xff]  }
 0x81c   :  { %9653 = vmatpush1.bf16.msra.mxu0 %v15819_v6  ;;  %9694 = vmatpush1.bf16.msra.mxu1 %v15822_v46 }
 0x81d   :  { %9654 = vmatprep.subr.bf16.mxu0 %v15827_v51  ;;  %9695 = vmatprep.subr.bf16.mxu1 %v15830_v36 }
 0x820   :  { %9655 = vmatpush1.bf16.msra.mxu0 %v15825_v20  ;;  %9696 = vmatpush1.bf16.msra.mxu1 %v15828_v26 }
 0x821   :  { %9656 = vmatprep.subr.bf16.mxu0 %v15833_v1  ;;  %9697 = vmatprep.subr.bf16.mxu1 %v15836_v44 }
 0x822   :  { %8703 = vmatmul.mubr.bf16.gmra.mrb[116].mxu0 %v18446_v18  ;;  %9181 = vmatmul.mubr.bf16.gmra.mrb[116].mxu1 %v18446_v18  ;;  %v8240_v18 = vpack.c.bf16 %v18482_v59, %v18482_v59  ;;  %v15896_v59 = vld [vmem:[#allocation19 + $0x34c] ss:$16 sps:$4 sm:$0xff]  }
 0x823   :  { %13442 = vmatprep.mubr.msk.bf16.mxu0 %vm986_vm4, %v18471_v7  ;;  %13502 = vmatprep.mubr.msk.bf16.mxu1 %vm986_vm4, %v18471_v7  ;;  %v15849_v7 = vld [vmem:[#allocation19 + $0x260] ss:$16 sps:$4 sm:$0xff]  }
 0x824   :  { %9657 = vmatpush1.bf16.msra.mxu0 %v15831_v3  ;;  %9698 = vmatpush1.bf16.msra.mxu1 %v15834_v41 }
 0x825   :  { %9658 = vmatprep.subr.bf16.mxu0 %v15839_v54  ;;  %9699 = vmatprep.subr.bf16.mxu1 %v15842_v49  ;;  %v15903_v49 = vld [vmem:[#allocation19] ss:$16 sps:$4 sm:$0xff]  }
 0x828   :  { %9659 = vmatpush1.bf16.msra.mxu0 %v15837_v34  ;;  %9700 = vmatpush1.bf16.msra.mxu1 %v15840_v0  ;;  %v15906_v34 = vld [vmem:[#allocation19 + $0x8] ss:$16 sps:$4 sm:$0xff]  }
 0x829   :  { %9660 = vmatprep.subr.bf16.mxu0 %v15845_v24  ;;  %9701 = vmatprep.subr.bf16.mxu1 %v15848_v32 }
 0x82a   :  { %8713 = vmatmul.mubr.bf16.gmra.mrb[120].mxu0 %v18469_v5  ;;  %9191 = vmatmul.mubr.bf16.gmra.mrb[120].mxu1 %v18469_v5  ;;  %v15863_v5 = vld [vmem:[#allocation19 + $0x2a4] ss:$16 sps:$4 sm:$0xff]  }
 0x82b   :  { %13443 = vmatprep.mubr.msk.bf16.mxu0 %vm986_vm4, %v8240_v18  ;;  %13503 = vmatprep.mubr.msk.bf16.mxu1 %vm986_vm4, %v8240_v18 }
 0x82c   :  { %9661 = vmatpush1.bf16.msra.mxu0 %v15843_v57  ;;  %9702 = vmatpush1.bf16.msra.mxu1 %v15846_v11  ;;  %v15911_v57 = vld [vmem:[#allocation19 + $0x24] ss:$16 sps:$4 sm:$0xff]   ;;  %v15914_v11 = vld [vmem:[#allocation19 + $0x2c] ss:$16 sps:$4 sm:$0xff]  }
 0x82d   :  { %9662 = vmatprep.subr.bf16.mxu0 %v15851_v35  ;;  %9703 = vmatprep.subr.bf16.mxu1 %v15854_v47 }
 0x830   :  { %9663 = vmatpush1.bf16.msra.mxu0 %v15849_v7  ;;  %9704 = vmatpush1.bf16.msra.mxu1 %v15852_v9 }
 0x831   :  { %9664 = vmatprep.subr.bf16.mxu0 %v15857_v17  ;;  %9705 = vmatprep.subr.bf16.mxu1 %v15860_v30 }
 0x832   :  { %8723 = vmatmul.mubr.bf16.gmra.mrb[124].mxu0 %v8239_v62  ;;  %9201 = vmatmul.mubr.bf16.gmra.mrb[124].mxu1 %v8239_v62  ;;  %v15909_v62 = vld [vmem:[#allocation19 + $0x20] ss:$16 sps:$4 sm:$0xff]  }
 0x834   :  { %9665 = vmatpush1.bf16.msra.mxu0 %v15855_v31  ;;  %9706 = vmatpush1.bf16.msra.mxu1 %v15858_v45  ;;  %v15912_v31 = vld [vmem:[#allocation19 + $0x28] ss:$16 sps:$4 sm:$0xff]  }
 0x835   :  { %9666 = vmatprep.subr.bf16.mxu0 %v15863_v5  ;;  %9707 = vmatprep.subr.bf16.mxu1 %v15866_v48 }
 0x838   :  { %9667 = vmatpush1.bf16.msra.mxu0 %v15861_v27  ;;  %9708 = vmatpush1.bf16.msra.mxu1 %v15864_v10  ;;  %v15917_v27 = vld [vmem:[#allocation19 + $0x44] ss:$16 sps:$4 sm:$0xff]   ;;  %v15920_v10 = vld [vmem:[#allocation19 + $0x4c] ss:$16 sps:$4 sm:$0xff]  }
 0x839   :  { %9668 = vmatprep.subr.bf16.mxu0 %v15869_v14  ;;  %9709 = vmatprep.subr.bf16.mxu1 %v15872_v38  ;;  %v15915_v38 = vld [vmem:[#allocation19 + $0x40] ss:$16 sps:$4 sm:$0xff]  }
 0x83c   :  { %9669 = vmatpush1.bf16.msra.mxu0 %v15867_v21  ;;  %9710 = vmatpush1.bf16.msra.mxu1 %v15870_v33  ;;  %v15918_v21 = vld [vmem:[#allocation19 + $0x48] ss:$16 sps:$4 sm:$0xff]   ;;  %v15923_v33 = vld [vmem:[#allocation19 + $0x64] ss:$16 sps:$4 sm:$0xff]  }
 0x83d   :  { %9670 = vmatprep.subr.bf16.mxu0 %v15875_v16  ;;  %9711 = vmatprep.subr.bf16.mxu1 %v15878_v4  ;;  %v15926_v16 = vld [vmem:[#allocation19 + $0x6c] ss:$16 sps:$4 sm:$0xff]  }
 0x840   :  { %9671 = vmatpush1.bf16.msra.mxu0 %v15873_v56  ;;  %9712 = vmatpush1.bf16.msra.mxu1 %v15876_v15 }
 0x841   :  { %9672 = vmatprep.subr.bf16.mxu0 %v15881_v60  ;;  %9713 = vmatprep.subr.bf16.mxu1 %v15884_v13 }
 0x844   :  { %9673 = vmatpush1.bf16.msra.mxu0 %v15879_v25  ;;  %9714 = vmatpush1.bf16.msra.mxu1 %v15882_v63 }
 0x845   :  { %9674 = vmatprep.subr.bf16.mxu0 %v15887_v52  ;;  %9715 = vmatprep.subr.bf16.mxu1 %v15890_v55  ;;  %v15921_v55 = vld [vmem:[#allocation19 + $0x60] ss:$16 sps:$4 sm:$0xff]  }
 0x848   :  { %9675 = vmatpush1.bf16.msra.mxu0 %v15885_v28  ;;  %9716 = vmatpush1.bf16.msra.mxu1 %v15888_v40  ;;  %v15924_v28 = vld [vmem:[#allocation19 + $0x68] ss:$16 sps:$4 sm:$0xff]  }
 0x849   :  { %9676 = vmatprep.subr.bf16.mxu0 %v15893_v2  ;;  %9717 = vmatprep.subr.bf16.mxu1 %v15896_v59 }
 0x84c   :  { %9677 = vmatpush1.bf16.msra.mxu0 %v15891_v43  ;;  %9718 = vmatpush1.bf16.msra.mxu1 %v15894_v29  ;;  %v15929_v43 = vld [vmem:[#allocation19 + $0x84] ss:$16 sps:$4 sm:$0xff]   ;;  %v15932_v29 = vld [vmem:[#allocation19 + $0x8c] ss:$16 sps:$4 sm:$0xff]  }
 0x84d   :  { %9678 = vmatprep.subr.bf16.mxu0 %v15899_v37  ;;  %9719 = vmatprep.subr.bf16.mxu1 %v15902_v23  ;;  %v15927_v23 = vld [vmem:[#allocation19 + $0x80] ss:$16 sps:$4 sm:$0xff]  }
 0x850   :  { %9679 = vmatpush1.bf16.msra.mxu0 %v15897_v61  ;;  %9720 = vmatpush1.bf16.msra.mxu1 %v15900_v8  ;;  %v15930_v61 = vld [vmem:[#allocation19 + $0x88] ss:$16 sps:$4 sm:$0xff]   ;;  %v15935_v8 = vld [vmem:[#allocation19 + $0xa4] ss:$16 sps:$4 sm:$0xff]  }
 0x851   :  { %10020 = vmatprep.subr.bf16.mxu0 %v15905_v42  ;;  %10061 = vmatprep.subr.bf16.mxu1 %v15908_v58  ;;  %v15938_v42 = vld [vmem:[#allocation19 + $0xac] ss:$16 sps:$4 sm:$0xff]  }
 0x8ed   :  { %v8694_v39 = vpop.f32.mrb[112].mxu0  ;;  %v9172_v53 = vpop.f32.mrb[112].mxu1 }
 0x8ee   :  { %v18508_v6 = vmax.f32 %v8694_v39, %v9172_v53  ;;  %v8696_v46 = vpop.f32.mrb[113].mxu0  ;;  %v9174_v51 = vpop.f32.mrb[113].mxu1 }
 0x8ef   :  { %v9210_v36 = vmax.f32 %v8696_v46, %v9174_v51  ;;  %v8698_v20 = vpop.f32.mrb[114].mxu0  ;;  %v9176_v26 = vpop.f32.mrb[114].mxu1 }
 0x8f0   :  { %v9211_v1 = vmax.f32 %v8698_v20, %v9176_v26  ;;  %v8700_v44 = vpop.f32.mrb[115].mxu0  ;;  %v9178_v3 = vpop.f32.mrb[115].mxu1 }
 0x8f1   :  { %v9212_v41 = vmax.f32 %v8700_v44, %v9178_v3  ;;  %v13969_v18 = vpack.c.bf16 %v9210_v36, %v9210_v36  ;;  %v15936_v44 = vld [vmem:[#allocation19 + $0xa8] ss:$16 sps:$4 sm:$0xff]  }
 0x8f2   :  { %v13966_v0 = vpack.c.bf16 %v9211_v1, %v9211_v1  ;;  %v15933_v1 = vld [vmem:[#allocation19 + $0xa0] ss:$16 sps:$4 sm:$0xff]  }
 0x8f3   :  { %v13967_v54 = vpack.c.bf16 %v9212_v41, %v9212_v41 }
 0x8f5   :  { %v8704_v24 = vpop.f32.mrb[116].mxu0  ;;  %v9182_v32 = vpop.f32.mrb[116].mxu1  ;;  %13562 = vmatprep.mubr.msk.bf16.mxu0 %vm1015_vm5, %v13967_v54  ;;  %13563 = vmatprep.mubr.msk.bf16.mxu1 %vm1015_vm5, %v13967_v54  ;;  %v15941_v54 = vld [vmem:[#allocation19 + $0xc4] ss:$16 sps:$4 sm:$0xff]  }
 0x8f6   :  { %v18512_v35 = vmax.f32 %v8704_v24, %v9182_v32  ;;  %v8706_v47 = vpop.f32.mrb[117].mxu0  ;;  %v9184_v7 = vpop.f32.mrb[117].mxu1  ;;  %9685 = vmatmul.mubr.bf16.vlgmr.msra.gmra.mrb[128].mxu0 %v13966_v0  ;;  %9726 = vmatmul.mubr.bf16.vlgmr.msra.gmra.mrb[128].mxu1 %v13966_v0  ;;  %v15942_v0 = vld [vmem:[#allocation19 + $0xc8] ss:$16 sps:$4 sm:$0xff]   ;;  %v15947_v24 = vld [vmem:[#allocation19 + $0xe4] ss:$16 sps:$4 sm:$0xff]  }
 0x8f7   :  { %v18514_v9 = vmax.f32 %v8706_v47, %v9184_v7  ;;  %10021 = vmatpush1.bf16.msra.mxu0 %v15903_v49  ;;  %10062 = vmatpush1.bf16.msra.mxu1 %v15906_v34  ;;  %v8708_v17 = vpop.f32.mrb[118].mxu0  ;;  %v9186_v30 = vpop.f32.mrb[118].mxu1  ;;  %v15944_v49 = vld [vmem:[#allocation19 + $0xcc] ss:$16 sps:$4 sm:$0xff]   ;;  %v15939_v34 = vld [vmem:[#allocation19 + $0xc0] ss:$16 sps:$4 sm:$0xff]  }
 0x8f8   :  { %v18516_v45 = vmax.f32 %v8708_v17, %v9186_v30  ;;  %13622 = vmatprep.mubr.msk.bf16.mxu0 %vm1015_vm5, %v13969_v18  ;;  %13623 = vmatprep.mubr.msk.bf16.mxu1 %vm1015_vm5, %v13969_v18  ;;  %v8710_v5 = vpop.f32.mrb[119].mxu0  ;;  %v9188_v48 = vpop.f32.mrb[119].mxu1  ;;  %v15950_v32 = vld [vmem:[#allocation19 + $0xec] ss:$16 sps:$4 sm:$0xff]   ;;  %v15953_v18 = vld [vmem:[#allocation19 + $0x104] ss:$16 sps:$4 sm:$0xff]  }
 0x8f9   :  { %v18520_v14 = vmax.f32 %v8710_v5, %v9188_v48  ;;  %10022 = vmatprep.subr.bf16.mxu0 %v15911_v57  ;;  %10063 = vmatprep.subr.bf16.mxu1 %v15914_v11  ;;  %v15945_v57 = vld [vmem:[#allocation19 + $0xe0] ss:$16 sps:$4 sm:$0xff]   ;;  %v15948_v11 = vld [vmem:[#allocation19 + $0xe8] ss:$16 sps:$4 sm:$0xff]   ;;  %v15956_v47 = vld [vmem:[#allocation19 + $0x10c] ss:$16 sps:$4 sm:$0xff]  }
 0x8fa   :  { %v15951_v7 = vld [vmem:[#allocation19 + $0x100] ss:$16 sps:$4 sm:$0xff]   ;;  %v15954_v17 = vld [vmem:[#allocation19 + $0x108] ss:$16 sps:$4 sm:$0xff]   ;;  %v15959_v30 = vld [vmem:[#allocation19 + $0x124] ss:$16 sps:$4 sm:$0xff]  }
 0x8fb   :  { %10023 = vmatpush1.bf16.msra.mxu0 %v15909_v62  ;;  %10064 = vmatpush1.bf16.msra.mxu1 %v15912_v31  ;;  %v15962_v62 = vld [vmem:[#allocation19 + $0x12c] ss:$16 sps:$4 sm:$0xff]   ;;  %v15957_v31 = vld [vmem:[#allocation19 + $0x120] ss:$16 sps:$4 sm:$0xff]   ;;  %v15960_v5 = vld [vmem:[#allocation19 + $0x128] ss:$16 sps:$4 sm:$0xff]  }
 0x8fc   :  { %10024 = vmatprep.subr.bf16.mxu0 %v15917_v27  ;;  %10065 = vmatprep.subr.bf16.mxu1 %v15920_v10  ;;  %v15965_v48 = vld [vmem:[#allocation19 + $0x144] ss:$16 sps:$4 sm:$0xff]   ;;  %v15968_v27 = vld [vmem:[#allocation19 + $0x14c] ss:$16 sps:$4 sm:$0xff]   ;;  %v15963_v10 = vld [vmem:[#allocation19 + $0x140] ss:$16 sps:$4 sm:$0xff]  }
 0x8fd   :  { %v8714_v4 = vpop.f32.mrb[120].mxu0  ;;  %v9192_v56 = vpop.f32.mrb[120].mxu1 }
 0x8fe   :  { %v18522_v15 = vmax.f32 %v8714_v4, %v9192_v56  ;;  %v8716_v60 = vpop.f32.mrb[121].mxu0  ;;  %v9194_v13 = vpop.f32.mrb[121].mxu1  ;;  %v15972_v4 = vld [vmem:[#allocation19 + $0x168] ss:$16 sps:$4 sm:$0xff]   ;;  %v15977_v56 = vld [vmem:[#allocation19 + $0x184] ss:$16 sps:$4 sm:$0xff]  }
 0x8ff   :  { %v18524_v25 = vmax.f32 %v8716_v60, %v9194_v13  ;;  %10025 = vmatpush1.bf16.msra.mxu0 %v15915_v38  ;;  %10066 = vmatpush1.bf16.msra.mxu1 %v15918_v21  ;;  %v8718_v63 = vpop.f32.mrb[122].mxu0  ;;  %v9196_v52 = vpop.f32.mrb[122].mxu1  ;;  %v15966_v38 = vld [vmem:[#allocation19 + $0x148] ss:$16 sps:$4 sm:$0xff]   ;;  %v15971_v21 = vld [vmem:[#allocation19 + $0x164] ss:$16 sps:$4 sm:$0xff]  }
 0x900   :  { %v18526_v40 = vmax.f32 %v8718_v63, %v9196_v52  ;;  %v8720_v2 = vpop.f32.mrb[123].mxu0  ;;  %v9198_v59 = vpop.f32.mrb[123].mxu1  ;;  %10026 = vmatprep.subr.bf16.mxu0 %v15923_v33  ;;  %10067 = vmatprep.subr.bf16.mxu1 %v15926_v16  ;;  %v15974_v33 = vld [vmem:[#allocation19 + $0x16c] ss:$16 sps:$4 sm:$0xff]   ;;  %v15969_v16 = vld [vmem:[#allocation19 + $0x160] ss:$16 sps:$4 sm:$0xff]  }
 0x901   :  { %v18528_v37 = vmax.f32 %v8720_v2, %v9198_v59  ;;  %v15980_v60 = vld [vmem:[#allocation19 + $0x18c] ss:$16 sps:$4 sm:$0xff]   ;;  %v15975_v13 = vld [vmem:[#allocation19 + $0x180] ss:$16 sps:$4 sm:$0xff]   ;;  %v15978_v63 = vld [vmem:[#allocation19 + $0x188] ss:$16 sps:$4 sm:$0xff]  }
 0x902   :  { %v15983_v52 = vld [vmem:[#allocation19 + $0x1a4] ss:$16 sps:$4 sm:$0xff]   ;;  %v15984_v2 = vld [vmem:[#allocation19 + $0x1a8] ss:$16 sps:$4 sm:$0xff]  }
 0x903   :  { %10027 = vmatpush1.bf16.msra.mxu0 %v15921_v55  ;;  %10068 = vmatpush1.bf16.msra.mxu1 %v15924_v28  ;;  %v15986_v55 = vld [vmem:[#allocation19 + $0x1ac] ss:$16 sps:$4 sm:$0xff]   ;;  %v15981_v28 = vld [vmem:[#allocation19 + $0x1a0] ss:$16 sps:$4 sm:$0xff]   ;;  %v15989_v59 = vld [vmem:[#allocation19 + $0x384] ss:$16 sps:$4 sm:$0xff]  }
 0x904   :  { %10028 = vmatprep.subr.bf16.mxu0 %v15929_v43  ;;  %10069 = vmatprep.subr.bf16.mxu1 %v15932_v29  ;;  %v15992_v43 = vld [vmem:[#allocation19 + $0x38c] ss:$16 sps:$4 sm:$0xff]   ;;  %v15987_v29 = vld [vmem:[#allocation19 + $0x380] ss:$16 sps:$4 sm:$0xff]  }
 0x905   :  { %v8724_v58 = vpop.f32.mrb[124].mxu0  ;;  %v9202_v39 = vpop.f32.mrb[124].mxu1 }
 0x906   :  { %v18530_v53 = vmax.f32 %v8724_v58, %v9202_v39  ;;  %v8726_v46 = vpop.f32.mrb[125].mxu0  ;;  %v9204_v51 = vpop.f32.mrb[125].mxu1  ;;  %v15998_v58 = vld [vmem:[#allocation19 + $0x3ac] ss:$16 sps:$4 sm:$0xff]   ;;  %v15993_v39 = vld [vmem:[#allocation19 + $0x3a0] ss:$16 sps:$4 sm:$0xff]  }
 0x907   :  { %v18532_v36 = vmax.f32 %v8726_v46, %v9204_v51  ;;  %10029 = vmatpush1.bf16.msra.mxu0 %v15927_v23  ;;  %10070 = vmatpush1.bf16.msra.mxu1 %v15930_v61  ;;  %v8728_v20 = vpop.f32.mrb[126].mxu0  ;;  %v9206_v26 = vpop.f32.mrb[126].mxu1  ;;  %v13968_v23 = vpack.c.bf16 %v18508_v6, %v18508_v6  ;;  %v15990_v61 = vld [vmem:[#allocation19 + $0x388] ss:$16 sps:$4 sm:$0xff]   ;;  %v16001_v51 = vld [vmem:[#allocation19 + $0x3c4] ss:$16 sps:$4 sm:$0xff]  }
 0x908   :  { %v8729_v3 = vpop.f32.mrb[127].mxu0  ;;  %v9207_v41 = vpop.f32.mrb[127].mxu1  ;;  %10030 = vmatprep.subr.bf16.mxu0 %v15935_v8  ;;  %10071 = vmatprep.subr.bf16.mxu1 %v15938_v42  ;;  %v13971_v8 = vpack.c.bf16 %v18514_v9, %v18514_v9  ;;  %v15995_v42 = vld [vmem:[#allocation19 + $0x3a4] ss:$16 sps:$4 sm:$0xff]   ;;  %v15996_v46 = vld [vmem:[#allocation19 + $0x3a8] ss:$16 sps:$4 sm:$0xff]  }
 0x909   :  { %v16004_v6 = vld [vmem:[#allocation19 + $0x3cc] ss:$16 sps:$4 sm:$0xff]   ;;  %v15999_v20 = vld [vmem:[#allocation19 + $0x3c0] ss:$16 sps:$4 sm:$0xff]   ;;  %v16002_v9 = vld [vmem:[#allocation19 + $0x3c8] ss:$16 sps:$4 sm:$0xff]  }
 0x90a   :  { %v16007_v26 = vld [vmem:[#allocation19 + $0x3e4] ss:$16 sps:$4 sm:$0xff]   ;;  %v16008_v3 = vld [vmem:[#allocation19 + $0x3e8] ss:$16 sps:$4 sm:$0xff]  }
 0x90b   :  { %10031 = vmatpush1.bf16.msra.mxu0 %v15933_v1  ;;  %10072 = vmatpush1.bf16.msra.mxu1 %v15936_v44  ;;  %v16010_v1 = vld [vmem:[#allocation19 + $0x3ec] ss:$16 sps:$4 sm:$0xff]   ;;  %v16005_v44 = vld [vmem:[#allocation19 + $0x3e0] ss:$16 sps:$4 sm:$0xff]   ;;  %v16013_v41 = vld [vmem:[#allocation19 + $0x404] ss:$16 sps:$4 sm:$0xff]  }
 0x90c   :  { %10032 = vmatprep.subr.bf16.mxu0 %v15941_v54  ;;  %10073 = vmatprep.subr.bf16.mxu1 %v15944_v49  ;;  %v16016_v54 = vld [vmem:[#allocation19 + $0x40c] ss:$16 sps:$4 sm:$0xff]   ;;  %v16011_v49 = vld [vmem:[#allocation19 + $0x400] ss:$16 sps:$4 sm:$0xff]  }
 0x90f   :  { %10033 = vmatpush1.bf16.msra.mxu0 %v15939_v34  ;;  %10074 = vmatpush1.bf16.msra.mxu1 %v15942_v0  ;;  %v16014_v34 = vld [vmem:[#allocation19 + $0x408] ss:$16 sps:$4 sm:$0xff]   ;;  %v16019_v0 = vld [vmem:[#allocation19 + $0x424] ss:$16 sps:$4 sm:$0xff]  }
 0x910   :  { %10034 = vmatprep.subr.bf16.mxu0 %v15947_v24  ;;  %10075 = vmatprep.subr.bf16.mxu1 %v15950_v32  ;;  %v16022_v24 = vld [vmem:[#allocation19 + $0x42c] ss:$16 sps:$4 sm:$0xff]   ;;  %v16017_v32 = vld [vmem:[#allocation19 + $0x420] ss:$16 sps:$4 sm:$0xff]  }
 0x913   :  { %10035 = vmatpush1.bf16.msra.mxu0 %v15945_v57  ;;  %10076 = vmatpush1.bf16.msra.mxu1 %v15948_v11  ;;  %v16020_v57 = vld [vmem:[#allocation19 + $0x428] ss:$16 sps:$4 sm:$0xff]   ;;  %v16025_v11 = vld [vmem:[#allocation19 + $0x444] ss:$16 sps:$4 sm:$0xff]  }
 0x914   :  { %10036 = vmatprep.subr.bf16.mxu0 %v15953_v18  ;;  %10077 = vmatprep.subr.bf16.mxu1 %v15956_v47  ;;  %v16028_v18 = vld [vmem:[#allocation19 + $0x44c] ss:$16 sps:$4 sm:$0xff]   ;;  %v16023_v47 = vld [vmem:[#allocation19 + $0x440] ss:$16 sps:$4 sm:$0xff]  }
 0x917   :  { %10037 = vmatpush1.bf16.msra.mxu0 %v15951_v7  ;;  %10078 = vmatpush1.bf16.msra.mxu1 %v15954_v17  ;;  %v16026_v7 = vld [vmem:[#allocation19 + $0x448] ss:$16 sps:$4 sm:$0xff]   ;;  %v16031_v17 = vld [vmem:[#allocation19 + $0x464] ss:$16 sps:$4 sm:$0xff]  }
 0x918   :  { %10038 = vmatprep.subr.bf16.mxu0 %v15959_v30  ;;  %10079 = vmatprep.subr.bf16.mxu1 %v15962_v62  ;;  %v16034_v30 = vld [vmem:[#allocation19 + $0x46c] ss:$16 sps:$4 sm:$0xff]   ;;  %v16029_v62 = vld [vmem:[#allocation19 + $0x460] ss:$16 sps:$4 sm:$0xff]  }
 0x91b   :  { %10039 = vmatpush1.bf16.msra.mxu0 %v15957_v31  ;;  %10080 = vmatpush1.bf16.msra.mxu1 %v15960_v5  ;;  %v16032_v31 = vld [vmem:[#allocation19 + $0x468] ss:$16 sps:$4 sm:$0xff]   ;;  %v16037_v5 = vld [vmem:[#allocation19 + $0x484] ss:$16 sps:$4 sm:$0xff]  }
 0x91c   :  { %10040 = vmatprep.subr.bf16.mxu0 %v15965_v48  ;;  %10081 = vmatprep.subr.bf16.mxu1 %v15968_v27  ;;  %v16040_v48 = vld [vmem:[#allocation19 + $0x48c] ss:$16 sps:$4 sm:$0xff]   ;;  %v16035_v27 = vld [vmem:[#allocation19 + $0x480] ss:$16 sps:$4 sm:$0xff]  }
 0x91f   :  { %10041 = vmatpush1.bf16.msra.mxu0 %v15963_v10  ;;  %10082 = vmatpush1.bf16.msra.mxu1 %v15966_v38  ;;  %v16038_v10 = vld [vmem:[#allocation19 + $0x488] ss:$16 sps:$4 sm:$0xff]   ;;  %v16043_v38 = vld [vmem:[#allocation19 + $0x4a4] ss:$16 sps:$4 sm:$0xff]  }
 0x920   :  { %10042 = vmatprep.subr.bf16.mxu0 %v15971_v21  ;;  %10083 = vmatprep.subr.bf16.mxu1 %v15974_v33  ;;  %v16046_v21 = vld [vmem:[#allocation19 + $0x4ac] ss:$16 sps:$4 sm:$0xff]   ;;  %v16041_v33 = vld [vmem:[#allocation19 + $0x4a0] ss:$16 sps:$4 sm:$0xff]  }
 0x923   :  { %10043 = vmatpush1.bf16.msra.mxu0 %v15969_v16  ;;  %10084 = vmatpush1.bf16.msra.mxu1 %v15972_v4  ;;  %v16044_v16 = vld [vmem:[#allocation19 + $0x4a8] ss:$16 sps:$4 sm:$0xff]   ;;  %v16049_v4 = vld [vmem:[#allocation19 + $0x4c4] ss:$16 sps:$4 sm:$0xff]  }
 0x924   :  { %10044 = vmatprep.subr.bf16.mxu0 %v15977_v56  ;;  %10085 = vmatprep.subr.bf16.mxu1 %v15980_v60  ;;  %v16052_v56 = vld [vmem:[#allocation19 + $0x4cc] ss:$16 sps:$4 sm:$0xff]   ;;  %v16047_v60 = vld [vmem:[#allocation19 + $0x4c0] ss:$16 sps:$4 sm:$0xff]  }
 0x927   :  { %10045 = vmatpush1.bf16.msra.mxu0 %v15975_v13  ;;  %10086 = vmatpush1.bf16.msra.mxu1 %v15978_v63  ;;  %v16050_v13 = vld [vmem:[#allocation19 + $0x4c8] ss:$16 sps:$4 sm:$0xff]   ;;  %v16055_v63 = vld [vmem:[#allocation19 + $0x4e4] ss:$16 sps:$4 sm:$0xff]  }
 0x928   :  { %10046 = vmatprep.subr.bf16.mxu0 %v15983_v52  ;;  %10087 = vmatprep.subr.bf16.mxu1 %v15986_v55  ;;  %v16058_v52 = vld [vmem:[#allocation19 + $0x4ec] ss:$16 sps:$4 sm:$0xff]   ;;  %v16053_v55 = vld [vmem:[#allocation19 + $0x4e0] ss:$16 sps:$4 sm:$0xff]  }
 0x92b   :  { %10047 = vmatpush1.bf16.msra.mxu0 %v15981_v28  ;;  %10088 = vmatpush1.bf16.msra.mxu1 %v15984_v2  ;;  %v16056_v28 = vld [vmem:[#allocation19 + $0x4e8] ss:$16 sps:$4 sm:$0xff]   ;;  %v16061_v2 = vld [vmem:[#allocation19 + $0x504] ss:$16 sps:$4 sm:$0xff]  }
 0x92c   :  { %10445 = vmatprep.subr.bf16.mxu0 %v15989_v59  ;;  %10486 = vmatprep.subr.bf16.mxu1 %v15992_v43  ;;  %v16064_v59 = vld [vmem:[#allocation19 + $0x50c] ss:$16 sps:$4 sm:$0xff]   ;;  %v16059_v43 = vld [vmem:[#allocation19 + $0x500] ss:$16 sps:$4 sm:$0xff]  }
 0x92e   :  { %10053 = vmatmul.mubr.bf16.vlgmr.msra.gmra.mrb[132].mxu0 %v13968_v23  ;;  %10094 = vmatmul.mubr.bf16.vlgmr.msra.gmra.mrb[132].mxu1 %v13968_v23  ;;  %v16067_v23 = vld [vmem:[#allocation19 + $0x524] ss:$16 sps:$4 sm:$0xff]  }
 0x92f   :  { %10446 = vmatpush1.bf16.msra.mxu0 %v15987_v29  ;;  %13682 = vmatprep.mubr.msk.bf16.mxu0 %vm1015_vm5, %v13971_v8  ;;  %v16062_v29 = vld [vmem:[#allocation19 + $0x508] ss:$16 sps:$4 sm:$0xff]  }
 0x930   :  { %10487 = vmatpush1.bf16.msra.mxu1 %v15990_v61  ;;  %13683 = vmatprep.mubr.msk.bf16.mxu1 %vm1015_vm5, %v13971_v8  ;;  %v16070_v61 = vld [vmem:[#allocation19 + $0x52c] ss:$16 sps:$4 sm:$0xff]   ;;  %v16065_v8 = vld [vmem:[#allocation19 + $0x520] ss:$16 sps:$4 sm:$0xff]  }
 0x931   :  { %10447 = vmatprep.subr.bf16.mxu0 %v15995_v42  ;;  %10488 = vmatprep.subr.bf16.mxu1 %v15998_v58  ;;  %v16068_v42 = vld [vmem:[#allocation19 + $0x528] ss:$16 sps:$4 sm:$0xff]   ;;  %v16073_v58 = vld [vmem:[#allocation19 + $0x544] ss:$16 sps:$4 sm:$0xff]  }
 0x933   :  { %10448 = vmatpush1.bf16.msra.mxu0 %v15993_v39  ;;  %v16076_v39 = vld [vmem:[#allocation19 + $0x54c] ss:$16 sps:$4 sm:$0xff]  }
 0x934   :  { %10489 = vmatpush1.bf16.msra.mxu1 %v15996_v46  ;;  %10449 = vmatprep.subr.bf16.mxu0 %v16001_v51  ;;  %v16071_v46 = vld [vmem:[#allocation19 + $0x540] ss:$16 sps:$4 sm:$0xff]   ;;  %v13970_v51 = vpack.c.bf16 %v18512_v35, %v18512_v35  ;;  %v16088_v35 = vld [vmem:[#allocation19 + $0x58c] ss:$16 sps:$4 sm:$0xff]  }
 0x935   :  { %10490 = vmatprep.subr.bf16.mxu1 %v16004_v6  ;;  %v16074_v6 = vld [vmem:[#allocation19 + $0x548] ss:$16 sps:$4 sm:$0xff]  }
 0x937   :  { %10450 = vmatpush1.bf16.msra.mxu0 %v15999_v20  ;;  %v16079_v20 = vld [vmem:[#allocation19 + $0x564] ss:$16 sps:$4 sm:$0xff]  }
 0x938   :  { %10491 = vmatpush1.bf16.msra.mxu1 %v16002_v9  ;;  %10451 = vmatprep.subr.bf16.mxu0 %v16007_v26  ;;  %v13973_v9 = vpack.c.bf16 %v18520_v14, %v18520_v14  ;;  %v16082_v26 = vld [vmem:[#allocation19 + $0x56c] ss:$16 sps:$4 sm:$0xff]   ;;  %v16086_v14 = vld [vmem:[#allocation19 + $0x588] ss:$16 sps:$4 sm:$0xff]  }
 0x939   :  { %10492 = vmatprep.subr.bf16.mxu1 %v16010_v1  ;;  %v16077_v1 = vld [vmem:[#allocation19 + $0x560] ss:$16 sps:$4 sm:$0xff]  }
 0x93b   :  { %10452 = vmatpush1.bf16.msra.mxu0 %v16005_v44  ;;  %v16080_v44 = vld [vmem:[#allocation19 + $0x568] ss:$16 sps:$4 sm:$0xff]  }
 0x93c   :  { %10493 = vmatpush1.bf16.msra.mxu1 %v16008_v3  ;;  %10453 = vmatprep.subr.bf16.mxu0 %v16013_v41  ;;  %v16085_v3 = vld [vmem:[#allocation19 + $0x584] ss:$16 sps:$4 sm:$0xff]   ;;  %v16083_v41 = vld [vmem:[#allocation19 + $0x580] ss:$16 sps:$4 sm:$0xff]  }
 0x93d   :  { %10494 = vmatprep.subr.bf16.mxu1 %v16016_v54  ;;  %v16091_v54 = vld [vmem:[#allocation19 + $0x5a4] ss:$16 sps:$4 sm:$0xff]  }
 0x93f   :  { %10454 = vmatpush1.bf16.msra.mxu0 %v16011_v49  ;;  %v16094_v49 = vld [vmem:[#allocation19 + $0x5ac] ss:$16 sps:$4 sm:$0xff]  }
 0x940   :  { %10495 = vmatpush1.bf16.msra.mxu1 %v16014_v34  ;;  %10455 = vmatprep.subr.bf16.mxu0 %v16019_v0  ;;  %v16089_v34 = vld [vmem:[#allocation19 + $0x5a0] ss:$16 sps:$4 sm:$0xff]   ;;  %v16092_v0 = vld [vmem:[#allocation19 + $0x5a8] ss:$16 sps:$4 sm:$0xff]  }
 0x941   :  { %10496 = vmatprep.subr.bf16.mxu1 %v16022_v24  ;;  %v16097_v24 = vld [vmem:[#allocation19 + $0x5c4] ss:$16 sps:$4 sm:$0xff]  }
 0x943   :  { %10456 = vmatpush1.bf16.msra.mxu0 %v16017_v32  ;;  %v16100_v32 = vld [vmem:[#allocation19 + $0x5cc] ss:$16 sps:$4 sm:$0xff]  }
 0x944   :  { %10497 = vmatpush1.bf16.msra.mxu1 %v16020_v57  ;;  %10457 = vmatprep.subr.bf16.mxu0 %v16025_v11  ;;  %v16095_v57 = vld [vmem:[#allocation19 + $0x5c0] ss:$16 sps:$4 sm:$0xff]   ;;  %v16098_v11 = vld [vmem:[#allocation19 + $0x5c8] ss:$16 sps:$4 sm:$0xff]  }
 0x945   :  { %10498 = vmatprep.subr.bf16.mxu1 %v16028_v18  ;;  %v16103_v18 = vld [vmem:[#allocation19 + $0x5e4] ss:$16 sps:$4 sm:$0xff]  }
 0x947   :  { %10458 = vmatpush1.bf16.msra.mxu0 %v16023_v47  ;;  %v16106_v47 = vld [vmem:[#allocation19 + $0x5ec] ss:$16 sps:$4 sm:$0xff]  }
 0x948   :  { %10499 = vmatpush1.bf16.msra.mxu1 %v16026_v7  ;;  %10459 = vmatprep.subr.bf16.mxu0 %v16031_v17  ;;  %v16101_v7 = vld [vmem:[#allocation19 + $0x5e0] ss:$16 sps:$4 sm:$0xff]   ;;  %v16104_v17 = vld [vmem:[#allocation19 + $0x5e8] ss:$16 sps:$4 sm:$0xff]  }
 0x949   :  { %10500 = vmatprep.subr.bf16.mxu1 %v16034_v30  ;;  %v16109_v30 = vld [vmem:[#allocation19 + $0x604] ss:$16 sps:$4 sm:$0xff]  }
 0x94b   :  { %10460 = vmatpush1.bf16.msra.mxu0 %v16029_v62  ;;  %v16112_v62 = vld [vmem:[#allocation19 + $0x60c] ss:$16 sps:$4 sm:$0xff]  }
 0x94c   :  { %10501 = vmatpush1.bf16.msra.mxu1 %v16032_v31  ;;  %10461 = vmatprep.subr.bf16.mxu0 %v16037_v5  ;;  %v16107_v31 = vld [vmem:[#allocation19 + $0x600] ss:$16 sps:$4 sm:$0xff]   ;;  %v16110_v5 = vld [vmem:[#allocation19 + $0x608] ss:$16 sps:$4 sm:$0xff]  }
 0x94d   :  { %10502 = vmatprep.subr.bf16.mxu1 %v16040_v48  ;;  %v16115_v48 = vld [vmem:[#allocation19 + $0x624] ss:$16 sps:$4 sm:$0xff]  }
 0x94f   :  { %10462 = vmatpush1.bf16.msra.mxu0 %v16035_v27  ;;  %v16118_v27 = vld [vmem:[#allocation19 + $0x62c] ss:$16 sps:$4 sm:$0xff]  }
 0x950   :  { %10503 = vmatpush1.bf16.msra.mxu1 %v16038_v10  ;;  %10463 = vmatprep.subr.bf16.mxu0 %v16043_v38  ;;  %v16113_v10 = vld [vmem:[#allocation19 + $0x620] ss:$16 sps:$4 sm:$0xff]   ;;  %v16116_v38 = vld [vmem:[#allocation19 + $0x628] ss:$16 sps:$4 sm:$0xff]  }
 0x951   :  { %10504 = vmatprep.subr.bf16.mxu1 %v16046_v21  ;;  %v16121_v21 = vld [vmem:[#allocation19 + $0x644] ss:$16 sps:$4 sm:$0xff]  }
 0x953   :  { %10464 = vmatpush1.bf16.msra.mxu0 %v16041_v33  ;;  %v16124_v33 = vld [vmem:[#allocation19 + $0x64c] ss:$16 sps:$4 sm:$0xff]  }
 0x954   :  { %10505 = vmatpush1.bf16.msra.mxu1 %v16044_v16  ;;  %10465 = vmatprep.subr.bf16.mxu0 %v16049_v4  ;;  %v16119_v16 = vld [vmem:[#allocation19 + $0x640] ss:$16 sps:$4 sm:$0xff]   ;;  %v16122_v4 = vld [vmem:[#allocation19 + $0x648] ss:$16 sps:$4 sm:$0xff]  }
 0x955   :  { %10506 = vmatprep.subr.bf16.mxu1 %v16052_v56  ;;  %v16127_v56 = vld [vmem:[#allocation19 + $0x664] ss:$16 sps:$4 sm:$0xff]  }
 0x957   :  { %10466 = vmatpush1.bf16.msra.mxu0 %v16047_v60  ;;  %v16130_v60 = vld [vmem:[#allocation19 + $0x66c] ss:$16 sps:$4 sm:$0xff]  }
 0x958   :  { %10507 = vmatpush1.bf16.msra.mxu1 %v16050_v13  ;;  %10467 = vmatprep.subr.bf16.mxu0 %v16055_v63  ;;  %v16125_v13 = vld [vmem:[#allocation19 + $0x660] ss:$16 sps:$4 sm:$0xff]   ;;  %v16128_v63 = vld [vmem:[#allocation19 + $0x668] ss:$16 sps:$4 sm:$0xff]  }
 0x959   :  { %10508 = vmatprep.subr.bf16.mxu1 %v16058_v52  ;;  %v16133_v52 = vld [vmem:[#allocation19 + $0x684] ss:$16 sps:$4 sm:$0xff]  }
 0x95b   :  { %10468 = vmatpush1.bf16.msra.mxu0 %v16053_v55  ;;  %v16136_v55 = vld [vmem:[#allocation19 + $0x68c] ss:$16 sps:$4 sm:$0xff]  }
 0x95c   :  { %10509 = vmatpush1.bf16.msra.mxu1 %v16056_v28  ;;  %10469 = vmatprep.subr.bf16.mxu0 %v16061_v2  ;;  %v16131_v28 = vld [vmem:[#allocation19 + $0x680] ss:$16 sps:$4 sm:$0xff]   ;;  %v16134_v2 = vld [vmem:[#allocation19 + $0x688] ss:$16 sps:$4 sm:$0xff]  }
 0x95d   :  { %10510 = vmatprep.subr.bf16.mxu1 %v16064_v59  ;;  %v16139_v59 = vld [vmem:[#allocation19 + $0x6a4] ss:$16 sps:$4 sm:$0xff]  }
 0x95f   :  { %10470 = vmatpush1.bf16.msra.mxu0 %v16059_v43  ;;  %v16142_v43 = vld [vmem:[#allocation19 + $0x6ac] ss:$16 sps:$4 sm:$0xff]  }
 0x960   :  { %10511 = vmatpush1.bf16.msra.mxu1 %v16062_v29  ;;  %10471 = vmatprep.subr.bf16.mxu0 %v16067_v23  ;;  %v16137_v29 = vld [vmem:[#allocation19 + $0x6a0] ss:$16 sps:$4 sm:$0xff]   ;;  %v16140_v23 = vld [vmem:[#allocation19 + $0x6a8] ss:$16 sps:$4 sm:$0xff]  }
 0x961   :  { %10512 = vmatprep.subr.bf16.mxu1 %v16070_v61  ;;  %v16145_v61 = vld [vmem:[#allocation19 + $0x6c4] ss:$16 sps:$4 sm:$0xff]  }
 0x963   :  { %10472 = vmatpush1.bf16.msra.mxu0 %v16065_v8  ;;  %v16148_v8 = vld [vmem:[#allocation19 + $0x6cc] ss:$16 sps:$4 sm:$0xff]  }
 0x964   :  { %10513 = vmatpush1.bf16.msra.mxu1 %v16068_v42  ;;  %10874 = vmatprep.subr.bf16.mxu0 %v16073_v58  ;;  %v16143_v42 = vld [vmem:[#allocation19 + $0x6c0] ss:$16 sps:$4 sm:$0xff]   ;;  %v16146_v58 = vld [vmem:[#allocation19 + $0x6c8] ss:$16 sps:$4 sm:$0xff]  }
 0x965   :  { %10915 = vmatprep.subr.bf16.mxu1 %v16076_v39  ;;  %v16151_v39 = vld [vmem:[#allocation19 + $0x6e4] ss:$16 sps:$4 sm:$0xff]  }
 0x966   :  { %10478 = vmatmul.mubr.bf16.vlgmr.msra.gmra.mrb[136].mxu0 %v13970_v51 }
 0x967   :  { %10519 = vmatmul.mubr.bf16.vlgmr.msra.gmra.mrb[136].mxu1 %v13970_v51  ;;  %10875 = vmatpush1.bf16.msra.mxu0 %v16071_v46  ;;  %v16154_v46 = vld [vmem:[#allocation19 + $0x6ec] ss:$16 sps:$4 sm:$0xff]   ;;  %v16149_v51 = vld [vmem:[#allocation19 + $0x6e0] ss:$16 sps:$4 sm:$0xff]  }
 0x968   :  { %13742 = vmatprep.mubr.msk.bf16.mxu0 %vm1015_vm5, %v13973_v9  ;;  %10916 = vmatpush1.bf16.msra.mxu1 %v16074_v6  ;;  %v16152_v6 = vld [vmem:[#allocation19 + $0x6e8] ss:$16 sps:$4 sm:$0xff]  }
 0x969   :  { %13743 = vmatprep.mubr.msk.bf16.mxu1 %vm1015_vm5, %v13973_v9  ;;  %10876 = vmatprep.subr.bf16.mxu0 %v16079_v20  ;;  %v16157_v20 = vld [vmem:[#allocation19 + $0x704] ss:$16 sps:$4 sm:$0xff]   ;;  %v16160_v9 = vld [vmem:[#allocation19 + $0x70c] ss:$16 sps:$4 sm:$0xff]  }
 0x96a   :  { %10917 = vmatprep.subr.bf16.mxu1 %v16082_v26  ;;  %v16155_v26 = vld [vmem:[#allocation19 + $0x700] ss:$16 sps:$4 sm:$0xff]  }
 0x96b   :  { %10877 = vmatpush1.bf16.msra.mxu0 %v16077_v1  ;;  %v13972_v1 = vpack.c.bf16 %v18516_v45, %v18516_v45  ;;  %v16172_v45 = vld [vmem:[#allocation19 + $0x74c] ss:$16 sps:$4 sm:$0xff]  }
 0x96c   :  { %10918 = vmatpush1.bf16.msra.mxu1 %v16080_v44  ;;  %10878 = vmatprep.subr.bf16.mxu0 %v16085_v3  ;;  %v16158_v44 = vld [vmem:[#allocation19 + $0x708] ss:$16 sps:$4 sm:$0xff]   ;;  %v16163_v3 = vld [vmem:[#allocation19 + $0x724] ss:$16 sps:$4 sm:$0xff]  }
 0x96d   :  { %10919 = vmatprep.subr.bf16.mxu1 %v16088_v35  ;;  %v13975_v35 = vpack.c.bf16 %v18524_v25, %v18524_v25  ;;  %v16170_v25 = vld [vmem:[#allocation19 + $0x748] ss:$16 sps:$4 sm:$0xff]  }
 0x96f   :  { %10879 = vmatpush1.bf16.msra.mxu0 %v16083_v41  ;;  %v16166_v41 = vld [vmem:[#allocation19 + $0x72c] ss:$16 sps:$4 sm:$0xff]  }
 0x970   :  { %10920 = vmatpush1.bf16.msra.mxu1 %v16086_v14  ;;  %10880 = vmatprep.subr.bf16.mxu0 %v16091_v54  ;;  %v16161_v14 = vld [vmem:[#allocation19 + $0x720] ss:$16 sps:$4 sm:$0xff]   ;;  %v16164_v54 = vld [vmem:[#allocation19 + $0x728] ss:$16 sps:$4 sm:$0xff]  }
 0x971   :  { %10921 = vmatprep.subr.bf16.mxu1 %v16094_v49  ;;  %v16169_v49 = vld [vmem:[#allocation19 + $0x744] ss:$16 sps:$4 sm:$0xff]  }
 0x973   :  { %10881 = vmatpush1.bf16.msra.mxu0 %v16089_v34  ;;  %v16167_v34 = vld [vmem:[#allocation19 + $0x740] ss:$16 sps:$4 sm:$0xff]  }
 0x974   :  { %10922 = vmatpush1.bf16.msra.mxu1 %v16092_v0  ;;  %10882 = vmatprep.subr.bf16.mxu0 %v16097_v24  ;;  %v16175_v0 = vld [vmem:[#allocation19 + $0x764] ss:$16 sps:$4 sm:$0xff]   ;;  %v16178_v24 = vld [vmem:[#allocation19 + $0x76c] ss:$16 sps:$4 sm:$0xff]  }
 0x975   :  { %10923 = vmatprep.subr.bf16.mxu1 %v16100_v32  ;;  %v16173_v32 = vld [vmem:[#allocation19 + $0x760] ss:$16 sps:$4 sm:$0xff]  }
 0x977   :  { %10883 = vmatpush1.bf16.msra.mxu0 %v16095_v57  ;;  %v16176_v57 = vld [vmem:[#allocation19 + $0x768] ss:$16 sps:$4 sm:$0xff]  }
 0x978   :  { %10924 = vmatpush1.bf16.msra.mxu1 %v16098_v11  ;;  %10884 = vmatprep.subr.bf16.mxu0 %v16103_v18  ;;  %v16181_v11 = vld [vmem:[#allocation19 + $0x784] ss:$16 sps:$4 sm:$0xff]   ;;  %v16184_v18 = vld [vmem:[#allocation19 + $0x78c] ss:$16 sps:$4 sm:$0xff]  }
 0x979   :  { %10925 = vmatprep.subr.bf16.mxu1 %v16106_v47  ;;  %v16179_v47 = vld [vmem:[#allocation19 + $0x780] ss:$16 sps:$4 sm:$0xff]  }
 0x97b   :  { %10885 = vmatpush1.bf16.msra.mxu0 %v16101_v7  ;;  %v16182_v7 = vld [vmem:[#allocation19 + $0x788] ss:$16 sps:$4 sm:$0xff]  }
 0x97c   :  { %10926 = vmatpush1.bf16.msra.mxu1 %v16104_v17  ;;  %10886 = vmatprep.subr.bf16.mxu0 %v16109_v30  ;;  %v16187_v17 = vld [vmem:[#allocation19 + $0x7a4] ss:$16 sps:$4 sm:$0xff]   ;;  %v16190_v30 = vld [vmem:[#allocation19 + $0x7ac] ss:$16 sps:$4 sm:$0xff]  }
 0x97d   :  { %10927 = vmatprep.subr.bf16.mxu1 %v16112_v62  ;;  %v16185_v62 = vld [vmem:[#allocation19 + $0x7a0] ss:$16 sps:$4 sm:$0xff]  }
 0x97f   :  { %10887 = vmatpush1.bf16.msra.mxu0 %v16107_v31  ;;  %v16188_v31 = vld [vmem:[#allocation19 + $0x7a8] ss:$16 sps:$4 sm:$0xff]  }
 0x980   :  { %10928 = vmatpush1.bf16.msra.mxu1 %v16110_v5  ;;  %10888 = vmatprep.subr.bf16.mxu0 %v16115_v48  ;;  %v16193_v5 = vld [vmem:[#allocation19 + $0x7c4] ss:$16 sps:$4 sm:$0xff]   ;;  %v16196_v48 = vld [vmem:[#allocation19 + $0x7cc] ss:$16 sps:$4 sm:$0xff]  }
 0x981   :  { %10929 = vmatprep.subr.bf16.mxu1 %v16118_v27  ;;  %v16191_v27 = vld [vmem:[#allocation19 + $0x7c0] ss:$16 sps:$4 sm:$0xff]  }
 0x983   :  { %10889 = vmatpush1.bf16.msra.mxu0 %v16113_v10  ;;  %v16194_v10 = vld [vmem:[#allocation19 + $0x7c8] ss:$16 sps:$4 sm:$0xff]  }
 0x984   :  { %10930 = vmatpush1.bf16.msra.mxu1 %v16116_v38  ;;  %10890 = vmatprep.subr.bf16.mxu0 %v16121_v21  ;;  %v16199_v38 = vld [vmem:[#allocation19 + $0x7e4] ss:$16 sps:$4 sm:$0xff]   ;;  %v16202_v21 = vld [vmem:[#allocation19 + $0x7ec] ss:$16 sps:$4 sm:$0xff]  }
 0x985   :  { %10931 = vmatprep.subr.bf16.mxu1 %v16124_v33  ;;  %v16197_v33 = vld [vmem:[#allocation19 + $0x7e0] ss:$16 sps:$4 sm:$0xff]  }
 0x987   :  { %10891 = vmatpush1.bf16.msra.mxu0 %v16119_v16  ;;  %v16200_v16 = vld [vmem:[#allocation19 + $0x7e8] ss:$16 sps:$4 sm:$0xff]  }
 0x988   :  { %10932 = vmatpush1.bf16.msra.mxu1 %v16122_v4  ;;  %10892 = vmatprep.subr.bf16.mxu0 %v16127_v56  ;;  %v16205_v4 = vld [vmem:[#allocation19 + $0x804] ss:$16 sps:$4 sm:$0xff]   ;;  %v16208_v56 = vld [vmem:[#allocation19 + $0x80c] ss:$16 sps:$4 sm:$0xff]  }
 0x989   :  { %10933 = vmatprep.subr.bf16.mxu1 %v16130_v60  ;;  %v16203_v60 = vld [vmem:[#allocation19 + $0x800] ss:$16 sps:$4 sm:$0xff]  }
 0x98b   :  { %10893 = vmatpush1.bf16.msra.mxu0 %v16125_v13  ;;  %v16206_v13 = vld [vmem:[#allocation19 + $0x808] ss:$16 sps:$4 sm:$0xff]  }
 0x98c   :  { %10934 = vmatpush1.bf16.msra.mxu1 %v16128_v63  ;;  %10894 = vmatprep.subr.bf16.mxu0 %v16133_v52  ;;  %v16211_v63 = vld [vmem:[#allocation19 + $0x824] ss:$16 sps:$4 sm:$0xff]   ;;  %v16214_v52 = vld [vmem:[#allocation19 + $0x82c] ss:$16 sps:$4 sm:$0xff]  }
 0x98d   :  { %10935 = vmatprep.subr.bf16.mxu1 %v16136_v55  ;;  %v16209_v55 = vld [vmem:[#allocation19 + $0x820] ss:$16 sps:$4 sm:$0xff]  }
 0x98f   :  { %10895 = vmatpush1.bf16.msra.mxu0 %v16131_v28  ;;  %v16212_v28 = vld [vmem:[#allocation19 + $0x828] ss:$16 sps:$4 sm:$0xff]  }
 0x990   :  { %10936 = vmatpush1.bf16.msra.mxu1 %v16134_v2  ;;  %10896 = vmatprep.subr.bf16.mxu0 %v16139_v59  ;;  %v16217_v2 = vld [vmem:[#allocation19 + $0x844] ss:$16 sps:$4 sm:$0xff]   ;;  %v16220_v59 = vld [vmem:[#allocation19 + $0x84c] ss:$16 sps:$4 sm:$0xff]  }
 0x991   :  { %10937 = vmatprep.subr.bf16.mxu1 %v16142_v43  ;;  %v16215_v43 = vld [vmem:[#allocation19 + $0x840] ss:$16 sps:$4 sm:$0xff]  }
 0x993   :  { %10897 = vmatpush1.bf16.msra.mxu0 %v16137_v29  ;;  %v16218_v29 = vld [vmem:[#allocation19 + $0x848] ss:$16 sps:$4 sm:$0xff]  }
 0x994   :  { %10938 = vmatpush1.bf16.msra.mxu1 %v16140_v23  ;;  %10898 = vmatprep.subr.bf16.mxu0 %v16145_v61  ;;  %v16223_v23 = vld [vmem:[#allocation19 + $0x864] ss:$16 sps:$4 sm:$0xff]   ;;  %v16226_v61 = vld [vmem:[#allocation19 + $0x86c] ss:$16 sps:$4 sm:$0xff]  }
 0x995   :  { %10939 = vmatprep.subr.bf16.mxu1 %v16148_v8  ;;  %v16221_v8 = vld [vmem:[#allocation19 + $0x860] ss:$16 sps:$4 sm:$0xff]  }
 0x997   :  { %10899 = vmatpush1.bf16.msra.mxu0 %v16143_v42  ;;  %v16224_v42 = vld [vmem:[#allocation19 + $0x868] ss:$16 sps:$4 sm:$0xff]  }
 0x998   :  { %10940 = vmatpush1.bf16.msra.mxu1 %v16146_v58  ;;  %10900 = vmatprep.subr.bf16.mxu0 %v16151_v39  ;;  %v16229_v58 = vld [vmem:[#allocation19 + $0x884] ss:$16 sps:$4 sm:$0xff]  }
 0x999   :  { %10941 = vmatprep.subr.bf16.mxu1 %v16154_v46 }
 0x99b   :  { %10901 = vmatpush1.bf16.msra.mxu0 %v16149_v51  ;;  %v16232_v51 = vld [vmem:[#allocation19 + $0x88c] ss:$16 sps:$4 sm:$0xff]  }
 0x99c   :  { %10942 = vmatpush1.bf16.msra.mxu1 %v16152_v6  ;;  %11303 = vmatprep.subr.bf16.mxu0 %v16157_v20 }
 0x99d   :  { %11344 = vmatprep.subr.bf16.mxu1 %v16160_v9 }
 0x99e   :  { %10907 = vmatmul.mubr.bf16.vlgmr.msra.gmra.mrb[140].mxu0 %v13972_v1 }
 0x99f   :  { %10948 = vmatmul.mubr.bf16.vlgmr.msra.gmra.mrb[140].mxu1 %v13972_v1  ;;  %11304 = vmatpush1.bf16.msra.mxu0 %v16155_v26  ;;  %v16227_v1 = vld [vmem:[#allocation19 + $0x880] ss:$16 sps:$4 sm:$0xff]  }
 0x9a0   :  { %13802 = vmatprep.mubr.msk.bf16.mxu0 %vm1015_vm5, %v13975_v35  ;;  %11345 = vmatpush1.bf16.msra.mxu1 %v16158_v44 }
 0x9a1   :  { %13803 = vmatprep.mubr.msk.bf16.mxu1 %vm1015_vm5, %v13975_v35  ;;  %11305 = vmatprep.subr.bf16.mxu0 %v16163_v3  ;;  %v16230_v35 = vld [vmem:[#allocation19 + $0x888] ss:$16 sps:$4 sm:$0xff]  }
 0x9a2   :  { %11346 = vmatprep.subr.bf16.mxu1 %v16166_v41  ;;  %v16235_v41 = vld [vmem:[#allocation19 + $0x8a4] ss:$16 sps:$4 sm:$0xff]  }
 0x9a3   :  { %11306 = vmatpush1.bf16.msra.mxu0 %v16161_v14  ;;  %v16238_v14 = vld [vmem:[#allocation19 + $0x8ac] ss:$16 sps:$4 sm:$0xff]  }
 0x9a4   :  { %11347 = vmatpush1.bf16.msra.mxu1 %v16164_v54  ;;  %11307 = vmatprep.subr.bf16.mxu0 %v16169_v49  ;;  %v16233_v54 = vld [vmem:[#allocation19 + $0x8a0] ss:$16 sps:$4 sm:$0xff]   ;;  %v16236_v49 = vld [vmem:[#allocation19 + $0x8a8] ss:$16 sps:$4 sm:$0xff]  }
 0x9a5   :  { %11348 = vmatprep.subr.bf16.mxu1 %v16172_v45  ;;  %v16241_v45 = vld [vmem:[#allocation19 + $0x8c4] ss:$16 sps:$4 sm:$0xff]  }
 0x9a7   :  { %11308 = vmatpush1.bf16.msra.mxu0 %v16167_v34  ;;  %v16244_v34 = vld [vmem:[#allocation19 + $0x8cc] ss:$16 sps:$4 sm:$0xff]  }
 0x9a8   :  { %11349 = vmatpush1.bf16.msra.mxu1 %v16170_v25  ;;  %11309 = vmatprep.subr.bf16.mxu0 %v16175_v0  ;;  %v16239_v25 = vld [vmem:[#allocation19 + $0x8c0] ss:$16 sps:$4 sm:$0xff]   ;;  %v13974_v0 = vpack.c.bf16 %v18522_v15, %v18522_v15  ;;  %v16256_v15 = vld [vmem:[#allocation19 + $0x90c] ss:$16 sps:$4 sm:$0xff]  }
 0x9a9   :  { %11350 = vmatprep.subr.bf16.mxu1 %v16178_v24  ;;  %v16242_v24 = vld [vmem:[#allocation19 + $0x8c8] ss:$16 sps:$4 sm:$0xff]  }
 0x9ab   :  { %11310 = vmatpush1.bf16.msra.mxu0 %v16173_v32  ;;  %v16247_v32 = vld [vmem:[#allocation19 + $0x8e4] ss:$16 sps:$4 sm:$0xff]  }
 0x9ac   :  { %11351 = vmatpush1.bf16.msra.mxu1 %v16176_v57  ;;  %11311 = vmatprep.subr.bf16.mxu0 %v16181_v11  ;;  %v13977_v57 = vpack.c.bf16 %v18528_v37, %v18528_v37  ;;  %v16250_v11 = vld [vmem:[#allocation19 + $0x8ec] ss:$16 sps:$4 sm:$0xff]   ;;  %v16254_v37 = vld [vmem:[#allocation19 + $0x908] ss:$16 sps:$4 sm:$0xff]  }
 0x9ad   :  { %11352 = vmatprep.subr.bf16.mxu1 %v16184_v18  ;;  %v16245_v18 = vld [vmem:[#allocation19 + $0x8e0] ss:$16 sps:$4 sm:$0xff]  }
 0x9af   :  { %11312 = vmatpush1.bf16.msra.mxu0 %v16179_v47  ;;  %v16248_v47 = vld [vmem:[#allocation19 + $0x8e8] ss:$16 sps:$4 sm:$0xff]  }
 0x9b0   :  { %11353 = vmatpush1.bf16.msra.mxu1 %v16182_v7  ;;  %11313 = vmatprep.subr.bf16.mxu0 %v16187_v17  ;;  %v16253_v7 = vld [vmem:[#allocation19 + $0x904] ss:$16 sps:$4 sm:$0xff]   ;;  %v16251_v17 = vld [vmem:[#allocation19 + $0x900] ss:$16 sps:$4 sm:$0xff]  }
 0x9b1   :  { %11354 = vmatprep.subr.bf16.mxu1 %v16190_v30  ;;  %v16259_v30 = vld [vmem:[#allocation19 + $0x924] ss:$16 sps:$4 sm:$0xff]  }
 0x9b3   :  { %11314 = vmatpush1.bf16.msra.mxu0 %v16185_v62  ;;  %v16262_v62 = vld [vmem:[#allocation19 + $0x92c] ss:$16 sps:$4 sm:$0xff]  }
 0x9b4   :  { %11355 = vmatpush1.bf16.msra.mxu1 %v16188_v31  ;;  %11315 = vmatprep.subr.bf16.mxu0 %v16193_v5  ;;  %v16257_v31 = vld [vmem:[#allocation19 + $0x920] ss:$16 sps:$4 sm:$0xff]   ;;  %v16260_v5 = vld [vmem:[#allocation19 + $0x928] ss:$16 sps:$4 sm:$0xff]  }
 0x9b5   :  { %11356 = vmatprep.subr.bf16.mxu1 %v16196_v48  ;;  %v16265_v48 = vld [vmem:[#allocation19 + $0x944] ss:$16 sps:$4 sm:$0xff]  }
 0x9b7   :  { %11316 = vmatpush1.bf16.msra.mxu0 %v16191_v27  ;;  %v16268_v27 = vld [vmem:[#allocation19 + $0x94c] ss:$16 sps:$4 sm:$0xff]  }
 0x9b8   :  { %11357 = vmatpush1.bf16.msra.mxu1 %v16194_v10  ;;  %11317 = vmatprep.subr.bf16.mxu0 %v16199_v38  ;;  %v16263_v10 = vld [vmem:[#allocation19 + $0x940] ss:$16 sps:$4 sm:$0xff]   ;;  %v16266_v38 = vld [vmem:[#allocation19 + $0x948] ss:$16 sps:$4 sm:$0xff]  }
 0x9b9   :  { %11358 = vmatprep.subr.bf16.mxu1 %v16202_v21  ;;  %v16271_v21 = vld [vmem:[#allocation19 + $0x964] ss:$16 sps:$4 sm:$0xff]  }
 0x9bb   :  { %11318 = vmatpush1.bf16.msra.mxu0 %v16197_v33  ;;  %v16274_v33 = vld [vmem:[#allocation19 + $0x96c] ss:$16 sps:$4 sm:$0xff]  }
 0x9bc   :  { %11359 = vmatpush1.bf16.msra.mxu1 %v16200_v16  ;;  %11319 = vmatprep.subr.bf16.mxu0 %v16205_v4  ;;  %v16269_v16 = vld [vmem:[#allocation19 + $0x960] ss:$16 sps:$4 sm:$0xff]   ;;  %v16272_v4 = vld [vmem:[#allocation19 + $0x968] ss:$16 sps:$4 sm:$0xff]  }
 0x9bd   :  { %11360 = vmatprep.subr.bf16.mxu1 %v16208_v56  ;;  %v16277_v56 = vld [vmem:[#allocation19 + $0x984] ss:$16 sps:$4 sm:$0xff]  }
 0x9bf   :  { %11320 = vmatpush1.bf16.msra.mxu0 %v16203_v60  ;;  %v16280_v60 = vld [vmem:[#allocation19 + $0x98c] ss:$16 sps:$4 sm:$0xff]  }
 0x9c0   :  { %11361 = vmatpush1.bf16.msra.mxu1 %v16206_v13  ;;  %11321 = vmatprep.subr.bf16.mxu0 %v16211_v63  ;;  %v16275_v13 = vld [vmem:[#allocation19 + $0x980] ss:$16 sps:$4 sm:$0xff]   ;;  %v16278_v63 = vld [vmem:[#allocation19 + $0x988] ss:$16 sps:$4 sm:$0xff]  }
 0x9c1   :  { %11362 = vmatprep.subr.bf16.mxu1 %v16214_v52  ;;  %v16283_v52 = vld [vmem:[#allocation19 + $0x9a4] ss:$16 sps:$4 sm:$0xff]  }
 0x9c3   :  { %11322 = vmatpush1.bf16.msra.mxu0 %v16209_v55  ;;  %v16286_v55 = vld [vmem:[#allocation19 + $0x9ac] ss:$16 sps:$4 sm:$0xff]  }
 0x9c4   :  { %11363 = vmatpush1.bf16.msra.mxu1 %v16212_v28  ;;  %11323 = vmatprep.subr.bf16.mxu0 %v16217_v2  ;;  %v16281_v28 = vld [vmem:[#allocation19 + $0x9a0] ss:$16 sps:$4 sm:$0xff]   ;;  %v16284_v2 = vld [vmem:[#allocation19 + $0x9a8] ss:$16 sps:$4 sm:$0xff]  }
 0x9c5   :  { %11364 = vmatprep.subr.bf16.mxu1 %v16220_v59  ;;  %v16289_v59 = vld [vmem:[#allocation19 + $0x9c4] ss:$16 sps:$4 sm:$0xff]  }
 0x9c7   :  { %11324 = vmatpush1.bf16.msra.mxu0 %v16215_v43  ;;  %v16292_v43 = vld [vmem:[#allocation19 + $0x9cc] ss:$16 sps:$4 sm:$0xff]  }
 0x9c8   :  { %11365 = vmatpush1.bf16.msra.mxu1 %v16218_v29  ;;  %11325 = vmatprep.subr.bf16.mxu0 %v16223_v23  ;;  %v16287_v29 = vld [vmem:[#allocation19 + $0x9c0] ss:$16 sps:$4 sm:$0xff]   ;;  %v16290_v23 = vld [vmem:[#allocation19 + $0x9c8] ss:$16 sps:$4 sm:$0xff]  }
 0x9c9   :  { %v18552_v39 = vpop.f32.mrb[128].mxu0  ;;  %v18554_v46 = vpop.f32.mrb[128].mxu1  ;;  %11366 = vmatprep.subr.bf16.mxu1 %v16226_v61  ;;  %v16295_v61 = vld [vmem:[#allocation19 + $0x9e4] ss:$16 sps:$4 sm:$0xff]  }
 0x9ca   :  { %v18556_v6 = vpop.f32.mrb[129].mxu0  ;;  %v18558_v20 = vpop.f32.mrb[129].mxu1 }
 0x9cb   :  { %11326 = vmatpush1.bf16.msra.mxu0 %v16221_v8  ;;  %v9690_v9 = vpop.f32.mrb[130].mxu0  ;;  %v9731_v26 = vpop.f32.mrb[130].mxu1  ;;  %v16298_v8 = vld [vmem:[#allocation19 + $0x9ec] ss:$16 sps:$4 sm:$0xff]  }
 0x9cc   :  { %11367 = vmatpush1.bf16.msra.mxu1 %v16224_v42  ;;  %v9691_v44 = vpop.f32.mrb[131].mxu0  ;;  %v9732_v3 = vpop.f32.mrb[131].mxu1  ;;  %11327 = vmatprep.subr.bf16.mxu0 %v16229_v58  ;;  %v16293_v42 = vld [vmem:[#allocation19 + $0x9e0] ss:$16 sps:$4 sm:$0xff]   ;;  %v16296_v58 = vld [vmem:[#allocation19 + $0x9e8] ss:$16 sps:$4 sm:$0xff]  }
 0x9cd   :  { %11368 = vmatprep.subr.bf16.mxu1 %v16232_v51  ;;  %v16301_v51 = vld [vmem:[#allocation19 + $0xa04] ss:$16 sps:$4 sm:$0xff]   ;;  %v16304_v9 = vld [vmem:[#allocation19 + $0xa0c] ss:$16 sps:$4 sm:$0xff]   ;;  %v16299_v26 = vld [vmem:[#allocation19 + $0xa00] ss:$16 sps:$4 sm:$0xff]  }
 0x9ce   :  { %v16307_v44 = vld [vmem:[#allocation19 + $0xa24] ss:$16 sps:$4 sm:$0xff]   ;;  %v16310_v3 = vld [vmem:[#allocation19 + $0xa2c] ss:$16 sps:$4 sm:$0xff]  }
 0x9cf   :  { %11328 = vmatpush1.bf16.msra.mxu0 %v16227_v1  ;;  %v16302_v1 = vld [vmem:[#allocation19 + $0xa08] ss:$16 sps:$4 sm:$0xff]  }
 0x9d0   :  { %11369 = vmatpush1.bf16.msra.mxu1 %v16230_v35  ;;  %11329 = vmatprep.subr.bf16.mxu0 %v16235_v41  ;;  %v16305_v35 = vld [vmem:[#allocation19 + $0xa20] ss:$16 sps:$4 sm:$0xff]   ;;  %v16308_v41 = vld [vmem:[#allocation19 + $0xa28] ss:$16 sps:$4 sm:$0xff]  }
 0x9d1   :  { %11370 = vmatprep.subr.bf16.mxu1 %v16238_v14  ;;  %v16313_v14 = vld [vmem:[#allocation19 + $0xa44] ss:$16 sps:$4 sm:$0xff]  }
 0x9d3   :  { %11330 = vmatpush1.bf16.msra.mxu0 %v16233_v54 }
 0x9d4   :  { %11371 = vmatpush1.bf16.msra.mxu1 %v16236_v49  ;;  %11732 = vmatprep.subr.bf16.mxu0 %v16241_v45  ;;  %v16316_v45 = vld [vmem:[#allocation19 + $0xa4c] ss:$16 sps:$4 sm:$0xff]  }
 0x9d5   :  { %11773 = vmatprep.subr.bf16.mxu1 %v16244_v34 }
 0x9d6   :  { %11336 = vmatmul.mubr.bf16.vlgmr.msra.gmra.mrb[144].mxu0 %v13974_v0 }
 0x9d7   :  { %11377 = vmatmul.mubr.bf16.vlgmr.msra.gmra.mrb[144].mxu1 %v13974_v0  ;;  %11733 = vmatpush1.bf16.msra.mxu0 %v16239_v25 }
 0x9d8   :  { %13862 = vmatprep.mubr.msk.bf16.mxu0 %vm1015_vm5, %v13977_v57  ;;  %11774 = vmatpush1.bf16.msra.mxu1 %v16242_v24 }
 0x9d9   :  { %13863 = vmatprep.mubr.msk.bf16.mxu1 %vm1015_vm5, %v13977_v57  ;;  %11734 = vmatprep.subr.bf16.mxu0 %v16247_v32 }
 0x9da   :  { %11775 = vmatprep.subr.bf16.mxu1 %v16250_v11 }
 0x9db   :  { %11735 = vmatpush1.bf16.msra.mxu0 %v16245_v18 }
 0x9dc   :  { %11776 = vmatpush1.bf16.msra.mxu1 %v16248_v47  ;;  %11736 = vmatprep.subr.bf16.mxu0 %v16253_v7  ;;  %v16311_v47 = vld [vmem:[#allocation19 + $0xa40] ss:$16 sps:$4 sm:$0xff]  }
 0x9dd   :  { %11777 = vmatprep.subr.bf16.mxu1 %v16256_v15 }
 0x9df   :  { %11737 = vmatpush1.bf16.msra.mxu0 %v16251_v17  ;;  %v16319_v17 = vld [vmem:[#allocation19 + $0xa64] ss:$16 sps:$4 sm:$0xff]  }
 0x9e0   :  { %11778 = vmatpush1.bf16.msra.mxu1 %v16254_v37  ;;  %11738 = vmatprep.subr.bf16.mxu0 %v16259_v30  ;;  %v16317_v37 = vld [vmem:[#allocation19 + $0xa60] ss:$16 sps:$4 sm:$0xff]   ;;  %v16325_v30 = vld [vmem:[#allocation19 + $0xa84] ss:$16 sps:$4 sm:$0xff]  }
 0x9e1   :  { %11779 = vmatprep.subr.bf16.mxu1 %v16262_v62  ;;  %v16323_v62 = vld [vmem:[#allocation19 + $0xa80] ss:$16 sps:$4 sm:$0xff]  }
 0x9e3   :  { %11739 = vmatpush1.bf16.msra.mxu0 %v16257_v31  ;;  %v13976_v31 = vpack.c.bf16 %v18526_v40, %v18526_v40  ;;  %v16340_v40 = vld [vmem:[#allocation19 + $0xacc] ss:$16 sps:$4 sm:$0xff]  }
 0x9e4   :  { %11780 = vmatpush1.bf16.msra.mxu1 %v16260_v5  ;;  %11740 = vmatprep.subr.bf16.mxu0 %v16265_v48  ;;  %v16326_v5 = vld [vmem:[#allocation19 + $0xa88] ss:$16 sps:$4 sm:$0xff]   ;;  %v16331_v48 = vld [vmem:[#allocation19 + $0xaa4] ss:$16 sps:$4 sm:$0xff]  }
 0x9e5   :  { %11781 = vmatprep.subr.bf16.mxu1 %v16268_v27  ;;  %v13979_v27 = vpack.c.bf16 %v18532_v36, %v18532_v36  ;;  %v16338_v36 = vld [vmem:[#allocation19 + $0xac8] ss:$16 sps:$4 sm:$0xff]  }
 0x9e7   :  { %11741 = vmatpush1.bf16.msra.mxu0 %v16263_v10  ;;  %v16334_v10 = vld [vmem:[#allocation19 + $0xaac] ss:$16 sps:$4 sm:$0xff]  }
 0x9e8   :  { %11782 = vmatpush1.bf16.msra.mxu1 %v16266_v38  ;;  %11742 = vmatprep.subr.bf16.mxu0 %v16271_v21  ;;  %v16329_v38 = vld [vmem:[#allocation19 + $0xaa0] ss:$16 sps:$4 sm:$0xff]   ;;  %v16332_v21 = vld [vmem:[#allocation19 + $0xaa8] ss:$16 sps:$4 sm:$0xff]  }
 0x9e9   :  { %11783 = vmatprep.subr.bf16.mxu1 %v16274_v33  ;;  %v16337_v33 = vld [vmem:[#allocation19 + $0xac4] ss:$16 sps:$4 sm:$0xff]  }
 0x9eb   :  { %11743 = vmatpush1.bf16.msra.mxu0 %v16269_v16  ;;  %v16335_v16 = vld [vmem:[#allocation19 + $0xac0] ss:$16 sps:$4 sm:$0xff]  }
 0x9ec   :  { %11784 = vmatpush1.bf16.msra.mxu1 %v16272_v4  ;;  %11744 = vmatprep.subr.bf16.mxu0 %v16277_v56  ;;  %v16343_v4 = vld [vmem:[#allocation19 + $0xae4] ss:$16 sps:$4 sm:$0xff]   ;;  %v16346_v56 = vld [vmem:[#allocation19 + $0xaec] ss:$16 sps:$4 sm:$0xff]  }
 0x9ed   :  { %11785 = vmatprep.subr.bf16.mxu1 %v16280_v60  ;;  %v16341_v60 = vld [vmem:[#allocation19 + $0xae0] ss:$16 sps:$4 sm:$0xff]  }
 0x9ef   :  { %11745 = vmatpush1.bf16.msra.mxu0 %v16275_v13  ;;  %v16344_v13 = vld [vmem:[#allocation19 + $0xae8] ss:$16 sps:$4 sm:$0xff]  }
 0x9f0   :  { %11786 = vmatpush1.bf16.msra.mxu1 %v16278_v63  ;;  %11746 = vmatprep.subr.bf16.mxu0 %v16283_v52  ;;  %v16349_v63 = vld [vmem:[#allocation19 + $0xb04] ss:$16 sps:$4 sm:$0xff]   ;;  %v16352_v52 = vld [vmem:[#allocation19 + $0xb0c] ss:$16 sps:$4 sm:$0xff]  }
 0x9f1   :  { %11787 = vmatprep.subr.bf16.mxu1 %v16286_v55  ;;  %v16347_v55 = vld [vmem:[#allocation19 + $0xb00] ss:$16 sps:$4 sm:$0xff]  }
 0x9f3   :  { %11747 = vmatpush1.bf16.msra.mxu0 %v16281_v28  ;;  %v16350_v28 = vld [vmem:[#allocation19 + $0xb08] ss:$16 sps:$4 sm:$0xff]  }
 0x9f4   :  { %11788 = vmatpush1.bf16.msra.mxu1 %v16284_v2  ;;  %11748 = vmatprep.subr.bf16.mxu0 %v16289_v59  ;;  %v16355_v2 = vld [vmem:[#allocation19 + $0xb24] ss:$16 sps:$4 sm:$0xff]   ;;  %v16358_v59 = vld [vmem:[#allocation19 + $0xb2c] ss:$16 sps:$4 sm:$0xff]  }
 0x9f5   :  { %11789 = vmatprep.subr.bf16.mxu1 %v16292_v43  ;;  %v16353_v43 = vld [vmem:[#allocation19 + $0xb20] ss:$16 sps:$4 sm:$0xff]  }
 0x9f7   :  { %11749 = vmatpush1.bf16.msra.mxu0 %v16287_v29  ;;  %v16356_v29 = vld [vmem:[#allocation19 + $0xb28] ss:$16 sps:$4 sm:$0xff]  }
 0x9f8   :  { %11790 = vmatpush1.bf16.msra.mxu1 %v16290_v23  ;;  %11750 = vmatprep.subr.bf16.mxu0 %v16295_v61  ;;  %v16361_v23 = vld [vmem:[#allocation19 + $0xb44] ss:$16 sps:$4 sm:$0xff]   ;;  %v16364_v61 = vld [vmem:[#allocation19 + $0xb4c] ss:$16 sps:$4 sm:$0xff]  }
 0x9f9   :  { %11791 = vmatprep.subr.bf16.mxu1 %v16298_v8  ;;  %v16359_v8 = vld [vmem:[#allocation19 + $0xb40] ss:$16 sps:$4 sm:$0xff]  }
 0x9fb   :  { %11751 = vmatpush1.bf16.msra.mxu0 %v16293_v42  ;;  %v16362_v42 = vld [vmem:[#allocation19 + $0xb48] ss:$16 sps:$4 sm:$0xff]  }
 0x9fc   :  { %11792 = vmatpush1.bf16.msra.mxu1 %v16296_v58  ;;  %11752 = vmatprep.subr.bf16.mxu0 %v16301_v51  ;;  %v16367_v58 = vld [vmem:[#allocation19 + $0xb64] ss:$16 sps:$4 sm:$0xff]   ;;  %v16370_v51 = vld [vmem:[#allocation19 + $0xb6c] ss:$16 sps:$4 sm:$0xff]  }
 0x9fd   :  { %11793 = vmatprep.subr.bf16.mxu1 %v16304_v9  ;;  %v16365_v9 = vld [vmem:[#allocation19 + $0xb60] ss:$16 sps:$4 sm:$0xff]  }
 0x9ff   :  { %11753 = vmatpush1.bf16.msra.mxu0 %v16299_v26  ;;  %v16368_v26 = vld [vmem:[#allocation19 + $0xb68] ss:$16 sps:$4 sm:$0xff]  }
 0xa00   :  { %11794 = vmatpush1.bf16.msra.mxu1 %v16302_v1  ;;  %11754 = vmatprep.subr.bf16.mxu0 %v16307_v44  ;;  %v16373_v1 = vld [vmem:[#allocation19 + $0xb84] ss:$16 sps:$4 sm:$0xff]   ;;  %v16376_v44 = vld [vmem:[#allocation19 + $0xb8c] ss:$16 sps:$4 sm:$0xff]  }
 0xa01   :  { %v10054_v54 = vpop.f32.mrb[132].mxu0  ;;  %v10095_v49 = vpop.f32.mrb[132].mxu1  ;;  %11795 = vmatprep.subr.bf16.mxu1 %v16310_v3  ;;  %v16371_v3 = vld [vmem:[#allocation19 + $0xb80] ss:$16 sps:$4 sm:$0xff]  }
 0xa02   :  { %v18567_v34 = vadd.f32 %v10054_v54, %v18552_v39  ;;  %v18570_v25 = vadd.f32 %v10095_v49, %v18554_v46  ;;  %v10056_v0 = vpop.f32.mrb[133].mxu0  ;;  %v10097_v24 = vpop.f32.mrb[133].mxu1  ;;  %v16314_v39 = vld [vmem:[#allocation19 + $0xa48] ss:$16 sps:$4 sm:$0xff]   ;;  %v16322_v46 = vld [vmem:[#allocation19 + $0xa6c] ss:$16 sps:$4 sm:$0xff]  }
 0xa03   :  { %v18573_v32 = vadd.f32 %v10056_v0, %v18556_v6  ;;  %v18576_v57 = vadd.f32 %v10097_v24, %v18558_v20  ;;  %v10058_v11 = vpop.f32.mrb[134].mxu0  ;;  %v10099_v18 = vpop.f32.mrb[134].mxu1  ;;  %11755 = vmatpush1.bf16.msra.mxu0 %v16305_v35  ;;  %v16320_v6 = vld [vmem:[#allocation19 + $0xa68] ss:$16 sps:$4 sm:$0xff]   ;;  %v16328_v20 = vld [vmem:[#allocation19 + $0xa8c] ss:$16 sps:$4 sm:$0xff]  }
 0xa04   :  { %11796 = vmatpush1.bf16.msra.mxu1 %v16308_v41  ;;  %v10059_v7 = vpop.f32.mrb[135].mxu0  ;;  %v10100_v15 = vpop.f32.mrb[135].mxu1  ;;  %11756 = vmatprep.subr.bf16.mxu0 %v16313_v14  ;;  %v16374_v35 = vld [vmem:[#allocation19 + $0xb88] ss:$16 sps:$4 sm:$0xff]   ;;  %v16379_v41 = vld [vmem:[#allocation19 + $0xba4] ss:$16 sps:$4 sm:$0xff]  }
 0xa05   :  { %11797 = vmatprep.subr.bf16.mxu1 %v16316_v45  ;;  %v16382_v14 = vld [vmem:[#allocation19 + $0xbac] ss:$16 sps:$4 sm:$0xff]   ;;  %v16377_v54 = vld [vmem:[#allocation19 + $0xba0] ss:$16 sps:$4 sm:$0xff]   ;;  %v16380_v49 = vld [vmem:[#allocation19 + $0xba8] ss:$16 sps:$4 sm:$0xff]  }
 0xa06   :  { %v16385_v45 = vld [vmem:[#allocation19 + $0xbc4] ss:$16 sps:$4 sm:$0xff]   ;;  %v16388_v0 = vld [vmem:[#allocation19 + $0xbcc] ss:$16 sps:$4 sm:$0xff]   ;;  %v16383_v24 = vld [vmem:[#allocation19 + $0xbc0] ss:$16 sps:$4 sm:$0xff]  }
 0xa07   :  { %11757 = vmatpush1.bf16.msra.mxu0 %v16311_v47  ;;  %v16386_v11 = vld [vmem:[#allocation19 + $0xbc8] ss:$16 sps:$4 sm:$0xff]   ;;  %v16391_v18 = vld [vmem:[#allocation19 + $0xbe4] ss:$16 sps:$4 sm:$0xff]   ;;  %v16394_v47 = vld [vmem:[#allocation19 + $0xbec] ss:$16 sps:$4 sm:$0xff]  }
 0xa08   :  { %11798 = vmatpush1.bf16.msra.mxu1 %v16314_v39  ;;  %11758 = vmatprep.subr.bf16.mxu0 %v16319_v17  ;;  %v16389_v7 = vld [vmem:[#allocation19 + $0xbe0] ss:$16 sps:$4 sm:$0xff]   ;;  %v16392_v15 = vld [vmem:[#allocation19 + $0xbe8] ss:$16 sps:$4 sm:$0xff]   ;;  %v16397_v39 = vld [vmem:[#allocation19 + $0xc04] ss:$16 sps:$4 sm:$0xff]  }
 0xa09   :  { %11799 = vmatprep.subr.bf16.mxu1 %v16322_v46  ;;  %v16400_v46 = vld [vmem:[#allocation19 + $0xc0c] ss:$16 sps:$4 sm:$0xff]  }
 0xa0b   :  { %11759 = vmatpush1.bf16.msra.mxu0 %v16317_v37 }
 0xa0c   :  { %11800 = vmatpush1.bf16.msra.mxu1 %v16320_v6  ;;  %12161 = vmatprep.subr.bf16.mxu0 %v16325_v30 }
 0xa0d   :  { %12202 = vmatprep.subr.bf16.mxu1 %v16328_v20 }
 0xa0e   :  { %11765 = vmatmul.mubr.bf16.vlgmr.msra.gmra.mrb[148].mxu0 %v13976_v31 }
 0xa0f   :  { %11806 = vmatmul.mubr.bf16.vlgmr.msra.gmra.mrb[148].mxu1 %v13976_v31  ;;  %12162 = vmatpush1.bf16.msra.mxu0 %v16323_v62 }
 0xa10   :  { %13922 = vmatprep.mubr.msk.bf16.mxu0 %vm1015_vm5, %v13979_v27  ;;  %12203 = vmatpush1.bf16.msra.mxu1 %v16326_v5 }
 0xa11   :  { %13923 = vmatprep.mubr.msk.bf16.mxu1 %vm1015_vm5, %v13979_v27  ;;  %12163 = vmatprep.subr.bf16.mxu0 %v16331_v48  ;;  %v16395_v48 = vld [vmem:[#allocation19 + $0xc00] ss:$16 sps:$4 sm:$0xff]  }
 0xa12   :  { %12204 = vmatprep.subr.bf16.mxu1 %v16334_v10 }
 0xa13   :  { %12164 = vmatpush1.bf16.msra.mxu0 %v16329_v38 }
 0xa14   :  { %12205 = vmatpush1.bf16.msra.mxu1 %v16332_v21  ;;  %12165 = vmatprep.subr.bf16.mxu0 %v16337_v33  ;;  %v16403_v21 = vld [vmem:[#allocation19 + $0xc24] ss:$16 sps:$4 sm:$0xff]  }
 0xa15   :  { %12206 = vmatprep.subr.bf16.mxu1 %v16340_v40  ;;  %v16406_v40 = vld [vmem:[#allocation19 + $0xc2c] ss:$16 sps:$4 sm:$0xff]  }
 0xa17   :  { %12166 = vmatpush1.bf16.msra.mxu0 %v16335_v16  ;;  %v13978_v16 = vpack.c.bf16 %v18530_v53, %v18530_v53  ;;  %v16417_v53 = vld [vmem:[#allocation22 + $0x10] sm:$0xff]  }
 0xa18   :  { %12207 = vmatpush1.bf16.msra.mxu1 %v16338_v36  ;;  %12167 = vmatprep.subr.bf16.mxu0 %v16343_v4  ;;  %v16408_v36 = vld [vmem:[#allocation22 + $0xc0] sm:$0xff]  }
 0xa19   :  { %12208 = vmatprep.subr.bf16.mxu1 %v16346_v56  ;;  %v16409_v4 = vld [vmem:[#allocation22] sm:$0xff]  }
 0xa1a   :  { %v16410_v56 = vld [vmem:[#allocation22 + $0x80] sm:$0xff]  }
 0xa1b   :  { %12168 = vmatpush1.bf16.msra.mxu0 %v16341_v60  ;;  %v16411_v60 = vld [vmem:[#allocation22 + $0x48] sm:$0xff]  }
 0xa1c   :  { %12209 = vmatpush1.bf16.msra.mxu1 %v16344_v13  ;;  %12169 = vmatprep.subr.bf16.mxu0 %v16349_v63  ;;  %v16412_v13 = vld [vmem:[#allocation22 + $0xc8] sm:$0xff]  }
 0xa1d   :  { %12210 = vmatprep.subr.bf16.mxu1 %v16352_v52  ;;  %v16413_v63 = vld [vmem:[#allocation22 + $0x8] sm:$0xff]  }
 0xa1e   :  { %v16414_v52 = vld [vmem:[#allocation22 + $0x88] sm:$0xff]  }
 0xa1f   :  { %12170 = vmatpush1.bf16.msra.mxu0 %v16347_v55  ;;  %v16415_v55 = vld [vmem:[#allocation22 + $0x50] sm:$0xff]  }
 0xa20   :  { %12211 = vmatpush1.bf16.msra.mxu1 %v16350_v28  ;;  %12171 = vmatprep.subr.bf16.mxu0 %v16355_v2  ;;  %v16416_v28 = vld [vmem:[#allocation22 + $0xd0] sm:$0xff]  }
 0xa21   :  { %12212 = vmatprep.subr.bf16.mxu1 %v16358_v59  ;;  %v16418_v2 = vld [vmem:[#allocation22 + $0x90] sm:$0xff]   ;;  %v16419_v59 = vld [vmem:[#allocation22 + $0x58] sm:$0xff]  }
 0xa23   :  { %12172 = vmatpush1.bf16.msra.mxu0 %v16353_v43  ;;  %v16420_v43 = vld [vmem:[#allocation22 + $0xd8] sm:$0xff]  }
 0xa24   :  { %12213 = vmatpush1.bf16.msra.mxu1 %v16356_v29  ;;  %12173 = vmatprep.subr.bf16.mxu0 %v16361_v23  ;;  %v16421_v29 = vld [vmem:[#allocation22 + $0x18] sm:$0xff]  }
 0xa25   :  { %12214 = vmatprep.subr.bf16.mxu1 %v16364_v61  ;;  %v16422_v23 = vld [vmem:[#allocation22 + $0x98] sm:$0xff]  }
 0xa27   :  { %12174 = vmatpush1.bf16.msra.mxu0 %v16359_v8  ;;  %v16423_v8 = vld [vmem:[#allocation22 + $0x60] sm:$0xff]  }
 0xa28   :  { %12215 = vmatpush1.bf16.msra.mxu1 %v16362_v42  ;;  %12175 = vmatprep.subr.bf16.mxu0 %v16367_v58  ;;  %v16424_v42 = vld [vmem:[#allocation22 + $0xe0] sm:$0xff]  }
 0xa29   :  { %12216 = vmatprep.subr.bf16.mxu1 %v16370_v51 }
 0xa2b   :  { %12176 = vmatpush1.bf16.msra.mxu0 %v16365_v9 }
 0xa2c   :  { %12217 = vmatpush1.bf16.msra.mxu1 %v16368_v26  ;;  %12177 = vmatprep.subr.bf16.mxu0 %v16373_v1 }
 0xa2d   :  { %12218 = vmatprep.subr.bf16.mxu1 %v16376_v44 }
 0xa2f   :  { %12178 = vmatpush1.bf16.msra.mxu0 %v16371_v3 }
 0xa30   :  { %12219 = vmatpush1.bf16.msra.mxu1 %v16374_v35  ;;  %12179 = vmatprep.subr.bf16.mxu0 %v16379_v41 }
 0xa31   :  { %12220 = vmatprep.subr.bf16.mxu1 %v16382_v14 }
 0xa33   :  { %12180 = vmatpush1.bf16.msra.mxu0 %v16377_v54  ;;  %v16425_v54 = vld [vmem:[#allocation22 + $0x20] sm:$0xff]  }
 0xa34   :  { %12221 = vmatpush1.bf16.msra.mxu1 %v16380_v49  ;;  %12181 = vmatprep.subr.bf16.mxu0 %v16385_v45  ;;  %v16426_v49 = vld [vmem:[#allocation22 + $0xa0] sm:$0xff]  }
 0xa35   :  { %12222 = vmatprep.subr.bf16.mxu1 %v16388_v0  ;;  %v16427_v0 = vld [vmem:[#allocation22 + $0x68] sm:$0xff]  }
 0xa37   :  { %12182 = vmatpush1.bf16.msra.mxu0 %v16383_v24  ;;  %v16428_v24 = vld [vmem:[#allocation22 + $0xe8] sm:$0xff]  }
 0xa38   :  { %12223 = vmatpush1.bf16.msra.mxu1 %v16386_v11  ;;  %12183 = vmatprep.subr.bf16.mxu0 %v16391_v18  ;;  %v16429_v11 = vld [vmem:[#allocation22 + $0x28] sm:$0xff]  }
 0xa39   :  { %v10479_v17 = vpop.f32.mrb[136].mxu0  ;;  %12224 = vmatprep.subr.bf16.mxu1 %v16394_v47  ;;  %v16430_v18 = vld [vmem:[#allocation22 + $0xa8] sm:$0xff]   ;;  %v16431_v47 = vld [vmem:[#allocation22 + $0x70] sm:$0xff]  }
 0xa3a   :  { %v18585_v37 = vadd.f32 %v10479_v17, %v18567_v34  ;;  %v10520_v6 = vpop.f32.mrb[136].mxu1  ;;  %v10481_v30 = vpop.f32.mrb[137].mxu0  ;;  %v16398_v34 = vld [vmem:[#allocation19 + $0xc08] ss:$16 sps:$4 sm:$0xff]   ;;  %v16435_v17 = vld [vmem:[#allocation22 + $0x78] sm:$0xff]  }
 0xa3b   :  { %v18588_v20 = vadd.f32 %v10520_v6, %v18570_v25  ;;  %v18591_v62 = vadd.f32 %v10481_v30, %v18573_v32  ;;  %v10522_v31 = vpop.f32.mrb[137].mxu1  ;;  %v10483_v5 = vpop.f32.mrb[138].mxu0  ;;  %12184 = vmatpush1.bf16.msra.mxu0 %v16389_v7  ;;  %v16401_v25 = vld [vmem:[#allocation19 + $0xc20] ss:$16 sps:$4 sm:$0xff]   ;;  %v16404_v32 = vld [vmem:[#allocation19 + $0xc28] ss:$16 sps:$4 sm:$0xff]  }
 0xa3c   :  { %v10530_v27 = vadd.f32 %v10522_v31, %v18576_v57  ;;  %v10524_v10 = vpop.f32.mrb[138].mxu1  ;;  %12225 = vmatpush1.bf16.msra.mxu1 %v16392_v15  ;;  %v10484_v38 = vpop.f32.mrb[139].mxu0  ;;  %12185 = vmatprep.subr.bf16.mxu0 %v16397_v39  ;;  %v16407_v57 = vld [vmem:[#allocation22 + $0x40] sm:$0xff]   ;;  %v16432_v7 = vld [vmem:[#allocation22 + $0xf0] sm:$0xff]   ;;  %v16438_v6 = vld [vmem:[#allocation22 + $0xb8] sm:$0xff]  }
 0xa3d   :  { %v10525_v33 = vpop.f32.mrb[139].mxu1  ;;  %12226 = vmatprep.subr.bf16.mxu1 %v16400_v46  ;;  %v16433_v15 = vld [vmem:[#allocation22 + $0x30] sm:$0xff]   ;;  %v16436_v46 = vld [vmem:[#allocation22 + $0xf8] sm:$0xff]   ;;  %v18599_v30 = vld [vmem:[#allocation3] sm:$0xff] }
 0xa3e   :  { %v16434_v39 = vld [vmem:[#allocation22 + $0xb0] sm:$0xff]  }
 0xa3f   :  { %12186 = vmatpush1.bf16.msra.mxu0 %v16395_v48 }
 0xa40   :  { %12227 = vmatpush1.bf16.msra.mxu1 %v16398_v34  ;;  %12187 = vmatprep.subr.bf16.mxu0 %v16403_v21 }
 0xa41   :  { %12228 = vmatprep.subr.bf16.mxu1 %v16406_v40 }
 0xa43   :  { %12188 = vmatpush1.bf16.msra.mxu0 %v16401_v25 }
 0xa44   :  { %12229 = vmatpush1.bf16.msra.mxu1 %v16404_v32  ;;  %13980 = vmatprep.subr.bf16.mxu0 %v16407_v57 }
 0xa45   :  { %14002 = vmatprep.subr.bf16.mxu1 %v16408_v36 }
 0xa46   :  { %12194 = vmatmul.mubr.bf16.vlgmr.msra.gmra.mrb[152].mxu0 %v13978_v16 }
 0xa47   :  { %12235 = vmatmul.mubr.bf16.vlgmr.msra.gmra.mrb[152].mxu1 %v13978_v16  ;;  %13981 = vmatpush3.bf16.msra.mxu0 %v16409_v4 }
 0xa48   :  { %14003 = vmatpush3.bf16.msra.mxu1 %v16410_v56  ;;  %13982 = vmatprep.subr.bf16.mxu0 %v16411_v60 }
 0xa49   :  { %14004 = vmatprep.subr.bf16.mxu1 %v16412_v13 }
 0xa4b   :  { %13983 = vmatpush3.bf16.msra.mxu0 %v16413_v63 }
 0xa4c   :  { %14005 = vmatpush3.bf16.msra.mxu1 %v16414_v52  ;;  %13984 = vmatprep.subr.bf16.mxu0 %v16415_v55 }
 0xa4d   :  { %14006 = vmatprep.subr.bf16.mxu1 %v16416_v28  ;;  %v12247_v28 = vld [vmem:[#allocation21] sm:$0xf] }
 0xa4f   :  { %13985 = vmatpush3.bf16.msra.mxu0 %v16417_v53  ;;  %v12252_v53 = vrot.slane %v12247_v28, %v18677_v19 }
 0xa50   :  { %14007 = vmatpush3.bf16.msra.mxu1 %v16418_v2  ;;  %13986 = vmatprep.subr.bf16.mxu0 %v16419_v59  ;;  %v12260_v59 = vrot.slane %v12247_v28, %v18678_v22 }
 0xa51   :  { %14008 = vmatprep.subr.bf16.mxu1 %v16420_v43  ;;  %v12256_v43 = vrot.slane %v12247_v28, %v18679_v12 }
 0xa53   :  { %13987 = vmatpush3.bf16.msra.mxu0 %v16421_v29 }
 0xa54   :  { %14009 = vmatpush3.bf16.msra.mxu1 %v16422_v23  ;;  %13988 = vmatprep.subr.bf16.mxu0 %v16423_v8  ;;  %v12264_v8 = vrot.slane %v12247_v28, %v18680_v50 }
 0xa55   :  { %14010 = vmatprep.subr.bf16.mxu1 %v16424_v42 }
 0xa57   :  { %13989 = vmatpush3.bf16.msra.mxu0 %v16425_v54 }
 0xa58   :  { %14011 = vmatpush3.bf16.msra.mxu1 %v16426_v49  ;;  %13990 = vmatprep.subr.bf16.mxu0 %v16427_v0  ;;  %v16439_v0 = vld [vmem:[#allocation25] sm:$0xff]  }
 0xa59   :  { %14012 = vmatprep.subr.bf16.mxu1 %v16428_v24 }
 0xa5b   :  { %13991 = vmatpush3.bf16.msra.mxu0 %v16429_v11 }
 0xa5c   :  { %14013 = vmatpush3.bf16.msra.mxu1 %v16430_v18  ;;  %13992 = vmatprep.subr.bf16.mxu0 %v16431_v47  ;;  %v16440_v18 = vld [vmem:[#allocation25 + $0x8] sm:$0xff]   ;;  %v16441_v47 = vld [vmem:[#allocation25 + $0x10] sm:$0xff]  }
 0xa5d   :  { %14014 = vmatprep.subr.bf16.mxu1 %v16432_v7  ;;  %v16442_v7 = vld [vmem:[#allocation25 + $0x18] sm:$0xff]  }
 0xa5f   :  { %13993 = vmatpush3.bf16.msra.mxu0 %v16433_v15  ;;  %v16443_v15 = vld [vmem:[#allocation25 + $0x20] sm:$0xff]  }
 0xa60   :  { %14015 = vmatpush3.bf16.msra.mxu1 %v16434_v39  ;;  %13994 = vmatprep.subr.bf16.mxu0 %v16435_v17  ;;  %v16444_v39 = vld [vmem:[#allocation25 + $0x28] sm:$0xff]   ;;  %v16445_v17 = vld [vmem:[#allocation25 + $0x30] sm:$0xff]  }
 0xa61   :  { %14016 = vmatprep.subr.bf16.mxu1 %v16436_v46  ;;  %v16446_v46 = vld [vmem:[#allocation25 + $0x38] sm:$0xff]  }
 0xa64   :  { %14017 = vmatpush3.bf16.msra.mxu1 %v16438_v6 }
 0xa71   :  { %v10908_v61 = vpop.f32.mrb[140].mxu0 }
 0xa72   :  { %v10956_v58 = vadd.f32 %v10908_v61, %v18585_v37  ;;  %v10949_v51 = vpop.f32.mrb[140].mxu1  ;;  %v10910_v9 = vpop.f32.mrb[141].mxu0  ;;  %v16437_v37 = vld [vmem:[#allocation22 + $0x38] sm:$0xff]  }
 0xa73   :  { %v10958_v26 = vadd.f32 %v10949_v51, %v18588_v20  ;;  %v10957_v1 = vadd.f32 %v10910_v9, %v18591_v62  ;;  %v10951_v44 = vpop.f32.mrb[141].mxu1  ;;  %v10912_v3 = vpop.f32.mrb[142].mxu0  ;;  %13995 = vmatpush3.bf16.msra.mxu0 %v16437_v37 }
 0xa74   :  { %v10959_v35 = vadd.f32 %v10951_v44, %v10530_v27  ;;  %v10953_v41 = vpop.f32.mrb[142].mxu1  ;;  %v10913_v14 = vpop.f32.mrb[143].mxu0  ;;  %14033 = vmatprep.subr.bf16.mxu0 %v18599_v30 }
 0xa75   :  { %v10954_v45 = vpop.f32.mrb[143].mxu1 }
 0xaa9   :  { %v11337_v20 = vpop.f32.mrb[144].mxu0 }
 0xaaa   :  { %v11385_v62 = vadd.f32 %v11337_v20, %v10956_v58  ;;  %v11378_v31 = vpop.f32.mrb[144].mxu1  ;;  %v11339_v5 = vpop.f32.mrb[145].mxu0  ;;  %v13924_v20 = vld [vmem:[#allocation24] ss:$0 sm:$0xff] }
 0xaab   :  { %v11387_v48 = vadd.f32 %v11378_v31, %v10958_v26  ;;  %v11386_v27 = vadd.f32 %v11339_v5, %v10957_v1  ;;  %v11380_v10 = vpop.f32.mrb[145].mxu1  ;;  %v11341_v38 = vpop.f32.mrb[146].mxu0 }
 0xaac   :  { %v11388_v34 = vadd.f32 %v11380_v10, %v10959_v35  ;;  %v11382_v21 = vpop.f32.mrb[146].mxu1  ;;  %v11342_v33 = vpop.f32.mrb[147].mxu0 }
 0xaad   :  { %v11383_v40 = vpop.f32.mrb[147].mxu1 }
 0xae1   :  { %v11766_v25 = vpop.f32.mrb[148].mxu0 }
 0xae2   :  { %v11814_v32 = vadd.f32 %v11766_v25, %v11385_v62  ;;  %v11807_v16 = vpop.f32.mrb[148].mxu1  ;;  %v11768_v57 = vpop.f32.mrb[149].mxu0 }
 0xae3   :  { %v11816_v36 = vadd.f32 %v11807_v16, %v11387_v48  ;;  %v11815_v4 = vadd.f32 %v11768_v57, %v11386_v27  ;;  %v11809_v56 = vpop.f32.mrb[149].mxu1  ;;  %v11770_v60 = vpop.f32.mrb[150].mxu0 }
 0xae4   :  { %v11817_v13 = vadd.f32 %v11809_v56, %v11388_v34  ;;  %v11811_v63 = vpop.f32.mrb[150].mxu1  ;;  %v11771_v52 = vpop.f32.mrb[151].mxu0 }
 0xae5   :  { %v11812_v55 = vpop.f32.mrb[151].mxu1 }
 0xb19   :  { %v12195_v2 = vpop.f32.mrb[152].mxu0 }
 0xb1a   :  { %v12243_v29 = vadd.f32 %v12195_v2, %v11814_v32  ;;  %v12236_v23 = vpop.f32.mrb[152].mxu1  ;;  %v12197_v61 = vpop.f32.mrb[153].mxu0  ;;  %v13957_v32 = vld [vmem:[#allocation27] ss:$0 sm:$0xff] }
 0xb1b   :  { %v12245_v42 = vadd.f32 %v12236_v23, %v11816_v36  ;;  %v12244_v58 = vadd.f32 %v12197_v61, %v11815_v4  ;;  %v12238_v51 = vpop.f32.mrb[153].mxu1  ;;  %v12199_v9 = vpop.f32.mrb[154].mxu0 }
 0xb1c   :  { %v12269_v26 = vadd.f32 %v12252_v53, %v12243_v29  ;;  %v12246_v1 = vadd.f32 %v12238_v51, %v11817_v13  ;;  %v12240_v44 = vpop.f32.mrb[154].mxu1  ;;  %v12200_v3 = vpop.f32.mrb[155].mxu0 }
 0xb1d   :  { %v12271_v35 = vadd.f32 %v12260_v59, %v12245_v42  ;;  %v12270_v19 = vadd.f32 %v12256_v43, %v12244_v58  ;;  %v12241_v41 = vpop.f32.mrb[155].mxu1 }
 0xb1e   :  { %v12273_v14 = vmax.f32 %v12269_v26, 0.0  ;;  %v12272_v22 = vadd.f32 %v12264_v8, %v12246_v1 }
 0xb1f   :  { %v12275_v54 = vmax.f32 %v12271_v35, 0.0  ;;  %v12274_v12 = vmax.f32 %v12270_v19, 0.0 }
 0xb20   :  { %v12276_v49 = vmax.f32 %v12272_v22, 0.0  ;;  %v12277_v24 = vpack.c.bf16 %v12273_v14, %v12273_v14 }
 0xb21   :  { %v12278_v45 = vpack.c.bf16 %v12274_v12, %v12274_v12  ;;  %v12279_v11 = vpack.c.bf16 %v12275_v54, %v12275_v54 }
 0xb22   :  { %v12280_v50 = vpack.c.bf16 %v12276_v49, %v12276_v49 }
 0xb23   :  { %12576 = vmatprep.mubr.bf16.mxu0 %v12278_v45 }
 0xb24   :  { %12616 = vmatprep.mubr.bf16.mxu1 %v12280_v50  ;;  %12577 = vmatmul.mubr.bf16.vlgmr.msra.gmra.mrb[156].mxu0 %v12277_v24 }
 0xb25   :  { %12617 = vmatmul.mubr.bf16.vlgmr.msra.gmra.mrb[156].mxu1 %v12279_v11  ;;  %14034 = vmatpush3.bf16.msra.mxu0 %v16439_v0 }
 0xb26   :  { %14035 = vmatprep.subr.bf16.mxu0 %v18599_v30  ;;  %14049 = vmatprep.mubr.msk.bf16.mxu0 %vm16878_vm7, %v18599_v30 }
 0xb29   :  { %14036 = vmatpush3.bf16.msra.mxu0 %v16440_v18 }
 0xb2a   :  { %14037 = vmatprep.subr.bf16.mxu0 %v18599_v30 }
 0xb2d   :  { %14038 = vmatpush3.bf16.msra.mxu0 %v16441_v47 }
 0xb2e   :  { %14039 = vmatprep.subr.bf16.mxu0 %v18599_v30 }
 0xb31   :  { %14040 = vmatpush3.bf16.msra.mxu0 %v16442_v7 }
 0xb32   :  { %14041 = vmatprep.subr.bf16.mxu0 %v18599_v30 }
 0xb35   :  { %14042 = vmatpush3.bf16.msra.mxu0 %v16443_v15 }
 0xb36   :  { %14043 = vmatprep.subr.bf16.mxu0 %v18599_v30 }
 0xb39   :  { %14044 = vmatpush3.bf16.msra.mxu0 %v16444_v39 }
 0xb3a   :  { %14045 = vmatprep.subr.bf16.mxu0 %v18599_v30 }
 0xb3d   :  { %14046 = vmatpush3.bf16.msra.mxu0 %v16445_v17 }
 0xb3e   :  { %14047 = vmatprep.subr.bf16.mxu0 %v18599_v30 }
 0xb41   :  { %14048 = vmatpush3.bf16.msra.mxu0 %v16446_v46 }
 0xbf7   :  { %v13996_v37 = vpop.f32.mrb[156].mxu0 }
 0xbf8   :  { %v14018_v6 = vpop.f32.mrb[156].mxu1  ;;  %v13997_v62 = vpop.f32.mrb[157].mxu0 }
 0xbf9   :  { %v13998_v31 = vadd.f32 %v13997_v62, %v13996_v37  ;;  %v14019_v5 = vpop.f32.mrb[157].mxu1  ;;  %v13999_v48 = vpop.f32.mrb[158].mxu0 }
 0xbfa   :  { %v14020_v27 = vadd.f32 %v14019_v5, %v14018_v6  ;;  %v14021_v10 = vpop.f32.mrb[158].mxu1  ;;  %v14000_v38 = vpop.f32.mrb[159].mxu0 }
 0xbfb   :  { %v12579_v34 = vadd.f32 %v13998_v31, %v13924_v20  ;;  %v14022_v21 = vpop.f32.mrb[159].mxu1 }
 0xbfd   :  { %v12619_v33 = vadd.f32 %v14020_v27, %v12579_v34 }
 0xbff   :  { %v12624_v40 = vmax.f32 %v12619_v33, 0.0 }
 0xc01   :  { %v12625_v25 = vpack.c.bf16 %v12624_v40, %v12624_v40 }
 0xc03   :  { %14050 = vmatmul.mubr.bf16.vlgmr.msra.gmra.mrb[160].mxu0 %v12625_v25 }
 0xcd6   :  { %v12731_v30 = vpop.f32.mrb[160].mxu0 }
 0xcd7   :  { %v12732_v16 = vadd.f32 %v13957_v32, %v12731_v30  ;;  %v14051_v57 = vpop.f32.mrb[161].mxu0 }
 0xcd8   :  { %v12734_v36 = vpop.f32.mrb[162].mxu0 }
 0xcd9   :  { %12737 = vst [vmem:[#allocation28] sm:$0xff] %v12732_v16  ;;  %v14052_v4 = vpop.f32.mrb[163].mxu0 }
 0xcda   :  { %16823 = shalt.err (!%p16820_p12)
}
 0xcdb   :  { %s18681_s3 = sld [smem:[#allocation48_spill]] }
 0xce1   :  { %s16824_s15 = scalar_lea.hbm %s18681_s3, 128 }
 0xce2   :  { %p16825_p13 = scmp.ne.s32.totalorder %s18681_s3, %s16824_s15  ;;  %p16828_p0 = scmp.lt.u32.totalorder %s16824_s15, %s18681_s3 }
 0xce4   :  { %p16830_p1 = pnand %p16828_p0, %p16825_p13 }
 0xce6   :  { %16833 = shalt.err (!%p16830_p1)
}
 0xce7   :  { %12747 = dma.vmem_to_hbm [thread:$0]  %s12745_s8, 128, %s18681_s3, [#allocation6]  }
 0xce8   :  { %16850 = dma.done.wait [#allocation6], 128  }
 0xce9   :  { %16851 = vsyncadd [#allocation6], 4294967168 }
 0xcea   :  { %12751 = vsyncpa [#allocation5], 1 }
 0xceb   :  { %12752 = vsyncpa [#allocation8], 1 }
 0xcec   :  { %12753 = vsyncpa [#allocation11], 1 }
 0xced   :  { %12754 = vsyncpa [#allocation14], 1 }
 0xcee   :  { %12755 = vsyncpa [#allocation17], 1 }
 0xcef   :  { %12756 = vsyncpa [#allocation20], 1 }
 0xcf0   :  { %12757 = vsyncpa [#allocation23], 1 }
 0xcf1   :  { %12758 = vsyncpa [#allocation26], 1 }
 0xcf2   :  { %12759 = vsyncpa [#allocation6], 1 }

</bundles_post_ra>
